<compile_context>
chip_gen: v5e
topology: v5e:2x2
jax: 0.10.0
libtpu: 0.0.40
codegen_flags: <defaults>
</compile_context>

<pallas_src>
import jax
import jax.numpy as jnp
from jax import lax
from jax.experimental import pallas as pl
from jax.experimental.pallas import tpu as pltpu

# ------------------------- model dimensions -------------------------
BATCH = 2
SEQ = 8                    # sequence_length
IMG_C, IMG_H, IMG_W = 3, 16, 16
CNN_OUT = 128              # synthetic backbone feature size
RNN_IN = 32                # rnn_input_size (adapt output, mamba d_model)
HIDDEN = 16                # hidden_size -> mamba n_state and dt_rank
D_INNER = 2 * RNN_IN       # 64
N_STATE = HIDDEN           # 16
DT_RANK = HIDDEN           # 16
NUM_CLASSES = 5
RNN_LAYERS = 1
KSIZE = 3
FC_IN = RNN_IN * SEQ       # rnn_out == 'all' -> 256
K_RAW = IMG_C * 9          # im2col K = 27
K_PAD = 32                 # padded to a sublane multiple (zero rows in weight)
FRAMES_PER_BLOCK = 8       # backbone frames per grid step (sublane-dense output)


def _full_spec(a):
    """BlockSpec covering the whole (small) array for grid=(1,) kernels."""
    zeros = (0,) * a.ndim
    return pl.BlockSpec(a.shape, lambda i: zeros)


# ============================================================================
# Kernel 1: backbone conv (im2col matmul) + ReLU + global-average-pool, fused.
# ============================================================================
def _backbone_gap_kernel(p_ref, w_ref, b_ref, o_ref):
    w = w_ref[...]
    b = b_ref[...]
    rows = []
    for f in range(p_ref.shape[0]):                         # unrolled frames
        y = jnp.dot(p_ref[f], w, preferred_element_type=jnp.float32) + b
        y = jnp.maximum(y, 0.0)
        rows.append(jnp.mean(y, axis=0, keepdims=True))     # GAP over H*W rows
    o_ref[...] = jnp.concatenate(rows, axis=0)              # (fb, 128) lane-dense


def backbone_gap(patches, w, b):
    F_, P, K = patches.shape
    N = w.shape[1]
    fb = FRAMES_PER_BLOCK
    assert F_ % fb == 0
    return pl.pallas_call(
        _backbone_gap_kernel,
        out_shape=jax.ShapeDtypeStruct((F_, N), jnp.float32),
        grid=(F_ // fb,),
        in_specs=[
            pl.BlockSpec((fb, P, K), lambda i: (i, 0, 0)),
            pl.BlockSpec((K, N), lambda i: (0, 0)),
            pl.BlockSpec((1, N), lambda i: (0, 0)),
        ],
        out_specs=pl.BlockSpec((fb, N), lambda i: (i, 0)),
        compiler_params=pltpu.CompilerParams(dimension_semantics=("parallel",)),
    )(patches, w, b.reshape(1, N))


# ============================================================================
# Kernel 2: Adapt 'lslsl' (128 -> 64 -> 32 -> 32) fused in one pass.
# ============================================================================
def _adapt_kernel(x_ref, w1_ref, b1_ref, w2_ref, b2_ref, w3_ref, b3_ref, o_ref):
    h = jnp.dot(x_ref[...], w1_ref[...], preferred_element_type=jnp.float32) + b1_ref[...]
    h = h * jax.nn.sigmoid(h)
    h = jnp.dot(h, w2_ref[...], preferred_element_type=jnp.float32) + b2_ref[...]
    h = h * jax.nn.sigmoid(h)
    h = jnp.dot(h, w3_ref[...], preferred_element_type=jnp.float32) + b3_ref[...]
    o_ref[...] = h


def adapt_mlp(feat, p):
    M = feat.shape[0]
    args = (feat, p["ad1_w"], p["ad1_b"].reshape(1, -1),
            p["ad2_w"], p["ad2_b"].reshape(1, -1),
            p["ad3_w"], p["ad3_b"].reshape(1, -1))
    return pl.pallas_call(
        _adapt_kernel,
        out_shape=jax.ShapeDtypeStruct((M, RNN_IN), jnp.float32),
        grid=(1,),
        in_specs=[_full_spec(a) for a in args],
        out_specs=pl.BlockSpec((M, RNN_IN), lambda i: (0, 0)),
        compiler_params=pltpu.CompilerParams(dimension_semantics=("arbitrary",)),
    )(*args)


# ============================================================================
# Kernel 3: full bidirectional Mamba residual block in ONE kernel.
# ============================================================================
def _resblock_kernel(x_ref, normw_ref, inw_ref, inb_ref, convw_ref, convb_ref,
                     wdtr_ref, wbcT_ref, dtw_ref, dtb_ref, alogT_ref,
                     outw_ref, outb_ref, o_ref):
    BL = x_ref.shape[0]
    nb = BL // SEQ
    x = x_ref[...]                                           # (B*L, 32)

    # --- RMSNorm ---
    ms = jnp.mean(jnp.square(x), axis=-1, keepdims=True)
    xn = x * lax.rsqrt(ms + 1e-5) * normw_ref[...]

    # --- in_proj -> [x | res] ---
    xr = jnp.dot(xn, inw_ref[...], preferred_element_type=jnp.float32) + inb_ref[...]
    xi = xr[:, :D_INNER]                                     # (B*L, 64)
    res = xr[:, D_INNER:]                                    # (B*L, 64)
    silu_res = res * jax.nn.sigmoid(res)

    # --- causal depthwise conv1d (k=3, left pad 2) + SiLU, per batch element ---
    w0 = convw_ref[0:1, :]
    w1 = convw_ref[1:2, :]
    w2 = convw_ref[2:3, :]
    cb = convb_ref[...]
    zero2 = jnp.zeros((2, D_INNER), jnp.float32)
    xc_parts = []
    for b in range(nb):
        xb = xi[b * SEQ:(b + 1) * SEQ, :]                    # (8, 64)
        x1 = jnp.concatenate([zero2[:1], xb[:SEQ - 1, :]], axis=0)
        x2 = jnp.concatenate([zero2, xb[:SEQ - 2, :]], axis=0)
        yb = xb * w2 + x1 * w1 + x2 * w0 + cb
        xc_parts.append(yb * jax.nn.sigmoid(yb))
    xc = jnp.concatenate(xc_parts, axis=0)                   # (B*L, 64)

    # --- x_proj: delta_r token-major; B/C produced directly in state-major
    #     (n on sublanes, tokens on lanes) via an NT matmul -> no transposes ---
    delta_r = jnp.dot(xc, wdtr_ref[...], preferred_element_type=jnp.float32)   # (B*L, 16)
    bc_t = lax.dot_general(wbcT_ref[...], xc, (((1,), (1,)), ((), ())),
                           preferred_element_type=jnp.float32)                  # (32, B*L)
    delta = jax.nn.softplus(
        jnp.dot(delta_r, dtw_ref[...], preferred_element_type=jnp.float32)
        + dtb_ref[...])                                                          # (B*L, 64)
    du = delta * xc                                                              # delta * u

    a_t = -jnp.exp(alogT_ref[...])                           # (16, 64) == A^T

    # --- bidirectional selective scan, state (n_state, d_inner); outputs packed
    #     lane-dense as [y_fwd | y_bwd] -> (B*L, 128); dA shared across dirs ---
    y_parts = []
    for b in range(nb):
        base = b * SEQ
        dA = [jnp.exp(delta[base + t:base + t + 1, :] * a_t) for t in range(SEQ)]
        bcol = [bc_t[0:N_STATE, base + t:base + t + 1] for t in range(SEQ)]
        ccol = [bc_t[N_STATE:2 * N_STATE, base + t:base + t + 1] for t in range(SEQ)]
        durow = [du[base + t:base + t + 1, :] for t in range(SEQ)]

        # forward
        state = jnp.zeros((N_STATE, D_INNER), jnp.float32)
        y_f = []
        for t in range(SEQ):
            state = dA[t] * state + durow[t] * bcol[t]
            y_f.append(jnp.sum(state * ccol[t], axis=0, keepdims=True))

        # backward: u/delta time-reversed, B/C kept in forward order (matches
        # the reference parallel_scan exactly); result un-flipped in place.
        state = jnp.zeros((N_STATE, D_INNER), jnp.float32)
        y_b = [None] * SEQ
        for t in range(SEQ):
            tr = SEQ - 1 - t
            state = dA[tr] * state + durow[tr] * bcol[t]
            y_b[tr] = jnp.sum(state * ccol[t], axis=0, keepdims=True)

        y_parts.append(jnp.concatenate(
            [jnp.concatenate(y_f, axis=0), jnp.concatenate(y_b, axis=0)], axis=-1))
    y = jnp.concatenate(y_parts, axis=0)                     # (B*L, 128)

    # --- gated out_proj + residual ---
    g = y * jnp.concatenate([silu_res, silu_res], axis=-1)
    out = jnp.dot(g, outw_ref[...], preferred_element_type=jnp.float32) + outb_ref[...]
    o_ref[...] = out + x


def residual_block(p, h):
    BL = h.shape[0]
    w_dtr = p["xproj_w"][:, :DT_RANK]                        # (64, 16)
    w_bc_t = jnp.transpose(p["xproj_w"][:, DT_RANK:])        # (32, 64)
    a_log_t = jnp.transpose(p["A_log"])                      # (16, 64)
    args = (h, p["norm_w"].reshape(1, -1), p["in_w"], p["in_b"].reshape(1, -1),
            p["conv_w"], p["conv_b"].reshape(1, -1), w_dtr, w_bc_t,
            p["dt_w"], p["dt_b"].reshape(1, -1), a_log_t,
            p["out_w"], p["out_b"].reshape(1, -1))
    return pl.pallas_call(
        _resblock_kernel,
        out_shape=jax.ShapeDtypeStruct((BL, RNN_IN), jnp.float32),
        grid=(1,),
        in_specs=[_full_spec(a) for a in args],
        out_specs=pl.BlockSpec((BL, RNN_IN), lambda i: (0, 0)),
        compiler_params=pltpu.CompilerParams(dimension_semantics=("arbitrary",)),
    )(*args)


# ============================================================================
# Kernel 4: multiclass head, fully fused (LN -> fc -> LN+SiLU -> fca -> LN+SiLU -> fcb)
# ============================================================================
def _head_kernel(x_ref, g0_ref, b0_ref, fcw_ref, fcb_ref, ga_ref, ba_ref,
                 faw_ref, fab_ref, gb_ref, bb_ref, fbw_ref, fbb_ref, o_ref):
    def ln(v, g, b):
        mu = jnp.mean(v, axis=-1, keepdims=True)
        var = jnp.mean(jnp.square(v - mu), axis=-1, keepdims=True)
        return (v - mu) * lax.rsqrt(var + 1e-5) * g + b

    h = ln(x_ref[...], g0_ref[...], b0_ref[...])
    h = jnp.dot(h, fcw_ref[...], preferred_element_type=jnp.float32) + fcb_ref[...]
    h = ln(h, ga_ref[...], ba_ref[...])
    h = h * jax.nn.sigmoid(h)
    h = jnp.dot(h, faw_ref[...], preferred_element_type=jnp.float32) + fab_ref[...]
    h = ln(h, gb_ref[...], bb_ref[...])
    h = h * jax.nn.sigmoid(h)
    h = jnp.dot(h, fbw_ref[...], preferred_element_type=jnp.float32) + fbb_ref[...]
    o_ref[...] = h


def classifier_head(r, p):
    Bsz = r.shape[0]
    args = (r, p["bn0_g"].reshape(1, -1), p["bn0_b"].reshape(1, -1),
            p["fc_w"], p["fc_b"].reshape(1, -1),
            p["bna_g"].reshape(1, -1), p["bna_b"].reshape(1, -1),
            p["fca_w"], p["fca_b"].reshape(1, -1),
            p["bnb_g"].reshape(1, -1), p["bnb_b"].reshape(1, -1),
            p["fcb_w"], p["fcb_b"].reshape(1, -1))
    return pl.pallas_call(
        _head_kernel,
        out_shape=jax.ShapeDtypeStruct((Bsz, NUM_CLASSES), jnp.float32),
        grid=(1,),
        in_specs=[_full_spec(a) for a in args],
        out_specs=pl.BlockSpec((Bsz, NUM_CLASSES), lambda i: (0, 0)),
        compiler_params=pltpu.CompilerParams(dimension_semantics=("arbitrary",)),
    )(*args)


# ============================ model glue ============================
def extract_patches(x):
    # x: (N, C, H, W) NCHW -> im2col patches (N, H*W, C*9), 3x3 SAME
    N, C, H, W = x.shape
    xp = jnp.pad(x, ((0, 0), (0, 0), (1, 1), (1, 1)))
    cols = []
    for i in range(3):
        for j in range(3):
            cols.append(xp[:, :, i:i + H, j:j + W])
    p = jnp.stack(cols, axis=2)                   # (N, C, 9, H, W)
    p = jnp.transpose(p, (0, 3, 4, 1, 2))         # (N, H, W, C, 9)
    return p.reshape(N, H * W, C * 9)


def lrcn_forward(params, x):
    B, T, C, H, W = x.shape
    frames = B * T
    xf = x.reshape(frames, C, H, W)

    # --- synthetic frozen CNN backbone fused with global-average-pool ---
    # TODO(synk): pretrained torchvision backbone cannot be loaded in-script.
    patches = extract_patches(xf)                                    # (F, 256, 27)
    patches = jnp.pad(patches, ((0, 0), (0, 0), (0, K_PAD - K_RAW)))  # K -> 32
    bb_w = jnp.pad(params["bb_w"], ((0, K_PAD - K_RAW), (0, 0)))      # zero rows
    feat = backbone_gap(patches, bb_w, params["bb_b"])               # (F, 128)

    # --- Adapt ('lslsl'): 128 -> 64 -> 32 -> 32, one fused kernel ---
    h = adapt_mlp(feat, params)                                      # (F, 32)

    # --- bidirectional Mamba residual blocks, one fused kernel per block ---
    for i in range(RNN_LAYERS):
        h = residual_block(params[f"block{i}"], h)                   # (B*T, 32)

    # --- rnn_out == 'all' + multiclass head (one fused kernel) ---
    r = h.reshape(B, T * RNN_IN)                                     # (B, 256)
    return classifier_head(r, params)                                # (B, classes)


# ============================ parameters ============================
def init_params(key):
    keys = iter(jax.random.split(key, 64))

    def nrm(shape, s=0.05):
        return s * jax.random.normal(next(keys), shape, jnp.float32)

    p = {}
    # synthetic backbone conv (3x3, C -> CNN_OUT), im2col weight layout (C*9, CNN_OUT)
    p["bb_w"] = nrm((K_RAW, CNN_OUT))
    p["bb_b"] = nrm((CNN_OUT,))
    # adapt: 128 -> 64 -> 32 -> 32
    p["ad1_w"] = nrm((CNN_OUT, CNN_OUT // 2)); p["ad1_b"] = nrm((CNN_OUT // 2,))
    p["ad2_w"] = nrm((CNN_OUT // 2, CNN_OUT // 4)); p["ad2_b"] = nrm((CNN_OUT // 4,))
    p["ad3_w"] = nrm((CNN_OUT // 4, RNN_IN)); p["ad3_b"] = nrm((RNN_IN,))
    # mamba residual blocks
    for i in range(RNN_LAYERS):
        blk = {}
        blk["norm_w"] = jnp.ones((RNN_IN,), jnp.float32)
        blk["A_log"] = jax.random.normal(next(keys), (D_INNER, N_STATE), jnp.float32)
        # NOTE: parameter `D` of ParallelMamba is never used in its forward.
        blk["in_w"] = nrm((RNN_IN, 2 * D_INNER)); blk["in_b"] = nrm((2 * D_INNER,))
        blk["conv_w"] = nrm((KSIZE, D_INNER)); blk["conv_b"] = nrm((D_INNER,))
        blk["xproj_w"] = nrm((D_INNER, DT_RANK + 2 * N_STATE))        # bias=False
        blk["dt_w"] = nrm((DT_RANK, D_INNER)); blk["dt_b"] = nrm((D_INNER,))
        blk["out_w"] = nrm((2 * D_INNER, RNN_IN)); blk["out_b"] = nrm((RNN_IN,))
        p[f"block{i}"] = blk
    # multiclass head (bn* are nn.LayerNorm in the reference)
    p["bn0_g"] = jnp.ones((FC_IN,), jnp.float32); p["bn0_b"] = jnp.zeros((FC_IN,), jnp.float32)
    p["fc_w"] = nrm((FC_IN, FC_IN // 2)); p["fc_b"] = nrm((FC_IN // 2,))
    p["bna_g"] = jnp.ones((FC_IN // 2,), jnp.float32); p["bna_b"] = jnp.zeros((FC_IN // 2,), jnp.float32)
    p["fca_w"] = nrm((FC_IN // 2, FC_IN // 4)); p["fca_b"] = nrm((FC_IN // 4,))
    p["bnb_g"] = jnp.ones((FC_IN // 4,), jnp.float32); p["bnb_b"] = jnp.zeros((FC_IN // 4,), jnp.float32)
    p["fcb_w"] = nrm((FC_IN // 4, NUM_CLASSES)); p["fcb_b"] = nrm((NUM_CLASSES,))
    return p


if __name__ == "__main__":
    key = jax.random.PRNGKey(0)
    pkey, xkey = jax.random.split(key)
    params = init_params(pkey)
    x = jax.random.normal(xkey, (BATCH, SEQ, IMG_C, IMG_H, IMG_W), jnp.float32)

    out = jax.jit(lrcn_forward)(params, x)
    out = jax.block_until_ready(out)
    assert out.shape == (BATCH, NUM_CLASSES)
    assert bool(jnp.all(jnp.isfinite(out)))
    print("KERNEL_OK")
</pallas_src>

<mosaic_0001>
module attributes {stable_mosaic.version = 11 : i64} {
  func.func @_backbone_gap_kernel(%arg0: i32, %arg1: memref<8x256x32xf32, #tpu.memory_space<vmem>>, %arg2: memref<32x128xf32, #tpu.memory_space<vmem>>, %arg3: memref<1x128xf32, #tpu.memory_space<vmem>>, %arg4: memref<8x128xf32, #tpu.memory_space<vmem>>) attributes {dimension_semantics = [#tpu.dimension_semantics<parallel>], iteration_bounds = array<i64: 2>, scalar_prefetch = 0 : i64, scratch_operands = 0 : i64, tpu.core_type = #tpu.core_type<tc>, window_params = [{transform_indices = @transform_0, window_bounds = array<i64: 8, 256, 32>}, {pipeline_mode = #tpu.pipeline_mode<synchronous>, transform_indices = @transform_1, window_bounds = array<i64: 32, 128>}, {pipeline_mode = #tpu.pipeline_mode<synchronous>, transform_indices = @transform_2, window_bounds = array<i64: 1, 128>}, {transform_indices = @transform_3, window_bounds = array<i64: 8, 128>}]} {
    %c0 = arith.constant 0 : index
    %c0_0 = arith.constant 0 : index
    %0 = vector.load %arg2[%c0, %c0_0] : memref<32x128xf32, #tpu.memory_space<vmem>>, vector<32x128xf32>
    %c0_1 = arith.constant 0 : index
    %c0_2 = arith.constant 0 : index
    %1 = vector.load %arg3[%c0_1, %c0_2] : memref<1x128xf32, #tpu.memory_space<vmem>>, vector<1x128xf32>
    %c0_3 = arith.constant 0 : index
    %c0_4 = arith.constant 0 : index
    %c0_5 = arith.constant 0 : index
    %2 = vector.load %arg1[%c0_3, %c0_4, %c0_5] : memref<8x256x32xf32, #tpu.memory_space<vmem>>, vector<1x256x32xf32>
    %3 = vector.shape_cast %2 : vector<1x256x32xf32> to vector<256x32xf32>
    %cst = arith.constant dense<0.000000e+00> : vector<256x128xf32>
    %4 = tpu.matmul %3, %0, %cst {dimension_numbers = #tpu.dot_dimension_numbers<[1], [0], [0], [1], [0, 0, 1, 1], [], []>} : vector<256x32xf32>, vector<32x128xf32>, vector<256x128xf32> -> vector<256x128xf32>
    %5 = vector.broadcast %1 : vector<1x128xf32> to vector<256x128xf32>
    %6 = arith.addf %4, %5 : vector<256x128xf32>
    %cst_6 = arith.constant 0.000000e+00 : f32
    %7 = vector.broadcast %cst_6 : f32 to vector<256x128xf32>
    %8 = arith.maximumf %6, %7 : vector<256x128xf32>
    %cst_7 = arith.constant dense<0.000000e+00> : vector<128xf32>
    %9 = vector.multi_reduction <add>, %8, %cst_7 [0] : vector<256x128xf32> to vector<128xf32>
    %10 = vector.shape_cast %9 : vector<128xf32> to vector<1x128xf32>
    %cst_8 = arith.constant 2.560000e+02 : f32
    %11 = vector.broadcast %cst_8 : f32 to vector<1x128xf32>
    %12 = arith.divf %10, %11 : vector<1x128xf32>
    %c1 = arith.constant 1 : index
    %c0_9 = arith.constant 0 : index
    %c0_10 = arith.constant 0 : index
    %13 = vector.load %arg1[%c1, %c0_9, %c0_10] : memref<8x256x32xf32, #tpu.memory_space<vmem>>, vector<1x256x32xf32>
    %14 = vector.shape_cast %13 : vector<1x256x32xf32> to vector<256x32xf32>
    %cst_11 = arith.constant dense<0.000000e+00> : vector<256x128xf32>
    %15 = tpu.matmul %14, %0, %cst_11 {dimension_numbers = #tpu.dot_dimension_numbers<[1], [0], [0], [1], [0, 0, 1, 1], [], []>} : vector<256x32xf32>, vector<32x128xf32>, vector<256x128xf32> -> vector<256x128xf32>
    %16 = vector.broadcast %1 : vector<1x128xf32> to vector<256x128xf32>
    %17 = arith.addf %15, %16 : vector<256x128xf32>
    %cst_12 = arith.constant 0.000000e+00 : f32
    %18 = vector.broadcast %cst_12 : f32 to vector<256x128xf32>
    %19 = arith.maximumf %17, %18 : vector<256x128xf32>
    %cst_13 = arith.constant dense<0.000000e+00> : vector<128xf32>
    %20 = vector.multi_reduction <add>, %19, %cst_13 [0] : vector<256x128xf32> to vector<128xf32>
    %21 = vector.shape_cast %20 : vector<128xf32> to vector<1x128xf32>
    %cst_14 = arith.constant 2.560000e+02 : f32
    %22 = vector.broadcast %cst_14 : f32 to vector<1x128xf32>
    %23 = arith.divf %21, %22 : vector<1x128xf32>
    %c2 = arith.constant 2 : index
    %c0_15 = arith.constant 0 : index
    %c0_16 = arith.constant 0 : index
    %24 = vector.load %arg1[%c2, %c0_15, %c0_16] : memref<8x256x32xf32, #tpu.memory_space<vmem>>, vector<1x256x32xf32>
    %25 = vector.shape_cast %24 : vector<1x256x32xf32> to vector<256x32xf32>
    %cst_17 = arith.constant dense<0.000000e+00> : vector<256x128xf32>
    %26 = tpu.matmul %25, %0, %cst_17 {dimension_numbers = #tpu.dot_dimension_numbers<[1], [0], [0], [1], [0, 0, 1, 1], [], []>} : vector<256x32xf32>, vector<32x128xf32>, vector<256x128xf32> -> vector<256x128xf32>
    %27 = vector.broadcast %1 : vector<1x128xf32> to vector<256x128xf32>
    %28 = arith.addf %26, %27 : vector<256x128xf32>
    %cst_18 = arith.constant 0.000000e+00 : f32
    %29 = vector.broadcast %cst_18 : f32 to vector<256x128xf32>
    %30 = arith.maximumf %28, %29 : vector<256x128xf32>
    %cst_19 = arith.constant dense<0.000000e+00> : vector<128xf32>
    %31 = vector.multi_reduction <add>, %30, %cst_19 [0] : vector<256x128xf32> to vector<128xf32>
    %32 = vector.shape_cast %31 : vector<128xf32> to vector<1x128xf32>
    %cst_20 = arith.constant 2.560000e+02 : f32
    %33 = vector.broadcast %cst_20 : f32 to vector<1x128xf32>
    %34 = arith.divf %32, %33 : vector<1x128xf32>
    %c3 = arith.constant 3 : index
    %c0_21 = arith.constant 0 : index
    %c0_22 = arith.constant 0 : index
    %35 = vector.load %arg1[%c3, %c0_21, %c0_22] : memref<8x256x32xf32, #tpu.memory_space<vmem>>, vector<1x256x32xf32>
    %36 = vector.shape_cast %35 : vector<1x256x32xf32> to vector<256x32xf32>
    %cst_23 = arith.constant dense<0.000000e+00> : vector<256x128xf32>
    %37 = tpu.matmul %36, %0, %cst_23 {dimension_numbers = #tpu.dot_dimension_numbers<[1], [0], [0], [1], [0, 0, 1, 1], [], []>} : vector<256x32xf32>, vector<32x128xf32>, vector<256x128xf32> -> vector<256x128xf32>
    %38 = vector.broadcast %1 : vector<1x128xf32> to vector<256x128xf32>
    %39 = arith.addf %37, %38 : vector<256x128xf32>
    %cst_24 = arith.constant 0.000000e+00 : f32
    %40 = vector.broadcast %cst_24 : f32 to vector<256x128xf32>
    %41 = arith.maximumf %39, %40 : vector<256x128xf32>
    %cst_25 = arith.constant dense<0.000000e+00> : vector<128xf32>
    %42 = vector.multi_reduction <add>, %41, %cst_25 [0] : vector<256x128xf32> to vector<128xf32>
    %43 = vector.shape_cast %42 : vector<128xf32> to vector<1x128xf32>
    %cst_26 = arith.constant 2.560000e+02 : f32
    %44 = vector.broadcast %cst_26 : f32 to vector<1x128xf32>
    %45 = arith.divf %43, %44 : vector<1x128xf32>
    %c4 = arith.constant 4 : index
    %c0_27 = arith.constant 0 : index
    %c0_28 = arith.constant 0 : index
    %46 = vector.load %arg1[%c4, %c0_27, %c0_28] : memref<8x256x32xf32, #tpu.memory_space<vmem>>, vector<1x256x32xf32>
    %47 = vector.shape_cast %46 : vector<1x256x32xf32> to vector<256x32xf32>
    %cst_29 = arith.constant dense<0.000000e+00> : vector<256x128xf32>
    %48 = tpu.matmul %47, %0, %cst_29 {dimension_numbers = #tpu.dot_dimension_numbers<[1], [0], [0], [1], [0, 0, 1, 1], [], []>} : vector<256x32xf32>, vector<32x128xf32>, vector<256x128xf32> -> vector<256x128xf32>
    %49 = vector.broadcast %1 : vector<1x128xf32> to vector<256x128xf32>
    %50 = arith.addf %48, %49 : vector<256x128xf32>
    %cst_30 = arith.constant 0.000000e+00 : f32
    %51 = vector.broadcast %cst_30 : f32 to vector<256x128xf32>
    %52 = arith.maximumf %50, %51 : vector<256x128xf32>
    %cst_31 = arith.constant dense<0.000000e+00> : vector<128xf32>
    %53 = vector.multi_reduction <add>, %52, %cst_31 [0] : vector<256x128xf32> to vector<128xf32>
    %54 = vector.shape_cast %53 : vector<128xf32> to vector<1x128xf32>
    %cst_32 = arith.constant 2.560000e+02 : f32
    %55 = vector.broadcast %cst_32 : f32 to vector<1x128xf32>
    %56 = arith.divf %54, %55 : vector<1x128xf32>
    %c5 = arith.constant 5 : index
    %c0_33 = arith.constant 0 : index
    %c0_34 = arith.constant 0 : index
    %57 = vector.load %arg1[%c5, %c0_33, %c0_34] : memref<8x256x32xf32, #tpu.memory_space<vmem>>, vector<1x256x32xf32>
    %58 = vector.shape_cast %57 : vector<1x256x32xf32> to vector<256x32xf32>
    %cst_35 = arith.constant dense<0.000000e+00> : vector<256x128xf32>
    %59 = tpu.matmul %58, %0, %cst_35 {dimension_numbers = #tpu.dot_dimension_numbers<[1], [0], [0], [1], [0, 0, 1, 1], [], []>} : vector<256x32xf32>, vector<32x128xf32>, vector<256x128xf32> -> vector<256x128xf32>
    %60 = vector.broadcast %1 : vector<1x128xf32> to vector<256x128xf32>
    %61 = arith.addf %59, %60 : vector<256x128xf32>
    %cst_36 = arith.constant 0.000000e+00 : f32
    %62 = vector.broadcast %cst_36 : f32 to vector<256x128xf32>
    %63 = arith.maximumf %61, %62 : vector<256x128xf32>
    %cst_37 = arith.constant dense<0.000000e+00> : vector<128xf32>
    %64 = vector.multi_reduction <add>, %63, %cst_37 [0] : vector<256x128xf32> to vector<128xf32>
    %65 = vector.shape_cast %64 : vector<128xf32> to vector<1x128xf32>
    %cst_38 = arith.constant 2.560000e+02 : f32
    %66 = vector.broadcast %cst_38 : f32 to vector<1x128xf32>
    %67 = arith.divf %65, %66 : vector<1x128xf32>
    %c6 = arith.constant 6 : index
    %c0_39 = arith.constant 0 : index
    %c0_40 = arith.constant 0 : index
    %68 = vector.load %arg1[%c6, %c0_39, %c0_40] : memref<8x256x32xf32, #tpu.memory_space<vmem>>, vector<1x256x32xf32>
    %69 = vector.shape_cast %68 : vector<1x256x32xf32> to vector<256x32xf32>
    %cst_41 = arith.constant dense<0.000000e+00> : vector<256x128xf32>
    %70 = tpu.matmul %69, %0, %cst_41 {dimension_numbers = #tpu.dot_dimension_numbers<[1], [0], [0], [1], [0, 0, 1, 1], [], []>} : vector<256x32xf32>, vector<32x128xf32>, vector<256x128xf32> -> vector<256x128xf32>
    %71 = vector.broadcast %1 : vector<1x128xf32> to vector<256x128xf32>
    %72 = arith.addf %70, %71 : vector<256x128xf32>
    %cst_42 = arith.constant 0.000000e+00 : f32
    %73 = vector.broadcast %cst_42 : f32 to vector<256x128xf32>
    %74 = arith.maximumf %72, %73 : vector<256x128xf32>
    %cst_43 = arith.constant dense<0.000000e+00> : vector<128xf32>
    %75 = vector.multi_reduction <add>, %74, %cst_43 [0] : vector<256x128xf32> to vector<128xf32>
    %76 = vector.shape_cast %75 : vector<128xf32> to vector<1x128xf32>
    %cst_44 = arith.constant 2.560000e+02 : f32
    %77 = vector.broadcast %cst_44 : f32 to vector<1x128xf32>
    %78 = arith.divf %76, %77 : vector<1x128xf32>
    %c7 = arith.constant 7 : index
    %c0_45 = arith.constant 0 : index
    %c0_46 = arith.constant 0 : index
    %79 = vector.load %arg1[%c7, %c0_45, %c0_46] : memref<8x256x32xf32, #tpu.memory_space<vmem>>, vector<1x256x32xf32>
    %80 = vector.shape_cast %79 : vector<1x256x32xf32> to vector<256x32xf32>
    %cst_47 = arith.constant dense<0.000000e+00> : vector<256x128xf32>
    %81 = tpu.matmul %80, %0, %cst_47 {dimension_numbers = #tpu.dot_dimension_numbers<[1], [0], [0], [1], [0, 0, 1, 1], [], []>} : vector<256x32xf32>, vector<32x128xf32>, vector<256x128xf32> -> vector<256x128xf32>
    %82 = vector.broadcast %1 : vector<1x128xf32> to vector<256x128xf32>
    %83 = arith.addf %81, %82 : vector<256x128xf32>
    %cst_48 = arith.constant 0.000000e+00 : f32
    %84 = vector.broadcast %cst_48 : f32 to vector<256x128xf32>
    %85 = arith.maximumf %83, %84 : vector<256x128xf32>
    %cst_49 = arith.constant dense<0.000000e+00> : vector<128xf32>
    %86 = vector.multi_reduction <add>, %85, %cst_49 [0] : vector<256x128xf32> to vector<128xf32>
    %87 = vector.shape_cast %86 : vector<128xf32> to vector<1x128xf32>
    %cst_50 = arith.constant 2.560000e+02 : f32
    %88 = vector.broadcast %cst_50 : f32 to vector<1x128xf32>
    %89 = arith.divf %87, %88 : vector<1x128xf32>
    %90 = tpu.concatenate %12, %23, %34, %45, %56, %67, %78, %89 in 0 : vector<1x128xf32>, vector<1x128xf32>, vector<1x128xf32>, vector<1x128xf32>, vector<1x128xf32>, vector<1x128xf32>, vector<1x128xf32>, vector<1x128xf32> -> vector<8x128xf32>
    %c0_51 = arith.constant 0 : index
    %c0_52 = arith.constant 0 : index
    %91 = vector.load %arg4[%c0_51, %c0_52] : memref<8x128xf32, #tpu.memory_space<vmem>>, vector<8x128xf32>
    tpu.vector_store %arg4[%c0_51, %c0_52], %90 {strides = array<i32>} : memref<8x128xf32, #tpu.memory_space<vmem>>, vector<8x128xf32>,
    return
  }
  func.func @transform_0(%arg0: i32) -> (i32, i32, i32) {
    %c0_i32 = arith.constant 0 : i32
    %c0_i32_0 = arith.constant 0 : i32
    %c0_i32_1 = arith.constant 0 : i32
    return %arg0, %c0_i32, %c0_i32_0 : i32, i32, i32
  }
  func.func @transform_1(%arg0: i32) -> (i32, i32) {
    %c0_i32 = arith.constant 0 : i32
    %c0_i32_0 = arith.constant 0 : i32
    %c0_i32_1 = arith.constant 0 : i32
    return %c0_i32, %c0_i32_0 : i32, i32
  }
  func.func @transform_2(%arg0: i32) -> (i32, i32) {
    %c0_i32 = arith.constant 0 : i32
    %c0_i32_0 = arith.constant 0 : i32
    %c0_i32_1 = arith.constant 0 : i32
    return %c0_i32, %c0_i32_0 : i32, i32
  }
  func.func @transform_3(%arg0: i32) -> (i32, i32) {
    %c0_i32 = arith.constant 0 : i32
    %c0_i32_0 = arith.constant 0 : i32
    return %arg0, %c0_i32 : i32, i32
  }
}

module attributes {stable_mosaic.version = 11 : i64} {
  func.func @_adapt_kernel(%arg0: i32, %arg1: memref<16x128xf32, #tpu.memory_space<vmem>>, %arg2: memref<128x64xf32, #tpu.memory_space<vmem>>, %arg3: memref<1x64xf32, #tpu.memory_space<vmem>>, %arg4: memref<64x32xf32, #tpu.memory_space<vmem>>, %arg5: memref<1x32xf32, #tpu.memory_space<vmem>>, %arg6: memref<32x32xf32, #tpu.memory_space<vmem>>, %arg7: memref<1x32xf32, #tpu.memory_space<vmem>>, %arg8: memref<16x32xf32, #tpu.memory_space<vmem>>) attributes {dimension_semantics = [#tpu.dimension_semantics<arbitrary>], iteration_bounds = array<i64: 1>, scalar_prefetch = 0 : i64, scratch_operands = 0 : i64, tpu.core_type = #tpu.core_type<tc>, window_params = [{pipeline_mode = #tpu.pipeline_mode<synchronous>, transform_indices = @transform_0, window_bounds = array<i64: 16, 128>}, {pipeline_mode = #tpu.pipeline_mode<synchronous>, transform_indices = @transform_1, window_bounds = array<i64: 128, 64>}, {pipeline_mode = #tpu.pipeline_mode<synchronous>, transform_indices = @transform_2, window_bounds = array<i64: 1, 64>}, {pipeline_mode = #tpu.pipeline_mode<synchronous>, transform_indices = @transform_3, window_bounds = array<i64: 64, 32>}, {pipeline_mode = #tpu.pipeline_mode<synchronous>, transform_indices = @transform_4, window_bounds = array<i64: 1, 32>}, {pipeline_mode = #tpu.pipeline_mode<synchronous>, transform_indices = @transform_5, window_bounds = array<i64: 32, 32>}, {pipeline_mode = #tpu.pipeline_mode<synchronous>, transform_indices = @transform_6, window_bounds = array<i64: 1, 32>}, {pipeline_mode = #tpu.pipeline_mode<synchronous>, transform_indices = @transform_7, window_bounds = array<i64: 16, 32>}]} {
    %c0 = arith.constant 0 : index
    %c0_0 = arith.constant 0 : index
    %0 = vector.load %arg1[%c0, %c0_0] : memref<16x128xf32, #tpu.memory_space<vmem>>, vector<16x128xf32>
    %c0_1 = arith.constant 0 : index
    %c0_2 = arith.constant 0 : index
    %1 = vector.load %arg2[%c0_1, %c0_2] : memref<128x64xf32, #tpu.memory_space<vmem>>, vector<128x64xf32>
    %cst = arith.constant dense<0.000000e+00> : vector<16x64xf32>
    %2 = tpu.matmul %0, %1, %cst {dimension_numbers = #tpu.dot_dimension_numbers<[1], [0], [0], [1], [0, 0, 1, 1], [], []>} : vector<16x128xf32>, vector<128x64xf32>, vector<16x64xf32> -> vector<16x64xf32>
    %c0_3 = arith.constant 0 : index
    %c0_4 = arith.constant 0 : index
    %3 = vector.load %arg3[%c0_3, %c0_4] : memref<1x64xf32, #tpu.memory_space<vmem>>, vector<1x64xf32>
    %4 = vector.broadcast %3 : vector<1x64xf32> to vector<16x64xf32>
    %5 = arith.addf %2, %4 : vector<16x64xf32>
    %6 = arith.negf %5 : vector<16x64xf32>
    %7 = math.exp %6 : vector<16x64xf32>
    %cst_5 = arith.constant 1.000000e+00 : f32
    %8 = vector.broadcast %cst_5 : f32 to vector<16x64xf32>
    %9 = arith.addf %8, %7 : vector<16x64xf32>
    %10 = arith.divf %8, %9 : vector<16x64xf32>
    %11 = arith.mulf %5, %10 : vector<16x64xf32>
    %c0_6 = arith.constant 0 : index
    %c0_7 = arith.constant 0 : index
    %12 = vector.load %arg4[%c0_6, %c0_7] : memref<64x32xf32, #tpu.memory_space<vmem>>, vector<64x32xf32>
    %cst_8 = arith.constant dense<0.000000e+00> : vector<16x32xf32>
    %13 = tpu.matmul %11, %12, %cst_8 {dimension_numbers = #tpu.dot_dimension_numbers<[1], [0], [0], [1], [0, 0, 1, 1], [], []>} : vector<16x64xf32>, vector<64x32xf32>, vector<16x32xf32> -> vector<16x32xf32>
    %c0_9 = arith.constant 0 : index
    %c0_10 = arith.constant 0 : index
    %14 = vector.load %arg5[%c0_9, %c0_10] : memref<1x32xf32, #tpu.memory_space<vmem>>, vector<1x32xf32>
    %15 = vector.broadcast %14 : vector<1x32xf32> to vector<16x32xf32>
    %16 = arith.addf %13, %15 : vector<16x32xf32>
    %17 = arith.negf %16 : vector<16x32xf32>
    %18 = math.exp %17 : vector<16x32xf32>
    %cst_11 = arith.constant 1.000000e+00 : f32
    %19 = vector.broadcast %cst_11 : f32 to vector<16x32xf32>
    %20 = arith.addf %19, %18 : vector<16x32xf32>
    %21 = arith.divf %19, %20 : vector<16x32xf32>
    %22 = arith.mulf %16, %21 : vector<16x32xf32>
    %c0_12 = arith.constant 0 : index
    %c0_13 = arith.constant 0 : index
    %23 = vector.load %arg6[%c0_12, %c0_13] : memref<32x32xf32, #tpu.memory_space<vmem>>, vector<32x32xf32>
    %cst_14 = arith.constant dense<0.000000e+00> : vector<16x32xf32>
    %24 = tpu.matmul %22, %23, %cst_14 {dimension_numbers = #tpu.dot_dimension_numbers<[1], [0], [0], [1], [0, 0, 1, 1], [], []>} : vector<16x32xf32>, vector<32x32xf32>, vector<16x32xf32> -> vector<16x32xf32>
    %c0_15 = arith.constant 0 : index
    %c0_16 = arith.constant 0 : index
    %25 = vector.load %arg7[%c0_15, %c0_16] : memref<1x32xf32, #tpu.memory_space<vmem>>, vector<1x32xf32>
    %26 = vector.broadcast %25 : vector<1x32xf32> to vector<16x32xf32>
    %27 = arith.addf %24, %26 : vector<16x32xf32>
    %c0_17 = arith.constant 0 : index
    %c0_18 = arith.constant 0 : index
    %28 = vector.load %arg8[%c0_17, %c0_18] : memref<16x32xf32, #tpu.memory_space<vmem>>, vector<16x32xf32>
    tpu.vector_store %arg8[%c0_17, %c0_18], %27 {strides = array<i32>} : memref<16x32xf32, #tpu.memory_space<vmem>>, vector<16x32xf32>,
    return
  }
  func.func @transform_0(%arg0: i32) -> (i32, i32) {
    %c0_i32 = arith.constant 0 : i32
    %c0_i32_0 = arith.constant 0 : i32
    %c0_i32_1 = arith.constant 0 : i32
    return %c0_i32, %c0_i32_0 : i32, i32
  }
  func.func @transform_1(%arg0: i32) -> (i32, i32) {
    %c0_i32 = arith.constant 0 : i32
    %c0_i32_0 = arith.constant 0 : i32
    %c0_i32_1 = arith.constant 0 : i32
    return %c0_i32, %c0_i32_0 : i32, i32
  }
  func.func @transform_2(%arg0: i32) -> (i32, i32) {
    %c0_i32 = arith.constant 0 : i32
    %c0_i32_0 = arith.constant 0 : i32
    %c0_i32_1 = arith.constant 0 : i32
    return %c0_i32, %c0_i32_0 : i32, i32
  }
  func.func @transform_3(%arg0: i32) -> (i32, i32) {
    %c0_i32 = arith.constant 0 : i32
    %c0_i32_0 = arith.constant 0 : i32
    %c0_i32_1 = arith.constant 0 : i32
    return %c0_i32, %c0_i32_0 : i32, i32
  }
  func.func @transform_4(%arg0: i32) -> (i32, i32) {
    %c0_i32 = arith.constant 0 : i32
    %c0_i32_0 = arith.constant 0 : i32
    %c0_i32_1 = arith.constant 0 : i32
    return %c0_i32, %c0_i32_0 : i32, i32
  }
  func.func @transform_5(%arg0: i32) -> (i32, i32) {
    %c0_i32 = arith.constant 0 : i32
    %c0_i32_0 = arith.constant 0 : i32
    %c0_i32_1 = arith.constant 0 : i32
    return %c0_i32, %c0_i32_0 : i32, i32
  }
  func.func @transform_6(%arg0: i32) -> (i32, i32) {
    %c0_i32 = arith.constant 0 : i32
    %c0_i32_0 = arith.constant 0 : i32
    %c0_i32_1 = arith.constant 0 : i32
    return %c0_i32, %c0_i32_0 : i32, i32
  }
  func.func @transform_7(%arg0: i32) -> (i32, i32) {
    %c0_i32 = arith.constant 0 : i32
    %c0_i32_0 = arith.constant 0 : i32
    %c0_i32_1 = arith.constant 0 : i32
    return %c0_i32, %c0_i32_0 : i32, i32
  }
}

module attributes {stable_mosaic.version = 11 : i64} {
  func.func @_resblock_kernel(%arg0: i32, %arg1: memref<16x32xf32, #tpu.memory_space<vmem>>, %arg2: memref<1x32xf32, #tpu.memory_space<vmem>>, %arg3: memref<32x128xf32, #tpu.memory_space<vmem>>, %arg4: memref<1x128xf32, #tpu.memory_space<vmem>>, %arg5: memref<3x64xf32, #tpu.memory_space<vmem>>, %arg6: memref<1x64xf32, #tpu.memory_space<vmem>>, %arg7: memref<64x16xf32, #tpu.memory_space<vmem>>, %arg8: memref<32x64xf32, #tpu.memory_space<vmem>>, %arg9: memref<16x64xf32, #tpu.memory_space<vmem>>, %arg10: memref<1x64xf32, #tpu.memory_space<vmem>>, %arg11: memref<16x64xf32, #tpu.memory_space<vmem>>, %arg12: memref<128x32xf32, #tpu.memory_space<vmem>>, %arg13: memref<1x32xf32, #tpu.memory_space<vmem>>, %arg14: memref<16x32xf32, #tpu.memory_space<vmem>>) attributes {dimension_semantics = [#tpu.dimension_semantics<arbitrary>], iteration_bounds = array<i64: 1>, scalar_prefetch = 0 : i64, scratch_operands = 0 : i64, tpu.core_type = #tpu.core_type<tc>, window_params = [{pipeline_mode = #tpu.pipeline_mode<synchronous>, transform_indices = @transform_0, window_bounds = array<i64: 16, 32>}, {pipeline_mode = #tpu.pipeline_mode<synchronous>, transform_indices = @transform_1, window_bounds = array<i64: 1, 32>}, {pipeline_mode = #tpu.pipeline_mode<synchronous>, transform_indices = @transform_2, window_bounds = array<i64: 32, 128>}, {pipeline_mode = #tpu.pipeline_mode<synchronous>, transform_indices = @transform_3, window_bounds = array<i64: 1, 128>}, {pipeline_mode = #tpu.pipeline_mode<synchronous>, transform_indices = @transform_4, window_bounds = array<i64: 3, 64>}, {pipeline_mode = #tpu.pipeline_mode<synchronous>, transform_indices = @transform_5, window_bounds = array<i64: 1, 64>}, {pipeline_mode = #tpu.pipeline_mode<synchronous>, transform_indices = @transform_6, window_bounds = array<i64: 64, 16>}, {pipeline_mode = #tpu.pipeline_mode<synchronous>, transform_indices = @transform_7, window_bounds = array<i64: 32, 64>}, {pipeline_mode = #tpu.pipeline_mode<synchronous>, transform_indices = @transform_8, window_bounds = array<i64: 16, 64>}, {pipeline_mode = #tpu.pipeline_mode<synchronous>, transform_indices = @transform_9, window_bounds = array<i64: 1, 64>}, {pipeline_mode = #tpu.pipeline_mode<synchronous>, transform_indices = @transform_10, window_bounds = array<i64: 16, 64>}, {pipeline_mode = #tpu.pipeline_mode<synchronous>, transform_indices = @transform_11, window_bounds = array<i64: 128, 32>}, {pipeline_mode = #tpu.pipeline_mode<synchronous>, transform_indices = @transform_12, window_bounds = array<i64: 1, 32>}, {pipeline_mode = #tpu.pipeline_mode<synchronous>, transform_indices = @transform_13, window_bounds = array<i64: 16, 32>}]} {
    %c0 = arith.constant 0 : index
    %c0_0 = arith.constant 0 : index
    %0 = vector.load %arg1[%c0, %c0_0] : memref<16x32xf32, #tpu.memory_space<vmem>>, vector<16x32xf32>
    %1 = arith.mulf %0, %0 : vector<16x32xf32>
    %cst = arith.constant dense<0.000000e+00> : vector<16xf32>
    %2 = vector.multi_reduction <add>, %1, %cst [1] : vector<16x32xf32> to vector<16xf32>
    %3 = vector.shape_cast %2 : vector<16xf32> to vector<16x1xf32>
    %cst_1 = arith.constant 3.200000e+01 : f32
    %4 = vector.broadcast %cst_1 : f32 to vector<16x1xf32>
    %5 = arith.divf %3, %4 : vector<16x1xf32>
    %cst_2 = arith.constant 9.99999974E-6 : f32
    %6 = vector.broadcast %cst_2 : f32 to vector<16x1xf32>
    %7 = arith.addf %5, %6 : vector<16x1xf32>
    %8 = math.rsqrt %7 : vector<16x1xf32>
    %9 = vector.broadcast %8 : vector<16x1xf32> to vector<16x32xf32>
    %10 = arith.mulf %0, %9 : vector<16x32xf32>
    %c0_3 = arith.constant 0 : index
    %c0_4 = arith.constant 0 : index
    %11 = vector.load %arg2[%c0_3, %c0_4] : memref<1x32xf32, #tpu.memory_space<vmem>>, vector<1x32xf32>
    %12 = vector.broadcast %11 : vector<1x32xf32> to vector<16x32xf32>
    %13 = arith.mulf %10, %12 : vector<16x32xf32>
    %c0_5 = arith.constant 0 : index
    %c0_6 = arith.constant 0 : index
    %14 = vector.load %arg3[%c0_5, %c0_6] : memref<32x128xf32, #tpu.memory_space<vmem>>, vector<32x128xf32>
    %cst_7 = arith.constant dense<0.000000e+00> : vector<16x128xf32>
    %15 = tpu.matmul %13, %14, %cst_7 {dimension_numbers = #tpu.dot_dimension_numbers<[1], [0], [0], [1], [0, 0, 1, 1], [], []>} : vector<16x32xf32>, vector<32x128xf32>, vector<16x128xf32> -> vector<16x128xf32>
    %c0_8 = arith.constant 0 : index
    %c0_9 = arith.constant 0 : index
    %16 = vector.load %arg4[%c0_8, %c0_9] : memref<1x128xf32, #tpu.memory_space<vmem>>, vector<1x128xf32>
    %17 = vector.broadcast %16 : vector<1x128xf32> to vector<16x128xf32>
    %18 = arith.addf %15, %17 : vector<16x128xf32>
    %19 = vector.extract_strided_slice %18 {offsets = [0, 0], sizes = [16, 64], strides = [1, 1]} : vector<16x128xf32> to vector<16x64xf32>
    %20 = vector.extract_strided_slice %18 {offsets = [0, 64], sizes = [16, 64], strides = [1, 1]} : vector<16x128xf32> to vector<16x64xf32>
    %21 = arith.negf %20 : vector<16x64xf32>
    %22 = math.exp %21 : vector<16x64xf32>
    %cst_10 = arith.constant 1.000000e+00 : f32
    %23 = vector.broadcast %cst_10 : f32 to vector<16x64xf32>
    %24 = arith.addf %23, %22 : vector<16x64xf32>
    %25 = arith.divf %23, %24 : vector<16x64xf32>
    %26 = arith.mulf %20, %25 : vector<16x64xf32>
    %c0_11 = arith.constant 0 : index
    %c0_12 = arith.constant 0 : index
    %27 = vector.load %arg5[%c0_11, %c0_12] : memref<3x64xf32, #tpu.memory_space<vmem>>, vector<1x64xf32>
    %c1 = arith.constant 1 : index
    %c0_13 = arith.constant 0 : index
    %28 = vector.load %arg5[%c1, %c0_13] : memref<3x64xf32, #tpu.memory_space<vmem>>, vector<1x64xf32>
    %c2 = arith.constant 2 : index
    %c0_14 = arith.constant 0 : index
    %29 = vector.load %arg5[%c2, %c0_14] : memref<3x64xf32, #tpu.memory_space<vmem>>, vector<1x64xf32>
    %c0_15 = arith.constant 0 : index
    %c0_16 = arith.constant 0 : index
    %30 = vector.load %arg6[%c0_15, %c0_16] : memref<1x64xf32, #tpu.memory_space<vmem>>, vector<1x64xf32>
    %cst_17 = arith.constant 0.000000e+00 : f32
    %31 = vector.broadcast %cst_17 : f32 to vector<2x64xf32>
    %32 = vector.extract_strided_slice %19 {offsets = [0, 0], sizes = [8, 64], strides = [1, 1]} : vector<16x64xf32> to vector<8x64xf32>
    %33 = vector.extract_strided_slice %31 {offsets = [0, 0], sizes = [1, 64], strides = [1, 1]} : vector<2x64xf32> to vector<1x64xf32>
    %34 = vector.extract_strided_slice %32 {offsets = [0, 0], sizes = [7, 64], strides = [1, 1]} : vector<8x64xf32> to vector<7x64xf32>
    %35 = tpu.concatenate %33, %34 in 0 : vector<1x64xf32>, vector<7x64xf32> -> vector<8x64xf32>
    %36 = vector.extract_strided_slice %32 {offsets = [0, 0], sizes = [6, 64], strides = [1, 1]} : vector<8x64xf32> to vector<6x64xf32>
    %37 = tpu.concatenate %31, %36 in 0 : vector<2x64xf32>, vector<6x64xf32> -> vector<8x64xf32>
    %38 = vector.broadcast %29 : vector<1x64xf32> to vector<8x64xf32>
    %39 = arith.mulf %32, %38 : vector<8x64xf32>
    %40 = vector.broadcast %28 : vector<1x64xf32> to vector<8x64xf32>
    %41 = arith.mulf %35, %40 : vector<8x64xf32>
    %42 = arith.addf %39, %41 : vector<8x64xf32>
    %43 = vector.broadcast %27 : vector<1x64xf32> to vector<8x64xf32>
    %44 = arith.mulf %37, %43 : vector<8x64xf32>
    %45 = arith.addf %42, %44 : vector<8x64xf32>
    %46 = vector.broadcast %30 : vector<1x64xf32> to vector<8x64xf32>
    %47 = arith.addf %45, %46 : vector<8x64xf32>
    %48 = arith.negf %47 : vector<8x64xf32>
    %49 = math.exp %48 : vector<8x64xf32>
    %cst_18 = arith.constant 1.000000e+00 : f32
    %50 = vector.broadcast %cst_18 : f32 to vector<8x64xf32>
    %51 = arith.addf %50, %49 : vector<8x64xf32>
    %52 = arith.divf %50, %51 : vector<8x64xf32>
    %53 = arith.mulf %47, %52 : vector<8x64xf32>
    %54 = vector.extract_strided_slice %19 {offsets = [8, 0], sizes = [8, 64], strides = [1, 1]} : vector<16x64xf32> to vector<8x64xf32>
    %55 = vector.extract_strided_slice %31 {offsets = [0, 0], sizes = [1, 64], strides = [1, 1]} : vector<2x64xf32> to vector<1x64xf32>
    %56 = vector.extract_strided_slice %54 {offsets = [0, 0], sizes = [7, 64], strides = [1, 1]} : vector<8x64xf32> to vector<7x64xf32>
    %57 = tpu.concatenate %55, %56 in 0 : vector<1x64xf32>, vector<7x64xf32> -> vector<8x64xf32>
    %58 = vector.extract_strided_slice %54 {offsets = [0, 0], sizes = [6, 64], strides = [1, 1]} : vector<8x64xf32> to vector<6x64xf32>
    %59 = tpu.concatenate %31, %58 in 0 : vector<2x64xf32>, vector<6x64xf32> -> vector<8x64xf32>
    %60 = vector.broadcast %29 : vector<1x64xf32> to vector<8x64xf32>
    %61 = arith.mulf %54, %60 : vector<8x64xf32>
    %62 = vector.broadcast %28 : vector<1x64xf32> to vector<8x64xf32>
    %63 = arith.mulf %57, %62 : vector<8x64xf32>
    %64 = arith.addf %61, %63 : vector<8x64xf32>
    %65 = vector.broadcast %27 : vector<1x64xf32> to vector<8x64xf32>
    %66 = arith.mulf %59, %65 : vector<8x64xf32>
    %67 = arith.addf %64, %66 : vector<8x64xf32>
    %68 = vector.broadcast %30 : vector<1x64xf32> to vector<8x64xf32>
    %69 = arith.addf %67, %68 : vector<8x64xf32>
    %70 = arith.negf %69 : vector<8x64xf32>
    %71 = math.exp %70 : vector<8x64xf32>
    %cst_19 = arith.constant 1.000000e+00 : f32
    %72 = vector.broadcast %cst_19 : f32 to vector<8x64xf32>
    %73 = arith.addf %72, %71 : vector<8x64xf32>
    %74 = arith.divf %72, %73 : vector<8x64xf32>
    %75 = arith.mulf %69, %74 : vector<8x64xf32>
    %76 = tpu.concatenate %53, %75 in 0 : vector<8x64xf32>, vector<8x64xf32> -> vector<16x64xf32>
    %c0_20 = arith.constant 0 : index
    %c0_21 = arith.constant 0 : index
    %77 = vector.load %arg7[%c0_20, %c0_21] : memref<64x16xf32, #tpu.memory_space<vmem>>, vector<64x16xf32>
    %cst_22 = arith.constant dense<0.000000e+00> : vector<16x16xf32>
    %78 = tpu.matmul %76, %77, %cst_22 {dimension_numbers = #tpu.dot_dimension_numbers<[1], [0], [0], [1], [0, 0, 1, 1], [], []>} : vector<16x64xf32>, vector<64x16xf32>, vector<16x16xf32> -> vector<16x16xf32>
    %c0_23 = arith.constant 0 : index
    %c0_24 = arith.constant 0 : index
    %79 = vector.load %arg8[%c0_23, %c0_24] : memref<32x64xf32, #tpu.memory_space<vmem>>, vector<32x64xf32>
    %cst_25 = arith.constant dense<0.000000e+00> : vector<32x16xf32>
    %80 = tpu.matmul %79, %76, %cst_25 {dimension_numbers = #tpu.dot_dimension_numbers<[1], [1], [0], [0], [0, 0, 1, 0], [], []>} : vector<32x64xf32>, vector<16x64xf32>, vector<32x16xf32> -> vector<32x16xf32>
    %c0_26 = arith.constant 0 : index
    %c0_27 = arith.constant 0 : index
    %81 = vector.load %arg9[%c0_26, %c0_27] : memref<16x64xf32, #tpu.memory_space<vmem>>, vector<16x64xf32>
    %cst_28 = arith.constant dense<0.000000e+00> : vector<16x64xf32>
    %82 = tpu.matmul %78, %81, %cst_28 {dimension_numbers = #tpu.dot_dimension_numbers<[1], [0], [0], [1], [0, 0, 1, 1], [], []>} : vector<16x16xf32>, vector<16x64xf32>, vector<16x64xf32> -> vector<16x64xf32>
    %c0_29 = arith.constant 0 : index
    %c0_30 = arith.constant 0 : index
    %83 = vector.load %arg10[%c0_29, %c0_30] : memref<1x64xf32, #tpu.memory_space<vmem>>, vector<1x64xf32>
    %84 = vector.broadcast %83 : vector<1x64xf32> to vector<16x64xf32>
    %85 = arith.addf %82, %84 : vector<16x64xf32>
    %cst_31 = arith.constant 0.000000e+00 : f32
    %86 = vector.broadcast %cst_31 : f32 to vector<16x64xf32>
    %87 = arith.maximumf %85, %86 : vector<16x64xf32>
    %88 = vector.broadcast %cst_31 : f32 to vector<16x64xf32>
    %89 = arith.subf %85, %88 : vector<16x64xf32>
    %90 = arith.cmpf one, %89, %89 : vector<16x64xf32>
    %91 = vector.broadcast %cst_31 : f32 to vector<16x64xf32>
    %92 = arith.addf %85, %91 : vector<16x64xf32>
    %93 = math.absf %89 : vector<16x64xf32>
    %cst_32 = arith.constant 0.000000e+00 : f32
    %94 = vector.broadcast %cst_32 : f32 to vector<16x64xf32>
    %95 = arith.subf %94, %93 : vector<16x64xf32>
    %96 = math.exp %95 : vector<16x64xf32>
    %97 = math.log1p %96 : vector<16x64xf32>
    %98 = arith.addf %87, %97 : vector<16x64xf32>
    %99 = arith.select %90, %92, %98 : vector<16x64xi1>, vector<16x64xf32>
    %100 = arith.mulf %99, %76 : vector<16x64xf32>
    %c0_33 = arith.constant 0 : index
    %c0_34 = arith.constant 0 : index
    %101 = vector.load %arg11[%c0_33, %c0_34] : memref<16x64xf32, #tpu.memory_space<vmem>>, vector<16x64xf32>
    %102 = math.exp %101 : vector<16x64xf32>
    %cst_35 = arith.constant 0.000000e+00 : f32
    %103 = vector.broadcast %cst_35 : f32 to vector<16x64xf32>
    %104 = arith.subf %103, %102 : vector<16x64xf32>
    %105 = vector.extract_strided_slice %99 {offsets = [0, 0], sizes = [1, 64], strides = [1, 1]} : vector<16x64xf32> to vector<1x64xf32>
    %106 = vector.broadcast %105 : vector<1x64xf32> to vector<16x64xf32>
    %107 = arith.mulf %106, %104 : vector<16x64xf32>
    %108 = math.exp %107 : vector<16x64xf32>
    %109 = vector.extract_strided_slice %99 {offsets = [1, 0], sizes = [1, 64], strides = [1, 1]} : vector<16x64xf32> to vector<1x64xf32>
    %110 = vector.broadcast %109 : vector<1x64xf32> to vector<16x64xf32>
    %111 = arith.mulf %110, %104 : vector<16x64xf32>
    %112 = math.exp %111 : vector<16x64xf32>
    %113 = vector.extract_strided_slice %99 {offsets = [2, 0], sizes = [1, 64], strides = [1, 1]} : vector<16x64xf32> to vector<1x64xf32>
    %114 = vector.broadcast %113 : vector<1x64xf32> to vector<16x64xf32>
    %115 = arith.mulf %114, %104 : vector<16x64xf32>
    %116 = math.exp %115 : vector<16x64xf32>
    %117 = vector.extract_strided_slice %99 {offsets = [3, 0], sizes = [1, 64], strides = [1, 1]} : vector<16x64xf32> to vector<1x64xf32>
    %118 = vector.broadcast %117 : vector<1x64xf32> to vector<16x64xf32>
    %119 = arith.mulf %118, %104 : vector<16x64xf32>
    %120 = math.exp %119 : vector<16x64xf32>
    %121 = vector.extract_strided_slice %99 {offsets = [4, 0], sizes = [1, 64], strides = [1, 1]} : vector<16x64xf32> to vector<1x64xf32>
    %122 = vector.broadcast %121 : vector<1x64xf32> to vector<16x64xf32>
    %123 = arith.mulf %122, %104 : vector<16x64xf32>
    %124 = math.exp %123 : vector<16x64xf32>
    %125 = vector.extract_strided_slice %99 {offsets = [5, 0], sizes = [1, 64], strides = [1, 1]} : vector<16x64xf32> to vector<1x64xf32>
    %126 = vector.broadcast %125 : vector<1x64xf32> to vector<16x64xf32>
    %127 = arith.mulf %126, %104 : vector<16x64xf32>
    %128 = math.exp %127 : vector<16x64xf32>
    %129 = vector.extract_strided_slice %99 {offsets = [6, 0], sizes = [1, 64], strides = [1, 1]} : vector<16x64xf32> to vector<1x64xf32>
    %130 = vector.broadcast %129 : vector<1x64xf32> to vector<16x64xf32>
    %131 = arith.mulf %130, %104 : vector<16x64xf32>
    %132 = math.exp %131 : vector<16x64xf32>
    %133 = vector.extract_strided_slice %99 {offsets = [7, 0], sizes = [1, 64], strides = [1, 1]} : vector<16x64xf32> to vector<1x64xf32>
    %134 = vector.broadcast %133 : vector<1x64xf32> to vector<16x64xf32>
    %135 = arith.mulf %134, %104 : vector<16x64xf32>
    %136 = math.exp %135 : vector<16x64xf32>
    %137 = vector.extract_strided_slice %80 {offsets = [0, 0], sizes = [16, 1], strides = [1, 1]} : vector<32x16xf32> to vector<16x1xf32>
    %138 = vector.extract_strided_slice %80 {offsets = [0, 1], sizes = [16, 1], strides = [1, 1]} : vector<32x16xf32> to vector<16x1xf32>
    %139 = vector.extract_strided_slice %80 {offsets = [0, 2], sizes = [16, 1], strides = [1, 1]} : vector<32x16xf32> to vector<16x1xf32>
    %140 = vector.extract_strided_slice %80 {offsets = [0, 3], sizes = [16, 1], strides = [1, 1]} : vector<32x16xf32> to vector<16x1xf32>
    %141 = vector.extract_strided_slice %80 {offsets = [0, 4], sizes = [16, 1], strides = [1, 1]} : vector<32x16xf32> to vector<16x1xf32>
    %142 = vector.extract_strided_slice %80 {offsets = [0, 5], sizes = [16, 1], strides = [1, 1]} : vector<32x16xf32> to vector<16x1xf32>
    %143 = vector.extract_strided_slice %80 {offsets = [0, 6], sizes = [16, 1], strides = [1, 1]} : vector<32x16xf32> to vector<16x1xf32>
    %144 = vector.extract_strided_slice %80 {offsets = [0, 7], sizes = [16, 1], strides = [1, 1]} : vector<32x16xf32> to vector<16x1xf32>
    %145 = vector.extract_strided_slice %80 {offsets = [16, 0], sizes = [16, 1], strides = [1, 1]} : vector<32x16xf32> to vector<16x1xf32>
    %146 = vector.extract_strided_slice %80 {offsets = [16, 1], sizes = [16, 1], strides = [1, 1]} : vector<32x16xf32> to vector<16x1xf32>
    %147 = vector.extract_strided_slice %80 {offsets = [16, 2], sizes = [16, 1], strides = [1, 1]} : vector<32x16xf32> to vector<16x1xf32>
    %148 = vector.extract_strided_slice %80 {offsets = [16, 3], sizes = [16, 1], strides = [1, 1]} : vector<32x16xf32> to vector<16x1xf32>
    %149 = vector.extract_strided_slice %80 {offsets = [16, 4], sizes = [16, 1], strides = [1, 1]} : vector<32x16xf32> to vector<16x1xf32>
    %150 = vector.extract_strided_slice %80 {offsets = [16, 5], sizes = [16, 1], strides = [1, 1]} : vector<32x16xf32> to vector<16x1xf32>
    %151 = vector.extract_strided_slice %80 {offsets = [16, 6], sizes = [16, 1], strides = [1, 1]} : vector<32x16xf32> to vector<16x1xf32>
    %152 = vector.extract_strided_slice %80 {offsets = [16, 7], sizes = [16, 1], strides = [1, 1]} : vector<32x16xf32> to vector<16x1xf32>
    %153 = vector.extract_strided_slice %100 {offsets = [0, 0], sizes = [1, 64], strides = [1, 1]} : vector<16x64xf32> to vector<1x64xf32>
    %154 = vector.extract_strided_slice %100 {offsets = [1, 0], sizes = [1, 64], strides = [1, 1]} : vector<16x64xf32> to vector<1x64xf32>
    %155 = vector.extract_strided_slice %100 {offsets = [2, 0], sizes = [1, 64], strides = [1, 1]} : vector<16x64xf32> to vector<1x64xf32>
    %156 = vector.extract_strided_slice %100 {offsets = [3, 0], sizes = [1, 64], strides = [1, 1]} : vector<16x64xf32> to vector<1x64xf32>
    %157 = vector.extract_strided_slice %100 {offsets = [4, 0], sizes = [1, 64], strides = [1, 1]} : vector<16x64xf32> to vector<1x64xf32>
    %158 = vector.extract_strided_slice %100 {offsets = [5, 0], sizes = [1, 64], strides = [1, 1]} : vector<16x64xf32> to vector<1x64xf32>
    %159 = vector.extract_strided_slice %100 {offsets = [6, 0], sizes = [1, 64], strides = [1, 1]} : vector<16x64xf32> to vector<1x64xf32>
    %160 = vector.extract_strided_slice %100 {offsets = [7, 0], sizes = [1, 64], strides = [1, 1]} : vector<16x64xf32> to vector<1x64xf32>
    %cst_36 = arith.constant 0.000000e+00 : f32
    %161 = vector.broadcast %cst_36 : f32 to vector<16x64xf32>
    %162 = arith.mulf %108, %161 : vector<16x64xf32>
    %163 = vector.broadcast %153 : vector<1x64xf32> to vector<16x64xf32>
    %164 = vector.broadcast %137 : vector<16x1xf32> to vector<16x64xf32>
    %165 = arith.mulf %163, %164 : vector<16x64xf32>
    %166 = arith.addf %162, %165 : vector<16x64xf32>
    %167 = vector.broadcast %145 : vector<16x1xf32> to vector<16x64xf32>
    %168 = arith.mulf %166, %167 : vector<16x64xf32>
    %cst_37 = arith.constant dense<0.000000e+00> : vector<64xf32>
    %169 = vector.multi_reduction <add>, %168, %cst_37 [0] : vector<16x64xf32> to vector<64xf32>
    %170 = vector.shape_cast %169 : vector<64xf32> to vector<1x64xf32>
    %171 = arith.mulf %112, %166 : vector<16x64xf32>
    %172 = vector.broadcast %154 : vector<1x64xf32> to vector<16x64xf32>
    %173 = vector.broadcast %138 : vector<16x1xf32> to vector<16x64xf32>
    %174 = arith.mulf %172, %173 : vector<16x64xf32>
    %175 = arith.addf %171, %174 : vector<16x64xf32>
    %176 = vector.broadcast %146 : vector<16x1xf32> to vector<16x64xf32>
    %177 = arith.mulf %175, %176 : vector<16x64xf32>
    %cst_38 = arith.constant dense<0.000000e+00> : vector<64xf32>
    %178 = vector.multi_reduction <add>, %177, %cst_38 [0] : vector<16x64xf32> to vector<64xf32>
    %179 = vector.shape_cast %178 : vector<64xf32> to vector<1x64xf32>
    %180 = arith.mulf %116, %175 : vector<16x64xf32>
    %181 = vector.broadcast %155 : vector<1x64xf32> to vector<16x64xf32>
    %182 = vector.broadcast %139 : vector<16x1xf32> to vector<16x64xf32>
    %183 = arith.mulf %181, %182 : vector<16x64xf32>
    %184 = arith.addf %180, %183 : vector<16x64xf32>
    %185 = vector.broadcast %147 : vector<16x1xf32> to vector<16x64xf32>
    %186 = arith.mulf %184, %185 : vector<16x64xf32>
    %cst_39 = arith.constant dense<0.000000e+00> : vector<64xf32>
    %187 = vector.multi_reduction <add>, %186, %cst_39 [0] : vector<16x64xf32> to vector<64xf32>
    %188 = vector.shape_cast %187 : vector<64xf32> to vector<1x64xf32>
    %189 = arith.mulf %120, %184 : vector<16x64xf32>
    %190 = vector.broadcast %156 : vector<1x64xf32> to vector<16x64xf32>
    %191 = vector.broadcast %140 : vector<16x1xf32> to vector<16x64xf32>
    %192 = arith.mulf %190, %191 : vector<16x64xf32>
    %193 = arith.addf %189, %192 : vector<16x64xf32>
    %194 = vector.broadcast %148 : vector<16x1xf32> to vector<16x64xf32>
    %195 = arith.mulf %193, %194 : vector<16x64xf32>
    %cst_40 = arith.constant dense<0.000000e+00> : vector<64xf32>
    %196 = vector.multi_reduction <add>, %195, %cst_40 [0] : vector<16x64xf32> to vector<64xf32>
    %197 = vector.shape_cast %196 : vector<64xf32> to vector<1x64xf32>
    %198 = arith.mulf %124, %193 : vector<16x64xf32>
    %199 = vector.broadcast %157 : vector<1x64xf32> to vector<16x64xf32>
    %200 = vector.broadcast %141 : vector<16x1xf32> to vector<16x64xf32>
    %201 = arith.mulf %199, %200 : vector<16x64xf32>
    %202 = arith.addf %198, %201 : vector<16x64xf32>
    %203 = vector.broadcast %149 : vector<16x1xf32> to vector<16x64xf32>
    %204 = arith.mulf %202, %203 : vector<16x64xf32>
    %cst_41 = arith.constant dense<0.000000e+00> : vector<64xf32>
    %205 = vector.multi_reduction <add>, %204, %cst_41 [0] : vector<16x64xf32> to vector<64xf32>
    %206 = vector.shape_cast %205 : vector<64xf32> to vector<1x64xf32>
    %207 = arith.mulf %128, %202 : vector<16x64xf32>
    %208 = vector.broadcast %158 : vector<1x64xf32> to vector<16x64xf32>
    %209 = vector.broadcast %142 : vector<16x1xf32> to vector<16x64xf32>
    %210 = arith.mulf %208, %209 : vector<16x64xf32>
    %211 = arith.addf %207, %210 : vector<16x64xf32>
    %212 = vector.broadcast %150 : vector<16x1xf32> to vector<16x64xf32>
    %213 = arith.mulf %211, %212 : vector<16x64xf32>
    %cst_42 = arith.constant dense<0.000000e+00> : vector<64xf32>
    %214 = vector.multi_reduction <add>, %213, %cst_42 [0] : vector<16x64xf32> to vector<64xf32>
    %215 = vector.shape_cast %214 : vector<64xf32> to vector<1x64xf32>
    %216 = arith.mulf %132, %211 : vector<16x64xf32>
    %217 = vector.broadcast %159 : vector<1x64xf32> to vector<16x64xf32>
    %218 = vector.broadcast %143 : vector<16x1xf32> to vector<16x64xf32>
    %219 = arith.mulf %217, %218 : vector<16x64xf32>
    %220 = arith.addf %216, %219 : vector<16x64xf32>
    %221 = vector.broadcast %151 : vector<16x1xf32> to vector<16x64xf32>
    %222 = arith.mulf %220, %221 : vector<16x64xf32>
    %cst_43 = arith.constant dense<0.000000e+00> : vector<64xf32>
    %223 = vector.multi_reduction <add>, %222, %cst_43 [0] : vector<16x64xf32> to vector<64xf32>
    %224 = vector.shape_cast %223 : vector<64xf32> to vector<1x64xf32>
    %225 = arith.mulf %136, %220 : vector<16x64xf32>
    %226 = vector.broadcast %160 : vector<1x64xf32> to vector<16x64xf32>
    %227 = vector.broadcast %144 : vector<16x1xf32> to vector<16x64xf32>
    %228 = arith.mulf %226, %227 : vector<16x64xf32>
    %229 = arith.addf %225, %228 : vector<16x64xf32>
    %230 = vector.broadcast %152 : vector<16x1xf32> to vector<16x64xf32>
    %231 = arith.mulf %229, %230 : vector<16x64xf32>
    %cst_44 = arith.constant dense<0.000000e+00> : vector<64xf32>
    %232 = vector.multi_reduction <add>, %231, %cst_44 [0] : vector<16x64xf32> to vector<64xf32>
    %233 = vector.shape_cast %232 : vector<64xf32> to vector<1x64xf32>
    %cst_45 = arith.constant 0.000000e+00 : f32
    %234 = vector.broadcast %cst_45 : f32 to vector<16x64xf32>
    %235 = arith.mulf %136, %234 : vector<16x64xf32>
    %236 = vector.broadcast %160 : vector<1x64xf32> to vector<16x64xf32>
    %237 = vector.broadcast %137 : vector<16x1xf32> to vector<16x64xf32>
    %238 = arith.mulf %236, %237 : vector<16x64xf32>
    %239 = arith.addf %235, %238 : vector<16x64xf32>
    %240 = vector.broadcast %145 : vector<16x1xf32> to vector<16x64xf32>
    %241 = arith.mulf %239, %240 : vector<16x64xf32>
    %cst_46 = arith.constant dense<0.000000e+00> : vector<64xf32>
    %242 = vector.multi_reduction <add>, %241, %cst_46 [0] : vector<16x64xf32> to vector<64xf32>
    %243 = vector.shape_cast %242 : vector<64xf32> to vector<1x64xf32>
    %244 = arith.mulf %132, %239 : vector<16x64xf32>
    %245 = vector.broadcast %159 : vector<1x64xf32> to vector<16x64xf32>
    %246 = vector.broadcast %138 : vector<16x1xf32> to vector<16x64xf32>
    %247 = arith.mulf %245, %246 : vector<16x64xf32>
    %248 = arith.addf %244, %247 : vector<16x64xf32>
    %249 = vector.broadcast %146 : vector<16x1xf32> to vector<16x64xf32>
    %250 = arith.mulf %248, %249 : vector<16x64xf32>
    %cst_47 = arith.constant dense<0.000000e+00> : vector<64xf32>
    %251 = vector.multi_reduction <add>, %250, %cst_47 [0] : vector<16x64xf32> to vector<64xf32>
    %252 = vector.shape_cast %251 : vector<64xf32> to vector<1x64xf32>
    %253 = arith.mulf %128, %248 : vector<16x64xf32>
    %254 = vector.broadcast %158 : vector<1x64xf32> to vector<16x64xf32>
    %255 = vector.broadcast %139 : vector<16x1xf32> to vector<16x64xf32>
    %256 = arith.mulf %254, %255 : vector<16x64xf32>
    %257 = arith.addf %253, %256 : vector<16x64xf32>
    %258 = vector.broadcast %147 : vector<16x1xf32> to vector<16x64xf32>
    %259 = arith.mulf %257, %258 : vector<16x64xf32>
    %cst_48 = arith.constant dense<0.000000e+00> : vector<64xf32>
    %260 = vector.multi_reduction <add>, %259, %cst_48 [0] : vector<16x64xf32> to vector<64xf32>
    %261 = vector.shape_cast %260 : vector<64xf32> to vector<1x64xf32>
    %262 = arith.mulf %124, %257 : vector<16x64xf32>
    %263 = vector.broadcast %157 : vector<1x64xf32> to vector<16x64xf32>
    %264 = vector.broadcast %140 : vector<16x1xf32> to vector<16x64xf32>
    %265 = arith.mulf %263, %264 : vector<16x64xf32>
    %266 = arith.addf %262, %265 : vector<16x64xf32>
    %267 = vector.broadcast %148 : vector<16x1xf32> to vector<16x64xf32>
    %268 = arith.mulf %266, %267 : vector<16x64xf32>
    %cst_49 = arith.constant dense<0.000000e+00> : vector<64xf32>
    %269 = vector.multi_reduction <add>, %268, %cst_49 [0] : vector<16x64xf32> to vector<64xf32>
    %270 = vector.shape_cast %269 : vector<64xf32> to vector<1x64xf32>
    %271 = arith.mulf %120, %266 : vector<16x64xf32>
    %272 = vector.broadcast %156 : vector<1x64xf32> to vector<16x64xf32>
    %273 = vector.broadcast %141 : vector<16x1xf32> to vector<16x64xf32>
    %274 = arith.mulf %272, %273 : vector<16x64xf32>
    %275 = arith.addf %271, %274 : vector<16x64xf32>
    %276 = vector.broadcast %149 : vector<16x1xf32> to vector<16x64xf32>
    %277 = arith.mulf %275, %276 : vector<16x64xf32>
    %cst_50 = arith.constant dense<0.000000e+00> : vector<64xf32>
    %278 = vector.multi_reduction <add>, %277, %cst_50 [0] : vector<16x64xf32> to vector<64xf32>
    %279 = vector.shape_cast %278 : vector<64xf32> to vector<1x64xf32>
    %280 = arith.mulf %116, %275 : vector<16x64xf32>
    %281 = vector.broadcast %155 : vector<1x64xf32> to vector<16x64xf32>
    %282 = vector.broadcast %142 : vector<16x1xf32> to vector<16x64xf32>
    %283 = arith.mulf %281, %282 : vector<16x64xf32>
    %284 = arith.addf %280, %283 : vector<16x64xf32>
    %285 = vector.broadcast %150 : vector<16x1xf32> to vector<16x64xf32>
    %286 = arith.mulf %284, %285 : vector<16x64xf32>
    %cst_51 = arith.constant dense<0.000000e+00> : vector<64xf32>
    %287 = vector.multi_reduction <add>, %286, %cst_51 [0] : vector<16x64xf32> to vector<64xf32>
    %288 = vector.shape_cast %287 : vector<64xf32> to vector<1x64xf32>
    %289 = arith.mulf %112, %284 : vector<16x64xf32>
    %290 = vector.broadcast %154 : vector<1x64xf32> to vector<16x64xf32>
    %291 = vector.broadcast %143 : vector<16x1xf32> to vector<16x64xf32>
    %292 = arith.mulf %290, %291 : vector<16x64xf32>
    %293 = arith.addf %289, %292 : vector<16x64xf32>
    %294 = vector.broadcast %151 : vector<16x1xf32> to vector<16x64xf32>
    %295 = arith.mulf %293, %294 : vector<16x64xf32>
    %cst_52 = arith.constant dense<0.000000e+00> : vector<64xf32>
    %296 = vector.multi_reduction <add>, %295, %cst_52 [0] : vector<16x64xf32> to vector<64xf32>
    %297 = vector.shape_cast %296 : vector<64xf32> to vector<1x64xf32>
    %298 = arith.mulf %108, %293 : vector<16x64xf32>
    %299 = vector.broadcast %153 : vector<1x64xf32> to vector<16x64xf32>
    %300 = vector.broadcast %144 : vector<16x1xf32> to vector<16x64xf32>
    %301 = arith.mulf %299, %300 : vector<16x64xf32>
    %302 = arith.addf %298, %301 : vector<16x64xf32>
    %303 = vector.broadcast %152 : vector<16x1xf32> to vector<16x64xf32>
    %304 = arith.mulf %302, %303 : vector<16x64xf32>
    %cst_53 = arith.constant dense<0.000000e+00> : vector<64xf32>
    %305 = vector.multi_reduction <add>, %304, %cst_53 [0] : vector<16x64xf32> to vector<64xf32>
    %306 = vector.shape_cast %305 : vector<64xf32> to vector<1x64xf32>
    %307 = tpu.concatenate %170, %179, %188, %197, %206, %215, %224, %233 in 0 : vector<1x64xf32>, vector<1x64xf32>, vector<1x64xf32>, vector<1x64xf32>, vector<1x64xf32>, vector<1x64xf32>, vector<1x64xf32>, vector<1x64xf32> -> vector<8x64xf32>
    %308 = tpu.concatenate %306, %297, %288, %279, %270, %261, %252, %243 in 0 : vector<1x64xf32>, vector<1x64xf32>, vector<1x64xf32>, vector<1x64xf32>, vector<1x64xf32>, vector<1x64xf32>, vector<1x64xf32>, vector<1x64xf32> -> vector<8x64xf32>
    %309 = tpu.concatenate %307, %308 in 1 : vector<8x64xf32>, vector<8x64xf32> -> vector<8x128xf32>
    %310 = vector.extract_strided_slice %99 {offsets = [8, 0], sizes = [1, 64], strides = [1, 1]} : vector<16x64xf32> to vector<1x64xf32>
    %311 = vector.broadcast %310 : vector<1x64xf32> to vector<16x64xf32>
    %312 = arith.mulf %311, %104 : vector<16x64xf32>
    %313 = math.exp %312 : vector<16x64xf32>
    %314 = vector.extract_strided_slice %99 {offsets = [9, 0], sizes = [1, 64], strides = [1, 1]} : vector<16x64xf32> to vector<1x64xf32>
    %315 = vector.broadcast %314 : vector<1x64xf32> to vector<16x64xf32>
    %316 = arith.mulf %315, %104 : vector<16x64xf32>
    %317 = math.exp %316 : vector<16x64xf32>
    %318 = vector.extract_strided_slice %99 {offsets = [10, 0], sizes = [1, 64], strides = [1, 1]} : vector<16x64xf32> to vector<1x64xf32>
    %319 = vector.broadcast %318 : vector<1x64xf32> to vector<16x64xf32>
    %320 = arith.mulf %319, %104 : vector<16x64xf32>
    %321 = math.exp %320 : vector<16x64xf32>
    %322 = vector.extract_strided_slice %99 {offsets = [11, 0], sizes = [1, 64], strides = [1, 1]} : vector<16x64xf32> to vector<1x64xf32>
    %323 = vector.broadcast %322 : vector<1x64xf32> to vector<16x64xf32>
    %324 = arith.mulf %323, %104 : vector<16x64xf32>
    %325 = math.exp %324 : vector<16x64xf32>
    %326 = vector.extract_strided_slice %99 {offsets = [12, 0], sizes = [1, 64], strides = [1, 1]} : vector<16x64xf32> to vector<1x64xf32>
    %327 = vector.broadcast %326 : vector<1x64xf32> to vector<16x64xf32>
    %328 = arith.mulf %327, %104 : vector<16x64xf32>
    %329 = math.exp %328 : vector<16x64xf32>
    %330 = vector.extract_strided_slice %99 {offsets = [13, 0], sizes = [1, 64], strides = [1, 1]} : vector<16x64xf32> to vector<1x64xf32>
    %331 = vector.broadcast %330 : vector<1x64xf32> to vector<16x64xf32>
    %332 = arith.mulf %331, %104 : vector<16x64xf32>
    %333 = math.exp %332 : vector<16x64xf32>
    %334 = vector.extract_strided_slice %99 {offsets = [14, 0], sizes = [1, 64], strides = [1, 1]} : vector<16x64xf32> to vector<1x64xf32>
    %335 = vector.broadcast %334 : vector<1x64xf32> to vector<16x64xf32>
    %336 = arith.mulf %335, %104 : vector<16x64xf32>
    %337 = math.exp %336 : vector<16x64xf32>
    %338 = vector.extract_strided_slice %99 {offsets = [15, 0], sizes = [1, 64], strides = [1, 1]} : vector<16x64xf32> to vector<1x64xf32>
    %339 = vector.broadcast %338 : vector<1x64xf32> to vector<16x64xf32>
    %340 = arith.mulf %339, %104 : vector<16x64xf32>
    %341 = math.exp %340 : vector<16x64xf32>
    %342 = vector.extract_strided_slice %80 {offsets = [0, 8], sizes = [16, 1], strides = [1, 1]} : vector<32x16xf32> to vector<16x1xf32>
    %343 = vector.extract_strided_slice %80 {offsets = [0, 9], sizes = [16, 1], strides = [1, 1]} : vector<32x16xf32> to vector<16x1xf32>
    %344 = vector.extract_strided_slice %80 {offsets = [0, 10], sizes = [16, 1], strides = [1, 1]} : vector<32x16xf32> to vector<16x1xf32>
    %345 = vector.extract_strided_slice %80 {offsets = [0, 11], sizes = [16, 1], strides = [1, 1]} : vector<32x16xf32> to vector<16x1xf32>
    %346 = vector.extract_strided_slice %80 {offsets = [0, 12], sizes = [16, 1], strides = [1, 1]} : vector<32x16xf32> to vector<16x1xf32>
    %347 = vector.extract_strided_slice %80 {offsets = [0, 13], sizes = [16, 1], strides = [1, 1]} : vector<32x16xf32> to vector<16x1xf32>
    %348 = vector.extract_strided_slice %80 {offsets = [0, 14], sizes = [16, 1], strides = [1, 1]} : vector<32x16xf32> to vector<16x1xf32>
    %349 = vector.extract_strided_slice %80 {offsets = [0, 15], sizes = [16, 1], strides = [1, 1]} : vector<32x16xf32> to vector<16x1xf32>
    %350 = vector.extract_strided_slice %80 {offsets = [16, 8], sizes = [16, 1], strides = [1, 1]} : vector<32x16xf32> to vector<16x1xf32>
    %351 = vector.extract_strided_slice %80 {offsets = [16, 9], sizes = [16, 1], strides = [1, 1]} : vector<32x16xf32> to vector<16x1xf32>
    %352 = vector.extract_strided_slice %80 {offsets = [16, 10], sizes = [16, 1], strides = [1, 1]} : vector<32x16xf32> to vector<16x1xf32>
    %353 = vector.extract_strided_slice %80 {offsets = [16, 11], sizes = [16, 1], strides = [1, 1]} : vector<32x16xf32> to vector<16x1xf32>
    %354 = vector.extract_strided_slice %80 {offsets = [16, 12], sizes = [16, 1], strides = [1, 1]} : vector<32x16xf32> to vector<16x1xf32>
    %355 = vector.extract_strided_slice %80 {offsets = [16, 13], sizes = [16, 1], strides = [1, 1]} : vector<32x16xf32> to vector<16x1xf32>
    %356 = vector.extract_strided_slice %80 {offsets = [16, 14], sizes = [16, 1], strides = [1, 1]} : vector<32x16xf32> to vector<16x1xf32>
    %357 = vector.extract_strided_slice %80 {offsets = [16, 15], sizes = [16, 1], strides = [1, 1]} : vector<32x16xf32> to vector<16x1xf32>
    %358 = vector.extract_strided_slice %100 {offsets = [8, 0], sizes = [1, 64], strides = [1, 1]} : vector<16x64xf32> to vector<1x64xf32>
    %359 = vector.extract_strided_slice %100 {offsets = [9, 0], sizes = [1, 64], strides = [1, 1]} : vector<16x64xf32> to vector<1x64xf32>
    %360 = vector.extract_strided_slice %100 {offsets = [10, 0], sizes = [1, 64], strides = [1, 1]} : vector<16x64xf32> to vector<1x64xf32>
    %361 = vector.extract_strided_slice %100 {offsets = [11, 0], sizes = [1, 64], strides = [1, 1]} : vector<16x64xf32> to vector<1x64xf32>
    %362 = vector.extract_strided_slice %100 {offsets = [12, 0], sizes = [1, 64], strides = [1, 1]} : vector<16x64xf32> to vector<1x64xf32>
    %363 = vector.extract_strided_slice %100 {offsets = [13, 0], sizes = [1, 64], strides = [1, 1]} : vector<16x64xf32> to vector<1x64xf32>
    %364 = vector.extract_strided_slice %100 {offsets = [14, 0], sizes = [1, 64], strides = [1, 1]} : vector<16x64xf32> to vector<1x64xf32>
    %365 = vector.extract_strided_slice %100 {offsets = [15, 0], sizes = [1, 64], strides = [1, 1]} : vector<16x64xf32> to vector<1x64xf32>
    %cst_54 = arith.constant 0.000000e+00 : f32
    %366 = vector.broadcast %cst_54 : f32 to vector<16x64xf32>
    %367 = arith.mulf %313, %366 : vector<16x64xf32>
    %368 = vector.broadcast %358 : vector<1x64xf32> to vector<16x64xf32>
    %369 = vector.broadcast %342 : vector<16x1xf32> to vector<16x64xf32>
    %370 = arith.mulf %368, %369 : vector<16x64xf32>
    %371 = arith.addf %367, %370 : vector<16x64xf32>
    %372 = vector.broadcast %350 : vector<16x1xf32> to vector<16x64xf32>
    %373 = arith.mulf %371, %372 : vector<16x64xf32>
    %cst_55 = arith.constant dense<0.000000e+00> : vector<64xf32>
    %374 = vector.multi_reduction <add>, %373, %cst_55 [0] : vector<16x64xf32> to vector<64xf32>
    %375 = vector.shape_cast %374 : vector<64xf32> to vector<1x64xf32>
    %376 = arith.mulf %317, %371 : vector<16x64xf32>
    %377 = vector.broadcast %359 : vector<1x64xf32> to vector<16x64xf32>
    %378 = vector.broadcast %343 : vector<16x1xf32> to vector<16x64xf32>
    %379 = arith.mulf %377, %378 : vector<16x64xf32>
    %380 = arith.addf %376, %379 : vector<16x64xf32>
    %381 = vector.broadcast %351 : vector<16x1xf32> to vector<16x64xf32>
    %382 = arith.mulf %380, %381 : vector<16x64xf32>
    %cst_56 = arith.constant dense<0.000000e+00> : vector<64xf32>
    %383 = vector.multi_reduction <add>, %382, %cst_56 [0] : vector<16x64xf32> to vector<64xf32>
    %384 = vector.shape_cast %383 : vector<64xf32> to vector<1x64xf32>
    %385 = arith.mulf %321, %380 : vector<16x64xf32>
    %386 = vector.broadcast %360 : vector<1x64xf32> to vector<16x64xf32>
    %387 = vector.broadcast %344 : vector<16x1xf32> to vector<16x64xf32>
    %388 = arith.mulf %386, %387 : vector<16x64xf32>
    %389 = arith.addf %385, %388 : vector<16x64xf32>
    %390 = vector.broadcast %352 : vector<16x1xf32> to vector<16x64xf32>
    %391 = arith.mulf %389, %390 : vector<16x64xf32>
    %cst_57 = arith.constant dense<0.000000e+00> : vector<64xf32>
    %392 = vector.multi_reduction <add>, %391, %cst_57 [0] : vector<16x64xf32> to vector<64xf32>
    %393 = vector.shape_cast %392 : vector<64xf32> to vector<1x64xf32>
    %394 = arith.mulf %325, %389 : vector<16x64xf32>
    %395 = vector.broadcast %361 : vector<1x64xf32> to vector<16x64xf32>
    %396 = vector.broadcast %345 : vector<16x1xf32> to vector<16x64xf32>
    %397 = arith.mulf %395, %396 : vector<16x64xf32>
    %398 = arith.addf %394, %397 : vector<16x64xf32>
    %399 = vector.broadcast %353 : vector<16x1xf32> to vector<16x64xf32>
    %400 = arith.mulf %398, %399 : vector<16x64xf32>
    %cst_58 = arith.constant dense<0.000000e+00> : vector<64xf32>
    %401 = vector.multi_reduction <add>, %400, %cst_58 [0] : vector<16x64xf32> to vector<64xf32>
    %402 = vector.shape_cast %401 : vector<64xf32> to vector<1x64xf32>
    %403 = arith.mulf %329, %398 : vector<16x64xf32>
    %404 = vector.broadcast %362 : vector<1x64xf32> to vector<16x64xf32>
    %405 = vector.broadcast %346 : vector<16x1xf32> to vector<16x64xf32>
    %406 = arith.mulf %404, %405 : vector<16x64xf32>
    %407 = arith.addf %403, %406 : vector<16x64xf32>
    %408 = vector.broadcast %354 : vector<16x1xf32> to vector<16x64xf32>
    %409 = arith.mulf %407, %408 : vector<16x64xf32>
    %cst_59 = arith.constant dense<0.000000e+00> : vector<64xf32>
    %410 = vector.multi_reduction <add>, %409, %cst_59 [0] : vector<16x64xf32> to vector<64xf32>
    %411 = vector.shape_cast %410 : vector<64xf32> to vector<1x64xf32>
    %412 = arith.mulf %333, %407 : vector<16x64xf32>
    %413 = vector.broadcast %363 : vector<1x64xf32> to vector<16x64xf32>
    %414 = vector.broadcast %347 : vector<16x1xf32> to vector<16x64xf32>
    %415 = arith.mulf %413, %414 : vector<16x64xf32>
    %416 = arith.addf %412, %415 : vector<16x64xf32>
    %417 = vector.broadcast %355 : vector<16x1xf32> to vector<16x64xf32>
    %418 = arith.mulf %416, %417 : vector<16x64xf32>
    %cst_60 = arith.constant dense<0.000000e+00> : vector<64xf32>
    %419 = vector.multi_reduction <add>, %418, %cst_60 [0] : vector<16x64xf32> to vector<64xf32>
    %420 = vector.shape_cast %419 : vector<64xf32> to vector<1x64xf32>
    %421 = arith.mulf %337, %416 : vector<16x64xf32>
    %422 = vector.broadcast %364 : vector<1x64xf32> to vector<16x64xf32>
    %423 = vector.broadcast %348 : vector<16x1xf32> to vector<16x64xf32>
    %424 = arith.mulf %422, %423 : vector<16x64xf32>
    %425 = arith.addf %421, %424 : vector<16x64xf32>
    %426 = vector.broadcast %356 : vector<16x1xf32> to vector<16x64xf32>
    %427 = arith.mulf %425, %426 : vector<16x64xf32>
    %cst_61 = arith.constant dense<0.000000e+00> : vector<64xf32>
    %428 = vector.multi_reduction <add>, %427, %cst_61 [0] : vector<16x64xf32> to vector<64xf32>
    %429 = vector.shape_cast %428 : vector<64xf32> to vector<1x64xf32>
    %430 = arith.mulf %341, %425 : vector<16x64xf32>
    %431 = vector.broadcast %365 : vector<1x64xf32> to vector<16x64xf32>
    %432 = vector.broadcast %349 : vector<16x1xf32> to vector<16x64xf32>
    %433 = arith.mulf %431, %432 : vector<16x64xf32>
    %434 = arith.addf %430, %433 : vector<16x64xf32>
    %435 = vector.broadcast %357 : vector<16x1xf32> to vector<16x64xf32>
    %436 = arith.mulf %434, %435 : vector<16x64xf32>
    %cst_62 = arith.constant dense<0.000000e+00> : vector<64xf32>
    %437 = vector.multi_reduction <add>, %436, %cst_62 [0] : vector<16x64xf32> to vector<64xf32>
    %438 = vector.shape_cast %437 : vector<64xf32> to vector<1x64xf32>
    %cst_63 = arith.constant 0.000000e+00 : f32
    %439 = vector.broadcast %cst_63 : f32 to vector<16x64xf32>
    %440 = arith.mulf %341, %439 : vector<16x64xf32>
    %441 = vector.broadcast %365 : vector<1x64xf32> to vector<16x64xf32>
    %442 = vector.broadcast %342 : vector<16x1xf32> to vector<16x64xf32>
    %443 = arith.mulf %441, %442 : vector<16x64xf32>
    %444 = arith.addf %440, %443 : vector<16x64xf32>
    %445 = vector.broadcast %350 : vector<16x1xf32> to vector<16x64xf32>
    %446 = arith.mulf %444, %445 : vector<16x64xf32>
    %cst_64 = arith.constant dense<0.000000e+00> : vector<64xf32>
    %447 = vector.multi_reduction <add>, %446, %cst_64 [0] : vector<16x64xf32> to vector<64xf32>
    %448 = vector.shape_cast %447 : vector<64xf32> to vector<1x64xf32>
    %449 = arith.mulf %337, %444 : vector<16x64xf32>
    %450 = vector.broadcast %364 : vector<1x64xf32> to vector<16x64xf32>
    %451 = vector.broadcast %343 : vector<16x1xf32> to vector<16x64xf32>
    %452 = arith.mulf %450, %451 : vector<16x64xf32>
    %453 = arith.addf %449, %452 : vector<16x64xf32>
    %454 = vector.broadcast %351 : vector<16x1xf32> to vector<16x64xf32>
    %455 = arith.mulf %453, %454 : vector<16x64xf32>
    %cst_65 = arith.constant dense<0.000000e+00> : vector<64xf32>
    %456 = vector.multi_reduction <add>, %455, %cst_65 [0] : vector<16x64xf32> to vector<64xf32>
    %457 = vector.shape_cast %456 : vector<64xf32> to vector<1x64xf32>
    %458 = arith.mulf %333, %453 : vector<16x64xf32>
    %459 = vector.broadcast %363 : vector<1x64xf32> to vector<16x64xf32>
    %460 = vector.broadcast %344 : vector<16x1xf32> to vector<16x64xf32>
    %461 = arith.mulf %459, %460 : vector<16x64xf32>
    %462 = arith.addf %458, %461 : vector<16x64xf32>
    %463 = vector.broadcast %352 : vector<16x1xf32> to vector<16x64xf32>
    %464 = arith.mulf %462, %463 : vector<16x64xf32>
    %cst_66 = arith.constant dense<0.000000e+00> : vector<64xf32>
    %465 = vector.multi_reduction <add>, %464, %cst_66 [0] : vector<16x64xf32> to vector<64xf32>
    %466 = vector.shape_cast %465 : vector<64xf32> to vector<1x64xf32>
    %467 = arith.mulf %329, %462 : vector<16x64xf32>
    %468 = vector.broadcast %362 : vector<1x64xf32> to vector<16x64xf32>
    %469 = vector.broadcast %345 : vector<16x1xf32> to vector<16x64xf32>
    %470 = arith.mulf %468, %469 : vector<16x64xf32>
    %471 = arith.addf %467, %470 : vector<16x64xf32>
    %472 = vector.broadcast %353 : vector<16x1xf32> to vector<16x64xf32>
    %473 = arith.mulf %471, %472 : vector<16x64xf32>
    %cst_67 = arith.constant dense<0.000000e+00> : vector<64xf32>
    %474 = vector.multi_reduction <add>, %473, %cst_67 [0] : vector<16x64xf32> to vector<64xf32>
    %475 = vector.shape_cast %474 : vector<64xf32> to vector<1x64xf32>
    %476 = arith.mulf %325, %471 : vector<16x64xf32>
    %477 = vector.broadcast %361 : vector<1x64xf32> to vector<16x64xf32>
    %478 = vector.broadcast %346 : vector<16x1xf32> to vector<16x64xf32>
    %479 = arith.mulf %477, %478 : vector<16x64xf32>
    %480 = arith.addf %476, %479 : vector<16x64xf32>
    %481 = vector.broadcast %354 : vector<16x1xf32> to vector<16x64xf32>
    %482 = arith.mulf %480, %481 : vector<16x64xf32>
    %cst_68 = arith.constant dense<0.000000e+00> : vector<64xf32>
    %483 = vector.multi_reduction <add>, %482, %cst_68 [0] : vector<16x64xf32> to vector<64xf32>
    %484 = vector.shape_cast %483 : vector<64xf32> to vector<1x64xf32>
    %485 = arith.mulf %321, %480 : vector<16x64xf32>
    %486 = vector.broadcast %360 : vector<1x64xf32> to vector<16x64xf32>
    %487 = vector.broadcast %347 : vector<16x1xf32> to vector<16x64xf32>
    %488 = arith.mulf %486, %487 : vector<16x64xf32>
    %489 = arith.addf %485, %488 : vector<16x64xf32>
    %490 = vector.broadcast %355 : vector<16x1xf32> to vector<16x64xf32>
    %491 = arith.mulf %489, %490 : vector<16x64xf32>
    %cst_69 = arith.constant dense<0.000000e+00> : vector<64xf32>
    %492 = vector.multi_reduction <add>, %491, %cst_69 [0] : vector<16x64xf32> to vector<64xf32>
    %493 = vector.shape_cast %492 : vector<64xf32> to vector<1x64xf32>
    %494 = arith.mulf %317, %489 : vector<16x64xf32>
    %495 = vector.broadcast %359 : vector<1x64xf32> to vector<16x64xf32>
    %496 = vector.broadcast %348 : vector<16x1xf32> to vector<16x64xf32>
    %497 = arith.mulf %495, %496 : vector<16x64xf32>
    %498 = arith.addf %494, %497 : vector<16x64xf32>
    %499 = vector.broadcast %356 : vector<16x1xf32> to vector<16x64xf32>
    %500 = arith.mulf %498, %499 : vector<16x64xf32>
    %cst_70 = arith.constant dense<0.000000e+00> : vector<64xf32>
    %501 = vector.multi_reduction <add>, %500, %cst_70 [0] : vector<16x64xf32> to vector<64xf32>
    %502 = vector.shape_cast %501 : vector<64xf32> to vector<1x64xf32>
    %503 = arith.mulf %313, %498 : vector<16x64xf32>
    %504 = vector.broadcast %358 : vector<1x64xf32> to vector<16x64xf32>
    %505 = vector.broadcast %349 : vector<16x1xf32> to vector<16x64xf32>
    %506 = arith.mulf %504, %505 : vector<16x64xf32>
    %507 = arith.addf %503, %506 : vector<16x64xf32>
    %508 = vector.broadcast %357 : vector<16x1xf32> to vector<16x64xf32>
    %509 = arith.mulf %507, %508 : vector<16x64xf32>
    %cst_71 = arith.constant dense<0.000000e+00> : vector<64xf32>
    %510 = vector.multi_reduction <add>, %509, %cst_71 [0] : vector<16x64xf32> to vector<64xf32>
    %511 = vector.shape_cast %510 : vector<64xf32> to vector<1x64xf32>
    %512 = tpu.concatenate %375, %384, %393, %402, %411, %420, %429, %438 in 0 : vector<1x64xf32>, vector<1x64xf32>, vector<1x64xf32>, vector<1x64xf32>, vector<1x64xf32>, vector<1x64xf32>, vector<1x64xf32>, vector<1x64xf32> -> vector<8x64xf32>
    %513 = tpu.concatenate %511, %502, %493, %484, %475, %466, %457, %448 in 0 : vector<1x64xf32>, vector<1x64xf32>, vector<1x64xf32>, vector<1x64xf32>, vector<1x64xf32>, vector<1x64xf32>, vector<1x64xf32>, vector<1x64xf32> -> vector<8x64xf32>
    %514 = tpu.concatenate %512, %513 in 1 : vector<8x64xf32>, vector<8x64xf32> -> vector<8x128xf32>
    %515 = tpu.concatenate %309, %514 in 0 : vector<8x128xf32>, vector<8x128xf32> -> vector<16x128xf32>
    %516 = tpu.concatenate %26, %26 in 1 : vector<16x64xf32>, vector<16x64xf32> -> vector<16x128xf32>
    %517 = arith.mulf %515, %516 : vector<16x128xf32>
    %c0_72 = arith.constant 0 : index
    %c0_73 = arith.constant 0 : index
    %518 = vector.load %arg12[%c0_72, %c0_73] : memref<128x32xf32, #tpu.memory_space<vmem>>, vector<128x32xf32>
    %cst_74 = arith.constant dense<0.000000e+00> : vector<16x32xf32>
    %519 = tpu.matmul %517, %518, %cst_74 {dimension_numbers = #tpu.dot_dimension_numbers<[1], [0], [0], [1], [0, 0, 1, 1], [], []>} : vector<16x128xf32>, vector<128x32xf32>, vector<16x32xf32> -> vector<16x32xf32>
    %c0_75 = arith.constant 0 : index
    %c0_76 = arith.constant 0 : index
    %520 = vector.load %arg13[%c0_75, %c0_76] : memref<1x32xf32, #tpu.memory_space<vmem>>, vector<1x32xf32>
    %521 = vector.broadcast %520 : vector<1x32xf32> to vector<16x32xf32>
    %522 = arith.addf %519, %521 : vector<16x32xf32>
    %523 = arith.addf %522, %0 : vector<16x32xf32>
    %c0_77 = arith.constant 0 : index
    %c0_78 = arith.constant 0 : index
    %524 = vector.load %arg14[%c0_77, %c0_78] : memref<16x32xf32, #tpu.memory_space<vmem>>, vector<16x32xf32>
    tpu.vector_store %arg14[%c0_77, %c0_78], %523 {strides = array<i32>} : memref<16x32xf32, #tpu.memory_space<vmem>>, vector<16x32xf32>,
    return
  }
  func.func @transform_0(%arg0: i32) -> (i32, i32) {
    %c0_i32 = arith.constant 0 : i32
    %c0_i32_0 = arith.constant 0 : i32
    %c0_i32_1 = arith.constant 0 : i32
    return %c0_i32, %c0_i32_0 : i32, i32
  }
  func.func @transform_1(%arg0: i32) -> (i32, i32) {
    %c0_i32 = arith.constant 0 : i32
    %c0_i32_0 = arith.constant 0 : i32
    %c0_i32_1 = arith.constant 0 : i32
    return %c0_i32, %c0_i32_0 : i32, i32
  }
  func.func @transform_2(%arg0: i32) -> (i32, i32) {
    %c0_i32 = arith.constant 0 : i32
    %c0_i32_0 = arith.constant 0 : i32
    %c0_i32_1 = arith.constant 0 : i32
    return %c0_i32, %c0_i32_0 : i32, i32
  }
  func.func @transform_3(%arg0: i32) -> (i32, i32) {
    %c0_i32 = arith.constant 0 : i32
    %c0_i32_0 = arith.constant 0 : i32
    %c0_i32_1 = arith.constant 0 : i32
    return %c0_i32, %c0_i32_0 : i32, i32
  }
  func.func @transform_4(%arg0: i32) -> (i32, i32) {
    %c0_i32 = arith.constant 0 : i32
    %c0_i32_0 = arith.constant 0 : i32
    %c0_i32_1 = arith.constant 0 : i32
    return %c0_i32, %c0_i32_0 : i32, i32
  }
  func.func @transform_5(%arg0: i32) -> (i32, i32) {
    %c0_i32 = arith.constant 0 : i32
    %c0_i32_0 = arith.constant 0 : i32
    %c0_i32_1 = arith.constant 0 : i32
    return %c0_i32, %c0_i32_0 : i32, i32
  }
  func.func @transform_6(%arg0: i32) -> (i32, i32) {
    %c0_i32 = arith.constant 0 : i32
    %c0_i32_0 = arith.constant 0 : i32
    %c0_i32_1 = arith.constant 0 : i32
    return %c0_i32, %c0_i32_0 : i32, i32
  }
  func.func @transform_7(%arg0: i32) -> (i32, i32) {
    %c0_i32 = arith.constant 0 : i32
    %c0_i32_0 = arith.constant 0 : i32
    %c0_i32_1 = arith.constant 0 : i32
    return %c0_i32, %c0_i32_0 : i32, i32
  }
  func.func @transform_8(%arg0: i32) -> (i32, i32) {
    %c0_i32 = arith.constant 0 : i32
    %c0_i32_0 = arith.constant 0 : i32
    %c0_i32_1 = arith.constant 0 : i32
    return %c0_i32, %c0_i32_0 : i32, i32
  }
  func.func @transform_9(%arg0: i32) -> (i32, i32) {
    %c0_i32 = arith.constant 0 : i32
    %c0_i32_0 = arith.constant 0 : i32
    %c0_i32_1 = arith.constant 0 : i32
    return %c0_i32, %c0_i32_0 : i32, i32
  }
  func.func @transform_10(%arg0: i32) -> (i32, i32) {
    %c0_i32 = arith.constant 0 : i32
    %c0_i32_0 = arith.constant 0 : i32
    %c0_i32_1 = arith.constant 0 : i32
    return %c0_i32, %c0_i32_0 : i32, i32
  }
  func.func @transform_11(%arg0: i32) -> (i32, i32) {
    %c0_i32 = arith.constant 0 : i32
    %c0_i32_0 = arith.constant 0 : i32
    %c0_i32_1 = arith.constant 0 : i32
    return %c0_i32, %c0_i32_0 : i32, i32
  }
  func.func @transform_12(%arg0: i32) -> (i32, i32) {
    %c0_i32 = arith.constant 0 : i32
    %c0_i32_0 = arith.constant 0 : i32
    %c0_i32_1 = arith.constant 0 : i32
    return %c0_i32, %c0_i32_0 : i32, i32
  }
  func.func @transform_13(%arg0: i32) -> (i32, i32) {
    %c0_i32 = arith.constant 0 : i32
    %c0_i32_0 = arith.constant 0 : i32
    %c0_i32_1 = arith.constant 0 : i32
    return %c0_i32, %c0_i32_0 : i32, i32
  }
}

module attributes {stable_mosaic.version = 11 : i64} {
  func.func @_head_kernel(%arg0: i32, %arg1: memref<2x256xf32, #tpu.memory_space<vmem>>, %arg2: memref<1x256xf32, #tpu.memory_space<vmem>>, %arg3: memref<1x256xf32, #tpu.memory_space<vmem>>, %arg4: memref<256x128xf32, #tpu.memory_space<vmem>>, %arg5: memref<1x128xf32, #tpu.memory_space<vmem>>, %arg6: memref<1x128xf32, #tpu.memory_space<vmem>>, %arg7: memref<1x128xf32, #tpu.memory_space<vmem>>, %arg8: memref<128x64xf32, #tpu.memory_space<vmem>>, %arg9: memref<1x64xf32, #tpu.memory_space<vmem>>, %arg10: memref<1x64xf32, #tpu.memory_space<vmem>>, %arg11: memref<1x64xf32, #tpu.memory_space<vmem>>, %arg12: memref<64x5xf32, #tpu.memory_space<vmem>>, %arg13: memref<1x5xf32, #tpu.memory_space<vmem>>, %arg14: memref<2x5xf32, #tpu.memory_space<vmem>>) attributes {dimension_semantics = [#tpu.dimension_semantics<arbitrary>], iteration_bounds = array<i64: 1>, scalar_prefetch = 0 : i64, scratch_operands = 0 : i64, tpu.core_type = #tpu.core_type<tc>, window_params = [{pipeline_mode = #tpu.pipeline_mode<synchronous>, transform_indices = @transform_0, window_bounds = array<i64: 2, 256>}, {pipeline_mode = #tpu.pipeline_mode<synchronous>, transform_indices = @transform_1, window_bounds = array<i64: 1, 256>}, {pipeline_mode = #tpu.pipeline_mode<synchronous>, transform_indices = @transform_2, window_bounds = array<i64: 1, 256>}, {pipeline_mode = #tpu.pipeline_mode<synchronous>, transform_indices = @transform_3, window_bounds = array<i64: 256, 128>}, {pipeline_mode = #tpu.pipeline_mode<synchronous>, transform_indices = @transform_4, window_bounds = array<i64: 1, 128>}, {pipeline_mode = #tpu.pipeline_mode<synchronous>, transform_indices = @transform_5, window_bounds = array<i64: 1, 128>}, {pipeline_mode = #tpu.pipeline_mode<synchronous>, transform_indices = @transform_6, window_bounds = array<i64: 1, 128>}, {pipeline_mode = #tpu.pipeline_mode<synchronous>, transform_indices = @transform_7, window_bounds = array<i64: 128, 64>}, {pipeline_mode = #tpu.pipeline_mode<synchronous>, transform_indices = @transform_8, window_bounds = array<i64: 1, 64>}, {pipeline_mode = #tpu.pipeline_mode<synchronous>, transform_indices = @transform_9, window_bounds = array<i64: 1, 64>}, {pipeline_mode = #tpu.pipeline_mode<synchronous>, transform_indices = @transform_10, window_bounds = array<i64: 1, 64>}, {pipeline_mode = #tpu.pipeline_mode<synchronous>, transform_indices = @transform_11, window_bounds = array<i64: 64, 5>}, {pipeline_mode = #tpu.pipeline_mode<synchronous>, transform_indices = @transform_12, window_bounds = array<i64: 1, 5>}, {pipeline_mode = #tpu.pipeline_mode<synchronous>, transform_indices = @transform_13, window_bounds = array<i64: 2, 5>}]} {
    %c0 = arith.constant 0 : index
    %c0_0 = arith.constant 0 : index
    %0 = vector.load %arg1[%c0, %c0_0] : memref<2x256xf32, #tpu.memory_space<vmem>>, vector<2x256xf32>
    %c0_1 = arith.constant 0 : index
    %c0_2 = arith.constant 0 : index
    %1 = vector.load %arg2[%c0_1, %c0_2] : memref<1x256xf32, #tpu.memory_space<vmem>>, vector<1x256xf32>
    %c0_3 = arith.constant 0 : index
    %c0_4 = arith.constant 0 : index
    %2 = vector.load %arg3[%c0_3, %c0_4] : memref<1x256xf32, #tpu.memory_space<vmem>>, vector<1x256xf32>
    %cst = arith.constant dense<0.000000e+00> : vector<2xf32>
    %3 = vector.multi_reduction <add>, %0, %cst [1] : vector<2x256xf32> to vector<2xf32>
    %4 = vector.shape_cast %3 : vector<2xf32> to vector<2x1xf32>
    %cst_5 = arith.constant 2.560000e+02 : f32
    %5 = vector.broadcast %cst_5 : f32 to vector<2x1xf32>
    %6 = arith.divf %4, %5 : vector<2x1xf32>
    %7 = vector.broadcast %6 : vector<2x1xf32> to vector<2x256xf32>
    %8 = arith.subf %0, %7 : vector<2x256xf32>
    %9 = arith.mulf %8, %8 : vector<2x256xf32>
    %cst_6 = arith.constant dense<0.000000e+00> : vector<2xf32>
    %10 = vector.multi_reduction <add>, %9, %cst_6 [1] : vector<2x256xf32> to vector<2xf32>
    %11 = vector.shape_cast %10 : vector<2xf32> to vector<2x1xf32>
    %cst_7 = arith.constant 2.560000e+02 : f32
    %12 = vector.broadcast %cst_7 : f32 to vector<2x1xf32>
    %13 = arith.divf %11, %12 : vector<2x1xf32>
    %14 = vector.broadcast %6 : vector<2x1xf32> to vector<2x256xf32>
    %15 = arith.subf %0, %14 : vector<2x256xf32>
    %cst_8 = arith.constant 9.99999974E-6 : f32
    %16 = vector.broadcast %cst_8 : f32 to vector<2x1xf32>
    %17 = arith.addf %13, %16 : vector<2x1xf32>
    %18 = math.rsqrt %17 : vector<2x1xf32>
    %19 = vector.broadcast %18 : vector<2x1xf32> to vector<2x256xf32>
    %20 = arith.mulf %15, %19 : vector<2x256xf32>
    %21 = vector.broadcast %1 : vector<1x256xf32> to vector<2x256xf32>
    %22 = arith.mulf %20, %21 : vector<2x256xf32>
    %23 = vector.broadcast %2 : vector<1x256xf32> to vector<2x256xf32>
    %24 = arith.addf %22, %23 : vector<2x256xf32>
    %c0_9 = arith.constant 0 : index
    %c0_10 = arith.constant 0 : index
    %25 = vector.load %arg4[%c0_9, %c0_10] : memref<256x128xf32, #tpu.memory_space<vmem>>, vector<256x128xf32>
    %cst_11 = arith.constant dense<0.000000e+00> : vector<2x128xf32>
    %26 = tpu.matmul %24, %25, %cst_11 {dimension_numbers = #tpu.dot_dimension_numbers<[1], [0], [0], [1], [0, 0, 1, 1], [], []>} : vector<2x256xf32>, vector<256x128xf32>, vector<2x128xf32> -> vector<2x128xf32>
    %c0_12 = arith.constant 0 : index
    %c0_13 = arith.constant 0 : index
    %27 = vector.load %arg5[%c0_12, %c0_13] : memref<1x128xf32, #tpu.memory_space<vmem>>, vector<1x128xf32>
    %28 = vector.broadcast %27 : vector<1x128xf32> to vector<2x128xf32>
    %29 = arith.addf %26, %28 : vector<2x128xf32>
    %c0_14 = arith.constant 0 : index
    %c0_15 = arith.constant 0 : index
    %30 = vector.load %arg6[%c0_14, %c0_15] : memref<1x128xf32, #tpu.memory_space<vmem>>, vector<1x128xf32>
    %c0_16 = arith.constant 0 : index
    %c0_17 = arith.constant 0 : index
    %31 = vector.load %arg7[%c0_16, %c0_17] : memref<1x128xf32, #tpu.memory_space<vmem>>, vector<1x128xf32>
    %cst_18 = arith.constant dense<0.000000e+00> : vector<2xf32>
    %32 = vector.multi_reduction <add>, %29, %cst_18 [1] : vector<2x128xf32> to vector<2xf32>
    %33 = vector.shape_cast %32 : vector<2xf32> to vector<2x1xf32>
    %cst_19 = arith.constant 1.280000e+02 : f32
    %34 = vector.broadcast %cst_19 : f32 to vector<2x1xf32>
    %35 = arith.divf %33, %34 : vector<2x1xf32>
    %36 = vector.broadcast %35 : vector<2x1xf32> to vector<2x128xf32>
    %37 = arith.subf %29, %36 : vector<2x128xf32>
    %38 = arith.mulf %37, %37 : vector<2x128xf32>
    %cst_20 = arith.constant dense<0.000000e+00> : vector<2xf32>
    %39 = vector.multi_reduction <add>, %38, %cst_20 [1] : vector<2x128xf32> to vector<2xf32>
    %40 = vector.shape_cast %39 : vector<2xf32> to vector<2x1xf32>
    %cst_21 = arith.constant 1.280000e+02 : f32
    %41 = vector.broadcast %cst_21 : f32 to vector<2x1xf32>
    %42 = arith.divf %40, %41 : vector<2x1xf32>
    %43 = vector.broadcast %35 : vector<2x1xf32> to vector<2x128xf32>
    %44 = arith.subf %29, %43 : vector<2x128xf32>
    %cst_22 = arith.constant 9.99999974E-6 : f32
    %45 = vector.broadcast %cst_22 : f32 to vector<2x1xf32>
    %46 = arith.addf %42, %45 : vector<2x1xf32>
    %47 = math.rsqrt %46 : vector<2x1xf32>
    %48 = vector.broadcast %47 : vector<2x1xf32> to vector<2x128xf32>
    %49 = arith.mulf %44, %48 : vector<2x128xf32>
    %50 = vector.broadcast %30 : vector<1x128xf32> to vector<2x128xf32>
    %51 = arith.mulf %49, %50 : vector<2x128xf32>
    %52 = vector.broadcast %31 : vector<1x128xf32> to vector<2x128xf32>
    %53 = arith.addf %51, %52 : vector<2x128xf32>
    %54 = arith.negf %53 : vector<2x128xf32>
    %55 = math.exp %54 : vector<2x128xf32>
    %cst_23 = arith.constant 1.000000e+00 : f32
    %56 = vector.broadcast %cst_23 : f32 to vector<2x128xf32>
    %57 = arith.addf %56, %55 : vector<2x128xf32>
    %58 = arith.divf %56, %57 : vector<2x128xf32>
    %59 = arith.mulf %53, %58 : vector<2x128xf32>
    %c0_24 = arith.constant 0 : index
    %c0_25 = arith.constant 0 : index
    %60 = vector.load %arg8[%c0_24, %c0_25] : memref<128x64xf32, #tpu.memory_space<vmem>>, vector<128x64xf32>
    %cst_26 = arith.constant dense<0.000000e+00> : vector<2x64xf32>
    %61 = tpu.matmul %59, %60, %cst_26 {dimension_numbers = #tpu.dot_dimension_numbers<[1], [0], [0], [1], [0, 0, 1, 1], [], []>} : vector<2x128xf32>, vector<128x64xf32>, vector<2x64xf32> -> vector<2x64xf32>
    %c0_27 = arith.constant 0 : index
    %c0_28 = arith.constant 0 : index
    %62 = vector.load %arg9[%c0_27, %c0_28] : memref<1x64xf32, #tpu.memory_space<vmem>>, vector<1x64xf32>
    %63 = vector.broadcast %62 : vector<1x64xf32> to vector<2x64xf32>
    %64 = arith.addf %61, %63 : vector<2x64xf32>
    %c0_29 = arith.constant 0 : index
    %c0_30 = arith.constant 0 : index
    %65 = vector.load %arg10[%c0_29, %c0_30] : memref<1x64xf32, #tpu.memory_space<vmem>>, vector<1x64xf32>
    %c0_31 = arith.constant 0 : index
    %c0_32 = arith.constant 0 : index
    %66 = vector.load %arg11[%c0_31, %c0_32] : memref<1x64xf32, #tpu.memory_space<vmem>>, vector<1x64xf32>
    %cst_33 = arith.constant dense<0.000000e+00> : vector<2xf32>
    %67 = vector.multi_reduction <add>, %64, %cst_33 [1] : vector<2x64xf32> to vector<2xf32>
    %68 = vector.shape_cast %67 : vector<2xf32> to vector<2x1xf32>
    %cst_34 = arith.constant 6.400000e+01 : f32
    %69 = vector.broadcast %cst_34 : f32 to vector<2x1xf32>
    %70 = arith.divf %68, %69 : vector<2x1xf32>
    %71 = vector.broadcast %70 : vector<2x1xf32> to vector<2x64xf32>
    %72 = arith.subf %64, %71 : vector<2x64xf32>
    %73 = arith.mulf %72, %72 : vector<2x64xf32>
    %cst_35 = arith.constant dense<0.000000e+00> : vector<2xf32>
    %74 = vector.multi_reduction <add>, %73, %cst_35 [1] : vector<2x64xf32> to vector<2xf32>
    %75 = vector.shape_cast %74 : vector<2xf32> to vector<2x1xf32>
    %cst_36 = arith.constant 6.400000e+01 : f32
    %76 = vector.broadcast %cst_36 : f32 to vector<2x1xf32>
    %77 = arith.divf %75, %76 : vector<2x1xf32>
    %78 = vector.broadcast %70 : vector<2x1xf32> to vector<2x64xf32>
    %79 = arith.subf %64, %78 : vector<2x64xf32>
    %cst_37 = arith.constant 9.99999974E-6 : f32
    %80 = vector.broadcast %cst_37 : f32 to vector<2x1xf32>
    %81 = arith.addf %77, %80 : vector<2x1xf32>
    %82 = math.rsqrt %81 : vector<2x1xf32>
    %83 = vector.broadcast %82 : vector<2x1xf32> to vector<2x64xf32>
    %84 = arith.mulf %79, %83 : vector<2x64xf32>
    %85 = vector.broadcast %65 : vector<1x64xf32> to vector<2x64xf32>
    %86 = arith.mulf %84, %85 : vector<2x64xf32>
    %87 = vector.broadcast %66 : vector<1x64xf32> to vector<2x64xf32>
    %88 = arith.addf %86, %87 : vector<2x64xf32>
    %89 = arith.negf %88 : vector<2x64xf32>
    %90 = math.exp %89 : vector<2x64xf32>
    %cst_38 = arith.constant 1.000000e+00 : f32
    %91 = vector.broadcast %cst_38 : f32 to vector<2x64xf32>
    %92 = arith.addf %91, %90 : vector<2x64xf32>
    %93 = arith.divf %91, %92 : vector<2x64xf32>
    %94 = arith.mulf %88, %93 : vector<2x64xf32>
    %c0_39 = arith.constant 0 : index
    %c0_40 = arith.constant 0 : index
    %95 = vector.load %arg12[%c0_39, %c0_40] : memref<64x5xf32, #tpu.memory_space<vmem>>, vector<64x5xf32>
    %cst_41 = arith.constant dense<0.000000e+00> : vector<2x5xf32>
    %96 = tpu.matmul %94, %95, %cst_41 {dimension_numbers = #tpu.dot_dimension_numbers<[1], [0], [0], [1], [0, 0, 1, 1], [], []>} : vector<2x64xf32>, vector<64x5xf32>, vector<2x5xf32> -> vector<2x5xf32>
    %c0_42 = arith.constant 0 : index
    %c0_43 = arith.constant 0 : index
    %97 = vector.load %arg13[%c0_42, %c0_43] : memref<1x5xf32, #tpu.memory_space<vmem>>, vector<1x5xf32>
    %98 = vector.broadcast %97 : vector<1x5xf32> to vector<2x5xf32>
    %99 = arith.addf %96, %98 : vector<2x5xf32>
    %c0_44 = arith.constant 0 : index
    %c0_45 = arith.constant 0 : index
    %100 = vector.load %arg14[%c0_44, %c0_45] : memref<2x5xf32, #tpu.memory_space<vmem>>, vector<2x5xf32>
    tpu.vector_store %arg14[%c0_44, %c0_45], %99 {strides = array<i32>} : memref<2x5xf32, #tpu.memory_space<vmem>>, vector<2x5xf32>,
    return
  }
  func.func @transform_0(%arg0: i32) -> (i32, i32) {
    %c0_i32 = arith.constant 0 : i32
    %c0_i32_0 = arith.constant 0 : i32
    %c0_i32_1 = arith.constant 0 : i32
    return %c0_i32, %c0_i32_0 : i32, i32
  }
  func.func @transform_1(%arg0: i32) -> (i32, i32) {
    %c0_i32 = arith.constant 0 : i32
    %c0_i32_0 = arith.constant 0 : i32
    %c0_i32_1 = arith.constant 0 : i32
    return %c0_i32, %c0_i32_0 : i32, i32
  }
  func.func @transform_2(%arg0: i32) -> (i32, i32) {
    %c0_i32 = arith.constant 0 : i32
    %c0_i32_0 = arith.constant 0 : i32
    %c0_i32_1 = arith.constant 0 : i32
    return %c0_i32, %c0_i32_0 : i32, i32
  }
  func.func @transform_3(%arg0: i32) -> (i32, i32) {
    %c0_i32 = arith.constant 0 : i32
    %c0_i32_0 = arith.constant 0 : i32
    %c0_i32_1 = arith.constant 0 : i32
    return %c0_i32, %c0_i32_0 : i32, i32
  }
  func.func @transform_4(%arg0: i32) -> (i32, i32) {
    %c0_i32 = arith.constant 0 : i32
    %c0_i32_0 = arith.constant 0 : i32
    %c0_i32_1 = arith.constant 0 : i32
    return %c0_i32, %c0_i32_0 : i32, i32
  }
  func.func @transform_5(%arg0: i32) -> (i32, i32) {
    %c0_i32 = arith.constant 0 : i32
    %c0_i32_0 = arith.constant 0 : i32
    %c0_i32_1 = arith.constant 0 : i32
    return %c0_i32, %c0_i32_0 : i32, i32
  }
  func.func @transform_6(%arg0: i32) -> (i32, i32) {
    %c0_i32 = arith.constant 0 : i32
    %c0_i32_0 = arith.constant 0 : i32
    %c0_i32_1 = arith.constant 0 : i32
    return %c0_i32, %c0_i32_0 : i32, i32
  }
  func.func @transform_7(%arg0: i32) -> (i32, i32) {
    %c0_i32 = arith.constant 0 : i32
    %c0_i32_0 = arith.constant 0 : i32
    %c0_i32_1 = arith.constant 0 : i32
    return %c0_i32, %c0_i32_0 : i32, i32
  }
  func.func @transform_8(%arg0: i32) -> (i32, i32) {
    %c0_i32 = arith.constant 0 : i32
    %c0_i32_0 = arith.constant 0 : i32
    %c0_i32_1 = arith.constant 0 : i32
    return %c0_i32, %c0_i32_0 : i32, i32
  }
  func.func @transform_9(%arg0: i32) -> (i32, i32) {
    %c0_i32 = arith.constant 0 : i32
    %c0_i32_0 = arith.constant 0 : i32
    %c0_i32_1 = arith.constant 0 : i32
    return %c0_i32, %c0_i32_0 : i32, i32
  }
  func.func @transform_10(%arg0: i32) -> (i32, i32) {
    %c0_i32 = arith.constant 0 : i32
    %c0_i32_0 = arith.constant 0 : i32
    %c0_i32_1 = arith.constant 0 : i32
    return %c0_i32, %c0_i32_0 : i32, i32
  }
  func.func @transform_11(%arg0: i32) -> (i32, i32) {
    %c0_i32 = arith.constant 0 : i32
    %c0_i32_0 = arith.constant 0 : i32
    %c0_i32_1 = arith.constant 0 : i32
    return %c0_i32, %c0_i32_0 : i32, i32
  }
  func.func @transform_12(%arg0: i32) -> (i32, i32) {
    %c0_i32 = arith.constant 0 : i32
    %c0_i32_0 = arith.constant 0 : i32
    %c0_i32_1 = arith.constant 0 : i32
    return %c0_i32, %c0_i32_0 : i32, i32
  }
  func.func @transform_13(%arg0: i32) -> (i32, i32) {
    %c0_i32 = arith.constant 0 : i32
    %c0_i32_0 = arith.constant 0 : i32
    %c0_i32_1 = arith.constant 0 : i32
    return %c0_i32, %c0_i32_0 : i32, i32
  }
}

</mosaic_0001>

<bundles_post_ra>
// kernel: lrcn_forward.4
= control target key start
LH: loop header
LB: loop body
LE: loop exit
PB: predicated region body
PF: predicated region fallthrough
CT: control target
= control target key end

     0   :  { %s3288_s12 = smov 0   ;;  %s4369_s0 = inlined_call_operand.vmem [shape: f32[16,256,32], index: 0, kind: input, shape index: {}]   ;;  %s4370_s1 = inlined_call_operand.vmem [shape: f32[32,128], index: 1, kind: input, shape index: {}]   ;;  %s4371_s2 = inlined_call_operand.vmem [shape: f32[1,128], index: 2, kind: input, shape index: {}]   ;;  %s4372_s3 = inlined_call_operand.vmem [shape: f32[16,128], index: 3, kind: output, shape index: {}]  }
   0x1 LB: > { %s3294_s13 = sadd.s32 4294967295, %s3265_s12   ;;  %p2757_p0 = scmp.ge.s32.totalorder %s3265_s12, 1  ;;  %s3265_s12 = sphi %s3288_s12, %s13_s12  }
   0x2   : > { %p139_p1 = scmp.lt.s32.totalorder %s3265_s12, 3 }
   0x4   : > { %p140_p2 = pnand %p2757_p0, %p139_p1 }
   0x6   : > { %143 = sbr.rel (%p140_p2) target bundleno = 680 (0x2a8), region = 32 }
   0xb   : > { %v177_v0 = vld [vmem:[%s4370_s1 + $0x18] sm:$0xff]  ;;  %v176_v1 = vld [vmem:[%s4370_s1 + $0x10] sm:$0xff]  ;;  %s2758_s18 = sshll.u32 %s3294_s13, 3  ;;  %v175_v2 = vld [vmem:[%s4370_s1 + $0x8] sm:$0xff]  ;;  %vm214_vm0 = vcmask 261120   ;;  %vm2685_vm2 = vcmask 1040384  }
   0xc   : > { %323 = vmatpush.msra.mxu0 %v177_v0  ;;  %642 = vmatpush.msra.mxu1 %v177_v0  ;;  %p164_p3 = scmp.lt.s32.totalorder %s2758_s18, 15  ;;  %v174_v3 = vld [vmem:[%s4370_s1] sm:$0xff]  ;;  %vm2687_vm3 = vcmask 1041408   ;;  %vm2689_vm4 = vcmask 1042432   ;;  %p170_p4 = scmp.lt.s32.totalorder %s3294_s13, 1  ;;  %vm2691_vm5 = vcmask 1043456  }
   0xd   : > { %954 = vmatpush.msra.mxu2 %v177_v0  ;;  %1266 = vmatpush.msra.mxu3 %v177_v0  ;;  %vm2693_vm6 = vcmask 1044480   ;;  %vm2695_vm7 = vcmask 1045504   ;;  %vm2697_vm8 = vcmask 1046528  }
   0xe   : > { %324 = vmatpush.msra.mxu0 %v176_v1  ;;  %643 = vmatpush.msra.mxu1 %v176_v1  ;;  %s4384_s18 = smov (!%p164_p3, %s2758_s18), 15  ;;  %s4386_s13 = smov (!%p170_p4, %s3294_s13), 1 }
   0xf   : > { %955 = vmatpush.msra.mxu2 %v176_v1  ;;  %1267 = vmatpush.msra.mxu3 %v176_v1  ;;  %s3244_s23 = sshll.u32 %s4384_s18, 8  ;;  %s2761_s6 = sshll.u32 %s4386_s13, 3 }
  0x10   : > { %325 = vmatpush.msra.mxu0 %v175_v2  ;;  %644 = vmatpush.msra.mxu1 %v175_v2  ;;  %s3314_s26 = scalar_lea.vmem %s4369_s0, %s3244_s23  ;;  %s173_s9 = scalar_lea.vmem %s4372_s3, %s2761_s6 }
  0x11   : > { %956 = vmatpush.msra.mxu2 %v175_v2  ;;  %1268 = vmatpush.msra.mxu3 %v175_v2  ;;  %v179_v4 = vld [vmem:[%s3314_s26] sm:$0xff]  ;;  %v180_v8 = vld [vmem:[%s3314_s26 + $0x8] sm:$0xff]  ;;  %v181_v12 = vld [vmem:[%s3314_s26 + $0x10] sm:$0xff] }
  0x12   : > { %326 = vmatpush.msra.mxu0 %v174_v3  ;;  %645 = vmatpush.msra.mxu1 %v174_v3  ;;  %v2794_v5 = vld [vmem:[%s3314_s26 + $0x100] sm:$0xff]  ;;  %v2795_v9 = vld [vmem:[%s3314_s26 + $0x108] sm:$0xff]  ;;  %v2796_v13 = vld [vmem:[%s3314_s26 + $0x110] sm:$0xff] }
  0x13   : > { %v2858_v6 = vld [vmem:[%s3314_s26 + $0x200] sm:$0xff]  ;;  %957 = vmatpush.msra.mxu2 %v174_v3  ;;  %1269 = vmatpush.msra.mxu3 %v174_v3  ;;  %v2859_v10 = vld [vmem:[%s3314_s26 + $0x208] sm:$0xff]  ;;  %v2860_v14 = vld [vmem:[%s3314_s26 + $0x210] sm:$0xff] }
  0x14   : > { %v2922_v7 = vld [vmem:[%s3314_s26 + $0x300] sm:$0xff]  ;;  %2762 = vmatmul.msk.f32.vlgmr.msra.gmra.mxu0 %vm214_vm0, %v179_v4  ;;  %2826 = vmatmul.msk.f32.vlgmr.msra.gmra.mxu1 %vm214_vm0, %v2794_v5  ;;  %v2923_v11 = vld [vmem:[%s3314_s26 + $0x308] sm:$0xff]  ;;  %v2924_v15 = vld [vmem:[%s3314_s26 + $0x310] sm:$0xff] }
  0x15   : > { %2890 = vmatmul.msk.f32.vlgmr.msra.gmra.mxu2 %vm214_vm0, %v2858_v6  ;;  %2954 = vmatmul.msk.f32.vlgmr.msra.gmra.mxu3 %vm214_vm0, %v2922_v7  ;;  %v182_v16 = vld [vmem:[%s3314_s26 + $0x18] sm:$0xff]  ;;  %v183_v20 = vld [vmem:[%s3314_s26 + $0x20] sm:$0xff]  ;;  %v184_v24 = vld [vmem:[%s3314_s26 + $0x28] sm:$0xff] }
  0x16   : > { %2202 = vmatpush.msrb.mxu2 %v177_v0  ;;  %2514 = vmatpush.msrb.mxu3 %v177_v0  ;;  %v2797_v17 = vld [vmem:[%s3314_s26 + $0x118] sm:$0xff]  ;;  %v2798_v21 = vld [vmem:[%s3314_s26 + $0x120] sm:$0xff]  ;;  %v2799_v25 = vld [vmem:[%s3314_s26 + $0x128] sm:$0xff] }
  0x17   : > { %1578 = vmatpush.msrb.mxu0 %v177_v0  ;;  %1890 = vmatpush.msrb.mxu1 %v177_v0  ;;  %v2861_v18 = vld [vmem:[%s3314_s26 + $0x218] sm:$0xff]  ;;  %v2862_v22 = vld [vmem:[%s3314_s26 + $0x220] sm:$0xff]  ;;  %v2863_v26 = vld [vmem:[%s3314_s26 + $0x228] sm:$0xff] }
  0x18   : > { %2203 = vmatpush.msrb.mxu2 %v176_v1  ;;  %2515 = vmatpush.msrb.mxu3 %v176_v1  ;;  %v2925_v19 = vld [vmem:[%s3314_s26 + $0x318] sm:$0xff]  ;;  %v2926_v23 = vld [vmem:[%s3314_s26 + $0x320] sm:$0xff]  ;;  %v2927_v27 = vld [vmem:[%s3314_s26 + $0x328] sm:$0xff] }
  0x19   : > { %1579 = vmatpush.msrb.mxu0 %v176_v1  ;;  %1891 = vmatpush.msrb.mxu1 %v176_v1  ;;  %v185_v28 = vld [vmem:[%s3314_s26 + $0x30] sm:$0xff]  ;;  %v186_v32 = vld [vmem:[%s3314_s26 + $0x38] sm:$0xff]  ;;  %v187_v36 = vld [vmem:[%s3314_s26 + $0x40] sm:$0xff] }
  0x1a   : > { %2204 = vmatpush.msrb.mxu2 %v175_v2  ;;  %2516 = vmatpush.msrb.mxu3 %v175_v2  ;;  %v2800_v29 = vld [vmem:[%s3314_s26 + $0x130] sm:$0xff]  ;;  %v2801_v33 = vld [vmem:[%s3314_s26 + $0x138] sm:$0xff]  ;;  %v2802_v37 = vld [vmem:[%s3314_s26 + $0x140] sm:$0xff] }
  0x1b   : > { %1580 = vmatpush.msrb.mxu0 %v175_v2  ;;  %1892 = vmatpush.msrb.mxu1 %v175_v2  ;;  %v2864_v30 = vld [vmem:[%s3314_s26 + $0x230] sm:$0xff]  ;;  %v2865_v34 = vld [vmem:[%s3314_s26 + $0x238] sm:$0xff]  ;;  %v2866_v38 = vld [vmem:[%s3314_s26 + $0x240] sm:$0xff] }
  0x1c   : > { %2763 = vmatmul.msk.f32.gmra.mxu0 %vm214_vm0, %v180_v8  ;;  %2827 = vmatmul.msk.f32.gmra.mxu1 %vm214_vm0, %v2795_v9  ;;  %v2928_v31 = vld [vmem:[%s3314_s26 + $0x330] sm:$0xff]  ;;  %v2929_v35 = vld [vmem:[%s3314_s26 + $0x338] sm:$0xff]  ;;  %v2930_v39 = vld [vmem:[%s3314_s26 + $0x340] sm:$0xff] }
  0x1d   : > { %2891 = vmatmul.msk.f32.gmra.mxu2 %vm214_vm0, %v2859_v10  ;;  %2955 = vmatmul.msk.f32.gmra.mxu3 %vm214_vm0, %v2923_v11  ;;  %v188_v40 = vld [vmem:[%s3314_s26 + $0x48] sm:$0xff]  ;;  %v189_v44 = vld [vmem:[%s3314_s26 + $0x50] sm:$0xff]  ;;  %v190_v48 = vld [vmem:[%s3314_s26 + $0x58] sm:$0xff] }
  0x1e   : > { %2205 = vmatpush.msrb.mxu2 %v174_v3  ;;  %2517 = vmatpush.msrb.mxu3 %v174_v3  ;;  %v2803_v41 = vld [vmem:[%s3314_s26 + $0x148] sm:$0xff]  ;;  %v2804_v45 = vld [vmem:[%s3314_s26 + $0x150] sm:$0xff]  ;;  %v2805_v49 = vld [vmem:[%s3314_s26 + $0x158] sm:$0xff] }
  0x1f   : > { %1581 = vmatpush.msrb.mxu0 %v174_v3  ;;  %1893 = vmatpush.msrb.mxu1 %v174_v3  ;;  %v2867_v42 = vld [vmem:[%s3314_s26 + $0x248] sm:$0xff]  ;;  %v2868_v46 = vld [vmem:[%s3314_s26 + $0x250] sm:$0xff]  ;;  %v2869_v50 = vld [vmem:[%s3314_s26 + $0x258] sm:$0xff] }
  0x20   : > { %v2931_v43 = vld [vmem:[%s3314_s26 + $0x348] sm:$0xff]  ;;  %v2932_v47 = vld [vmem:[%s3314_s26 + $0x350] sm:$0xff]  ;;  %v2933_v51 = vld [vmem:[%s3314_s26 + $0x358] sm:$0xff] }
  0x21   : > { %v191_v52 = vld [vmem:[%s3314_s26 + $0x60] sm:$0xff]  ;;  %v192_v56 = vld [vmem:[%s3314_s26 + $0x68] sm:$0xff]  ;;  %v193_v60 = vld [vmem:[%s3314_s26 + $0x70] sm:$0xff] }
  0x22   : > { %v2806_v53 = vld [vmem:[%s3314_s26 + $0x160] sm:$0xff]  ;;  %v2807_v57 = vld [vmem:[%s3314_s26 + $0x168] sm:$0xff]  ;;  %v2808_v61 = vld [vmem:[%s3314_s26 + $0x170] sm:$0xff] }
  0x23   : > { %v2870_v54 = vld [vmem:[%s3314_s26 + $0x260] sm:$0xff]  ;;  %v2871_v58 = vld [vmem:[%s3314_s26 + $0x268] sm:$0xff]  ;;  %v2872_v62 = vld [vmem:[%s3314_s26 + $0x270] sm:$0xff] }
  0x24   : > { %2764 = vmatmul.msk.f32.gmra.mxu0 %vm214_vm0, %v181_v12  ;;  %2828 = vmatmul.msk.f32.gmra.mxu1 %vm214_vm0, %v2796_v13  ;;  %v2934_v55 = vld [vmem:[%s3314_s26 + $0x360] sm:$0xff]  ;;  %v2935_v59 = vld [vmem:[%s3314_s26 + $0x368] sm:$0xff]  ;;  %v2936_v63 = vld [vmem:[%s3314_s26 + $0x370] sm:$0xff] }
  0x25   : > { %2892 = vmatmul.msk.f32.gmra.mxu2 %vm214_vm0, %v2860_v14  ;;  %2956 = vmatmul.msk.f32.gmra.mxu3 %vm214_vm0, %v2924_v15  ;;  %v194_v0 = vld [vmem:[%s3314_s26 + $0x78] sm:$0xff]  ;;  %v195_v6 = vld [vmem:[%s3314_s26 + $0x80] sm:$0xff]  ;;  %v196_v14 = vld [vmem:[%s3314_s26 + $0x88] sm:$0xff] }
  0x26   : > { %v2809_v1 = vld [vmem:[%s3314_s26 + $0x178] sm:$0xff]  ;;  %v2810_v7 = vld [vmem:[%s3314_s26 + $0x180] sm:$0xff]  ;;  %v2811_v15 = vld [vmem:[%s3314_s26 + $0x188] sm:$0xff] }
  0x27   : > { %v2873_v2 = vld [vmem:[%s3314_s26 + $0x278] sm:$0xff]  ;;  %v2874_v8 = vld [vmem:[%s3314_s26 + $0x280] sm:$0xff] }
  0x28   : > { %v2937_v3 = vld [vmem:[%s3314_s26 + $0x378] sm:$0xff]  ;;  %v2938_v9 = vld [vmem:[%s3314_s26 + $0x380] sm:$0xff] }
  0x2c   : > { %2765 = vmatmul.msk.f32.gmra.mxu0 %vm214_vm0, %v182_v16  ;;  %2829 = vmatmul.msk.f32.gmra.mxu1 %vm214_vm0, %v2797_v17  ;;  %v2875_v16 = vld [vmem:[%s3314_s26 + $0x288] sm:$0xff] }
  0x2d   : > { %2893 = vmatmul.msk.f32.gmra.mxu2 %vm214_vm0, %v2861_v18  ;;  %2957 = vmatmul.msk.f32.gmra.mxu3 %vm214_vm0, %v2925_v19  ;;  %v2939_v17 = vld [vmem:[%s3314_s26 + $0x388] sm:$0xff]  ;;  %v3469_v18 = vld [vmem:[%s4371_s2] ss:$0 sm:$0xff] }
  0x34   : > { %2766 = vmatmul.msk.f32.gmra.mxu0 %vm214_vm0, %v183_v20  ;;  %2830 = vmatmul.msk.f32.gmra.mxu1 %vm214_vm0, %v2798_v21 }
  0x35   : > { %2894 = vmatmul.msk.f32.gmra.mxu2 %vm214_vm0, %v2862_v22  ;;  %2958 = vmatmul.msk.f32.gmra.mxu3 %vm214_vm0, %v2926_v23 }
  0x3c   : > { %2767 = vmatmul.msk.f32.gmra.mxu0 %vm214_vm0, %v184_v24  ;;  %2831 = vmatmul.msk.f32.gmra.mxu1 %vm214_vm0, %v2799_v25 }
  0x3d   : > { %2895 = vmatmul.msk.f32.gmra.mxu2 %vm214_vm0, %v2863_v26  ;;  %2959 = vmatmul.msk.f32.gmra.mxu3 %vm214_vm0, %v2927_v27  ;;  %v197_v27 = vld [vmem:[%s3314_s26 + $0x90] sm:$0xff] }
  0x44   : > { %2768 = vmatmul.msk.f32.gmra.mxu0 %vm214_vm0, %v185_v28  ;;  %2832 = vmatmul.msk.f32.gmra.mxu1 %vm214_vm0, %v2800_v29  ;;  %v2812_v28 = vld [vmem:[%s3314_s26 + $0x190] sm:$0xff] }
  0x45   : > { %2896 = vmatmul.msk.f32.gmra.mxu2 %vm214_vm0, %v2864_v30  ;;  %2960 = vmatmul.msk.f32.gmra.mxu3 %vm214_vm0, %v2928_v31  ;;  %v2876_v29 = vld [vmem:[%s3314_s26 + $0x290] sm:$0xff] }
  0x46   : > { %v2940_v30 = vld [vmem:[%s3314_s26 + $0x390] sm:$0xff] }
  0x4c   : > { %2769 = vmatmul.msk.f32.gmra.mxu0 %vm214_vm0, %v186_v32  ;;  %2833 = vmatmul.msk.f32.gmra.mxu1 %vm214_vm0, %v2801_v33 }
  0x4d   : > { %2897 = vmatmul.msk.f32.gmra.mxu2 %vm214_vm0, %v2865_v34  ;;  %2961 = vmatmul.msk.f32.gmra.mxu3 %vm214_vm0, %v2929_v35 }
  0x54   : > { %2770 = vmatmul.msk.f32.gmra.mxu0 %vm214_vm0, %v187_v36  ;;  %2834 = vmatmul.msk.f32.gmra.mxu1 %vm214_vm0, %v2802_v37 }
  0x55   : > { %2898 = vmatmul.msk.f32.gmra.mxu2 %vm214_vm0, %v2866_v38  ;;  %2962 = vmatmul.msk.f32.gmra.mxu3 %vm214_vm0, %v2930_v39 }
  0x5c   : > { %2771 = vmatmul.msk.f32.gmra.mxu0 %vm214_vm0, %v188_v40  ;;  %2835 = vmatmul.msk.f32.gmra.mxu1 %vm214_vm0, %v2803_v41 }
  0x5d   : > { %2899 = vmatmul.msk.f32.gmra.mxu2 %vm214_vm0, %v2867_v42  ;;  %2963 = vmatmul.msk.f32.gmra.mxu3 %vm214_vm0, %v2931_v43  ;;  %v198_v43 = vld [vmem:[%s3314_s26 + $0x98] sm:$0xff] }
  0x64   : > { %2772 = vmatmul.msk.f32.gmra.mxu0 %vm214_vm0, %v189_v44  ;;  %2836 = vmatmul.msk.f32.gmra.mxu1 %vm214_vm0, %v2804_v45  ;;  %v2813_v44 = vld [vmem:[%s3314_s26 + $0x198] sm:$0xff] }
  0x65   : > { %2900 = vmatmul.msk.f32.gmra.mxu2 %vm214_vm0, %v2868_v46  ;;  %2964 = vmatmul.msk.f32.gmra.mxu3 %vm214_vm0, %v2932_v47  ;;  %v2877_v45 = vld [vmem:[%s3314_s26 + $0x298] sm:$0xff] }
  0x66   : > { %v2941_v46 = vld [vmem:[%s3314_s26 + $0x398] sm:$0xff] }
  0x6c   : > { %2773 = vmatmul.msk.f32.gmra.mxu0 %vm214_vm0, %v190_v48  ;;  %2837 = vmatmul.msk.f32.gmra.mxu1 %vm214_vm0, %v2805_v49 }
  0x6d   : > { %2901 = vmatmul.msk.f32.gmra.mxu2 %vm214_vm0, %v2869_v50  ;;  %2965 = vmatmul.msk.f32.gmra.mxu3 %vm214_vm0, %v2933_v51 }
  0x74   : > { %2774 = vmatmul.msk.f32.gmra.mxu0 %vm214_vm0, %v191_v52  ;;  %2838 = vmatmul.msk.f32.gmra.mxu1 %vm214_vm0, %v2806_v53 }
  0x75   : > { %2902 = vmatmul.msk.f32.gmra.mxu2 %vm214_vm0, %v2870_v54  ;;  %2966 = vmatmul.msk.f32.gmra.mxu3 %vm214_vm0, %v2934_v55 }
  0x7c   : > { %2775 = vmatmul.msk.f32.gmra.mxu0 %vm214_vm0, %v192_v56  ;;  %2839 = vmatmul.msk.f32.gmra.mxu1 %vm214_vm0, %v2807_v57  ;;  %v199_v57 = vld [vmem:[%s3314_s26 + $0xa0] sm:$0xff] }
  0x7d   : > { %2903 = vmatmul.msk.f32.gmra.mxu2 %vm214_vm0, %v2871_v58  ;;  %2967 = vmatmul.msk.f32.gmra.mxu3 %vm214_vm0, %v2935_v59  ;;  %v2814_v58 = vld [vmem:[%s3314_s26 + $0x1a0] sm:$0xff] }
  0x7e   : > { %v2878_v59 = vld [vmem:[%s3314_s26 + $0x2a0] sm:$0xff] }
  0x84   : > { %2776 = vmatmul.msk.f32.gmra.mxu0 %vm214_vm0, %v193_v60  ;;  %2840 = vmatmul.msk.f32.gmra.mxu1 %vm214_vm0, %v2808_v61  ;;  %v2942_v60 = vld [vmem:[%s3314_s26 + $0x3a0] sm:$0xff] }
  0x85   : > { %2904 = vmatmul.msk.f32.gmra.mxu2 %vm214_vm0, %v2872_v62  ;;  %2968 = vmatmul.msk.f32.gmra.mxu3 %vm214_vm0, %v2936_v63 }
  0x8c   : > { %2777 = vmatmul.msk.f32.gmra.mxu0 %vm214_vm0, %v194_v0  ;;  %2841 = vmatmul.msk.f32.gmra.mxu1 %vm214_vm0, %v2809_v1 }
  0x8d   : > { %2905 = vmatmul.msk.f32.gmra.mxu2 %vm214_vm0, %v2873_v2  ;;  %2969 = vmatmul.msk.f32.gmra.mxu3 %vm214_vm0, %v2937_v3 }
  0x91   : > { %v3444_v4 = vpop.f32.mrf.mxu0  ;;  %v3446_v5 = vpop.f32.mrf.mxu1 }
  0x94   : > { %2778 = vmatmul.msk.f32.gmra.mxu0 %vm214_vm0, %v195_v6  ;;  %2842 = vmatmul.msk.f32.gmra.mxu1 %vm214_vm0, %v2810_v7 }
  0x95   : > { %2906 = vmatmul.msk.f32.gmra.mxu2 %vm214_vm0, %v2874_v8  ;;  %2970 = vmatmul.msk.f32.gmra.mxu3 %vm214_vm0, %v2938_v9  ;;  %v200_v9 = vld [vmem:[%s3314_s26 + $0xa8] sm:$0xff] }
  0x98   : > { %v959_v10 = vpop.f32.mrf.mxu2  ;;  %v1271_v11 = vpop.f32.mrf.mxu3 }
  0x99   : > { %v3456_v12 = vpop.f32.mrf.mxu0  ;;  %v3458_v13 = vpop.f32.mrf.mxu1  ;;  %v960_v19 = vadd.f32 %v3469_v18, %v959_v10  ;;  %v1272_v20 = vadd.f32 %v3469_v18, %v1271_v11  ;;  %v2815_v10 = vld [vmem:[%s3314_s26 + $0x1a8] sm:$0xff] }
  0x9a   : > { %v2879_v11 = vld [vmem:[%s3314_s26 + $0x2a8] sm:$0xff] }
  0x9b   : > { %v1055_v31 = vmax.f32 %v960_v19, 0.0  ;;  %v1367_v32 = vmax.f32 %v1272_v20, 0.0 }
  0x9c   : > { %2779 = vmatmul.msk.f32.gmra.mxu0 %vm214_vm0, %v196_v14  ;;  %2843 = vmatmul.msk.f32.gmra.mxu1 %vm214_vm0, %v2811_v15  ;;  %v2943_v14 = vld [vmem:[%s3314_s26 + $0x3a8] sm:$0xff] }
  0x9d   : > { %2907 = vmatmul.msk.f32.gmra.mxu2 %vm214_vm0, %v2875_v16  ;;  %2971 = vmatmul.msk.f32.gmra.mxu3 %vm214_vm0, %v2939_v17 }
  0xa0   : > { %v962_v21 = vpop.f32.mrf.mxu2  ;;  %v1274_v22 = vpop.f32.mrf.mxu3 }
  0xa1   : > { %v963_v23 = vadd.f32 %v3469_v18, %v962_v21  ;;  %v1275_v24 = vadd.f32 %v3469_v18, %v1274_v22  ;;  %v3477_v25 = vpop.f32.mrf.mxu0  ;;  %v3479_v26 = vpop.f32.mrf.mxu1 }
  0xa3   : > { %v1056_v33 = vmax.f32 %v963_v23, 0.0  ;;  %v1368_v34 = vmax.f32 %v1275_v24, 0.0 }
  0xa4   : > { %2780 = vmatmul.msk.f32.gmra.mxu0 %vm214_vm0, %v197_v27  ;;  %2844 = vmatmul.msk.f32.gmra.mxu1 %vm214_vm0, %v2812_v28  ;;  %v201_v28 = vld [vmem:[%s3314_s26 + $0xb0] sm:$0xff] }
  0xa5   : > { %v1087_v35 = vadd.f32 %v1056_v33, %v1055_v31  ;;  %v1399_v36 = vadd.f32 %v1368_v34, %v1367_v32  ;;  %2908 = vmatmul.msk.f32.gmra.mxu2 %vm214_vm0, %v2876_v29  ;;  %2972 = vmatmul.msk.f32.gmra.mxu3 %vm214_vm0, %v2940_v30  ;;  %v2816_v29 = vld [vmem:[%s3314_s26 + $0x1b0] sm:$0xff] }
  0xa6   : > { %v2880_v30 = vld [vmem:[%s3314_s26 + $0x2b0] sm:$0xff] }
  0xa7   : > { %v2944_v31 = vld [vmem:[%s3314_s26 + $0x3b0] sm:$0xff] }
  0xa8   : > { %v965_v37 = vpop.f32.mrf.mxu2  ;;  %v1277_v38 = vpop.f32.mrf.mxu3 }
  0xa9   : > { %v966_v39 = vadd.f32 %v3469_v18, %v965_v37  ;;  %v1278_v40 = vadd.f32 %v3469_v18, %v1277_v38  ;;  %v3491_v41 = vpop.f32.mrf.mxu0  ;;  %v3493_v42 = vpop.f32.mrf.mxu1 }
  0xab   : > { %v1057_v47 = vmax.f32 %v966_v39, 0.0  ;;  %v1369_v48 = vmax.f32 %v1278_v40, 0.0 }
  0xac   : > { %2781 = vmatmul.msk.f32.gmra.mxu0 %vm214_vm0, %v198_v43  ;;  %2845 = vmatmul.msk.f32.gmra.mxu1 %vm214_vm0, %v2813_v44  ;;  %v202_v44 = vld [vmem:[%s3314_s26 + $0xb8] sm:$0xff] }
  0xad   : > { %v1088_v49 = vadd.f32 %v1087_v35, %v1057_v47  ;;  %v1400_v50 = vadd.f32 %v1399_v36, %v1369_v48  ;;  %2909 = vmatmul.msk.f32.gmra.mxu2 %vm214_vm0, %v2877_v45  ;;  %2973 = vmatmul.msk.f32.gmra.mxu3 %vm214_vm0, %v2941_v46  ;;  %v2817_v45 = vld [vmem:[%s3314_s26 + $0x1b8] sm:$0xff] }
  0xae   : > { %v2881_v46 = vld [vmem:[%s3314_s26 + $0x2b8] sm:$0xff] }
  0xaf   : > { %v2945_v47 = vld [vmem:[%s3314_s26 + $0x3b8] sm:$0xff] }
  0xb0   : > { %v968_v51 = vpop.f32.mrf.mxu2  ;;  %v1280_v52 = vpop.f32.mrf.mxu3 }
  0xb1   : > { %v969_v53 = vadd.f32 %v3469_v18, %v968_v51  ;;  %v1281_v54 = vadd.f32 %v3469_v18, %v1280_v52  ;;  %v3505_v55 = vpop.f32.mrf.mxu0  ;;  %v3507_v56 = vpop.f32.mrf.mxu1 }
  0xb3   : > { %v1058_v61 = vmax.f32 %v969_v53, 0.0  ;;  %v1370_v62 = vmax.f32 %v1281_v54, 0.0 }
  0xb4   : > { %2782 = vmatmul.msk.f32.gmra.mxu0 %vm214_vm0, %v199_v57  ;;  %2846 = vmatmul.msk.f32.gmra.mxu1 %vm214_vm0, %v2814_v58 }
  0xb5   : > { %v1089_v63 = vadd.f32 %v1088_v49, %v1058_v61  ;;  %v1401_v0 = vadd.f32 %v1400_v50, %v1370_v62  ;;  %2910 = vmatmul.msk.f32.gmra.mxu2 %vm214_vm0, %v2878_v59  ;;  %2974 = vmatmul.msk.f32.gmra.mxu3 %vm214_vm0, %v2942_v60  ;;  %v203_v60 = vld [vmem:[%s3314_s26 + $0xc0] sm:$0xff] }
  0xb6   : > { %v2818_v61 = vld [vmem:[%s3314_s26 + $0x1c0] sm:$0xff] }
  0xb7   : > { %v2882_v62 = vld [vmem:[%s3314_s26 + $0x2c0] sm:$0xff] }
  0xb8   : > { %v971_v1 = vpop.f32.mrf.mxu2  ;;  %v1283_v2 = vpop.f32.mrf.mxu3 }
  0xb9   : > { %v972_v3 = vadd.f32 %v3469_v18, %v971_v1  ;;  %v1284_v6 = vadd.f32 %v3469_v18, %v1283_v2  ;;  %v3519_v7 = vpop.f32.mrf.mxu0  ;;  %v3521_v8 = vpop.f32.mrf.mxu1 }
  0xbb   : > { %v1059_v15 = vmax.f32 %v972_v3, 0.0  ;;  %v1371_v16 = vmax.f32 %v1284_v6, 0.0 }
  0xbc   : > { %2783 = vmatmul.msk.f32.gmra.mxu0 %vm214_vm0, %v200_v9  ;;  %2847 = vmatmul.msk.f32.gmra.mxu1 %vm214_vm0, %v2815_v10 }
  0xbd   : > { %v1090_v17 = vadd.f32 %v1089_v63, %v1059_v15  ;;  %v1402_v19 = vadd.f32 %v1401_v0, %v1371_v16  ;;  %2911 = vmatmul.msk.f32.gmra.mxu2 %vm214_vm0, %v2879_v11  ;;  %2975 = vmatmul.msk.f32.gmra.mxu3 %vm214_vm0, %v2943_v14  ;;  %v2946_v63 = vld [vmem:[%s3314_s26 + $0x3c0] sm:$0xff]  ;;  %v204_v16 = vld [vmem:[%s3314_s26 + $0xc8] sm:$0xff] }
  0xc0   : > { %v974_v20 = vpop.f32.mrf.mxu2  ;;  %v1286_v21 = vpop.f32.mrf.mxu3 }
  0xc1   : > { %v975_v22 = vadd.f32 %v3469_v18, %v974_v20  ;;  %v1287_v23 = vadd.f32 %v3469_v18, %v1286_v21  ;;  %v3533_v24 = vpop.f32.mrf.mxu0  ;;  %v3535_v27 = vpop.f32.mrf.mxu1  ;;  %v2947_v20 = vld [vmem:[%s3314_s26 + $0x3c8] sm:$0xff] }
  0xc3   : > { %v1060_v32 = vmax.f32 %v975_v22, 0.0  ;;  %v1372_v33 = vmax.f32 %v1287_v23, 0.0 }
  0xc4   : > { %2784 = vmatmul.msk.f32.gmra.mxu0 %vm214_vm0, %v201_v28  ;;  %2848 = vmatmul.msk.f32.gmra.mxu1 %vm214_vm0, %v2816_v29 }
  0xc5   : > { %v1091_v34 = vadd.f32 %v1090_v17, %v1060_v32  ;;  %v1403_v35 = vadd.f32 %v1402_v19, %v1372_v33  ;;  %2912 = vmatmul.msk.f32.gmra.mxu2 %vm214_vm0, %v2880_v30  ;;  %2976 = vmatmul.msk.f32.gmra.mxu3 %vm214_vm0, %v2944_v31  ;;  %v2819_v17 = vld [vmem:[%s3314_s26 + $0x1c8] sm:$0xff] }
  0xc6   : > { %v2883_v19 = vld [vmem:[%s3314_s26 + $0x2c8] sm:$0xff] }
  0xc8   : > { %v977_v36 = vpop.f32.mrf.mxu2  ;;  %v1289_v37 = vpop.f32.mrf.mxu3 }
  0xc9   : > { %v978_v38 = vadd.f32 %v3469_v18, %v977_v36  ;;  %v1290_v39 = vadd.f32 %v3469_v18, %v1289_v37  ;;  %v3547_v40 = vpop.f32.mrf.mxu0  ;;  %v3549_v43 = vpop.f32.mrf.mxu1  ;;  %v2820_v36 = vld [vmem:[%s3314_s26 + $0x1d0] sm:$0xff] }
  0xca   : > { %v2884_v37 = vld [vmem:[%s3314_s26 + $0x2d0] sm:$0xff] }
  0xcb   : > { %v1061_v48 = vmax.f32 %v978_v38, 0.0  ;;  %v1373_v49 = vmax.f32 %v1290_v39, 0.0  ;;  %v2948_v38 = vld [vmem:[%s3314_s26 + $0x3d0] sm:$0xff] }
  0xcc   : > { %2785 = vmatmul.msk.f32.gmra.mxu0 %vm214_vm0, %v202_v44  ;;  %2849 = vmatmul.msk.f32.gmra.mxu1 %vm214_vm0, %v2817_v45 }
  0xcd   : > { %v1092_v50 = vadd.f32 %v1091_v34, %v1061_v48  ;;  %v1404_v51 = vadd.f32 %v1403_v35, %v1373_v49  ;;  %2913 = vmatmul.msk.f32.gmra.mxu2 %vm214_vm0, %v2881_v46  ;;  %2977 = vmatmul.msk.f32.gmra.mxu3 %vm214_vm0, %v2945_v47  ;;  %v205_v35 = vld [vmem:[%s3314_s26 + $0xd0] sm:$0xff] }
  0xd0   : > { %v980_v52 = vpop.f32.mrf.mxu2  ;;  %v1292_v53 = vpop.f32.mrf.mxu3 }
  0xd1   : > { %v981_v54 = vadd.f32 %v3469_v18, %v980_v52  ;;  %v1293_v57 = vadd.f32 %v3469_v18, %v1292_v53  ;;  %v3561_v58 = vpop.f32.mrf.mxu0  ;;  %v3563_v59 = vpop.f32.mrf.mxu1  ;;  %v206_v53 = vld [vmem:[%s3314_s26 + $0xd8] sm:$0xff] }
  0xd3   : > { %v1062_v0 = vmax.f32 %v981_v54, 0.0  ;;  %v1374_v1 = vmax.f32 %v1293_v57, 0.0  ;;  %v2821_v54 = vld [vmem:[%s3314_s26 + $0x1d8] sm:$0xff] }
  0xd4   : > { %2786 = vmatmul.msk.f32.gmra.mxu0 %vm214_vm0, %v203_v60  ;;  %2850 = vmatmul.msk.f32.gmra.mxu1 %vm214_vm0, %v2818_v61  ;;  %v2885_v57 = vld [vmem:[%s3314_s26 + $0x2d8] sm:$0xff] }
  0xd5   : > { %v1093_v2 = vadd.f32 %v1092_v50, %v1062_v0  ;;  %v1405_v3 = vadd.f32 %v1404_v51, %v1374_v1  ;;  %2914 = vmatmul.msk.f32.gmra.mxu2 %vm214_vm0, %v2882_v62  ;;  %2978 = vmatmul.msk.f32.gmra.mxu3 %vm214_vm0, %v2946_v63  ;;  %v2949_v60 = vld [vmem:[%s3314_s26 + $0x3d8] sm:$0xff] }
  0xd8   : > { %v983_v6 = vpop.f32.mrf.mxu2  ;;  %v1295_v9 = vpop.f32.mrf.mxu3 }
  0xd9   : > { %v984_v10 = vadd.f32 %v3469_v18, %v983_v6  ;;  %v1296_v11 = vadd.f32 %v3469_v18, %v1295_v9  ;;  %v3575_v14 = vpop.f32.mrf.mxu0  ;;  %v3577_v15 = vpop.f32.mrf.mxu1 }
  0xdb   : > { %v1063_v21 = vmax.f32 %v984_v10, 0.0  ;;  %v1375_v22 = vmax.f32 %v1296_v11, 0.0  ;;  %v207_v11 = vld [vmem:[%s3314_s26 + $0xe0] sm:$0xff] }
  0xdc   : > { %2787 = vmatmul.msk.f32.gmra.mxu0 %vm214_vm0, %v204_v16  ;;  %2851 = vmatmul.msk.f32.gmra.mxu1 %vm214_vm0, %v2819_v17  ;;  %v2822_v16 = vld [vmem:[%s3314_s26 + $0x1e0] sm:$0xff] }
  0xdd   : > { %v1094_v23 = vadd.f32 %v1093_v2, %v1063_v21  ;;  %v1406_v28 = vadd.f32 %v1405_v3, %v1375_v22  ;;  %2915 = vmatmul.msk.f32.gmra.mxu2 %vm214_vm0, %v2883_v19  ;;  %2979 = vmatmul.msk.f32.gmra.mxu3 %vm214_vm0, %v2947_v20  ;;  %v2886_v17 = vld [vmem:[%s3314_s26 + $0x2e0] sm:$0xff] }
  0xde   : > { %v2950_v19 = vld [vmem:[%s3314_s26 + $0x3e0] sm:$0xff] }
  0xe0   : > { %v986_v29 = vpop.f32.mrf.mxu2  ;;  %v1298_v30 = vpop.f32.mrf.mxu3 }
  0xe1   : > { %v987_v31 = vadd.f32 %v3469_v18, %v986_v29  ;;  %v1299_v32 = vadd.f32 %v3469_v18, %v1298_v30  ;;  %v3589_v33 = vpop.f32.mrf.mxu0  ;;  %v3591_v34 = vpop.f32.mrf.mxu1 }
  0xe3   : > { %v1064_v39 = vmax.f32 %v987_v31, 0.0  ;;  %v1376_v44 = vmax.f32 %v1299_v32, 0.0 }
  0xe4   : > { %2788 = vmatmul.msk.f32.gmra.mxu0 %vm214_vm0, %v205_v35  ;;  %2852 = vmatmul.msk.f32.gmra.mxu1 %vm214_vm0, %v2820_v36  ;;  %v208_v36 = vld [vmem:[%s3314_s26 + $0xe8] sm:$0xff] }
  0xe5   : > { %v1095_v45 = vadd.f32 %v1094_v23, %v1064_v39  ;;  %v1407_v46 = vadd.f32 %v1406_v28, %v1376_v44  ;;  %2916 = vmatmul.msk.f32.gmra.mxu2 %vm214_vm0, %v2884_v37  ;;  %2980 = vmatmul.msk.f32.gmra.mxu3 %vm214_vm0, %v2948_v38  ;;  %v2823_v37 = vld [vmem:[%s3314_s26 + $0x1e8] sm:$0xff] }
  0xe6   : > { %v2887_v38 = vld [vmem:[%s3314_s26 + $0x2e8] sm:$0xff] }
  0xe7   : > { %v2951_v39 = vld [vmem:[%s3314_s26 + $0x3e8] sm:$0xff] }
  0xe8   : > { %v989_v47 = vpop.f32.mrf.mxu2  ;;  %v1301_v48 = vpop.f32.mrf.mxu3 }
  0xe9   : > { %v990_v49 = vadd.f32 %v3469_v18, %v989_v47  ;;  %v1302_v50 = vadd.f32 %v3469_v18, %v1301_v48  ;;  %v3603_v51 = vpop.f32.mrf.mxu0  ;;  %v3605_v52 = vpop.f32.mrf.mxu1 }
  0xeb   : > { %v1065_v61 = vmax.f32 %v990_v49, 0.0  ;;  %v1377_v62 = vmax.f32 %v1302_v50, 0.0 }
  0xec   : > { %2789 = vmatmul.msk.f32.gmra.mxu0 %vm214_vm0, %v206_v53  ;;  %2853 = vmatmul.msk.f32.gmra.mxu1 %vm214_vm0, %v2821_v54 }
  0xed   : > { %v1096_v63 = vadd.f32 %v1095_v45, %v1065_v61  ;;  %v1408_v0 = vadd.f32 %v1407_v46, %v1377_v62  ;;  %2917 = vmatmul.msk.f32.gmra.mxu2 %vm214_vm0, %v2885_v57  ;;  %2981 = vmatmul.msk.f32.gmra.mxu3 %vm214_vm0, %v2949_v60  ;;  %v209_v60 = vld [vmem:[%s3314_s26 + $0xf0] sm:$0xff] }
  0xee   : > { %v2824_v61 = vld [vmem:[%s3314_s26 + $0x1f0] sm:$0xff] }
  0xef   : > { %v2888_v62 = vld [vmem:[%s3314_s26 + $0x2f0] sm:$0xff] }
  0xf0   : > { %v992_v1 = vpop.f32.mrf.mxu2  ;;  %v1304_v2 = vpop.f32.mrf.mxu3 }
  0xf1   : > { %v993_v3 = vadd.f32 %v3469_v18, %v992_v1  ;;  %v1305_v6 = vadd.f32 %v3469_v18, %v1304_v2  ;;  %v3617_v9 = vpop.f32.mrf.mxu0  ;;  %v3619_v10 = vpop.f32.mrf.mxu1 }
  0xf3   : > { %v1066_v20 = vmax.f32 %v993_v3, 0.0  ;;  %v1378_v21 = vmax.f32 %v1305_v6, 0.0 }
  0xf4   : > { %2790 = vmatmul.msk.f32.gmra.mxu0 %vm214_vm0, %v207_v11  ;;  %2854 = vmatmul.msk.f32.gmra.mxu1 %vm214_vm0, %v2822_v16 }
  0xf5   : > { %v1097_v22 = vadd.f32 %v1096_v63, %v1066_v20  ;;  %v1409_v23 = vadd.f32 %v1408_v0, %v1378_v21  ;;  %2918 = vmatmul.msk.f32.gmra.mxu2 %vm214_vm0, %v2886_v17  ;;  %2982 = vmatmul.msk.f32.gmra.mxu3 %vm214_vm0, %v2950_v19  ;;  %v2952_v63 = vld [vmem:[%s3314_s26 + $0x3f0] sm:$0xff]  ;;  %v210_v21 = vld [vmem:[%s3314_s26 + $0xf8] sm:$0xff] }
  0xf8   : > { %v995_v28 = vpop.f32.mrf.mxu2  ;;  %v1307_v29 = vpop.f32.mrf.mxu3 }
  0xf9   : > { %v996_v30 = vadd.f32 %v3469_v18, %v995_v28  ;;  %v1308_v31 = vadd.f32 %v3469_v18, %v1307_v29  ;;  %v3631_v32 = vpop.f32.mrf.mxu0  ;;  %v3633_v35 = vpop.f32.mrf.mxu1  ;;  %v2953_v28 = vld [vmem:[%s3314_s26 + $0x3f8] sm:$0xff] }
  0xfb   : > { %v1067_v44 = vmax.f32 %v996_v30, 0.0  ;;  %v1379_v45 = vmax.f32 %v1308_v31, 0.0 }
  0xfc   : > { %2791 = vmatmul.msk.f32.gmra.mxu0 %vm214_vm0, %v208_v36  ;;  %2855 = vmatmul.msk.f32.gmra.mxu1 %vm214_vm0, %v2823_v37 }
  0xfd   : > { %v1098_v46 = vadd.f32 %v1097_v22, %v1067_v44  ;;  %v1410_v47 = vadd.f32 %v1409_v23, %v1379_v45  ;;  %2919 = vmatmul.msk.f32.gmra.mxu2 %vm214_vm0, %v2887_v38  ;;  %2983 = vmatmul.msk.f32.gmra.mxu3 %vm214_vm0, %v2951_v39  ;;  %v2825_v22 = vld [vmem:[%s3314_s26 + $0x1f8] sm:$0xff] }
  0xfe   : > { %v2889_v23 = vld [vmem:[%s3314_s26 + $0x2f8] sm:$0xff] }
 0x100   : > { %v998_v48 = vpop.f32.mrf.mxu2  ;;  %v1310_v49 = vpop.f32.mrf.mxu3 }
 0x101   : > { %v999_v50 = vadd.f32 %v3469_v18, %v998_v48  ;;  %v1311_v53 = vadd.f32 %v3469_v18, %v1310_v49  ;;  %v3645_v54 = vpop.f32.mrf.mxu0  ;;  %v3647_v57 = vpop.f32.mrf.mxu1  ;;  %v3050_v48 = vld [vmem:[%s3314_s26 + $0x500] sm:$0xff] }
 0x102   : > { %v3114_v49 = vld [vmem:[%s3314_s26 + $0x600] sm:$0xff] }
 0x103   : > { %v1068_v0 = vmax.f32 %v999_v50, 0.0  ;;  %v1380_v1 = vmax.f32 %v1311_v53, 0.0  ;;  %v3178_v50 = vld [vmem:[%s3314_s26 + $0x700] sm:$0xff] }
 0x104   : > { %2792 = vmatmul.msk.f32.gmra.mxu0 %vm214_vm0, %v209_v60  ;;  %2856 = vmatmul.msk.f32.gmra.mxu1 %vm214_vm0, %v2824_v61 }
 0x105   : > { %v1099_v2 = vadd.f32 %v1098_v46, %v1068_v0  ;;  %v1411_v3 = vadd.f32 %v1410_v47, %v1380_v1  ;;  %2920 = vmatmul.msk.f32.gmra.mxu2 %vm214_vm0, %v2888_v62  ;;  %2984 = vmatmul.msk.f32.gmra.mxu3 %vm214_vm0, %v2952_v63  ;;  %v2986_v47 = vld [vmem:[%s3314_s26 + $0x400] sm:$0xff] }
 0x108   : > { %v1001_v6 = vpop.f32.mrf.mxu2  ;;  %v1313_v11 = vpop.f32.mrf.mxu3 }
 0x109   : > { %v1002_v16 = vadd.f32 %v3469_v18, %v1001_v6  ;;  %v1314_v17 = vadd.f32 %v3469_v18, %v1313_v11  ;;  %v3659_v19 = vpop.f32.mrf.mxu0  ;;  %v3661_v20 = vpop.f32.mrf.mxu1  ;;  %v2987_v11 = vld [vmem:[%s3314_s26 + $0x408] sm:$0xff] }
 0x10b   : > { %v1069_v29 = vmax.f32 %v1002_v16, 0.0  ;;  %v1381_v30 = vmax.f32 %v1314_v17, 0.0  ;;  %v3051_v16 = vld [vmem:[%s3314_s26 + $0x508] sm:$0xff] }
 0x10c   : > { %2793 = vmatmul.msk.f32.gmra.mxu0 %vm214_vm0, %v210_v21  ;;  %2857 = vmatmul.msk.f32.gmra.mxu1 %vm214_vm0, %v2825_v22  ;;  %v3115_v17 = vld [vmem:[%s3314_s26 + $0x608] sm:$0xff] }
 0x10d   : > { %v1100_v31 = vadd.f32 %v1099_v2, %v1069_v29  ;;  %v1412_v36 = vadd.f32 %v1411_v3, %v1381_v30  ;;  %2921 = vmatmul.msk.f32.gmra.mxu2 %vm214_vm0, %v2889_v23  ;;  %2985 = vmatmul.msk.f32.gmra.mxu3 %vm214_vm0, %v2953_v28  ;;  %v3179_v21 = vld [vmem:[%s3314_s26 + $0x708] sm:$0xff] }
 0x110   : > { %v1004_v37 = vpop.f32.mrf.mxu2  ;;  %v1316_v38 = vpop.f32.mrf.mxu3 }
 0x111   : > { %v1005_v39 = vadd.f32 %v3469_v18, %v1004_v37  ;;  %v1317_v44 = vadd.f32 %v3469_v18, %v1316_v38  ;;  %v3673_v45 = vpop.f32.mrf.mxu0  ;;  %v3675_v46 = vpop.f32.mrf.mxu1 }
 0x113   : > { %v1070_v53 = vmax.f32 %v1005_v39, 0.0  ;;  %v1382_v60 = vmax.f32 %v1317_v44, 0.0  ;;  %v2988_v44 = vld [vmem:[%s3314_s26 + $0x410] sm:$0xff] }
 0x114   : > { %3018 = vmatmul.msk.f32.vlgmr.msrb.gmra.mxu0 %vm214_vm0, %v2986_v47  ;;  %3082 = vmatmul.msk.f32.vlgmr.msrb.gmra.mxu1 %vm214_vm0, %v3050_v48  ;;  %v3052_v47 = vld [vmem:[%s3314_s26 + $0x510] sm:$0xff] }
 0x115   : > { %v1101_v61 = vadd.f32 %v1100_v31, %v1070_v53  ;;  %v1413_v62 = vadd.f32 %v1412_v36, %v1382_v60  ;;  %3146 = vmatmul.msk.f32.vlgmr.msrb.gmra.mxu2 %vm214_vm0, %v3114_v49  ;;  %3210 = vmatmul.msk.f32.vlgmr.msrb.gmra.mxu3 %vm214_vm0, %v3178_v50  ;;  %v3116_v48 = vld [vmem:[%s3314_s26 + $0x610] sm:$0xff] }
 0x116   : > { %v3180_v49 = vld [vmem:[%s3314_s26 + $0x710] sm:$0xff] }
 0x118   : > { %v1007_v63 = vpop.f32.mrf.mxu2  ;;  %v1319_v0 = vpop.f32.mrf.mxu3 }
 0x119   : > { %v1008_v1 = vadd.f32 %v3469_v18, %v1007_v63  ;;  %v1320_v2 = vadd.f32 %v3469_v18, %v1319_v0  ;;  %v3687_v3 = vpop.f32.mrf.mxu0  ;;  %v3689_v6 = vpop.f32.mrf.mxu1 }
 0x11b   : > { %v1071_v22 = vmax.f32 %v1008_v1, 0.0  ;;  %v1383_v23 = vmax.f32 %v1320_v2, 0.0 }
 0x11c   : > { %3019 = vmatmul.msk.f32.gmra.mxu0 %vm214_vm0, %v2987_v11  ;;  %3083 = vmatmul.msk.f32.gmra.mxu1 %vm214_vm0, %v3051_v16  ;;  %v2989_v16 = vld [vmem:[%s3314_s26 + $0x418] sm:$0xff] }
 0x11d   : > { %v1102_v28 = vadd.f32 %v1101_v61, %v1071_v22  ;;  %v1414_v29 = vadd.f32 %v1413_v62, %v1383_v23  ;;  %3147 = vmatmul.msk.f32.gmra.mxu2 %vm214_vm0, %v3115_v17  ;;  %3211 = vmatmul.msk.f32.gmra.mxu3 %vm214_vm0, %v3179_v21  ;;  %v3053_v17 = vld [vmem:[%s3314_s26 + $0x518] sm:$0xff] }
 0x11e   : > { %v3117_v21 = vld [vmem:[%s3314_s26 + $0x618] sm:$0xff] }
 0x11f   : > { %v3181_v22 = vld [vmem:[%s3314_s26 + $0x718] sm:$0xff] }
 0x120   : > { %v1010_v30 = vpop.f32.mrf.mxu2  ;;  %v1322_v31 = vpop.f32.mrf.mxu3 }
 0x121   : > { %v1011_v36 = vadd.f32 %v3469_v18, %v1010_v30  ;;  %v1323_v37 = vadd.f32 %v3469_v18, %v1322_v31  ;;  %v3701_v38 = vpop.f32.mrf.mxu0  ;;  %v3703_v39 = vpop.f32.mrf.mxu1 }
 0x123   : > { %v1072_v50 = vmax.f32 %v1011_v36, 0.0  ;;  %v1384_v53 = vmax.f32 %v1323_v37, 0.0 }
 0x124   : > { %3020 = vmatmul.msk.f32.gmra.mxu0 %vm214_vm0, %v2988_v44  ;;  %3084 = vmatmul.msk.f32.gmra.mxu1 %vm214_vm0, %v3052_v47 }
 0x125   : > { %v1103_v60 = vadd.f32 %v1102_v28, %v1072_v50  ;;  %v1415_v61 = vadd.f32 %v1414_v29, %v1384_v53  ;;  %3148 = vmatmul.msk.f32.gmra.mxu2 %vm214_vm0, %v3116_v48  ;;  %3212 = vmatmul.msk.f32.gmra.mxu3 %vm214_vm0, %v3180_v49  ;;  %v2990_v49 = vld [vmem:[%s3314_s26 + $0x420] sm:$0xff] }
 0x126   : > { %v3054_v50 = vld [vmem:[%s3314_s26 + $0x520] sm:$0xff] }
 0x127   : > { %v3118_v53 = vld [vmem:[%s3314_s26 + $0x620] sm:$0xff] }
 0x128   : > { %v1013_v62 = vpop.f32.mrf.mxu2  ;;  %v1325_v63 = vpop.f32.mrf.mxu3 }
 0x129   : > { %v1014_v0 = vadd.f32 %v3469_v18, %v1013_v62  ;;  %v1326_v1 = vadd.f32 %v3469_v18, %v1325_v63  ;;  %v3715_v2 = vpop.f32.mrf.mxu0  ;;  %v3717_v11 = vpop.f32.mrf.mxu1 }
 0x12b   : > { %v1073_v23 = vmax.f32 %v1014_v0, 0.0  ;;  %v1385_v28 = vmax.f32 %v1326_v1, 0.0 }
 0x12c   : > { %3021 = vmatmul.msk.f32.gmra.mxu0 %vm214_vm0, %v2989_v16  ;;  %3085 = vmatmul.msk.f32.gmra.mxu1 %vm214_vm0, %v3053_v17 }
 0x12d   : > { %v1104_v29 = vadd.f32 %v1103_v60, %v1073_v23  ;;  %v1416_v30 = vadd.f32 %v1415_v61, %v1385_v28  ;;  %3149 = vmatmul.msk.f32.gmra.mxu2 %vm214_vm0, %v3117_v21  ;;  %3213 = vmatmul.msk.f32.gmra.mxu3 %vm214_vm0, %v3181_v22  ;;  %v3182_v60 = vld [vmem:[%s3314_s26 + $0x720] sm:$0xff]  ;;  %v2991_v28 = vld [vmem:[%s3314_s26 + $0x428] sm:$0xff] }
 0x130   : > { %v1016_v31 = vpop.f32.mrf.mxu2  ;;  %v1328_v36 = vpop.f32.mrf.mxu3 }
 0x131   : > { %v1017_v37 = vadd.f32 %v3469_v18, %v1016_v31  ;;  %v1329_v44 = vadd.f32 %v3469_v18, %v1328_v36  ;;  %v3729_v47 = vpop.f32.mrf.mxu0  ;;  %v3731_v48 = vpop.f32.mrf.mxu1  ;;  %v3055_v31 = vld [vmem:[%s3314_s26 + $0x528] sm:$0xff] }
 0x132   : > { %v3119_v36 = vld [vmem:[%s3314_s26 + $0x628] sm:$0xff] }
 0x133   : > { %v1074_v61 = vmax.f32 %v1017_v37, 0.0  ;;  %v1386_v62 = vmax.f32 %v1329_v44, 0.0 }
 0x134   : > { %3022 = vmatmul.msk.f32.gmra.mxu0 %vm214_vm0, %v2990_v49  ;;  %3086 = vmatmul.msk.f32.gmra.mxu1 %vm214_vm0, %v3054_v50 }
 0x135   : > { %v1105_v63 = vadd.f32 %v1104_v29, %v1074_v61  ;;  %v1417_v0 = vadd.f32 %v1416_v30, %v1386_v62  ;;  %3150 = vmatmul.msk.f32.gmra.mxu2 %vm214_vm0, %v3118_v53  ;;  %3214 = vmatmul.msk.f32.gmra.mxu3 %vm214_vm0, %v3182_v60  ;;  %v3183_v29 = vld [vmem:[%s3314_s26 + $0x728] sm:$0xff] }
 0x138   : > { %v1019_v1 = vpop.f32.mrf.mxu2  ;;  %v1331_v16 = vpop.f32.mrf.mxu3 }
 0x139   : > { %v1020_v17 = vadd.f32 %v3469_v18, %v1019_v1  ;;  %v1332_v21 = vadd.f32 %v3469_v18, %v1331_v16  ;;  %v3743_v22 = vpop.f32.mrf.mxu0  ;;  %v3745_v23 = vpop.f32.mrf.mxu1  ;;  %v2992_v16 = vld [vmem:[%s3314_s26 + $0x430] sm:$0xff] }
 0x13a   : > { %4373 = vst [vmem:[#allocation2_spill] sm:$0xff] %v3745_v23 }
 0x13b   : > { %v1075_v30 = vmax.f32 %v1020_v17, 0.0  ;;  %v1387_v37 = vmax.f32 %v1332_v21, 0.0  ;;  %v3056_v17 = vld [vmem:[%s3314_s26 + $0x530] sm:$0xff] }
 0x13c   : > { %3023 = vmatmul.msk.f32.gmra.mxu0 %vm214_vm0, %v2991_v28  ;;  %3087 = vmatmul.msk.f32.gmra.mxu1 %vm214_vm0, %v3055_v31  ;;  %v3120_v21 = vld [vmem:[%s3314_s26 + $0x630] sm:$0xff]  ;;  %v329_v31 = vadd.f32 %v3469_v18, %v3444_v4 }
 0x13d   : > { %v1106_v44 = vadd.f32 %v1105_v63, %v1075_v30  ;;  %v1418_v49 = vadd.f32 %v1417_v0, %v1387_v37  ;;  %3151 = vmatmul.msk.f32.gmra.mxu2 %vm214_vm0, %v3119_v36  ;;  %3215 = vmatmul.msk.f32.gmra.mxu3 %vm214_vm0, %v3183_v29  ;;  %v332_v63 = vadd.f32 %v3469_v18, %v3456_v12  ;;  %v3184_v28 = vld [vmem:[%s3314_s26 + $0x730] sm:$0xff] }
 0x13e   : > { %v651_v0 = vadd.f32 %v3469_v18, %v3458_v13  ;;  %v648_v30 = vadd.f32 %v3469_v18, %v3446_v5  ;;  %v335_v37 = vadd.f32 %v3469_v18, %v3477_v25  ;;  %v338_v5 = vadd.f32 %v3469_v18, %v3491_v41 }
 0x13f   : > { %v425_v4 = vmax.f32 %v332_v63, 0.0  ;;  %v424_v25 = vmax.f32 %v329_v31, 0.0  ;;  %v660_v63 = vadd.f32 %v3469_v18, %v3507_v56  ;;  %v3057_v31 = vld [vmem:[%s3314_s26 + $0x538] sm:$0xff]  ;;  %v663_v56 = vadd.f32 %v3469_v18, %v3521_v8 }
 0x140   : > { %v1022_v50 = vpop.f32.mrf.mxu2  ;;  %v1334_v53 = vpop.f32.mrf.mxu3 }
 0x141   : > { %v1023_v60 = vadd.f32 %v3469_v18, %v1022_v50  ;;  %v1335_v61 = vadd.f32 %v3469_v18, %v1334_v53  ;;  %v3757_v62 = vpop.f32.mrf.mxu0  ;;  %v3759_v1 = vpop.f32.mrf.mxu1  ;;  %v654_v50 = vadd.f32 %v3469_v18, %v3479_v26  ;;  %v744_v53 = vmax.f32 %v651_v0, 0.0 }
 0x142   : > { %4374 = vst [vmem:[#allocation3_spill] sm:$0xff] %v3757_v62  ;;  %v657_v26 = vadd.f32 %v3469_v18, %v3493_v42 }
 0x143   : > { %4375 = vst [vmem:[#allocation4_spill] sm:$0xff] %v3759_v1  ;;  %v1076_v36 = vmax.f32 %v1023_v60, 0.0  ;;  %v1388_v29 = vmax.f32 %v1335_v61, 0.0  ;;  %v743_v60 = vmax.f32 %v648_v30, 0.0  ;;  %v426_v61 = vmax.f32 %v335_v37, 0.0  ;;  %v3121_v37 = vld [vmem:[%s3314_s26 + $0x638] sm:$0xff] }
 0x144   : > { %3024 = vmatmul.msk.f32.gmra.mxu0 %vm214_vm0, %v2992_v16  ;;  %3088 = vmatmul.msk.f32.gmra.mxu1 %vm214_vm0, %v3056_v17  ;;  %v427_v30 = vmax.f32 %v338_v5, 0.0  ;;  %v746_v1 = vmax.f32 %v657_v26, 0.0 }
 0x145   : > { %v1107_v12 = vadd.f32 %v1106_v44, %v1076_v36  ;;  %v1419_v13 = vadd.f32 %v1418_v49, %v1388_v29  ;;  %3152 = vmatmul.msk.f32.gmra.mxu2 %vm214_vm0, %v3120_v21  ;;  %3216 = vmatmul.msk.f32.gmra.mxu3 %vm214_vm0, %v3184_v28  ;;  %v745_v44 = vmax.f32 %v654_v50, 0.0  ;;  %v341_v49 = vadd.f32 %v3469_v18, %v3505_v55  ;;  %v2993_v28 = vld [vmem:[%s3314_s26 + $0x438] sm:$0xff] }
 0x146   : > { %v456_v36 = vadd.f32 %v425_v4, %v424_v25  ;;  %v775_v29 = vadd.f32 %v744_v53, %v743_v60  ;;  %v344_v55 = vadd.f32 %v3469_v18, %v3519_v7  ;;  %v3185_v50 = vld [vmem:[%s3314_s26 + $0x738] sm:$0xff]  ;;  %v747_v4 = vmax.f32 %v660_v63, 0.0 }
 0x147   : > { %v428_v23 = vmax.f32 %v341_v49, 0.0  ;;  %v666_v7 = vadd.f32 %v3469_v18, %v3535_v27  ;;  %v748_v60 = vmax.f32 %v663_v56, 0.0 }
 0x148   : > { %v1025_v16 = vpop.f32.mrf.mxu2  ;;  %v1337_v17 = vpop.f32.mrf.mxu3  ;;  %v457_v62 = vadd.f32 %v456_v36, %v426_v61  ;;  %v429_v25 = vmax.f32 %v344_v55, 0.0  ;;  %v669_v61 = vadd.f32 %v3469_v18, %v3549_v43  ;;  %v2994_v43 = vld [vmem:[%s3314_s26 + $0x440] sm:$0xff] }
 0x149   : > { %v1026_v0 = vadd.f32 %v3469_v18, %v1025_v16  ;;  %v1338_v41 = vadd.f32 %v3469_v18, %v1337_v17  ;;  %v3791_v21 = vpop.f32.mrf.mxu0  ;;  %v3793_v42 = vpop.f32.mrf.mxu1  ;;  %v749_v63 = vmax.f32 %v666_v7, 0.0  ;;  %v3186_v36 = vld [vmem:[%s3314_s26 + $0x740] sm:$0xff] }
 0x14a   : > { %4376 = vst [vmem:[#allocation5_spill] sm:$0xff] %v3791_v21  ;;  %v776_v21 = vadd.f32 %v775_v29, %v745_v44  ;;  %v458_v8 = vadd.f32 %v457_v62, %v427_v30  ;;  %v750_v30 = vmax.f32 %v669_v61, 0.0 }
 0x14b   : > { %4377 = vst [vmem:[#allocation6_spill] sm:$0xff] %v3793_v42  ;;  %v1077_v16 = vmax.f32 %v1026_v0, 0.0  ;;  %v1389_v17 = vmax.f32 %v1338_v41, 0.0  ;;  %v347_v42 = vadd.f32 %v3469_v18, %v3533_v24  ;;  %v350_v24 = vadd.f32 %v3469_v18, %v3547_v40 }
 0x14c   : > { %3025 = vmatmul.msk.f32.gmra.mxu0 %vm214_vm0, %v2993_v28  ;;  %3089 = vmatmul.msk.f32.gmra.mxu1 %vm214_vm0, %v3057_v31  ;;  %v777_v26 = vadd.f32 %v776_v21, %v746_v1  ;;  %v459_v44 = vadd.f32 %v458_v8, %v428_v23  ;;  %v3058_v23 = vld [vmem:[%s3314_s26 + $0x540] sm:$0xff]  ;;  %v356_v28 = vadd.f32 %v3469_v18, %v3575_v14 }
 0x14d   : > { %v1108_v53 = vadd.f32 %v1107_v12, %v1077_v16  ;;  %v1420_v5 = vadd.f32 %v1419_v13, %v1389_v17  ;;  %3153 = vmatmul.msk.f32.gmra.mxu2 %vm214_vm0, %v3121_v37  ;;  %3217 = vmatmul.msk.f32.gmra.mxu3 %vm214_vm0, %v3185_v50  ;;  %v430_v27 = vmax.f32 %v347_v42, 0.0  ;;  %v353_v12 = vadd.f32 %v3469_v18, %v3561_v58  ;;  %v3122_v31 = vld [vmem:[%s3314_s26 + $0x640] sm:$0xff] }
 0x14e   : > { %v778_v49 = vadd.f32 %v777_v26, %v747_v4  ;;  %v460_v21 = vadd.f32 %v459_v44, %v429_v25  ;;  %v431_v42 = vmax.f32 %v350_v24, 0.0  ;;  %v672_v58 = vadd.f32 %v3469_v18, %v3563_v59 }
 0x14f   : > { %v432_v56 = vmax.f32 %v353_v12, 0.0  ;;  %v675_v16 = vadd.f32 %v3469_v18, %v3577_v15  ;;  %v359_v17 = vadd.f32 %v3469_v18, %v3589_v33  ;;  %v433_v25 = vmax.f32 %v356_v28, 0.0 }
 0x150   : > { %v1028_v13 = vpop.f32.mrf.mxu2  ;;  %v1340_v62 = vpop.f32.mrf.mxu3  ;;  %v779_v29 = vadd.f32 %v778_v49, %v748_v60  ;;  %v461_v50 = vadd.f32 %v460_v21, %v430_v27  ;;  %v751_v8 = vmax.f32 %v672_v58, 0.0  ;;  %v678_v15 = vadd.f32 %v3469_v18, %v3591_v34  ;;  %v3059_v49 = vld [vmem:[%s3314_s26 + $0x548] sm:$0xff] }
 0x151   : > { %v1029_v0 = vadd.f32 %v3469_v18, %v1028_v13  ;;  %v1341_v40 = vadd.f32 %v3469_v18, %v1340_v62  ;;  %v3819_v1 = vpop.f32.mrf.mxu0  ;;  %v3821_v41 = vpop.f32.mrf.mxu1  ;;  %v362_v24 = vadd.f32 %v3469_v18, %v3603_v51  ;;  %v752_v60 = vmax.f32 %v675_v16, 0.0  ;;  %v2995_v62 = vld [vmem:[%s3314_s26 + $0x448] sm:$0xff]  ;;  %v3872_v16 = vld [vmem:[%s4371_s2] ss:$0 sm:$0xff] }
 0x152   : > { %v780_v59 = vadd.f32 %v779_v29, %v749_v63  ;;  %v462_v7 = vadd.f32 %v461_v50, %v431_v42  ;;  %v365_v27 = vadd.f32 %v3469_v18, %v3617_v9  ;;  %v368_v9 = vadd.f32 %v3469_v18, %v3631_v32 }
 0x153   : > { %v1078_v55 = vmax.f32 %v1029_v0, 0.0  ;;  %v1390_v37 = vmax.f32 %v1341_v40, 0.0  ;;  %v753_v40 = vmax.f32 %v678_v15, 0.0  ;;  %v435_v21 = vmax.f32 %v362_v24, 0.0 }
 0x154   : > { %3026 = vmatmul.msk.f32.gmra.mxu0 %vm214_vm0, %v2994_v43  ;;  %3090 = vmatmul.msk.f32.gmra.mxu1 %vm214_vm0, %v3058_v23  ;;  %v781_v33 = vadd.f32 %v780_v59, %v750_v30  ;;  %v463_v26 = vadd.f32 %v462_v7, %v432_v56  ;;  %v3123_v43 = vld [vmem:[%s3314_s26 + $0x648] sm:$0xff]  ;;  %v687_v29 = vadd.f32 %v3469_v18, %v3633_v35  ;;  %v436_v30 = vmax.f32 %v365_v27, 0.0 }
 0x155   : > { %v1109_v14 = vadd.f32 %v1108_v53, %v1078_v55  ;;  %v1421_v4 = vadd.f32 %v1420_v5, %v1390_v37  ;;  %3154 = vmatmul.msk.f32.gmra.mxu2 %vm214_vm0, %v3122_v31  ;;  %3218 = vmatmul.msk.f32.gmra.mxu3 %vm214_vm0, %v3186_v36  ;;  %v434_v53 = vmax.f32 %v359_v17, 0.0  ;;  %v681_v5 = vadd.f32 %v3469_v18, %v3605_v52  ;;  %v3187_v23 = vld [vmem:[%s3314_s26 + $0x748] sm:$0xff] }
 0x156   : > { %v782_v63 = vadd.f32 %v781_v33, %v751_v8  ;;  %v464_v0 = vadd.f32 %v463_v26, %v433_v25  ;;  %v684_v52 = vadd.f32 %v3469_v18, %v3619_v10  ;;  %v371_v10 = vadd.f32 %v3469_v18, %v3645_v54  ;;  %v3060_v26 = vld [vmem:[%s3314_s26 + $0x550] sm:$0xff] }
 0x157   : > { %v754_v36 = vmax.f32 %v681_v5, 0.0  ;;  %v437_v35 = vmax.f32 %v368_v9, 0.0  ;;  %v756_v17 = vmax.f32 %v687_v29, 0.0  ;;  %v374_v59 = vadd.f32 %v3872_v16, %v3659_v19  ;;  %v3124_v5 = vld [vmem:[%s3314_s26 + $0x650] sm:$0xff] }
 0x158   : > { %v1031_v61 = vpop.f32.mrf.mxu2  ;;  %v1343_v44 = vpop.f32.mrf.mxu3  ;;  %v783_v28 = vadd.f32 %v782_v63, %v752_v60  ;;  %v465_v31 = vadd.f32 %v464_v0, %v434_v53  ;;  %v755_v50 = vmax.f32 %v684_v52, 0.0  ;;  %v438_v8 = vmax.f32 %v371_v10, 0.0  ;;  %v2997_v10 = vld [vmem:[%s3314_s26 + $0x458] sm:$0xff] }
 0x159   : > { %v1032_v12 = vadd.f32 %v3469_v18, %v1031_v61  ;;  %v1344_v34 = vadd.f32 %v3469_v18, %v1343_v44  ;;  %v3849_v13 = vpop.f32.mrf.mxu0  ;;  %v3851_v51 = vpop.f32.mrf.mxu1  ;;  %v690_v18 = vadd.f32 %v3872_v16, %v3647_v57  ;;  %v2996_v57 = vld [vmem:[%s3314_s26 + $0x450] sm:$0xff]  ;;  %v693_v53 = vadd.f32 %v3872_v16, %v3661_v20 }
 0x15a   : > { %v784_v32 = vadd.f32 %v783_v28, %v753_v40  ;;  %v466_v56 = vadd.f32 %v465_v31, %v435_v21  ;;  %v377_v19 = vadd.f32 %v3872_v16, %v3673_v45  ;;  %v3188_v61 = vld [vmem:[%s3314_s26 + $0x750] sm:$0xff]  ;;  %v696_v63 = vadd.f32 %v3872_v16, %v3675_v46 }
 0x15b   : > { %v1079_v42 = vmax.f32 %v1032_v12, 0.0  ;;  %v1391_v58 = vmax.f32 %v1344_v34, 0.0  ;;  %v757_v27 = vmax.f32 %v690_v18, 0.0  ;;  %v380_v0 = vadd.f32 %v3872_v16, %v3687_v3 }
 0x15c   : > { %3027 = vmatmul.msk.f32.gmra.mxu0 %vm214_vm0, %v2995_v62  ;;  %3091 = vmatmul.msk.f32.gmra.mxu1 %vm214_vm0, %v3059_v49  ;;  %v785_v54 = vadd.f32 %v784_v32, %v754_v36  ;;  %v467_v7 = vadd.f32 %v466_v56, %v436_v30  ;;  %v439_v49 = vmax.f32 %v374_v59, 0.0  ;;  %v758_v52 = vmax.f32 %v693_v53, 0.0 }
 0x15d   : > { %v1110_v55 = vadd.f32 %v1109_v14, %v1079_v42  ;;  %v1422_v37 = vadd.f32 %v1421_v4, %v1391_v58  ;;  %3155 = vmatmul.msk.f32.gmra.mxu2 %vm214_vm0, %v3123_v43  ;;  %3219 = vmatmul.msk.f32.gmra.mxu3 %vm214_vm0, %v3187_v23  ;;  %v440_v43 = vmax.f32 %v377_v19, 0.0  ;;  %v699_v46 = vadd.f32 %v3872_v16, %v3689_v6  ;;  %v4378_v19 = vld [vmem:[#allocation2_spill] sm:$0xff] }
 0x15e   : > { %v786_v60 = vadd.f32 %v785_v54, %v755_v50  ;;  %v468_v44 = vadd.f32 %v467_v7, %v437_v35  ;;  %v383_v3 = vadd.f32 %v3872_v16, %v3701_v38  ;;  %v759_v9 = vmax.f32 %v696_v63, 0.0  ;;  %v3189_v35 = vld [vmem:[%s3314_s26 + $0x758] sm:$0xff] }
 0x15f   : > { %v441_v42 = vmax.f32 %v380_v0, 0.0  ;;  %v702_v58 = vadd.f32 %v3872_v16, %v3703_v39  ;;  %v386_v36 = vadd.f32 %v3872_v16, %v3715_v2  ;;  %v760_v50 = vmax.f32 %v699_v46, 0.0  ;;  %v3125_v39 = vld [vmem:[%s3314_s26 + $0x658] sm:$0xff]  ;;  %v2998_v0 = vld [vmem:[%s3314_s26 + $0x460] sm:$0xff] }
 0x160   : > { %v1034_v14 = vpop.f32.mrf.mxu2  ;;  %v1346_v4 = vpop.f32.mrf.mxu3  ;;  %v787_v62 = vadd.f32 %v786_v60, %v756_v17  ;;  %v469_v20 = vadd.f32 %v468_v44, %v438_v8  ;;  %v442_v56 = vmax.f32 %v383_v3, 0.0  ;;  %v705_v18 = vadd.f32 %v3872_v16, %v3717_v11  ;;  %v3126_v3 = vld [vmem:[%s3314_s26 + $0x660] sm:$0xff] }
 0x161   : > { %v1035_v25 = vadd.f32 %v3872_v16, %v1034_v14  ;;  %v1347_v15 = vadd.f32 %v3872_v16, %v1346_v4  ;;  %v3880_v33 = vpop.f32.mrf.mxu0  ;;  %v3882_v24 = vpop.f32.mrf.mxu1  ;;  %v389_v2 = vadd.f32 %v3872_v16, %v3729_v47  ;;  %v761_v4 = vmax.f32 %v702_v58, 0.0 }
 0x162   : > { %v788_v23 = vadd.f32 %v787_v62, %v757_v27  ;;  %v470_v21 = vadd.f32 %v469_v20, %v439_v49  ;;  %v443_v7 = vmax.f32 %v386_v36, 0.0  ;;  %v708_v8 = vadd.f32 %v3872_v16, %v3731_v48  ;;  %v3062_v20 = vld [vmem:[%s3314_s26 + $0x560] sm:$0xff] }
 0x163   : > { %v1080_v12 = vmax.f32 %v1035_v25, 0.0  ;;  %v1392_v34 = vmax.f32 %v1347_v15, 0.0  ;;  %v392_v47 = vadd.f32 %v3872_v16, %v3743_v22  ;;  %v444_v60 = vmax.f32 %v389_v2, 0.0  ;;  %v4382_v36 = vld [vmem:[#allocation6_spill] sm:$0xff] }
 0x164   : > { %3028 = vmatmul.msk.f32.gmra.mxu0 %vm214_vm0, %v2996_v57  ;;  %3092 = vmatmul.msk.f32.gmra.mxu1 %vm214_vm0, %v3060_v26  ;;  %v471_v32 = vadd.f32 %v470_v21, %v440_v43  ;;  %v762_v26 = vmax.f32 %v705_v18, 0.0  ;;  %v711_v48 = vadd.f32 %v3872_v16, %v4378_v19  ;;  %v4381_v43 = vld [vmem:[#allocation5_spill] sm:$0xff] }
 0x165   : > { %v1111_v45 = vadd.f32 %v1110_v55, %v1080_v12  ;;  %v1423_v40 = vadd.f32 %v1422_v37, %v1392_v34  ;;  %3156 = vmatmul.msk.f32.gmra.mxu2 %vm214_vm0, %v3124_v5  ;;  %3220 = vmatmul.msk.f32.gmra.mxu3 %vm214_vm0, %v3188_v61  ;;  %v3061_v55 = vld [vmem:[%s3314_s26 + $0x558] sm:$0xff]  ;;  %v789_v37 = vadd.f32 %v788_v23, %v758_v52  ;;  %v4379_v5 = vld [vmem:[#allocation3_spill] sm:$0xff]  ;;  %v763_v34 = vmax.f32 %v708_v8, 0.0  ;;  %v3190_v23 = vld [vmem:[%s3314_s26 + $0x760] sm:$0xff] }
 0x166   : > { %v472_v14 = vadd.f32 %v471_v32, %v441_v42  ;;  %v395_v61 = vadd.f32 %v3872_v16, %v4379_v5  ;;  %v398_v46 = vadd.f32 %v3872_v16, %v4381_v43 }
 0x167   : > { %v790_v59 = vadd.f32 %v789_v37, %v759_v9 }
 0x168   : > { %v1037_v28 = vpop.f32.mrf.mxu2  ;;  %v1349_v31 = vpop.f32.mrf.mxu3  ;;  %v473_v57 = vadd.f32 %v472_v14, %v442_v56  ;;  %v447_v56 = vmax.f32 %v398_v46, 0.0  ;;  %v723_v14 = vadd.f32 %v3872_v16, %v3851_v51  ;;  %v726_v51 = vadd.f32 %v3872_v16, %v3882_v24 }
 0x169   : > { %v1038_v29 = vadd.f32 %v3872_v16, %v1037_v28  ;;  %v1350_v6 = vadd.f32 %v3872_v16, %v1349_v31  ;;  %v3910_v30 = vpop.f32.mrf.mxu0  ;;  %v3912_v38 = vpop.f32.mrf.mxu1  ;;  %v791_v11 = vadd.f32 %v790_v59, %v760_v50  ;;  %v764_v28 = vmax.f32 %v711_v48, 0.0 }
 0x16a   : > { %v474_v12 = vadd.f32 %v473_v57, %v443_v7  ;;  %v446_v31 = vmax.f32 %v395_v61, 0.0  ;;  %v768_v61 = vmax.f32 %v723_v14, 0.0  ;;  %v410_v24 = vadd.f32 %v3872_v16, %v3910_v30 }
 0x16b   : > { %v1081_v54 = vmax.f32 %v1038_v29, 0.0  ;;  %v1393_v17 = vmax.f32 %v1350_v6, 0.0  ;;  %v792_v53 = vadd.f32 %v791_v11, %v761_v4  ;;  %v717_v29 = vadd.f32 %v3872_v16, %v4382_v36 }
 0x16c   : > { %3029 = vmatmul.msk.f32.gmra.mxu0 %vm214_vm0, %v2997_v10  ;;  %3093 = vmatmul.msk.f32.gmra.mxu1 %vm214_vm0, %v3061_v55  ;;  %v475_v9 = vadd.f32 %v474_v12, %v444_v60  ;;  %v401_v6 = vadd.f32 %v3872_v16, %v3819_v1  ;;  %v404_v1 = vadd.f32 %v3872_v16, %v3849_v13  ;;  %v3191_v60 = vld [vmem:[%s3314_s26 + $0x768] sm:$0xff] }
 0x16d   : > { %v1112_v25 = vadd.f32 %v1111_v45, %v1081_v54  ;;  %v1424_v15 = vadd.f32 %v1423_v40, %v1393_v17  ;;  %3157 = vmatmul.msk.f32.gmra.mxu2 %vm214_vm0, %v3125_v39  ;;  %3221 = vmatmul.msk.f32.gmra.mxu3 %vm214_vm0, %v3189_v35  ;;  %v445_v45 = vmax.f32 %v392_v47, 0.0  ;;  %v4380_v40 = vld [vmem:[#allocation4_spill] sm:$0xff]  ;;  %v793_v21 = vadd.f32 %v792_v53, %v762_v26  ;;  %v3127_v26 = vld [vmem:[%s3314_s26 + $0x668] sm:$0xff] }
 0x16e   : > { %v714_v52 = vadd.f32 %v3872_v16, %v4380_v40  ;;  %v720_v39 = vadd.f32 %v3872_v16, %v3821_v41  ;;  %v766_v2 = vmax.f32 %v717_v29, 0.0  ;;  %v448_v54 = vmax.f32 %v401_v6, 0.0 }
 0x16f   : > { %v794_v10 = vadd.f32 %v793_v21, %v763_v34  ;;  %v476_v32 = vadd.f32 %v475_v9, %v445_v45  ;;  %v407_v4 = vadd.f32 %v3872_v16, %v3880_v33  ;;  %v449_v53 = vmax.f32 %v404_v1, 0.0  ;;  %v3000_v21 = vld [vmem:[%s3314_s26 + $0x470] sm:$0xff] }
 0x170   : > { %v1040_v44 = vpop.f32.mrf.mxu2  ;;  %v1352_v27 = vpop.f32.mrf.mxu3  ;;  %v765_v50 = vmax.f32 %v714_v52, 0.0  ;;  %v767_v57 = vmax.f32 %v720_v39, 0.0  ;;  %v729_v34 = vadd.f32 %v3872_v16, %v3912_v38  ;;  %v3064_v9 = vld [vmem:[%s3314_s26 + $0x570] sm:$0xff] }
 0x171   : > { %v1041_v62 = vadd.f32 %v3872_v16, %v1040_v44  ;;  %v1353_v22 = vadd.f32 %v3872_v16, %v1352_v27  ;;  %v3936_v49 = vpop.f32.mrf.mxu0  ;;  %v3938_v63 = vpop.f32.mrf.mxu1  ;;  %v795_v35 = vadd.f32 %v794_v10, %v764_v28  ;;  %v477_v18 = vadd.f32 %v476_v32, %v446_v31  ;;  %v3192_v31 = vld [vmem:[%s3314_s26 + $0x770] sm:$0xff] }
 0x172   : > { %v450_v44 = vmax.f32 %v407_v4, 0.0  ;;  %v732_v45 = vadd.f32 %v3872_v16, %v3938_v63  ;;  %v3128_v63 = vld [vmem:[%s3314_s26 + $0x670] sm:$0xff]  ;;  %v3267_v10 = vmov 256.0  }
 0x173   : > { %v1082_v42 = vmax.f32 %v1041_v62, 0.0  ;;  %v1394_v58 = vmax.f32 %v1353_v22, 0.0  ;;  %v796_v11 = vadd.f32 %v795_v35, %v765_v50  ;;  %v478_v47 = vadd.f32 %v477_v18, %v447_v56 }
 0x174   : > { %3030 = vmatmul.msk.f32.gmra.mxu0 %vm214_vm0, %v2998_v0  ;;  %3094 = vmatmul.msk.f32.gmra.mxu1 %vm214_vm0, %v3062_v20  ;;  %v769_v0 = vmax.f32 %v726_v51, 0.0  ;;  %v413_v20 = vadd.f32 %v3872_v16, %v3936_v49  ;;  %3255 = vrcp.f32 %v3267_v10  ;;  %v3129_v51 = vld [vmem:[%s3314_s26 + $0x678] sm:$0xff] }
 0x175   : > { %v1113_v55 = vadd.f32 %v1112_v25, %v1082_v42  ;;  %v1425_v37 = vadd.f32 %v1424_v15, %v1394_v58  ;;  %3158 = vmatmul.msk.f32.gmra.mxu2 %vm214_vm0, %v3126_v3  ;;  %3222 = vmatmul.msk.f32.gmra.mxu3 %vm214_vm0, %v3190_v23  ;;  %v2999_v25 = vld [vmem:[%s3314_s26 + $0x468] sm:$0xff]  ;;  %v797_v33 = vadd.f32 %v796_v11, %v766_v2  ;;  %v451_v42 = vmax.f32 %v410_v24, 0.0  ;;  %v3001_v11 = vld [vmem:[%s3314_s26 + $0x478] sm:$0xff] }
 0x176   : > { %v3063_v15 = vld [vmem:[%s3314_s26 + $0x568] sm:$0xff]  ;;  %v479_v5 = vadd.f32 %v478_v47, %v448_v54  ;;  %v770_v58 = vmax.f32 %v729_v34, 0.0  ;;  %v3065_v47 = vld [vmem:[%s3314_s26 + $0x578] sm:$0xff] }
 0x177   : > { %v798_v62 = vadd.f32 %v797_v33, %v767_v57 }
 0x178   : > { %v1043_v17 = vpop.f32.mrf.mxu2  ;;  %v1355_v59 = vpop.f32.mrf.mxu3  ;;  %v480_v22 = vadd.f32 %v479_v5, %v449_v53 }
 0x179   : > { %v1044_v7 = vadd.f32 %v3872_v16, %v1043_v17  ;;  %v1356_v41 = vadd.f32 %v3872_v16, %v1355_v59  ;;  %v415_v8 = vpop.f32.mrf.mxu0  ;;  %v734_v13 = vpop.f32.mrf.mxu1  ;;  %v799_v43 = vadd.f32 %v798_v62, %v768_v61 }
 0x17a   : > { %v481_v46 = vadd.f32 %v480_v22, %v450_v44  ;;  %v416_v49 = vadd.f32 %v3872_v16, %v415_v8  ;;  %v735_v28 = vadd.f32 %v3872_v16, %v734_v13 }
 0x17b   : > { %v1083_v19 = vmax.f32 %v1044_v7, 0.0  ;;  %v1395_v48 = vmax.f32 %v1356_v41, 0.0  ;;  %v800_v36 = vadd.f32 %v799_v43, %v769_v0  ;;  %v3998_v41 = vpop.eup %3255 }
 0x17c   : > { %3031 = vmatmul.msk.f32.gmra.mxu0 %vm214_vm0, %v2999_v25  ;;  %3095 = vmatmul.msk.f32.gmra.mxu1 %vm214_vm0, %v3063_v15  ;;  %v482_v1 = vadd.f32 %v481_v46, %v451_v42  ;;  %v453_v18 = vmax.f32 %v416_v49, 0.0  ;;  %v772_v2 = vmax.f32 %v735_v28, 0.0  ;;  %v494_v34 = vmul.f32 256.0, %v3998_v41  ;;  %v3130_v42 = vld [vmem:[%s3314_s26 + $0x680] sm:$0xff] }
 0x17d   : > { %v1114_v27 = vadd.f32 %v1113_v55, %v1083_v19  ;;  %v1426_v12 = vadd.f32 %v1425_v37, %v1395_v48  ;;  %3159 = vmatmul.msk.f32.gmra.mxu2 %vm214_vm0, %v3127_v26  ;;  %3223 = vmatmul.msk.f32.gmra.mxu3 %vm214_vm0, %v3191_v60  ;;  %v452_v55 = vmax.f32 %v413_v20, 0.0  ;;  %v771_v37 = vmax.f32 %v732_v45, 0.0  ;;  %v3193_v19 = vld [vmem:[%s3314_s26 + $0x778] sm:$0xff] }
 0x17e   : > { %v801_v35 = vadd.f32 %v800_v36, %v770_v58  ;;  %v3194_v58 = vld [vmem:[%s3314_s26 + $0x780] sm:$0xff]  ;;  %vm498_vm1 = vweird.f32 %v3998_v41 }
 0x17f   : > { %v483_v54 = vadd.f32 %v482_v1, %v452_v55 }
 0x180   : > { %v1046_v40 = vpop.f32.mrf.mxu2  ;;  %v1358_v52 = vpop.f32.mrf.mxu3  ;;  %v802_v17 = vadd.f32 %v801_v35, %v771_v37 }
 0x181   : > { %v1047_v30 = vadd.f32 %v3872_v16, %v1046_v40  ;;  %v1359_v3 = vadd.f32 %v3872_v16, %v1358_v52  ;;  %v418_v38 = vpop.f32.mrf.mxu0  ;;  %v737_v23 = vpop.f32.mrf.mxu1  ;;  %v484_v57 = vadd.f32 %v483_v54, %v453_v18  ;;  %v495_v52 = vsub.f32 1.0, %v494_v34  ;;  %v3004_v34 = vld [vmem:[%s3314_s26 + $0x490] sm:$0xff] }
 0x182   : > { %v419_v32 = vadd.f32 %v3872_v16, %v418_v38  ;;  %v738_v50 = vadd.f32 %v3872_v16, %v737_v23  ;;  %v803_v26 = vadd.f32 %v802_v17, %v772_v2  ;;  %v3002_v38 = vld [vmem:[%s3314_s26 + $0x480] sm:$0xff] }
 0x183   : > { %v1084_v29 = vmax.f32 %v1047_v30, 0.0  ;;  %v1396_v6 = vmax.f32 %v1359_v3, 0.0  ;;  %v3066_v23 = vld [vmem:[%s3314_s26 + $0x580] sm:$0xff]  ;;  %v496_v36 = vmul.f32 %v3998_v41, %v495_v52 }
 0x184   : > { %3032 = vmatmul.msk.f32.gmra.mxu0 %vm214_vm0, %v3000_v21  ;;  %3096 = vmatmul.msk.f32.gmra.mxu1 %vm214_vm0, %v3064_v9  ;;  %v454_v59 = vmax.f32 %v419_v32, 0.0  ;;  %v773_v14 = vmax.f32 %v738_v50, 0.0 }
 0x185   : > { %v1115_v56 = vadd.f32 %v1114_v27, %v1084_v29  ;;  %v1427_v39 = vadd.f32 %v1426_v12, %v1396_v6  ;;  %3160 = vmatmul.msk.f32.gmra.mxu2 %vm214_vm0, %v3128_v63  ;;  %3224 = vmatmul.msk.f32.gmra.mxu3 %vm214_vm0, %v3192_v31  ;;  %v497_v35 = vadd.f32 %v3998_v41, %v496_v36 }
 0x186   : > { %v485_v5 = vadd.f32 %v484_v57, %v454_v59  ;;  %v804_v61 = vadd.f32 %v803_v26, %v773_v14  ;;  %v3003_v59 = vld [vmem:[%s3314_s26 + $0x488] sm:$0xff] }
 0x187   : > { %v3067_v14 = vld [vmem:[%s3314_s26 + $0x588] sm:$0xff] }
 0x188   : > { %v1049_v4 = vpop.f32.mrf.mxu2  ;;  %v1361_v7 = vpop.f32.mrf.mxu3 }
 0x189   : > { %v1050_v8 = vadd.f32 %v3872_v16, %v1049_v4  ;;  %v1362_v13 = vadd.f32 %v3872_v16, %v1361_v7  ;;  %v421_v25 = vpop.f32.mrf.mxu0  ;;  %v740_v15 = vpop.f32.mrf.mxu1  ;;  %v3131_v4 = vld [vmem:[%s3314_s26 + $0x688] sm:$0xff] }
 0x18a   : > { %v422_v60 = vadd.f32 %v3872_v16, %v421_v25  ;;  %v741_v53 = vadd.f32 %v3872_v16, %v740_v15  ;;  %v3195_v7 = vld [vmem:[%s3314_s26 + $0x788] sm:$0xff] }
 0x18b   : > { %v1085_v48 = vmax.f32 %v1050_v8, 0.0  ;;  %v1397_v33 = vmax.f32 %v1362_v13, 0.0 }
 0x18c   : > { %v455_v44 = vmax.f32 %v422_v60, 0.0  ;;  %v774_v27 = vmax.f32 %v741_v53, 0.0  ;;  %3033 = vmatmul.msk.f32.gmra.mxu0 %vm214_vm0, %v3001_v11  ;;  %3097 = vmatmul.msk.f32.gmra.mxu1 %vm214_vm0, %v3065_v47  ;;  %v4041_v11 = vsel %vm498_vm1, %v3998_v41, %v497_v35 }
 0x18d   : > { %v1116_v12 = vadd.f32 %v1115_v56, %v1085_v48  ;;  %v1428_v24 = vadd.f32 %v1427_v39, %v1397_v33  ;;  %3161 = vmatmul.msk.f32.gmra.mxu2 %vm214_vm0, %v3129_v51  ;;  %3225 = vmatmul.msk.f32.gmra.mxu3 %vm214_vm0, %v3193_v19 }
 0x18e   : > { %v486_v62 = vadd.f32 %v485_v5, %v455_v44  ;;  %v805_v22 = vadd.f32 %v804_v61, %v774_v27 }
 0x190   : > { %v487_v0 = vrot.slane %v486_v62, 4  ;;  %v806_v20 = vrot.slane %v805_v22, 4  ;;  %v1052_v45 = vpop.f32.mrf.mxu2  ;;  %v1364_v40 = vpop.f32.mrf.mxu3 }
 0x191   : > { %v1053_v43 = vadd.f32 %v3872_v16, %v1052_v45  ;;  %v1365_v46 = vadd.f32 %v3872_v16, %v1364_v40  ;;  %v4015_v30 = vpop.f32.mrf.mxu0  ;;  %v4017_v3 = vpop.f32.mrf.mxu1  ;;  %v3196_v45 = vld [vmem:[%s3314_s26 + $0x790] sm:$0xff] }
 0x192   : > { %v488_v21 = vadd.f32 %v487_v0, %v486_v62  ;;  %v807_v9 = vadd.f32 %v806_v20, %v805_v22  ;;  %v3068_v62 = vld [vmem:[%s3314_s26 + $0x590] sm:$0xff] }
 0x193   : > { %v1086_v49 = vmax.f32 %v1053_v43, 0.0  ;;  %v1398_v28 = vmax.f32 %v1365_v46, 0.0  ;;  %v3132_v20 = vld [vmem:[%s3314_s26 + $0x690] sm:$0xff] }
 0x194   : > { %v489_v63 = vrot.slane %v488_v21, 2  ;;  %v808_v31 = vrot.slane %v807_v9, 2  ;;  %3034 = vmatmul.msk.f32.gmra.mxu0 %vm214_vm0, %v3002_v38  ;;  %3098 = vmatmul.msk.f32.gmra.mxu1 %vm214_vm0, %v3066_v23 }
 0x195   : > { %v1117_v29 = vadd.f32 %v1116_v12, %v1086_v49  ;;  %v1429_v6 = vadd.f32 %v1428_v24, %v1398_v28  ;;  %3162 = vmatmul.msk.f32.gmra.mxu2 %vm214_vm0, %v3130_v42  ;;  %3226 = vmatmul.msk.f32.gmra.mxu3 %vm214_vm0, %v3194_v58 }
 0x196   : > { %v490_v10 = vadd.f32 %v489_v63, %v488_v21  ;;  %v809_v55 = vadd.f32 %v808_v31, %v807_v9 }
 0x197   : > { %v1118_v37 = vrot.slane %v1117_v29, 4  ;;  %v1430_v32 = vrot.slane %v1429_v6, 4 }
 0x198   : > { %v491_v50 = vrot.slane %v490_v10, 1  ;;  %v810_v56 = vrot.slane %v809_v55, 1  ;;  %v2207_v39 = vpop.f32.mrf.mxu2  ;;  %v2519_v1 = vpop.f32.mrf.mxu3 }
 0x199   : > { %v1119_v18 = vadd.f32 %v1118_v37, %v1117_v29  ;;  %v1431_v2 = vadd.f32 %v1430_v32, %v1429_v6  ;;  %v4029_v54 = vpop.f32.mrf.mxu0  ;;  %v4031_v17 = vpop.f32.mrf.mxu1  ;;  %v2208_v26 = vadd.f32 %v3872_v16, %v2207_v39  ;;  %v2520_v60 = vadd.f32 %v3872_v16, %v2519_v1  ;;  %v3005_v29 = vld [vmem:[%s3314_s26 + $0x498] sm:$0xff] }
 0x19a   : > { %v492_v25 = vadd.f32 %v491_v50, %v490_v10  ;;  %v811_v15 = vadd.f32 %v810_v56, %v809_v55  ;;  %v3069_v6 = vld [vmem:[%s3314_s26 + $0x598] sm:$0xff] }
 0x19b   : > { %v1120_v8 = vrot.slane %v1119_v18, 2  ;;  %v1432_v13 = vrot.slane %v1431_v2, 2  ;;  %v2303_v22 = vmax.f32 %v2208_v26, 0.0  ;;  %v2615_v0 = vmax.f32 %v2520_v60, 0.0  ;;  %v3133_v10 = vld [vmem:[%s3314_s26 + $0x698] sm:$0xff] }
 0x19c   : > { %3035 = vmatmul.msk.f32.gmra.mxu0 %vm214_vm0, %v3003_v59  ;;  %3099 = vmatmul.msk.f32.gmra.mxu1 %vm214_vm0, %v3067_v14  ;;  %v500_v19 = vmul.f32 %v4041_v11, %v492_v25  ;;  %v812_v48 = vmul.f32 %v811_v15, %v4041_v11  ;;  %v3197_v55 = vld [vmem:[%s3314_s26 + $0x798] sm:$0xff]  ;;  %v3006_v14 = vld [vmem:[%s3314_s26 + $0x4a0] sm:$0xff] }
 0x19d   : > { %v1121_v47 = vadd.f32 %v1120_v8, %v1119_v18  ;;  %v1433_v57 = vadd.f32 %v1432_v13, %v1431_v2  ;;  %3163 = vmatmul.msk.f32.gmra.mxu2 %vm214_vm0, %v3131_v4  ;;  %3227 = vmatmul.msk.f32.gmra.mxu3 %vm214_vm0, %v3195_v7  ;;  %v3070_v4 = vld [vmem:[%s3314_s26 + $0x5a0] sm:$0xff] }
 0x19e   : > { %v2686_v38 = vsel %vm2685_vm2, %v500_v19, %v812_v48  ;;  %v3134_v7 = vld [vmem:[%s3314_s26 + $0x6a0] sm:$0xff]  ;;  %v3007_v48 = vld [vmem:[%s3314_s26 + $0x4a8] sm:$0xff] }
 0x19f   : > { %v1122_v53 = vrot.slane %v1121_v47, 1  ;;  %v1434_v51 = vrot.slane %v1433_v57, 1  ;;  %v3198_v8 = vld [vmem:[%s3314_s26 + $0x7a0] sm:$0xff] }
 0x1a0   : > { %v2210_v41 = vpop.f32.mrf.mxu2  ;;  %v2522_v33 = vpop.f32.mrf.mxu3 }
 0x1a1   : > { %v1123_v5 = vadd.f32 %v1122_v53, %v1121_v47  ;;  %v1435_v61 = vadd.f32 %v1434_v51, %v1433_v57  ;;  %v2211_v44 = vadd.f32 %v3872_v16, %v2210_v41  ;;  %v2523_v27 = vadd.f32 %v3872_v16, %v2522_v33  ;;  %v4051_v12 = vpop.f32.mrf.mxu0  ;;  %v4053_v24 = vpop.f32.mrf.mxu1  ;;  %v3071_v41 = vld [vmem:[%s3314_s26 + $0x5a8] sm:$0xff] }
 0x1a2   : > { %v3135_v33 = vld [vmem:[%s3314_s26 + $0x6a8] sm:$0xff] }
 0x1a3   : > { %v1124_v40 = vmul.f32 %v1123_v5, %v4041_v11  ;;  %v1436_v52 = vmul.f32 %v1435_v61, %v4041_v11  ;;  %v2304_v43 = vmax.f32 %v2211_v44, 0.0  ;;  %v2616_v46 = vmax.f32 %v2523_v27, 0.0  ;;  %v3199_v5 = vld [vmem:[%s3314_s26 + $0x7a8] sm:$0xff] }
 0x1a4   : > { %3036 = vmatmul.msk.f32.gmra.mxu0 %vm214_vm0, %v3004_v34  ;;  %3100 = vmatmul.msk.f32.gmra.mxu1 %vm214_vm0, %v3068_v62 }
 0x1a5   : > { %v2688_v23 = vsel %vm2687_vm3, %v2686_v38, %v1124_v40  ;;  %v2335_v21 = vadd.f32 %v2304_v43, %v2303_v22  ;;  %v2647_v9 = vadd.f32 %v2616_v46, %v2615_v0  ;;  %3164 = vmatmul.msk.f32.gmra.mxu2 %vm214_vm0, %v3132_v20  ;;  %3228 = vmatmul.msk.f32.gmra.mxu3 %vm214_vm0, %v3196_v45  ;;  %v3072_v43 = vld [vmem:[%s3314_s26 + $0x5b0] sm:$0xff] }
 0x1a6   : > { %v4067_v42 = vsel %vm2689_vm4, %v2688_v23, %v1436_v52  ;;  %v3008_v52 = vld [vmem:[%s3314_s26 + $0x4b0] sm:$0xff] }
 0x1a7   : > { %v3136_v46 = vld [vmem:[%s3314_s26 + $0x6b0] sm:$0xff] }
 0x1a8   : > { %v2213_v58 = vpop.f32.mrf.mxu2  ;;  %v2525_v49 = vpop.f32.mrf.mxu3  ;;  %v3200_v38 = vld [vmem:[%s3314_s26 + $0x7b0] sm:$0xff] }
 0x1a9   : > { %v2214_v28 = vadd.f32 %v3872_v16, %v2213_v58  ;;  %v2526_v63 = vadd.f32 %v3872_v16, %v2525_v49  ;;  %v4071_v31 = vpop.f32.mrf.mxu0  ;;  %v4073_v36 = vpop.f32.mrf.mxu1  ;;  %v1899_v58 = vadd.f32 %v3872_v16, %v4031_v17  ;;  %v1590_v17 = vadd.f32 %v3872_v16, %v4051_v12 }
 0x1ab   : > { %v2305_v37 = vmax.f32 %v2214_v28, 0.0  ;;  %v2617_v32 = vmax.f32 %v2526_v63, 0.0  ;;  %v1584_v63 = vadd.f32 %v3872_v16, %v4015_v30  ;;  %v1905_v30 = vadd.f32 %v3872_v16, %v4073_v36 }
 0x1ac   : > { %3037 = vmatmul.msk.f32.gmra.mxu0 %vm214_vm0, %v3005_v29  ;;  %3101 = vmatmul.msk.f32.gmra.mxu1 %vm214_vm0, %v3069_v6  ;;  %v1902_v29 = vadd.f32 %v3872_v16, %v4053_v24  ;;  %v3073_v24 = vld [vmem:[%s3314_s26 + $0x5b8] sm:$0xff] }
 0x1ad   : > { %v2336_v50 = vadd.f32 %v2335_v21, %v2305_v37  ;;  %v2648_v56 = vadd.f32 %v2647_v9, %v2617_v32  ;;  %3165 = vmatmul.msk.f32.gmra.mxu2 %vm214_vm0, %v3133_v10  ;;  %3229 = vmatmul.msk.f32.gmra.mxu3 %vm214_vm0, %v3197_v55  ;;  %v1587_v9 = vadd.f32 %v3872_v16, %v4029_v54  ;;  %v1992_v10 = vmax.f32 %v1899_v58, 0.0 }
 0x1ae   : > { %v1896_v54 = vadd.f32 %v3872_v16, %v4017_v3  ;;  %v1593_v32 = vadd.f32 %v3872_v16, %v4071_v31 }
 0x1af   : > { %v1680_v6 = vmax.f32 %v1587_v9, 0.0 }
 0x1b0   : > { %v2216_v39 = vpop.f32.mrf.mxu2  ;;  %v2528_v1 = vpop.f32.mrf.mxu3 }
 0x1b1   : > { %v2217_v35 = vadd.f32 %v3872_v16, %v2216_v39  ;;  %v2529_v18 = vadd.f32 %v3872_v16, %v2528_v1  ;;  %v4085_v2 = vpop.f32.mrf.mxu0  ;;  %v4087_v59 = vpop.f32.mrf.mxu1  ;;  %v3009_v39 = vld [vmem:[%s3314_s26 + $0x4b8] sm:$0xff]  ;;  %v1679_v1 = vmax.f32 %v1584_v63, 0.0 }
 0x1b2   : > { %v1596_v31 = vadd.f32 %v3872_v16, %v4085_v2  ;;  %v1908_v36 = vadd.f32 %v3872_v16, %v4087_v59 }
 0x1b3   : > { %v2306_v13 = vmax.f32 %v2217_v35, 0.0  ;;  %v2618_v25 = vmax.f32 %v2529_v18, 0.0  ;;  %v1991_v35 = vmax.f32 %v1896_v54, 0.0  ;;  %v1681_v18 = vmax.f32 %v1590_v17, 0.0 }
 0x1b4   : > { %3038 = vmatmul.msk.f32.gmra.mxu0 %vm214_vm0, %v3006_v14  ;;  %3102 = vmatmul.msk.f32.gmra.mxu1 %vm214_vm0, %v3070_v4  ;;  %v1993_v14 = vmax.f32 %v1902_v29, 0.0  ;;  %v3137_v4 = vld [vmem:[%s3314_s26 + $0x6b8] sm:$0xff] }
 0x1b5   : > { %v2337_v15 = vadd.f32 %v2336_v50, %v2306_v13  ;;  %v2649_v47 = vadd.f32 %v2648_v56, %v2618_v25  ;;  %3166 = vmatmul.msk.f32.gmra.mxu2 %vm214_vm0, %v3134_v7  ;;  %3230 = vmatmul.msk.f32.gmra.mxu3 %vm214_vm0, %v3198_v8  ;;  %v3201_v7 = vld [vmem:[%s3314_s26 + $0x7b8] sm:$0xff]  ;;  %v1711_v25 = vadd.f32 %v1680_v6, %v1679_v1 }
 0x1b8   : > { %v2219_v57 = vpop.f32.mrf.mxu2  ;;  %v2531_v26 = vpop.f32.mrf.mxu3 }
 0x1b9   : > { %v2220_v60 = vadd.f32 %v3872_v16, %v2219_v57  ;;  %v2532_v53 = vadd.f32 %v3872_v16, %v2531_v26  ;;  %v4099_v51 = vpop.f32.mrf.mxu0  ;;  %v4101_v19 = vpop.f32.mrf.mxu1  ;;  %v1994_v57 = vmax.f32 %v1905_v30, 0.0 }
 0x1ba   : > { %v1599_v2 = vadd.f32 %v3872_v16, %v4099_v51  ;;  %v1911_v59 = vadd.f32 %v3872_v16, %v4101_v19 }
 0x1bb   : > { %v2307_v61 = vmax.f32 %v2220_v60, 0.0  ;;  %v2619_v44 = vmax.f32 %v2532_v53, 0.0  ;;  %v1712_v53 = vadd.f32 %v1711_v25, %v1681_v18  ;;  %v3203_v25 = vld [vmem:[%s3314_s26 + $0x7c8] sm:$0xff] }
 0x1bc   : > { %3039 = vmatmul.msk.f32.gmra.mxu0 %vm214_vm0, %v3007_v48  ;;  %3103 = vmatmul.msk.f32.gmra.mxu1 %vm214_vm0, %v3071_v41  ;;  %v1683_v41 = vmax.f32 %v1596_v31, 0.0 }
 0x1bd   : > { %v2338_v27 = vadd.f32 %v2337_v15, %v2307_v61  ;;  %v2650_v34 = vadd.f32 %v2649_v47, %v2619_v44  ;;  %3167 = vmatmul.msk.f32.gmra.mxu2 %vm214_vm0, %v3135_v33  ;;  %3231 = vmatmul.msk.f32.gmra.mxu3 %vm214_vm0, %v3199_v5  ;;  %v2023_v15 = vadd.f32 %v1992_v10, %v1991_v35  ;;  %v1682_v47 = vmax.f32 %v1593_v32, 0.0 }
 0x1be   : > { %v1995_v33 = vmax.f32 %v1908_v36, 0.0 }
 0x1bf   : > { %v2024_v48 = vadd.f32 %v2023_v15, %v1993_v14  ;;  %v3011_v14 = vld [vmem:[%s3314_s26 + $0x4c8] sm:$0xff] }
 0x1c0   : > { %v2222_v62 = vpop.f32.mrf.mxu2  ;;  %v2534_v22 = vpop.f32.mrf.mxu3 }
 0x1c1   : > { %v2223_v0 = vadd.f32 %v3872_v16, %v2222_v62  ;;  %v2535_v20 = vadd.f32 %v3872_v16, %v2534_v22  ;;  %v1601_v45 = vpop.f32.mrf.mxu0  ;;  %v1913_v40 = vpop.f32.mrf.mxu1  ;;  %v2025_v62 = vadd.f32 %v2024_v48, %v1994_v57 }
 0x1c2   : > { %v1602_v5 = vadd.f32 %v3872_v16, %v1601_v45  ;;  %v1914_v61 = vadd.f32 %v3872_v16, %v1913_v40  ;;  %v3138_v40 = vld [vmem:[%s3314_s26 + $0x6c0] sm:$0xff] }
 0x1c3   : > { %v2308_v23 = vmax.f32 %v2223_v0, 0.0  ;;  %v2620_v21 = vmax.f32 %v2535_v20, 0.0  ;;  %v3010_v20 = vld [vmem:[%s3314_s26 + $0x4c0] sm:$0xff]  ;;  %v2026_v9 = vadd.f32 %v2025_v62, %v1995_v33  ;;  %v3012_v62 = vld [vmem:[%s3314_s26 + $0x4d0] sm:$0xff] }
 0x1c4   : > { %3040 = vmatmul.msk.f32.gmra.mxu0 %vm214_vm0, %v3008_v52  ;;  %3104 = vmatmul.msk.f32.gmra.mxu1 %vm214_vm0, %v3072_v43  ;;  %v3074_v52 = vld [vmem:[%s3314_s26 + $0x5c0] sm:$0xff]  ;;  %v1684_v43 = vmax.f32 %v1599_v2, 0.0  ;;  %v1997_v63 = vmax.f32 %v1914_v61, 0.0 }
 0x1c5   : > { %v2339_v49 = vadd.f32 %v2338_v27, %v2308_v23  ;;  %v2651_v28 = vadd.f32 %v2650_v34, %v2620_v21  ;;  %3168 = vmatmul.msk.f32.gmra.mxu2 %vm214_vm0, %v3136_v46  ;;  %3232 = vmatmul.msk.f32.gmra.mxu3 %vm214_vm0, %v3200_v38  ;;  %v1713_v34 = vadd.f32 %v1712_v53, %v1682_v47  ;;  %v1996_v46 = vmax.f32 %v1911_v59, 0.0  ;;  %v3202_v23 = vld [vmem:[%s3314_s26 + $0x7c0] sm:$0xff] }
 0x1c7   : > { %v1714_v21 = vadd.f32 %v1713_v34, %v1683_v41 }
 0x1c8   : > { %v2225_v55 = vpop.f32.mrf.mxu2  ;;  %v2537_v37 = vpop.f32.mrf.mxu3 }
 0x1c9   : > { %v2226_v3 = vadd.f32 %v3872_v16, %v2225_v55  ;;  %v2538_v50 = vadd.f32 %v3872_v16, %v2537_v37  ;;  %v1604_v12 = vpop.f32.mrf.mxu0  ;;  %v1916_v56 = vpop.f32.mrf.mxu1  ;;  %v1715_v10 = vadd.f32 %v1714_v21, %v1684_v43  ;;  %v2027_v55 = vadd.f32 %v2026_v9, %v1996_v46 }
 0x1ca   : > { %v1605_v45 = vadd.f32 %v3872_v16, %v1604_v12  ;;  %v1917_v38 = vadd.f32 %v3872_v16, %v1916_v56 }
 0x1cb   : > { %v2309_v8 = vmax.f32 %v2226_v3, 0.0  ;;  %v2621_v13 = vmax.f32 %v2538_v50, 0.0  ;;  %v2028_v3 = vadd.f32 %v2027_v55, %v1997_v63  ;;  %v3141_v55 = vld [vmem:[%s3314_s26 + $0x6d8] sm:$0xff] }
 0x1cc   : > { %3041 = vmatmul.msk.f32.gmra.mxu0 %vm214_vm0, %v3009_v39  ;;  %3105 = vmatmul.msk.f32.gmra.mxu1 %vm214_vm0, %v3073_v24  ;;  %v1686_v37 = vmax.f32 %v1605_v45, 0.0  ;;  %v1998_v32 = vmax.f32 %v1917_v38, 0.0 }
 0x1cd   : > { %v2340_v26 = vadd.f32 %v2339_v49, %v2309_v8  ;;  %v2652_v60 = vadd.f32 %v2651_v28, %v2621_v13  ;;  %3169 = vmatmul.msk.f32.gmra.mxu2 %vm214_vm0, %v3137_v4  ;;  %3233 = vmatmul.msk.f32.gmra.mxu3 %vm214_vm0, %v3201_v7  ;;  %v1685_v28 = vmax.f32 %v1602_v5, 0.0  ;;  %v3075_v4 = vld [vmem:[%s3314_s26 + $0x5c8] sm:$0xff] }
 0x1ce   : > { %v2029_v31 = vadd.f32 %v2028_v3, %v1998_v32  ;;  %v3139_v13 = vld [vmem:[%s3314_s26 + $0x6c8] sm:$0xff] }
 0x1cf   : > { %v1716_v30 = vadd.f32 %v1715_v10, %v1685_v28 }
 0x1d0   : > { %v2228_v44 = vpop.f32.mrf.mxu2  ;;  %v2540_v27 = vpop.f32.mrf.mxu3 }
 0x1d1   : > { %v2229_v51 = vadd.f32 %v3872_v16, %v2228_v44  ;;  %v2541_v22 = vadd.f32 %v3872_v16, %v2540_v27  ;;  %v1607_v19 = vpop.f32.mrf.mxu0  ;;  %v1919_v0 = vpop.f32.mrf.mxu1  ;;  %v1717_v7 = vadd.f32 %v1716_v30, %v1686_v37  ;;  %v3205_v37 = vld [vmem:[%s3314_s26 + $0x7d8] sm:$0xff] }
 0x1d2   : > { %v1608_v54 = vadd.f32 %v3872_v16, %v1607_v19  ;;  %v1920_v17 = vadd.f32 %v3872_v16, %v1919_v0  ;;  %v3140_v0 = vld [vmem:[%s3314_s26 + $0x6d0] sm:$0xff] }
 0x1d3   : > { %v2310_v58 = vmax.f32 %v2229_v51, 0.0  ;;  %v2622_v49 = vmax.f32 %v2541_v22, 0.0  ;;  %v3076_v51 = vld [vmem:[%s3314_s26 + $0x5d0] sm:$0xff] }
 0x1d4   : > { %3042 = vmatmul.msk.f32.gmra.mxu0 %vm214_vm0, %v3010_v20  ;;  %3106 = vmatmul.msk.f32.gmra.mxu1 %vm214_vm0, %v3074_v52  ;;  %v1687_v50 = vmax.f32 %v1608_v54, 0.0  ;;  %v1999_v12 = vmax.f32 %v1920_v17, 0.0  ;;  %v3204_v20 = vld [vmem:[%s3314_s26 + $0x7d0] sm:$0xff]  ;;  %v3013_v17 = vld [vmem:[%s3314_s26 + $0x4d8] sm:$0xff] }
 0x1d5   : > { %v2341_v29 = vadd.f32 %v2340_v26, %v2310_v58  ;;  %v2653_v6 = vadd.f32 %v2652_v60, %v2622_v49  ;;  %3170 = vmatmul.msk.f32.gmra.mxu2 %vm214_vm0, %v3138_v40  ;;  %3234 = vmatmul.msk.f32.gmra.mxu3 %vm214_vm0, %v3202_v23  ;;  %v4198_v58 = vld [vmem:[%s4371_s2] ss:$0 sm:$0xff] }
 0x1d6   : > { %v1718_v57 = vadd.f32 %v1717_v7, %v1687_v50  ;;  %v2030_v26 = vadd.f32 %v2029_v31, %v1999_v12  ;;  %v3014_v31 = vld [vmem:[%s3314_s26 + $0x4e0] sm:$0xff] }
 0x1d8   : > { %v2231_v56 = vpop.f32.mrf.mxu2  ;;  %v2543_v39 = vpop.f32.mrf.mxu3 }
 0x1d9   : > { %v2232_v24 = vadd.f32 %v3872_v16, %v2231_v56  ;;  %v2544_v1 = vadd.f32 %v3872_v16, %v2543_v39  ;;  %v1610_v35 = vpop.f32.mrf.mxu0  ;;  %v1922_v18 = vpop.f32.mrf.mxu1 }
 0x1da   : > { %v1611_v36 = vadd.f32 %v3872_v16, %v1610_v35  ;;  %v1923_v8 = vadd.f32 %v3872_v16, %v1922_v18 }
 0x1db   : > { %v2311_v15 = vmax.f32 %v2232_v24, 0.0  ;;  %v2623_v47 = vmax.f32 %v2544_v1, 0.0 }
 0x1dc   : > { %v1688_v60 = vmax.f32 %v1611_v36, 0.0  ;;  %v2000_v2 = vmax.f32 %v1923_v8, 0.0  ;;  %3043 = vmatmul.msk.f32.gmra.mxu0 %vm214_vm0, %v3011_v14  ;;  %3107 = vmatmul.msk.f32.gmra.mxu1 %vm214_vm0, %v3075_v4  ;;  %v3078_v36 = vld [vmem:[%s3314_s26 + $0x5e0] sm:$0xff] }
 0x1dd   : > { %v2342_v59 = vadd.f32 %v2341_v29, %v2311_v15  ;;  %v2654_v53 = vadd.f32 %v2653_v6, %v2623_v47  ;;  %3171 = vmatmul.msk.f32.gmra.mxu2 %vm214_vm0, %v3139_v13  ;;  %3235 = vmatmul.msk.f32.gmra.mxu3 %vm214_vm0, %v3203_v25  ;;  %v3077_v29 = vld [vmem:[%s3314_s26 + $0x5d8] sm:$0xff]  ;;  %v3142_v25 = vld [vmem:[%s3314_s26 + $0x6e0] sm:$0xff] }
 0x1de   : > { %v1719_v48 = vadd.f32 %v1718_v57, %v1688_v60  ;;  %v2031_v41 = vadd.f32 %v2030_v26, %v2000_v2  ;;  %v3206_v15 = vld [vmem:[%s3314_s26 + $0x7e0] sm:$0xff] }
 0x1e0   : > { %v2234_v33 = vpop.f32.mrf.mxu2  ;;  %v2546_v5 = vpop.f32.mrf.mxu3 }
 0x1e1   : > { %v2235_v61 = vadd.f32 %v3872_v16, %v2234_v33  ;;  %v2547_v44 = vadd.f32 %v3872_v16, %v2546_v5  ;;  %v1613_v27 = vpop.f32.mrf.mxu0  ;;  %v1925_v34 = vpop.f32.mrf.mxu1 }
 0x1e2   : > { %v1614_v22 = vadd.f32 %v3872_v16, %v1613_v27  ;;  %v1926_v19 = vadd.f32 %v3872_v16, %v1925_v34  ;;  %v3015_v34 = vld [vmem:[%s3314_s26 + $0x4e8] sm:$0xff] }
 0x1e3   : > { %v2312_v52 = vmax.f32 %v2235_v61, 0.0  ;;  %v2624_v43 = vmax.f32 %v2547_v44, 0.0 }
 0x1e4   : > { %v1689_v46 = vmax.f32 %v1614_v22, 0.0  ;;  %v2001_v45 = vmax.f32 %v1926_v19, 0.0  ;;  %3044 = vmatmul.msk.f32.gmra.mxu0 %vm214_vm0, %v3012_v62  ;;  %3108 = vmatmul.msk.f32.gmra.mxu1 %vm214_vm0, %v3076_v51  ;;  %v3079_v62 = vld [vmem:[%s3314_s26 + $0x5e8] sm:$0xff] }
 0x1e5   : > { %v2343_v38 = vadd.f32 %v2342_v59, %v2312_v52  ;;  %v2655_v40 = vadd.f32 %v2654_v53, %v2624_v43  ;;  %3172 = vmatmul.msk.f32.gmra.mxu2 %vm214_vm0, %v3140_v0  ;;  %3236 = vmatmul.msk.f32.gmra.mxu3 %vm214_vm0, %v3204_v20  ;;  %v3143_v19 = vld [vmem:[%s3314_s26 + $0x6e8] sm:$0xff] }
 0x1e6   : > { %v1720_v16 = vadd.f32 %v1719_v48, %v1689_v46  ;;  %v2032_v23 = vadd.f32 %v2031_v41, %v2001_v45  ;;  %v3207_v0 = vld [vmem:[%s3314_s26 + $0x7e8] sm:$0xff] }
 0x1e8   : > { %v2237_v21 = vpop.f32.mrf.mxu2  ;;  %v2549_v9 = vpop.f32.mrf.mxu3 }
 0x1e9   : > { %v2238_v49 = vadd.f32 %v4198_v58, %v2237_v21  ;;  %v2550_v28 = vadd.f32 %v4198_v58, %v2549_v9  ;;  %v1616_v63 = vpop.f32.mrf.mxu0  ;;  %v1928_v54 = vpop.f32.mrf.mxu1 }
 0x1ea   : > { %v1617_v6 = vadd.f32 %v4198_v58, %v1616_v63  ;;  %v1929_v10 = vadd.f32 %v4198_v58, %v1928_v54  ;;  %v3016_v54 = vld [vmem:[%s3314_s26 + $0x4f0] sm:$0xff] }
 0x1eb   : > { %v2313_v32 = vmax.f32 %v2238_v49, 0.0  ;;  %v2625_v30 = vmax.f32 %v2550_v28, 0.0 }
 0x1ec   : > { %v1690_v3 = vmax.f32 %v1617_v6, 0.0  ;;  %v2002_v50 = vmax.f32 %v1929_v10, 0.0  ;;  %3045 = vmatmul.msk.f32.gmra.mxu0 %vm214_vm0, %v3013_v17  ;;  %3109 = vmatmul.msk.f32.gmra.mxu1 %vm214_vm0, %v3077_v29  ;;  %v3080_v17 = vld [vmem:[%s3314_s26 + $0x5f0] sm:$0xff] }
 0x1ed   : > { %v2344_v12 = vadd.f32 %v2343_v38, %v2313_v32  ;;  %v2656_v56 = vadd.f32 %v2655_v40, %v2625_v30  ;;  %3173 = vmatmul.msk.f32.gmra.mxu2 %vm214_vm0, %v3141_v55  ;;  %3237 = vmatmul.msk.f32.gmra.mxu3 %vm214_vm0, %v3205_v37  ;;  %v3144_v10 = vld [vmem:[%s3314_s26 + $0x6f0] sm:$0xff] }
 0x1ee   : > { %v1721_v39 = vadd.f32 %v1720_v16, %v1690_v3  ;;  %v2033_v24 = vadd.f32 %v2032_v23, %v2002_v50  ;;  %v3208_v55 = vld [vmem:[%s3314_s26 + $0x7f0] sm:$0xff] }
 0x1f0   : > { %v2240_v1 = vpop.f32.mrf.mxu2  ;;  %v2552_v35 = vpop.f32.mrf.mxu3 }
 0x1f1   : > { %v2241_v18 = vadd.f32 %v4198_v58, %v2240_v1  ;;  %v2553_v14 = vadd.f32 %v4198_v58, %v2552_v35  ;;  %v1619_v4 = vpop.f32.mrf.mxu0  ;;  %v1931_v7 = vpop.f32.mrf.mxu1 }
 0x1f2   : > { %v1620_v8 = vadd.f32 %v4198_v58, %v1619_v4  ;;  %v1932_v13 = vadd.f32 %v4198_v58, %v1931_v7  ;;  %v3017_v7 = vld [vmem:[%s3314_s26 + $0x4f8] sm:$0xff] }
 0x1f3   : > { %v2314_v47 = vmax.f32 %v2241_v18, 0.0  ;;  %v2626_v57 = vmax.f32 %v2553_v14, 0.0 }
 0x1f4   : > { %v1691_v26 = vmax.f32 %v1620_v8, 0.0  ;;  %v2003_v60 = vmax.f32 %v1932_v13, 0.0  ;;  %3046 = vmatmul.msk.f32.gmra.mxu0 %vm214_vm0, %v3014_v31  ;;  %3110 = vmatmul.msk.f32.gmra.mxu1 %vm214_vm0, %v3078_v36  ;;  %v3081_v31 = vld [vmem:[%s3314_s26 + $0x5f8] sm:$0xff] }
 0x1f5   : > { %v2345_v2 = vadd.f32 %v2344_v12, %v2314_v47  ;;  %v2657_v59 = vadd.f32 %v2656_v56, %v2626_v57  ;;  %3174 = vmatmul.msk.f32.gmra.mxu2 %vm214_vm0, %v3142_v25  ;;  %3238 = vmatmul.msk.f32.gmra.mxu3 %vm214_vm0, %v3206_v15  ;;  %v3145_v13 = vld [vmem:[%s3314_s26 + $0x6f8] sm:$0xff] }
 0x1f6   : > { %v1722_v53 = vadd.f32 %v1721_v39, %v1691_v26  ;;  %v2034_v48 = vadd.f32 %v2033_v24, %v2003_v60  ;;  %v3209_v25 = vld [vmem:[%s3314_s26 + $0x7f8] sm:$0xff] }
 0x1f8   : > { %v2243_v41 = vpop.f32.mrf.mxu2  ;;  %v2555_v33 = vpop.f32.mrf.mxu3 }
 0x1f9   : > { %v2244_v5 = vadd.f32 %v4198_v58, %v2243_v41  ;;  %v2556_v61 = vadd.f32 %v4198_v58, %v2555_v33  ;;  %v1622_v44 = vpop.f32.mrf.mxu0  ;;  %v1934_v27 = vpop.f32.mrf.mxu1 }
 0x1fa   : > { %v1623_v51 = vadd.f32 %v4198_v58, %v1622_v44  ;;  %v1935_v22 = vadd.f32 %v4198_v58, %v1934_v27 }
 0x1fb   : > { %v2315_v20 = vmax.f32 %v2244_v5, 0.0  ;;  %v2627_v52 = vmax.f32 %v2556_v61, 0.0 }
 0x1fc   : > { %v1692_v43 = vmax.f32 %v1623_v51, 0.0  ;;  %v2004_v46 = vmax.f32 %v1935_v22, 0.0  ;;  %3047 = vmatmul.msk.f32.gmra.mxu0 %vm214_vm0, %v3015_v34  ;;  %3111 = vmatmul.msk.f32.gmra.mxu1 %vm214_vm0, %v3079_v62 }
 0x1fd   : > { %v2346_v45 = vadd.f32 %v2345_v2, %v2315_v20  ;;  %v2658_v38 = vadd.f32 %v2657_v59, %v2627_v52  ;;  %3175 = vmatmul.msk.f32.gmra.mxu2 %vm214_vm0, %v3143_v19  ;;  %3239 = vmatmul.msk.f32.gmra.mxu3 %vm214_vm0, %v3207_v0 }
 0x1fe   : > { %v1723_v40 = vadd.f32 %v1722_v53, %v1692_v43  ;;  %v2035_v16 = vadd.f32 %v2034_v48, %v2004_v46 }
 0x200   : > { %v2246_v23 = vpop.f32.mrf.mxu2  ;;  %v2558_v21 = vpop.f32.mrf.mxu3 }
 0x201   : > { %v2247_v9 = vadd.f32 %v4198_v58, %v2246_v23  ;;  %v2559_v49 = vadd.f32 %v4198_v58, %v2558_v21  ;;  %v1625_v28 = vpop.f32.mrf.mxu0  ;;  %v1937_v63 = vpop.f32.mrf.mxu1 }
 0x202   : > { %v1626_v29 = vadd.f32 %v4198_v58, %v1625_v28  ;;  %v1938_v6 = vadd.f32 %v4198_v58, %v1937_v63 }
 0x203   : > { %v2316_v37 = vmax.f32 %v2247_v9, 0.0  ;;  %v2628_v32 = vmax.f32 %v2559_v49, 0.0 }
 0x204   : > { %v1693_v30 = vmax.f32 %v1626_v29, 0.0  ;;  %v2005_v3 = vmax.f32 %v1938_v6, 0.0  ;;  %3048 = vmatmul.msk.f32.gmra.mxu0 %vm214_vm0, %v3016_v54  ;;  %3112 = vmatmul.msk.f32.gmra.mxu1 %vm214_vm0, %v3080_v17 }
 0x205   : > { %v2347_v50 = vadd.f32 %v2346_v45, %v2316_v37  ;;  %v2659_v12 = vadd.f32 %v2658_v38, %v2628_v32  ;;  %3176 = vmatmul.msk.f32.gmra.mxu2 %vm214_vm0, %v3144_v10  ;;  %3240 = vmatmul.msk.f32.gmra.mxu3 %vm214_vm0, %v3208_v55 }
 0x206   : > { %v1724_v56 = vadd.f32 %v1723_v40, %v1693_v30  ;;  %v2036_v39 = vadd.f32 %v2035_v16, %v2005_v3 }
 0x208   : > { %v2249_v24 = vpop.f32.mrf.mxu2  ;;  %v2561_v1 = vpop.f32.mrf.mxu3 }
 0x209   : > { %v2250_v35 = vadd.f32 %v4198_v58, %v2249_v24  ;;  %v2562_v18 = vadd.f32 %v4198_v58, %v2561_v1  ;;  %v1628_v14 = vpop.f32.mrf.mxu0  ;;  %v1940_v4 = vpop.f32.mrf.mxu1 }
 0x20a   : > { %v1629_v36 = vadd.f32 %v4198_v58, %v1628_v14  ;;  %v1941_v8 = vadd.f32 %v4198_v58, %v1940_v4 }
 0x20b   : > { %v2317_v15 = vmax.f32 %v2250_v35, 0.0  ;;  %v2629_v47 = vmax.f32 %v2562_v18, 0.0 }
 0x20c   : > { %v1694_v57 = vmax.f32 %v1629_v36, 0.0  ;;  %v2006_v26 = vmax.f32 %v1941_v8, 0.0  ;;  %3049 = vmatmul.msk.f32.gmra.mxu0 %vm214_vm0, %v3017_v7  ;;  %3113 = vmatmul.msk.f32.gmra.mxu1 %vm214_vm0, %v3081_v31 }
 0x20d   : > { %v2348_v60 = vadd.f32 %v2347_v50, %v2317_v15  ;;  %v2660_v2 = vadd.f32 %v2659_v12, %v2629_v47  ;;  %3177 = vmatmul.msk.f32.gmra.mxu2 %vm214_vm0, %v3145_v13  ;;  %3241 = vmatmul.msk.f32.gmra.mxu3 %vm214_vm0, %v3209_v25 }
 0x20e   : > { %v1725_v59 = vadd.f32 %v1724_v56, %v1694_v57  ;;  %v2037_v53 = vadd.f32 %v2036_v39, %v2006_v26 }
 0x210   : > { %v2252_v48 = vpop.f32.mrf.mxu2  ;;  %v2564_v41 = vpop.f32.mrf.mxu3 }
 0x211   : > { %v2253_v33 = vadd.f32 %v4198_v58, %v2252_v48  ;;  %v2565_v5 = vadd.f32 %v4198_v58, %v2564_v41  ;;  %v1631_v61 = vpop.f32.mrf.mxu0  ;;  %v1943_v44 = vpop.f32.mrf.mxu1 }
 0x212   : > { %v1632_v27 = vadd.f32 %v4198_v58, %v1631_v61  ;;  %v1944_v34 = vadd.f32 %v4198_v58, %v1943_v44 }
 0x213   : > { %v2318_v62 = vmax.f32 %v2253_v33, 0.0  ;;  %v2630_v51 = vmax.f32 %v2565_v5, 0.0 }
 0x214   : > { %v1695_v22 = vmax.f32 %v1632_v27, 0.0  ;;  %v2007_v19 = vmax.f32 %v1944_v34, 0.0 }
 0x215   : > { %v2349_v0 = vadd.f32 %v2348_v60, %v2318_v62  ;;  %v2661_v20 = vadd.f32 %v2660_v2, %v2630_v51 }
 0x216   : > { %v1726_v52 = vadd.f32 %v1725_v59, %v1695_v22  ;;  %v2038_v43 = vadd.f32 %v2037_v53, %v2007_v19 }
 0x218   : > { %v2255_v46 = vpop.f32.mrf.mxu2  ;;  %v2567_v45 = vpop.f32.mrf.mxu3 }
 0x219   : > { %v2256_v38 = vadd.f32 %v4198_v58, %v2255_v46  ;;  %v2568_v40 = vadd.f32 %v4198_v58, %v2567_v45  ;;  %v1634_v16 = vpop.f32.mrf.mxu0  ;;  %v1946_v23 = vpop.f32.mrf.mxu1 }
 0x21a   : > { %v1635_v21 = vadd.f32 %v4198_v58, %v1634_v16  ;;  %v1947_v9 = vadd.f32 %v4198_v58, %v1946_v23 }
 0x21b   : > { %v2319_v49 = vmax.f32 %v2256_v38, 0.0  ;;  %v2631_v28 = vmax.f32 %v2568_v40, 0.0 }
 0x21c   : > { %v1696_v63 = vmax.f32 %v1635_v21, 0.0  ;;  %v2008_v54 = vmax.f32 %v1947_v9, 0.0 }
 0x21d   : > { %v2350_v17 = vadd.f32 %v2349_v0, %v2319_v49  ;;  %v2662_v29 = vadd.f32 %v2661_v20, %v2631_v28 }
 0x21e   : > { %v1727_v6 = vadd.f32 %v1726_v52, %v1696_v63  ;;  %v2039_v10 = vadd.f32 %v2038_v43, %v2008_v54 }
 0x220   : > { %v2258_v55 = vpop.f32.mrf.mxu2  ;;  %v2570_v37 = vpop.f32.mrf.mxu3 }
 0x221   : > { %v2259_v32 = vadd.f32 %v4198_v58, %v2258_v55  ;;  %v2571_v30 = vadd.f32 %v4198_v58, %v2570_v37  ;;  %v1637_v3 = vpop.f32.mrf.mxu0  ;;  %v1949_v50 = vpop.f32.mrf.mxu1 }
 0x222   : > { %v1638_v12 = vadd.f32 %v4198_v58, %v1637_v3  ;;  %v1950_v56 = vadd.f32 %v4198_v58, %v1949_v50 }
 0x223   : > { %v2320_v39 = vmax.f32 %v2259_v32, 0.0  ;;  %v2632_v24 = vmax.f32 %v2571_v30, 0.0 }
 0x224   : > { %v1697_v1 = vmax.f32 %v1638_v12, 0.0  ;;  %v2009_v35 = vmax.f32 %v1950_v56, 0.0 }
 0x225   : > { %v2351_v18 = vadd.f32 %v2350_v17, %v2320_v39  ;;  %v2663_v14 = vadd.f32 %v2662_v29, %v2632_v24 }
 0x226   : > { %v1728_v4 = vadd.f32 %v1727_v6, %v1697_v1  ;;  %v2040_v7 = vadd.f32 %v2039_v10, %v2009_v35 }
 0x228   : > { %v2261_v31 = vpop.f32.mrf.mxu2  ;;  %v2573_v36 = vpop.f32.mrf.mxu3 }
 0x229   : > { %v2262_v8 = vadd.f32 %v4198_v58, %v2261_v31  ;;  %v2574_v13 = vadd.f32 %v4198_v58, %v2573_v36  ;;  %v1640_v25 = vpop.f32.mrf.mxu0  ;;  %v1952_v15 = vpop.f32.mrf.mxu1 }
 0x22a   : > { %v1641_v47 = vadd.f32 %v4198_v58, %v1640_v25  ;;  %v1953_v57 = vadd.f32 %v4198_v58, %v1952_v15 }
 0x22b   : > { %v2321_v26 = vmax.f32 %v2262_v8, 0.0  ;;  %v2633_v60 = vmax.f32 %v2574_v13, 0.0 }
 0x22c   : > { %v1698_v2 = vmax.f32 %v1641_v47, 0.0  ;;  %v2010_v59 = vmax.f32 %v1953_v57, 0.0 }
 0x22d   : > { %v2352_v53 = vadd.f32 %v2351_v18, %v2321_v26  ;;  %v2664_v48 = vadd.f32 %v2663_v14, %v2633_v60 }
 0x22e   : > { %v1729_v41 = vadd.f32 %v1728_v4, %v1698_v2  ;;  %v2041_v33 = vadd.f32 %v2040_v7, %v2010_v59 }
 0x230   : > { %v2264_v5 = vpop.f32.mrf.mxu2  ;;  %v2576_v61 = vpop.f32.mrf.mxu3 }
 0x231   : > { %v2265_v44 = vadd.f32 %v4198_v58, %v2264_v5  ;;  %v2577_v27 = vadd.f32 %v4198_v58, %v2576_v61  ;;  %v1643_v34 = vpop.f32.mrf.mxu0  ;;  %v1955_v62 = vpop.f32.mrf.mxu1 }
 0x232   : > { %v1644_v51 = vadd.f32 %v4198_v58, %v1643_v34  ;;  %v1956_v22 = vadd.f32 %v4198_v58, %v1955_v62 }
 0x233   : > { %v2322_v19 = vmax.f32 %v2265_v44, 0.0  ;;  %v2634_v0 = vmax.f32 %v2577_v27, 0.0 }
 0x234   : > { %v1699_v20 = vmax.f32 %v1644_v51, 0.0  ;;  %v2011_v52 = vmax.f32 %v1956_v22, 0.0 }
 0x235   : > { %v2353_v43 = vadd.f32 %v2352_v53, %v2322_v19  ;;  %v2665_v46 = vadd.f32 %v2664_v48, %v2634_v0 }
 0x236   : > { %v1730_v45 = vadd.f32 %v1729_v41, %v1699_v20  ;;  %v2042_v38 = vadd.f32 %v2041_v33, %v2011_v52 }
 0x238   : > { %v2267_v40 = vpop.f32.mrf.mxu2  ;;  %v2579_v16 = vpop.f32.mrf.mxu3 }
 0x239   : > { %v2268_v23 = vadd.f32 %v4198_v58, %v2267_v40  ;;  %v2580_v21 = vadd.f32 %v4198_v58, %v2579_v16  ;;  %v1646_v9 = vpop.f32.mrf.mxu0  ;;  %v1958_v49 = vpop.f32.mrf.mxu1 }
 0x23a   : > { %v1647_v15 = vadd.f32 %v4198_v58, %v1646_v9  ;;  %v1959_v47 = vadd.f32 %v4198_v58, %v1958_v49 }
 0x23b   : > { %v2323_v28 = vmax.f32 %v2268_v23, 0.0  ;;  %v2635_v63 = vmax.f32 %v2580_v21, 0.0 }
 0x23c   : > { %v1700_v59 = vmax.f32 %v1647_v15, 0.0  ;;  %v2012_v53 = vmax.f32 %v1959_v47, 0.0 }
 0x23d   : > { %v2354_v54 = vadd.f32 %v2353_v43, %v2323_v28  ;;  %v2666_v17 = vadd.f32 %v2665_v46, %v2635_v63 }
 0x23e   : > { %v1731_v0 = vadd.f32 %v1730_v45, %v1700_v59  ;;  %v2043_v20 = vadd.f32 %v2042_v38, %v2012_v53 }
 0x240   : > { %v2270_v29 = vpop.f32.mrf.mxu2  ;;  %v2582_v6 = vpop.f32.mrf.mxu3 }
 0x241   : > { %v1649_v10 = vpop.f32.mrf.mxu0  ;;  %v1961_v55 = vpop.f32.mrf.mxu1  ;;  %v2271_v57 = vadd.f32 %v4198_v58, %v2270_v29  ;;  %v2583_v26 = vadd.f32 %v4198_v58, %v2582_v6 }
 0x242   : > { %v1650_v48 = vadd.f32 %v4198_v58, %v1649_v10  ;;  %v1962_v41 = vadd.f32 %v4198_v58, %v1961_v55 }
 0x243   : > { %v2324_v27 = vmax.f32 %v2271_v57, 0.0  ;;  %v2636_v34 = vmax.f32 %v2583_v26, 0.0 }
 0x244   : > { %v1701_v52 = vmax.f32 %v1650_v48, 0.0  ;;  %v2013_v43 = vmax.f32 %v1962_v41, 0.0 }
 0x245   : > { %v2355_v21 = vadd.f32 %v2354_v54, %v2324_v27  ;;  %v2667_v9 = vadd.f32 %v2666_v17, %v2636_v34 }
 0x246   : > { %v1732_v55 = vadd.f32 %v1731_v0, %v1701_v52 }
 0x248   : > { %v2273_v37 = vpop.f32.mrf.mxu2  ;;  %v2585_v32 = vpop.f32.mrf.mxu3 }
 0x249   : > { %v1652_v30 = vpop.f32.mrf.mxu0  ;;  %v1964_v3 = vpop.f32.mrf.mxu1  ;;  %v2274_v61 = vadd.f32 %v4198_v58, %v2273_v37  ;;  %v2586_v44 = vadd.f32 %v4198_v58, %v2585_v32  ;;  %v2044_v37 = vadd.f32 %v2043_v20, %v2013_v43 }
 0x24a   : > { %v1653_v62 = vadd.f32 %v4198_v58, %v1652_v30  ;;  %v1965_v51 = vadd.f32 %v4198_v58, %v1964_v3 }
 0x24b   : > { %v2325_v46 = vmax.f32 %v2274_v61, 0.0  ;;  %v2637_v40 = vmax.f32 %v2586_v44, 0.0 }
 0x24c   : > { %v1702_v49 = vmax.f32 %v1653_v62, 0.0  ;;  %v2014_v28 = vmax.f32 %v1965_v51, 0.0 }
 0x24d   : > { %v2356_v3 = vadd.f32 %v2355_v21, %v2325_v46 }
 0x250   : > { %v2276_v50 = vpop.f32.mrf.mxu2  ;;  %v2588_v12 = vpop.f32.mrf.mxu3 }
 0x251   : > { %v1655_v56 = vpop.f32.mrf.mxu0  ;;  %v1967_v39 = vpop.f32.mrf.mxu1  ;;  %v2277_v22 = vadd.f32 %v4198_v58, %v2276_v50  ;;  %v2589_v19 = vadd.f32 %v4198_v58, %v2588_v12  ;;  %v2668_v50 = vadd.f32 %v2667_v9, %v2637_v40 }
 0x252   : > { %v1656_v16 = vadd.f32 %v4198_v58, %v1655_v56  ;;  %v1968_v23 = vadd.f32 %v4198_v58, %v1967_v39  ;;  %v1733_v39 = vadd.f32 %v1732_v55, %v1702_v49 }
 0x253   : > { %v2326_v63 = vmax.f32 %v2277_v22, 0.0  ;;  %v2638_v29 = vmax.f32 %v2589_v19, 0.0 }
 0x254   : > { %v1703_v12 = vmax.f32 %v1656_v16, 0.0  ;;  %v2015_v56 = vmax.f32 %v1968_v23, 0.0 }
 0x255   : > { %v2357_v47 = vadd.f32 %v2356_v3, %v2326_v63  ;;  %v2669_v57 = vadd.f32 %v2668_v50, %v2638_v29 }
 0x256   : > { %v1734_v41 = vadd.f32 %v1733_v39, %v1703_v12 }
 0x258   : > { %v2279_v24 = vpop.f32.mrf.mxu2  ;;  %v2591_v1 = vpop.f32.mrf.mxu3 }
 0x259   : > { %v1658_v35 = vpop.f32.mrf.mxu0  ;;  %v1970_v18 = vpop.f32.mrf.mxu1  ;;  %v2280_v6 = vadd.f32 %v4198_v58, %v2279_v24  ;;  %v2592_v10 = vadd.f32 %v4198_v58, %v2591_v1  ;;  %v2045_v24 = vadd.f32 %v2044_v37, %v2014_v28 }
 0x25a   : > { %v1659_v32 = vadd.f32 %v4198_v58, %v1658_v35  ;;  %v1971_v30 = vadd.f32 %v4198_v58, %v1970_v18 }
 0x25b   : > { %v2327_v26 = vmax.f32 %v2280_v6, 0.0  ;;  %v2639_v59 = vmax.f32 %v2592_v10, 0.0  ;;  %v2046_v61 = vadd.f32 %v2045_v24, %v2015_v56 }
 0x25c   : > { %v1704_v53 = vmax.f32 %v1659_v32, 0.0  ;;  %v2016_v35 = vmax.f32 %v1971_v30, 0.0 }
 0x25d   : > { %v2670_v51 = vadd.f32 %v2669_v57, %v2639_v59 }
 0x25e   : > { %v2047_v20 = vadd.f32 %v2046_v61, %v2016_v35 }
 0x260   : > { %v4282_v14 = vpop.f32.mrf.mxu2  ;;  %v4284_v4 = vpop.f32.mrf.mxu3 }
 0x261   : > { %v1661_v7 = vpop.f32.mrf.mxu0  ;;  %v1973_v31 = vpop.f32.mrf.mxu1  ;;  %v2283_v18 = vadd.f32 %v4198_v58, %v4282_v14  ;;  %v2595_v48 = vadd.f32 %v4198_v58, %v4284_v4  ;;  %v2358_v14 = vadd.f32 %v2357_v47, %v2327_v26 }
 0x262   : > { %v1662_v1 = vadd.f32 %v4198_v58, %v1661_v7  ;;  %v1974_v15 = vadd.f32 %v4198_v58, %v1973_v31 }
 0x263   : > { %v2328_v52 = vmax.f32 %v2283_v18, 0.0 }
 0x264   : > { %v1705_v31 = vmax.f32 %v1662_v1, 0.0  ;;  %v2017_v27 = vmax.f32 %v1974_v15, 0.0 }
 0x265   : > { %v2359_v29 = vadd.f32 %v2358_v14, %v2328_v52 }
 0x266   : > { %v2048_v21 = vadd.f32 %v2047_v20, %v2017_v27 }
 0x268   : > { %v4286_v36 = vpop.f32.mrf.mxu2  ;;  %v4288_v8 = vpop.f32.mrf.mxu3 }
 0x269   : > { %v4290_v13 = vpop.f32.mrf.mxu0  ;;  %v4292_v25 = vpop.f32.mrf.mxu1  ;;  %v2286_v34 = vadd.f32 %v4198_v58, %v4286_v36  ;;  %v2598_v62 = vadd.f32 %v4198_v58, %v4288_v8 }
 0x26a   : > { %v1665_v44 = vadd.f32 %v4198_v58, %v4290_v13  ;;  %v1977_v7 = vadd.f32 %v4198_v58, %v4292_v25  ;;  %v1735_v13 = vadd.f32 %v1734_v41, %v1704_v53  ;;  %v2640_v25 = vmax.f32 %v2595_v48, 0.0 }
 0x26b   : > { %v2329_v9 = vmax.f32 %v2286_v34, 0.0 }
 0x26c   : > { %v1706_v40 = vmax.f32 %v1665_v44, 0.0  ;;  %v2018_v16 = vmax.f32 %v1977_v7, 0.0  ;;  %v1736_v23 = vadd.f32 %v1735_v13, %v1705_v31  ;;  %v2671_v6 = vadd.f32 %v2670_v51, %v2640_v25 }
 0x26e   : > { %v1737_v37 = vadd.f32 %v1736_v23, %v1706_v40  ;;  %v2049_v32 = vadd.f32 %v2048_v21, %v2018_v16 }
 0x270   : > { %v4298_v60 = vpop.f32.mrf.mxu2  ;;  %v4300_v2 = vpop.f32.mrf.mxu3 }
 0x271   : > { %v1667_v33 = vpop.f32.mrf.mxu0  ;;  %v1979_v5 = vpop.f32.mrf.mxu1  ;;  %v2289_v10 = vadd.f32 %v4198_v58, %v4298_v60  ;;  %v2601_v55 = vadd.f32 %v4198_v58, %v4300_v2 }
 0x272   : > { %v1668_v4 = vadd.f32 %v4198_v58, %v1667_v33  ;;  %v1980_v22 = vadd.f32 %v4198_v58, %v1979_v5  ;;  %v2641_v33 = vmax.f32 %v2598_v62, 0.0 }
 0x273   : > { %v2330_v47 = vmax.f32 %v2289_v10, 0.0  ;;  %v2642_v2 = vmax.f32 %v2601_v55, 0.0 }
 0x274   : > { %v1707_v49 = vmax.f32 %v1668_v4, 0.0  ;;  %v2019_v5 = vmax.f32 %v1980_v22, 0.0  ;;  %v2672_v3 = vadd.f32 %v2671_v6, %v2641_v33 }
 0x276   : > { %v1738_v56 = vadd.f32 %v1737_v37, %v1707_v49  ;;  %v2050_v39 = vadd.f32 %v2049_v32, %v2019_v5  ;;  %v2673_v14 = vadd.f32 %v2672_v3, %v2642_v2 }
 0x278   : > { %v4314_v45 = vpop.f32.mrf.mxu2  ;;  %v4316_v38 = vpop.f32.mrf.mxu3 }
 0x279   : > { %v1670_v54 = vpop.f32.mrf.mxu0  ;;  %v1982_v17 = vpop.f32.mrf.mxu1  ;;  %v2292_v50 = vadd.f32 %v4198_v58, %v4314_v45  ;;  %v2604_v12 = vadd.f32 %v4198_v58, %v4316_v38 }
 0x27a   : > { %v1671_v36 = vadd.f32 %v4198_v58, %v1670_v54  ;;  %v1983_v8 = vadd.f32 %v4198_v58, %v1982_v17  ;;  %v2360_v17 = vadd.f32 %v2359_v29, %v2329_v9 }
 0x27b   : > { %v2331_v48 = vmax.f32 %v2292_v50, 0.0  ;;  %v2643_v41 = vmax.f32 %v2604_v12, 0.0 }
 0x27c   : > { %v1708_v30 = vmax.f32 %v1671_v36, 0.0  ;;  %v2020_v54 = vmax.f32 %v1983_v8, 0.0  ;;  %v2361_v62 = vadd.f32 %v2360_v17, %v2330_v47 }
 0x27d   : > { %v2674_v13 = vadd.f32 %v2673_v14, %v2643_v41 }
 0x27e   : > { %v1739_v35 = vadd.f32 %v1738_v56, %v1708_v30  ;;  %v2051_v18 = vadd.f32 %v2050_v39, %v2020_v54 }
 0x280   : > { %v2294_v19 = vpop.f32.mrf.mxu2  ;;  %v2606_v0 = vpop.f32.mrf.mxu3 }
 0x281   : > { %v1673_v43 = vpop.f32.mrf.mxu0  ;;  %v1985_v46 = vpop.f32.mrf.mxu1  ;;  %v2295_v57 = vadd.f32 %v4198_v58, %v2294_v19  ;;  %v2607_v26 = vadd.f32 %v4198_v58, %v2606_v0  ;;  %v2362_v0 = vadd.f32 %v2361_v62, %v2331_v48 }
 0x282   : > { %v1674_v28 = vadd.f32 %v4198_v58, %v1673_v43  ;;  %v1986_v63 = vadd.f32 %v4198_v58, %v1985_v46 }
 0x283   : > { %v2332_v51 = vmax.f32 %v2295_v57, 0.0  ;;  %v2644_v4 = vmax.f32 %v2607_v26, 0.0 }
 0x284   : > { %v1709_v24 = vmax.f32 %v1674_v28, 0.0  ;;  %v2021_v1 = vmax.f32 %v1986_v63, 0.0 }
 0x285   : > { %v2363_v16 = vadd.f32 %v2362_v0, %v2332_v51  ;;  %v2675_v36 = vadd.f32 %v2674_v13, %v2644_v4 }
 0x286   : > { %v1740_v7 = vadd.f32 %v1739_v35, %v1709_v24  ;;  %v2052_v31 = vadd.f32 %v2051_v18, %v2021_v1 }
 0x288   : > { %v2297_v60 = vpop.f32.mrf.mxu2  ;;  %v2609_v15 = vpop.f32.mrf.mxu3 }
 0x289   : > { %v1676_v59 = vpop.f32.mrf.mxu0  ;;  %v1988_v53 = vpop.f32.mrf.mxu1  ;;  %v2298_v61 = vadd.f32 %v4198_v58, %v2297_v60  ;;  %v2610_v44 = vadd.f32 %v4198_v58, %v2609_v15 }
 0x28a   : > { %v1677_v45 = vadd.f32 %v4198_v58, %v1676_v59  ;;  %v1989_v38 = vadd.f32 %v4198_v58, %v1988_v53 }
 0x28b   : > { %v2333_v20 = vmax.f32 %v2298_v61, 0.0  ;;  %v2645_v52 = vmax.f32 %v2610_v44, 0.0 }
 0x28c   : > { %v1710_v27 = vmax.f32 %v1677_v45, 0.0  ;;  %v2022_v34 = vmax.f32 %v1989_v38, 0.0 }
 0x28d   : > { %v2364_v33 = vadd.f32 %v2363_v16, %v2333_v20  ;;  %v2676_v49 = vadd.f32 %v2675_v36, %v2645_v52 }
 0x28e   : > { %v1741_v22 = vadd.f32 %v1740_v7, %v1710_v27  ;;  %v2053_v19 = vadd.f32 %v2052_v31, %v2022_v34 }
 0x290   : > { %v1742_v25 = vrot.slane %v1741_v22, 4  ;;  %v2054_v43 = vrot.slane %v2053_v19, 4  ;;  %v2300_v46 = vpop.f32.mrf.mxu2  ;;  %v2612_v40 = vpop.f32.mrf.mxu3 }
 0x291   : > { %v2301_v8 = vadd.f32 %v4198_v58, %v2300_v46  ;;  %v2613_v23 = vadd.f32 %v4198_v58, %v2612_v40 }
 0x292   : > { %v1743_v21 = vadd.f32 %v1742_v25, %v1741_v22  ;;  %v2055_v9 = vadd.f32 %v2054_v43, %v2053_v19 }
 0x293   : > { %v2334_v5 = vmax.f32 %v2301_v8, 0.0  ;;  %v2646_v28 = vmax.f32 %v2613_v23, 0.0 }
 0x294   : > { %v1744_v63 = vrot.slane %v1743_v21, 2  ;;  %v2056_v29 = vrot.slane %v2055_v9, 2 }
 0x295   : > { %v2365_v6 = vadd.f32 %v2364_v33, %v2334_v5  ;;  %v2677_v10 = vadd.f32 %v2676_v49, %v2646_v28 }
 0x296   : > { %v1745_v55 = vadd.f32 %v1744_v63, %v1743_v21  ;;  %v2057_v37 = vadd.f32 %v2056_v29, %v2055_v9 }
 0x297   : > { %v2366_v32 = vrot.slane %v2365_v6, 4  ;;  %v2678_v30 = vrot.slane %v2677_v10, 4 }
 0x298   : > { %v1746_v54 = vrot.slane %v1745_v55, 1  ;;  %v2058_v17 = vrot.slane %v2057_v37, 1 }
 0x299   : > { %v2367_v3 = vadd.f32 %v2366_v32, %v2365_v6  ;;  %v2679_v58 = vadd.f32 %v2678_v30, %v2677_v10 }
 0x29a   : > { %v1747_v50 = vadd.f32 %v1746_v54, %v1745_v55  ;;  %v2059_v12 = vadd.f32 %v2058_v17, %v2057_v37 }
 0x29b   : > { %v2368_v56 = vrot.slane %v2367_v3, 2  ;;  %v2680_v39 = vrot.slane %v2679_v58, 2 }
 0x29c   : > { %v1748_v24 = vmul.f32 %v1747_v50, %v4041_v11  ;;  %v2060_v1 = vmul.f32 %v2059_v12, %v4041_v11 }
 0x29d   : > { %v2369_v60 = vadd.f32 %v2368_v56, %v2367_v3  ;;  %v2681_v15 = vadd.f32 %v2680_v39, %v2679_v58 }
 0x29e   : > { %v2692_v47 = vsel %vm2691_vm5, %v4067_v42, %v1748_v24 }
 0x29f   : > { %v2694_v2 = vsel %vm2693_vm6, %v2692_v47, %v2060_v1  ;;  %v2370_v57 = vrot.slane %v2369_v60, 1  ;;  %v2682_v26 = vrot.slane %v2681_v15, 1 }
 0x2a1   : > { %v2371_v59 = vadd.f32 %v2370_v57, %v2369_v60  ;;  %v2683_v53 = vadd.f32 %v2682_v26, %v2681_v15 }
 0x2a3   : > { %v2372_v35 = vmul.f32 %v2371_v59, %v4041_v11  ;;  %v2684_v18 = vmul.f32 %v2683_v53, %v4041_v11 }
 0x2a5   : > { %v2696_v45 = vsel %vm2695_vm7, %v2694_v2, %v2372_v35 }
 0x2a6   : > { %v2698_v38 = vsel %vm2697_vm8, %v2696_v45, %v2684_v18 }
 0x2a7   : > { %2699 = vst [vmem:[%s173_s9] sm:$0xff] %v2698_v38 }
 0x2a8 PF: > { %s13_s12 = sadd.s32 1, %s3265_s12  }
 0x2a9   : > { %p10_p5 = scmp.ge.s32.totalorder %s13_s12, 4  }
 0x2ab   :  { %12 = sbr.rel (!%p10_p5) target bundleno = 1 (0x1), region = 69 }

// kernel: lrcn_forward.5
= control target key start
LH: loop header
LB: loop body
LE: loop exit
PB: predicated region body
PF: predicated region fallthrough
CT: control target
= control target key end

     0   :  { %vm123_vm4 = vcmask 523264   ;;  %vm201_vm13 = vcmask 261120   ;;  %s429_s1 = inlined_call_operand.vmem [shape: f32[128,64], index: 1, kind: input, shape index: {}]   ;;  %s430_s2 = inlined_call_operand.vmem [shape: f32[1,64], index: 2, kind: input, shape index: {}]   ;;  %s431_s0 = inlined_call_operand.vmem [shape: f32[16,128], index: 0, kind: input, shape index: {}]   ;;  %s432_s4 = inlined_call_operand.vmem [shape: f32[1,32], index: 4, kind: input, shape index: {}]   ;;  %s433_s3 = inlined_call_operand.vmem [shape: f32[64,32], index: 3, kind: input, shape index: {}]   ;;  %s434_s6 = inlined_call_operand.vmem [shape: f32[1,32], index: 6, kind: input, shape index: {}]   ;;  %s435_s5 = inlined_call_operand.vmem [shape: f32[32,32], index: 5, kind: input, shape index: {}]   ;;  %s436_s7 = inlined_call_operand.vmem [shape: f32[16,32], index: 7, kind: output, shape index: {}]  }
   0x1   :  { %v43_v0 = vld [vmem:[%s429_s1 + $0x78] sm:$0xff]  ;;  %v42_v1 = vld [vmem:[%s429_s1 + $0x70] sm:$0xff]  ;;  %v41_v2 = vld [vmem:[%s429_s1 + $0x68] sm:$0xff] }
   0x2   :  { %48 = vmatpush.msra.mxu0 %v43_v0  ;;  %245 = vmatpush.msra.mxu3 %v43_v0  ;;  %v40_v3 = vld [vmem:[%s429_s1 + $0x60] sm:$0xff]  ;;  %v39_v4 = vld [vmem:[%s429_s1 + $0x58] sm:$0xff]  ;;  %v38_v5 = vld [vmem:[%s429_s1 + $0x50] sm:$0xff] }
   0x3   :  { %v37_v6 = vld [vmem:[%s429_s1 + $0x48] sm:$0xff]  ;;  %v36_v7 = vld [vmem:[%s429_s1 + $0x40] sm:$0xff]  ;;  %v35_v8 = vld [vmem:[%s429_s1 + $0x38] sm:$0xff] }
   0x4   :  { %49 = vmatpush.msra.mxu0 %v42_v1  ;;  %246 = vmatpush.msra.mxu3 %v42_v1  ;;  %v34_v9 = vld [vmem:[%s429_s1 + $0x30] sm:$0xff]  ;;  %v33_v10 = vld [vmem:[%s429_s1 + $0x28] sm:$0xff]  ;;  %v32_v11 = vld [vmem:[%s429_s1 + $0x20] sm:$0xff] }
   0x5   :  { %v31_v12 = vld [vmem:[%s429_s1 + $0x18] sm:$0xff]  ;;  %v30_v13 = vld [vmem:[%s429_s1 + $0x10] sm:$0xff]  ;;  %v29_v14 = vld [vmem:[%s429_s1 + $0x8] sm:$0xff] }
   0x6   :  { %50 = vmatpush.msra.mxu0 %v41_v2  ;;  %247 = vmatpush.msra.mxu3 %v41_v2  ;;  %v28_v15 = vld [vmem:[%s429_s1] sm:$0xff]  ;;  %v27_v17 = vld [vmem:[%s431_s0 + $0x8] sm:$0xff]  ;;  %v118_v18 = vld [vmem:[%s433_s3 + $0x38] sm:$0xff] }
   0x7   :  { %v26_v16 = vld [vmem:[%s431_s0] sm:$0xff]  ;;  %138 = vmatpush.msra.mxu1 %v118_v18  ;;  %v117_v19 = vld [vmem:[%s433_s3 + $0x30] sm:$0xff]  ;;  %v116_v20 = vld [vmem:[%s433_s3 + $0x28] sm:$0xff] }
   0x8   :  { %51 = vmatpush.msra.mxu0 %v40_v3  ;;  %248 = vmatpush.msra.mxu3 %v40_v3  ;;  %v115_v21 = vld [vmem:[%s433_s3 + $0x20] sm:$0xff]  ;;  %v114_v22 = vld [vmem:[%s433_s3 + $0x18] sm:$0xff]  ;;  %v113_v23 = vld [vmem:[%s433_s3 + $0x10] sm:$0xff] }
   0x9   :  { %139 = vmatpush.msra.mxu1 %v117_v19  ;;  %v261_v24 = vld [vmem:[%s430_s2] ss:$0 sm:$0xff]  ;;  %v112_v25 = vld [vmem:[%s433_s3 + $0x8] sm:$0xff]  ;;  %v196_v59 = vld [vmem:[%s435_s5 + $0x18] sm:$0xff] }
   0xa   :  { %52 = vmatpush.msra.mxu0 %v39_v4  ;;  %249 = vmatpush.msra.mxu3 %v39_v4  ;;  %v111_v26 = vld [vmem:[%s433_s3] sm:$0xff]  ;;  %v195_v60 = vld [vmem:[%s435_s5 + $0x10] sm:$0xff]  ;;  %v194_v62 = vld [vmem:[%s435_s5 + $0x8] sm:$0xff] }
   0xb   :  { %140 = vmatpush.msra.mxu1 %v116_v20  ;;  %220 = vmatpush.msra.mxu2 %v196_v59  ;;  %v262_v61 = vld [vmem:[%s432_s4] ss:$0 sm:$0xff] }
   0xc   :  { %53 = vmatpush.msra.mxu0 %v38_v5  ;;  %250 = vmatpush.msra.mxu3 %v38_v5  ;;  %v193_v63 = vld [vmem:[%s435_s5] sm:$0xff] }
   0xd   :  { %141 = vmatpush.msra.mxu1 %v115_v21  ;;  %221 = vmatpush.msra.mxu2 %v195_v60 }
   0xe   :  { %54 = vmatpush.msra.mxu0 %v37_v6  ;;  %251 = vmatpush.msra.mxu3 %v37_v6 }
   0xf   :  { %142 = vmatpush.msra.mxu1 %v114_v22  ;;  %222 = vmatpush.msra.mxu2 %v194_v62 }
  0x10   :  { %55 = vmatpush.msra.mxu0 %v36_v7  ;;  %252 = vmatpush.msra.mxu3 %v36_v7 }
  0x11   :  { %143 = vmatpush.msra.mxu1 %v113_v23  ;;  %223 = vmatpush.msra.mxu2 %v193_v63 }
  0x12   :  { %56 = vmatpush.msra.mxu0 %v35_v8  ;;  %253 = vmatpush.msra.mxu3 %v35_v8 }
  0x13   :  { %144 = vmatpush.msra.mxu1 %v112_v25 }
  0x14   :  { %57 = vmatpush.msra.mxu0 %v34_v9  ;;  %254 = vmatpush.msra.mxu3 %v34_v9 }
  0x15   :  { %145 = vmatpush.msra.mxu1 %v111_v26 }
  0x16   :  { %58 = vmatpush.msra.mxu0 %v33_v10  ;;  %255 = vmatpush.msra.mxu3 %v33_v10 }
  0x18   :  { %59 = vmatpush.msra.mxu0 %v32_v11  ;;  %256 = vmatpush.msra.mxu3 %v32_v11 }
  0x1a   :  { %60 = vmatpush.msra.mxu0 %v31_v12  ;;  %257 = vmatpush.msra.mxu3 %v31_v12 }
  0x1c   :  { %61 = vmatpush.msra.mxu0 %v30_v13  ;;  %258 = vmatpush.msra.mxu3 %v30_v13 }
  0x1e   :  { %62 = vmatpush.msra.mxu0 %v29_v14  ;;  %259 = vmatpush.msra.mxu3 %v29_v14 }
  0x20   :  { %63 = vmatpush.msra.mxu0 %v28_v15  ;;  %260 = vmatpush.msra.mxu3 %v28_v15 }
  0x21   :  { %64 = vmatmul.f32.vlgmr.msra.gmra.mxu0 %v26_v16  ;;  %67 = vmatmul.f32.vlgmr.msra.gmra.mxu3 %v27_v17 }
  0x9e   :  { %v65_v27 = vpop.f32.mrf.mxu0 }
  0x9f   :  { %v66_v28 = vadd.f32 %v261_v24, %v65_v27 }
  0xa1   :  { %v237_v29 = vmul.f32 -1.442695, %v66_v28 }
  0xa3   :  { %264 = vpow2.f32 %v237_v29 }
  0xa4   :  { %v68_v30 = vpop.f32.mrf.mxu3 }
  0xa5   :  { %v69_v31 = vadd.f32 %v261_v24, %v68_v30 }
  0xa7   :  { %v238_v32 = vmul.f32 -1.442695, %v69_v31 }
  0xa9   :  { %v265_v33 = vpop.eup %264  ;;  %266 = vpow2.f32 %v238_v32  ;;  %v263_v32 = vld [vmem:[%s434_s6] ss:$0 sm:$0xff] }
  0xaa   :  { %v77_v34 = vadd.f32 1.0, %v265_v33 }
  0xac   :  { %268 = vrcp.f32 %v77_v34  ;;  %v90_v40 = vand.u32 2147483648, %v77_v34  ;;  %v88_v42 = vand.u32 2147483647, %v77_v34  ;;  %vm84_vm1 = vweird.f32 %v77_v34 }
  0xae   :  { %v91_v46 = vor.u32 1.1754944e-38, %v90_v40  ;;  %vm89_vm3 = vcmp.eq.f32.partialorder %v88_v42, 8.507059e+37 }
  0xaf   :  { %v267_v35 = vpop.eup %266 }
  0xb0   :  { %v78_v36 = vadd.f32 1.0, %v267_v35 }
  0xb2   :  { %v269_v37 = vpop.eup %268  ;;  %270 = vrcp.f32 %v78_v36  ;;  %v105_v50 = vand.u32 2147483648, %v78_v36  ;;  %v103_v53 = vand.u32 2147483647, %v78_v36  ;;  %vm99_vm6 = vweird.f32 %v78_v36 }
  0xb3   :  { %v80_v38 = vmul.f32 %v269_v37, %v77_v34  ;;  %vm85_vm0 = vweird.f32 %v269_v37 }
  0xb4   :  { %vm86_vm2 = vmor %vm84_vm1, %vm85_vm0  ;;  %v106_v55 = vor.u32 1.1754944e-38, %v105_v50  ;;  %vm104_vm8 = vcmp.eq.f32.partialorder %v103_v53, 8.507059e+37 }
  0xb5   :  { %v81_v39 = vsub.f32 1.0, %v80_v38 }
  0xb7   :  { %v82_v41 = vmul.f32 %v269_v37, %v81_v39 }
  0xb8   :  { %v271_v43 = vpop.eup %270 }
  0xb9   :  { %v83_v44 = vadd.f32 %v269_v37, %v82_v41  ;;  %v95_v45 = vmul.f32 %v271_v43, %v78_v36  ;;  %vm100_vm5 = vweird.f32 %v271_v43 }
  0xba   :  { %vm101_vm7 = vmor %vm99_vm6, %vm100_vm5 }
  0xbb   :  { %v87_v47 = vsel %vm86_vm2, %v269_v37, %v83_v44  ;;  %v96_v48 = vsub.f32 1.0, %v95_v45 }
  0xbc   :  { %v92_v49 = vsel %vm89_vm3, %v91_v46, %v87_v47 }
  0xbd   :  { %v109_v51 = vmul.f32 %v92_v49, %v66_v28  ;;  %v97_v52 = vmul.f32 %v271_v43, %v96_v48 }
  0xbf   :  { %v98_v54 = vadd.f32 %v271_v43, %v97_v52  ;;  %239 = vmatmul.msk.f32.vlgmr.msra.gmra.mxu1 %vm123_vm4, %v109_v51 }
  0xc1   :  { %v102_v56 = vsel %vm101_vm7, %v271_v43, %v98_v54 }
  0xc2   :  { %v107_v57 = vsel %vm104_vm8, %v106_v55, %v102_v56 }
  0xc3   :  { %v110_v58 = vmul.f32 %v107_v57, %v69_v31 }
  0xc7   :  { %240 = vmatmul.msk.f32.gmra.mxu1 %vm123_vm4, %v110_v58 }
 0x13c   :  { %v147_v0 = vpop.f32.mrf.mxu1 }
 0x13d   :  { %v148_v1 = vadd.f32 %v262_v61, %v147_v0 }
 0x13f   :  { %v241_v2 = vmul.f32 -1.442695, %v148_v1 }
 0x141   :  { %272 = vpow2.f32 %v241_v2 }
 0x144   :  { %v150_v3 = vpop.f32.mrf.mxu1 }
 0x145   :  { %v151_v4 = vadd.f32 %v262_v61, %v150_v3 }
 0x147   :  { %v273_v5 = vpop.eup %272  ;;  %v242_v6 = vmul.f32 -1.442695, %v151_v4 }
 0x148   :  { %v159_v7 = vadd.f32 1.0, %v273_v5 }
 0x149   :  { %274 = vpow2.f32 %v242_v6 }
 0x14a   :  { %276 = vrcp.f32 %v159_v7  ;;  %v172_v13 = vand.u32 2147483648, %v159_v7  ;;  %v170_v15 = vand.u32 2147483647, %v159_v7  ;;  %vm166_vm10 = vweird.f32 %v159_v7 }
 0x14c   :  { %v173_v18 = vor.u32 1.1754944e-38, %v172_v13  ;;  %vm171_vm12 = vcmp.eq.f32.partialorder %v170_v15, 8.507059e+37 }
 0x14f   :  { %v275_v8 = vpop.eup %274 }
 0x150   :  { %v277_v9 = vpop.eup %276  ;;  %v160_v10 = vadd.f32 1.0, %v275_v8 }
 0x151   :  { %v162_v11 = vmul.f32 %v277_v9, %v159_v7  ;;  %vm167_vm9 = vweird.f32 %v277_v9 }
 0x152   :  { %278 = vrcp.f32 %v160_v10  ;;  %vm168_vm11 = vmor %vm166_vm10, %vm167_vm9  ;;  %v187_v24 = vand.u32 2147483648, %v160_v10  ;;  %v185_v26 = vand.u32 2147483647, %v160_v10  ;;  %vm181_vm15 = vweird.f32 %v160_v10 }
 0x153   :  { %v163_v12 = vsub.f32 1.0, %v162_v11 }
 0x154   :  { %v188_v28 = vor.u32 1.1754944e-38, %v187_v24  ;;  %vm186_vm1 = vcmp.eq.f32.partialorder %v185_v26, 8.507059e+37 }
 0x155   :  { %v164_v14 = vmul.f32 %v277_v9, %v163_v12 }
 0x157   :  { %v165_v16 = vadd.f32 %v277_v9, %v164_v14 }
 0x158   :  { %v279_v17 = vpop.eup %278 }
 0x159   :  { %v169_v19 = vsel %vm168_vm11, %v277_v9, %v165_v16  ;;  %v177_v20 = vmul.f32 %v279_v17, %v160_v10  ;;  %vm182_vm14 = vweird.f32 %v279_v17 }
 0x15a   :  { %v174_v21 = vsel %vm171_vm12, %v173_v18, %v169_v19  ;;  %vm183_vm0 = vmor %vm181_vm15, %vm182_vm14 }
 0x15b   :  { %v191_v22 = vmul.f32 %v174_v21, %v148_v1  ;;  %v178_v23 = vsub.f32 1.0, %v177_v20 }
 0x15d   :  { %v179_v25 = vmul.f32 %v279_v17, %v178_v23  ;;  %243 = vmatmul.msk.f32.vlgmr.msra.gmra.mxu2 %vm201_vm13, %v191_v22 }
 0x15f   :  { %v180_v27 = vadd.f32 %v279_v17, %v179_v25 }
 0x161   :  { %v184_v29 = vsel %vm183_vm0, %v279_v17, %v180_v27 }
 0x162   :  { %v189_v30 = vsel %vm186_vm1, %v188_v28, %v184_v29 }
 0x163   :  { %v192_v31 = vmul.f32 %v189_v30, %v151_v4 }
 0x165   :  { %244 = vmatmul.msk.f32.gmra.mxu2 %vm201_vm13, %v192_v31 }
 0x1e0   :  { %v225_v33 = vpop.f32.mrf.mxu2 }
 0x1e1   :  { %v226_v34 = vadd.f32 %v263_v32, %v225_v33 }
 0x1e3   :  { %231 = vst.msk [vmem:[%s436_s7] sm:$0xff] %vm201_vm13, %v226_v34 }
 0x1e8   :  { %v228_v35 = vpop.f32.mrf.mxu2 }
 0x1e9   :  { %v229_v36 = vadd.f32 %v263_v32, %v228_v35 }
 0x1eb   :  { %232 = vst.msk [vmem:[%s436_s7 + $0x8] sm:$0xff] %vm201_vm13, %v229_v36 }

// kernel: lrcn_forward.7
= control target key start
LH: loop header
LB: loop body
LE: loop exit
PB: predicated region body
PF: predicated region fallthrough
CT: control target
= control target key end

     0   :  { %s778_s0 = inlined_call_operand.vmem [shape: f32[2,256], index: 0, kind: input, shape index: {}]   ;;  %s779_s1 = inlined_call_operand.vmem [shape: f32[1,256], index: 1, kind: input, shape index: {}]   ;;  %s780_s2 = inlined_call_operand.vmem [shape: f32[1,256], index: 2, kind: input, shape index: {}]   ;;  %s781_s3 = inlined_call_operand.vmem [shape: f32[256,128], index: 3, kind: input, shape index: {}]   ;;  %s782_s4 = inlined_call_operand.vmem [shape: f32[1,128], index: 4, kind: input, shape index: {}]   ;;  %s783_s5 = inlined_call_operand.vmem [shape: f32[1,128], index: 5, kind: input, shape index: {}]   ;;  %s784_s6 = inlined_call_operand.vmem [shape: f32[1,128], index: 6, kind: input, shape index: {}]   ;;  %s785_s7 = inlined_call_operand.vmem [shape: f32[128,64], index: 7, kind: input, shape index: {}]   ;;  %s786_s8 = inlined_call_operand.vmem [shape: f32[1,64], index: 8, kind: input, shape index: {}]   ;;  %s787_s9 = inlined_call_operand.vmem [shape: f32[1,64], index: 9, kind: input, shape index: {}]   ;;  %s788_s10 = inlined_call_operand.vmem [shape: f32[1,64], index: 10, kind: input, shape index: {}]   ;;  %s789_s11 = inlined_call_operand.vmem [shape: f32[64,5], index: 11, kind: input, shape index: {}]   ;;  %s790_s12 = inlined_call_operand.vmem [shape: f32[1,5], index: 12, kind: input, shape index: {}]   ;;  %s791_s13 = inlined_call_operand.hbm [shape: f32[2,5], index: 13, kind: output, shape index: {}]  }
   0x1   :  { %v45_v0 = vld [vmem:[%s778_s0] sm:$0xf] }
   0x2   :  { %49 = vst [vmem:[#allocation1] ss:$4 sm:$0xff] %v45_v0 }
   0x3   :  { %18 = vsyncpa [#allocation3], 0  ;;  %vm54_vm0 = vcmask 1041408   ;;  %v476_v6 = vmov 256.0   ;;  %v477_v12 = vmov 269488144  }
   0x4   :  { %430 = vrcp.f32 %v476_v6  ;;  %v556_v13 = vunpack.c.l.s4 %v477_v12  ;;  %v135_v26 = vld [vmem:[%s781_s3 + $0x78] sm:$0xff]  ;;  %v134_v28 = vld [vmem:[%s781_s3 + $0x70] sm:$0xff]  ;;  %v133_v30 = vld [vmem:[%s781_s3 + $0x68] sm:$0xff]  ;;  %vm303_vm13 = vcmask 517120   ;;  %s480_s29 = smov [#allocation2]   ;;  %s406_s16 = sshll.u32 %s791_s13, 4  ;;  %s407_s16 = int_to_ptr.hbm [resolvable:$true] %s406_s16 }
   0x5   :  { %v151_v27 = vld [vmem:[%s781_s3 + $0xf8] sm:$0xff]  ;;  %162 = vmatpush.msra.mxu0 %v135_v26  ;;  %v150_v29 = vld [vmem:[%s781_s3 + $0xf0] sm:$0xff]  ;;  %v149_v31 = vld [vmem:[%s781_s3 + $0xe8] sm:$0xff]  ;;  %s404_s30 = sshll.u32 %s480_s29, 4  ;;  %s405_s30 = int_to_ptr.vmem [resolvable:$true] %s404_s30 }
   0x6   :  { %v71_v15 = vunpack.c.0.s8 %v556_v13  ;;  %182 = vmatpush.msra.mxu1 %v151_v27  ;;  %v132_v32 = vld [vmem:[%s781_s3 + $0x60] sm:$0xff]  ;;  %v131_v34 = vld [vmem:[%s781_s3 + $0x58] sm:$0xff]  ;;  %v130_v36 = vld [vmem:[%s781_s3 + $0x50] sm:$0xff] }
   0x7   :  { %163 = vmatpush.msra.mxu0 %v134_v28  ;;  %v148_v33 = vld [vmem:[%s781_s3 + $0xe0] sm:$0xff]  ;;  %v147_v35 = vld [vmem:[%s781_s3 + $0xd8] sm:$0xff]  ;;  %v146_v37 = vld [vmem:[%s781_s3 + $0xd0] sm:$0xff] }
   0x8   :  { %183 = vmatpush.msra.mxu1 %v150_v29  ;;  %v129_v38 = vld [vmem:[%s781_s3 + $0x48] sm:$0xff]  ;;  %v128_v40 = vld [vmem:[%s781_s3 + $0x40] sm:$0xff]  ;;  %v127_v42 = vld [vmem:[%s781_s3 + $0x38] sm:$0xff] }
   0x9   :  { %v50_v1 = vld.sshfl [vmem:[#allocation1] sm:$0xff pattern:$0x73625140]  ;;  %v51_v2 = vld.sshfl [vmem:[#allocation1 + $0x8] sm:$0xff pattern:$0x73625140]  ;;  %164 = vmatpush.msra.mxu0 %v133_v30 }
   0xa   :  { %v55_v3 = vsel %vm54_vm0, %v50_v1, 0.0  ;;  %v56_v4 = vsel %vm54_vm0, %v51_v2, 0.0  ;;  %v431_v7 = vpop.eup %430  ;;  %184 = vmatpush.msra.mxu1 %v149_v31  ;;  %v145_v39 = vld [vmem:[%s781_s3 + $0xc8] sm:$0xff]  ;;  %v144_v41 = vld [vmem:[%s781_s3 + $0xc0] sm:$0xff]  ;;  %v143_v43 = vld [vmem:[%s781_s3 + $0xb8] sm:$0xff] }
   0xb   :  { %v57_v5 = vadd.f32 %v56_v4, %v55_v3  ;;  %v61_v8 = vmul.f32 256.0, %v431_v7  ;;  %vm65_vm1 = vweird.f32 %v431_v7  ;;  %165 = vmatpush.msra.mxu0 %v132_v32  ;;  %v126_v44 = vld [vmem:[%s781_s3 + $0x30] sm:$0xff]  ;;  %v125_v46 = vld [vmem:[%s781_s3 + $0x28] sm:$0xff]  ;;  %v124_v48 = vld [vmem:[%s781_s3 + $0x20] sm:$0xff] }
   0xc   :  { %185 = vmatpush.msra.mxu1 %v148_v33  ;;  %v142_v45 = vld [vmem:[%s781_s3 + $0xb0] sm:$0xff]  ;;  %v141_v47 = vld [vmem:[%s781_s3 + $0xa8] sm:$0xff]  ;;  %v140_v49 = vld [vmem:[%s781_s3 + $0xa0] sm:$0xff] }
   0xd   :  { %58 = vadd.xlane.f32.xlu0 %v57_v5  ;;  %v62_v9 = vsub.f32 1.0, %v61_v8  ;;  %166 = vmatpush.msra.mxu0 %v131_v34  ;;  %v123_v50 = vld [vmem:[%s781_s3 + $0x18] sm:$0xff]  ;;  %v122_v52 = vld [vmem:[%s781_s3 + $0x10] sm:$0xff]  ;;  %v121_v56 = vld [vmem:[%s781_s3 + $0x8] sm:$0xff] }
   0xe   :  { %186 = vmatpush.msra.mxu1 %v147_v35  ;;  %v139_v51 = vld [vmem:[%s781_s3 + $0x98] sm:$0xff]  ;;  %v138_v54 = vld [vmem:[%s781_s3 + $0x90] sm:$0xff]  ;;  %v137_v57 = vld [vmem:[%s781_s3 + $0x88] sm:$0xff] }
   0xf   :  { %v63_v10 = vmul.f32 %v431_v7, %v62_v9  ;;  %167 = vmatpush.msra.mxu0 %v130_v36  ;;  %v120_v59 = vld [vmem:[%s781_s3] sm:$0xff] }
  0x10   :  { %187 = vmatpush.msra.mxu1 %v146_v37  ;;  %v136_v60 = vld [vmem:[%s781_s3 + $0x80] sm:$0xff] }
  0x11   :  { %v64_v11 = vadd.f32 %v431_v7, %v63_v10  ;;  %168 = vmatpush.msra.mxu0 %v129_v38  ;;  %v46_v63 = vld [vmem:[%s779_s1] sm:$0x3]  ;;  %v276_v38 = vld [vmem:[%s785_s7 + $0x78] sm:$0xff] }
  0x12   :  { %188 = vmatpush.msra.mxu1 %v145_v39  ;;  %v47_v1 = vld [vmem:[%s780_s2] sm:$0x3]  ;;  %v108_v2 = vperm.slane %v46_v63, 1  ;;  %v107_v6 = vperm.slane %v46_v63, 0  ;;  %v275_v39 = vld [vmem:[%s785_s7 + $0x70] sm:$0xff]  ;;  %281 = vmatpush.msra.mxu2 %v276_v38 }
  0x13   :  { %v558_v14 = vsel %vm65_vm1, %v431_v7, %v64_v11  ;;  %169 = vmatpush.msra.mxu0 %v128_v40  ;;  %v115_v4 = vperm.slane %v47_v1, 1  ;;  %v114_v9 = vperm.slane %v47_v1, 0  ;;  %v274_v40 = vld [vmem:[%s785_s7 + $0x68] sm:$0xff]  ;;  %v424_v63 = vld [vmem:[%s783_s5] ss:$0 sm:$0xff] }
  0x14   :  { %189 = vmatpush.msra.mxu1 %v144_v41  ;;  %v109_v7 = vrot.slane %v108_v2, 6  ;;  %282 = vmatpush.msra.mxu2 %v275_v39  ;;  %v273_v41 = vld [vmem:[%s785_s7 + $0x60] sm:$0xff]  ;;  %v364_v39 = vld [vmem:[%s789_s11 + $0x18] sm:$0xff] }
  0x15   :  { %170 = vmatpush.msra.mxu0 %v127_v42  ;;  %v116_v10 = vrot.slane %v115_v4, 6  ;;  %v272_v42 = vld [vmem:[%s785_s7 + $0x58] sm:$0xff]  ;;  %v425_v2 = vld [vmem:[%s784_s6] ss:$0 sm:$0xff] }
  0x16   :  { %190 = vmatpush.msra.mxu1 %v143_v43  ;;  %283 = vmatpush.msra.mxu2 %v274_v40  ;;  %v271_v43 = vld [vmem:[%s785_s7 + $0x50] sm:$0xff]  ;;  %v365_v38 = vld [vmem:[%s789_s11 + $0x20] sm:$0xff] }
  0x17   :  { %171 = vmatpush.msra.mxu0 %v126_v44  ;;  %v270_v44 = vld [vmem:[%s785_s7 + $0x48] sm:$0xff]  ;;  %v363_v40 = vld [vmem:[%s789_s11 + $0x10] sm:$0xff] }
  0x18   :  { %191 = vmatpush.msra.mxu1 %v142_v45  ;;  %284 = vmatpush.msra.mxu2 %v273_v41 }
  0x19   :  { %172 = vmatpush.msra.mxu0 %v125_v46  ;;  %v269_v46 = vld [vmem:[%s785_s7 + $0x40] sm:$0xff] }
  0x1a   :  { %192 = vmatpush.msra.mxu1 %v141_v47  ;;  %285 = vmatpush.msra.mxu2 %v272_v42 }
  0x1b   :  { %173 = vmatpush.msra.mxu0 %v124_v48  ;;  %v268_v48 = vld [vmem:[%s785_s7 + $0x38] sm:$0xff] }
  0x1c   :  { %193 = vmatpush.msra.mxu1 %v140_v49  ;;  %286 = vmatpush.msra.mxu2 %v271_v43  ;;  %v362_v43 = vld [vmem:[%s789_s11 + $0x8] sm:$0xff] }
  0x1d   :  { %174 = vmatpush.msra.mxu0 %v123_v50  ;;  %v267_v50 = vld [vmem:[%s785_s7 + $0x30] sm:$0xff] }
  0x1e   :  { %194 = vmatpush.msra.mxu1 %v139_v51  ;;  %287 = vmatpush.msra.mxu2 %v270_v44  ;;  %v266_v51 = vld [vmem:[%s785_s7 + $0x28] sm:$0xff] }
  0x1f   :  { %175 = vmatpush.msra.mxu0 %v122_v52  ;;  %v265_v52 = vld [vmem:[%s785_s7 + $0x20] sm:$0xff] }
  0x20   :  { %195 = vmatpush.msra.mxu1 %v138_v54  ;;  %288 = vmatpush.msra.mxu2 %v269_v46 }
  0x21   :  { %176 = vmatpush.msra.mxu0 %v121_v56  ;;  %v263_v56 = vld [vmem:[%s785_s7 + $0x10] sm:$0xff] }
  0x22   :  { %196 = vmatpush.msra.mxu1 %v137_v57  ;;  %289 = vmatpush.msra.mxu2 %v268_v48 }
  0x23   :  { %177 = vmatpush.msra.mxu0 %v120_v59 }
  0x24   :  { %197 = vmatpush.msra.mxu1 %v136_v60  ;;  %290 = vmatpush.msra.mxu2 %v267_v50  ;;  %v261_v60 = vld [vmem:[%s785_s7] sm:$0xff] }
  0x26   :  { %291 = vmatpush.msra.mxu2 %v266_v51 }
  0x28   :  { %292 = vmatpush.msra.mxu2 %v265_v52  ;;  %v427_v52 = vld [vmem:[%s787_s9] ss:$0 sm:$0xff] }
  0x80   :  { %v59_v16 = vpop.xlane.xlu0 %58 }
  0x81   :  { %v67_v17 = vmul.f32 %v558_v14, %v59_v16 }
  0x83   :  { %v72_v18 = vperm.slane %v67_v17, %v71_v15  ;;  %v117_v17 = vsel %vm54_vm0, %v114_v9, %v116_v10 }
  0x85   :  { %v564_v19 = vsub.f32 %v45_v0, %v72_v18 }
  0x87   :  { %v75_v20 = vmul.f32 %v564_v19, %v564_v19 }
  0x89   :  { %77 = vst [vmem:[#allocation1] ss:$4 sm:$0xff] %v75_v20 }
  0x90   :  { %v78_v21 = vld.sshfl [vmem:[#allocation1] sm:$0xff pattern:$0x73625140]  ;;  %v79_v22 = vld.sshfl [vmem:[#allocation1 + $0x8] sm:$0xff pattern:$0x73625140] }
  0x91   :  { %v82_v23 = vsel %vm54_vm0, %v78_v21, 0.0  ;;  %v83_v24 = vsel %vm54_vm0, %v79_v22, 0.0 }
  0x92   :  { %v84_v25 = vadd.f32 %v83_v24, %v82_v23  ;;  %v423_v23 = vld [vmem:[%s782_s4] ss:$0 sm:$0xff] }
  0x94   :  { %85 = vadd.xlane.f32.xlu0 %v84_v25 }
 0x107   :  { %v86_v53 = vpop.xlane.xlu0 %85 }
 0x108   :  { %v87_v55 = vmul.f32 %v86_v53, %v558_v14  ;;  %v110_v14 = vsel %vm54_vm0, %v107_v6, %v109_v7  ;;  %v264_v53 = vld [vmem:[%s785_s7 + $0x18] sm:$0xff] }
 0x109   :  { %293 = vmatpush.msra.mxu2 %v264_v53 }
 0x10a   :  { %v88_v58 = vadd.f32 1e-05, %v87_v55 }
 0x10b   :  { %294 = vmatpush.msra.mxu2 %v263_v56 }
 0x10c   :  { %432 = vrsqrt.f32 %v88_v58  ;;  %vm95_vm3 = vweird.f32 %v88_v58 }
 0x112   :  { %v433_v61 = vpop.eup %432 }
 0x113   :  { %v90_v62 = vmul.f32 %v433_v61, %v88_v58  ;;  %vm96_vm2 = vweird.f32 %v433_v61  ;;  %v262_v58 = vld [vmem:[%s785_s7 + $0x8] sm:$0xff] }
 0x114   :  { %vm97_vm4 = vmor %vm95_vm3, %vm96_vm2  ;;  %295 = vmatpush.msra.mxu2 %v262_v58 }
 0x115   :  { %v91_v0 = vmul.f32 %v433_v61, %v90_v62 }
 0x116   :  { %296 = vmatpush.msra.mxu2 %v261_v60 }
 0x117   :  { %v92_v3 = vmul.f32 0.5, %v91_v0 }
 0x119   :  { %v93_v5 = vsub.f32 1.5, %v92_v3 }
 0x11b   :  { %v94_v8 = vmul.f32 %v433_v61, %v93_v5 }
 0x11d   :  { %v98_v11 = vsel %vm97_vm4, %v433_v61, %v94_v8 }
 0x11e   :  { %v103_v12 = vperm.slane %v98_v11, %v71_v15 }
 0x120   :  { %v105_v16 = vmul.f32 %v103_v12, %v564_v19  ;;  %v478_v19 = vmov 128.0  }
 0x121   :  { %434 = vrcp.f32 %v478_v19 }
 0x122   :  { %v112_v18 = vmul.f32 %v110_v14, %v105_v16 }
 0x124   :  { %v119_v20 = vadd.f32 %v117_v17, %v112_v18 }
 0x126   :  { %157 = vst [vmem:[#allocation1] ss:$4 sm:$0xff] %v119_v20 }
 0x127   :  { %v435_v27 = vpop.eup %434 }
 0x128   :  { %v208_v28 = vmul.f32 128.0, %v435_v27  ;;  %vm212_vm5 = vweird.f32 %v435_v27 }
 0x12a   :  { %v209_v29 = vsub.f32 1.0, %v208_v28 }
 0x12c   :  { %v210_v30 = vmul.f32 %v435_v27, %v209_v29 }
 0x12d   :  { %v158_v21 = vld.sshfl [vmem:[#allocation1] sm:$0xff pattern:$0x73625140]  ;;  %v159_v22 = vld.sshfl [vmem:[#allocation1 + $0x8] sm:$0xff pattern:$0x73625140] }
 0x12e   :  { %178 = vmatmul.f32.vlgmr.msra.gmra.mxu0 %v158_v21  ;;  %198 = vmatmul.f32.vlgmr.msra.gmra.mxu1 %v159_v22  ;;  %v211_v31 = vadd.f32 %v435_v27, %v210_v30  ;;  %v426_v22 = vld [vmem:[%s786_s8] ss:$0 sm:$0xff] }
 0x130   :  { %v213_v32 = vsel %vm212_vm5, %v435_v27, %v211_v31 }
 0x1ab   :  { %v179_v24 = vpop.f32.mrf.mxu0  ;;  %v199_v15 = vpop.f32.mrf.mxu1 }
 0x1ac   :  { %v180_v13 = vadd.f32 %v423_v23, %v179_v24 }
 0x1ae   :  { %v200_v25 = vadd.f32 %v199_v15, %v180_v13  ;;  %v479_v15 = vmov 64.0  }
 0x1b0   :  { %v204_v26 = vsel %vm54_vm0, %v200_v25, 0.0 }
 0x1b1   :  { %205 = vadd.xlane.f32.xlu1 %v204_v26 }
 0x224   :  { %v206_v33 = vpop.xlane.xlu1 %205 }
 0x225   :  { %v214_v34 = vmul.f32 %v213_v32, %v206_v33 }
 0x227   :  { %v215_v35 = vsub.f32 %v200_v25, %v214_v34 }
 0x229   :  { %v216_v36 = vmul.f32 %v215_v35, %v215_v35 }
 0x22b   :  { %v217_v37 = vsel %vm54_vm0, %v216_v36, 0.0  ;;  %v367_v36 = vld [vmem:[%s789_s11 + $0x30] sm:$0xff] }
 0x22c   :  { %218 = vadd.xlane.f32.xlu1 %v217_v37  ;;  %v366_v37 = vld [vmem:[%s789_s11 + $0x28] sm:$0xff] }
 0x29f   :  { %v219_v45 = vpop.xlane.xlu1 %218 }
 0x2a0   :  { %v220_v47 = vmul.f32 %v219_v45, %v213_v32  ;;  %v361_v45 = vld [vmem:[%s789_s11] sm:$0xff] }
 0x2a2   :  { %v221_v49 = vadd.f32 1e-05, %v220_v47 }
 0x2a4   :  { %436 = vrsqrt.f32 %v221_v49  ;;  %vm228_vm7 = vweird.f32 %v221_v49 }
 0x2aa   :  { %v437_v54 = vpop.eup %436 }
 0x2ab   :  { %v223_v55 = vmul.f32 %v437_v54, %v221_v49  ;;  %vm229_vm6 = vweird.f32 %v437_v54 }
 0x2ac   :  { %vm230_vm8 = vmor %vm228_vm7, %vm229_vm6  ;;  %vm373_vm6 = vcmask 523264   ;;  %vm397_vm7 = vcmask 33792  }
 0x2ad   :  { %v224_v57 = vmul.f32 %v437_v54, %v223_v55  ;;  %v428_v55 = vld [vmem:[%s788_s10] ss:$0 sm:$0xff] }
 0x2af   :  { %v225_v59 = vmul.f32 0.5, %v224_v57 }
 0x2b1   :  { %v226_v61 = vsub.f32 1.5, %v225_v59 }
 0x2b3   :  { %v227_v62 = vmul.f32 %v437_v54, %v226_v61 }
 0x2b5   :  { %v231_v0 = vsel %vm230_vm8, %v437_v54, %v227_v62 }
 0x2b6   :  { %v232_v1 = vmul.f32 %v231_v0, %v215_v35  ;;  %v368_v35 = vld [vmem:[%s789_s11 + $0x38] sm:$0xff] }
 0x2b7   :  { %385 = vmatpush.msra.mxu3 %v368_v35 }
 0x2b8   :  { %v236_v3 = vmul.f32 %v424_v63, %v232_v1 }
 0x2b9   :  { %386 = vmatpush.msra.mxu3 %v367_v36 }
 0x2ba   :  { %v240_v4 = vadd.f32 %v425_v2, %v236_v3 }
 0x2bb   :  { %387 = vmatpush.msra.mxu3 %v366_v37 }
 0x2bc   :  { %v415_v5 = vmul.f32 -1.442695, %v240_v4 }
 0x2bd   :  { %388 = vmatpush.msra.mxu3 %v365_v38 }
 0x2be   :  { %438 = vpow2.f32 %v415_v5 }
 0x2bf   :  { %389 = vmatpush.msra.mxu3 %v364_v39 }
 0x2c1   :  { %390 = vmatpush.msra.mxu3 %v363_v40 }
 0x2c3   :  { %391 = vmatpush.msra.mxu3 %v362_v43 }
 0x2c4   :  { %v439_v6 = vpop.eup %438 }
 0x2c5   :  { %v244_v7 = vadd.f32 1.0, %v439_v6  ;;  %392 = vmatpush.msra.mxu3 %v361_v45 }
 0x2c7   :  { %440 = vrcp.f32 %v244_v7  ;;  %v256_v11 = vand.u32 2147483648, %v244_v7  ;;  %v254_v14 = vand.u32 2147483647, %v244_v7  ;;  %vm250_vm10 = vweird.f32 %v244_v7 }
 0x2c8   :  { %442 = vrcp.f32 %v479_v15 }
 0x2c9   :  { %v257_v17 = vor.u32 1.1754944e-38, %v256_v11  ;;  %vm255_vm12 = vcmp.eq.f32.partialorder %v254_v14, 8.507059e+37 }
 0x2cd   :  { %v441_v8 = vpop.eup %440 }
 0x2ce   :  { %v246_v9 = vmul.f32 %v441_v8, %v244_v7  ;;  %vm251_vm9 = vweird.f32 %v441_v8  ;;  %v443_v25 = vpop.eup %442 }
 0x2cf   :  { %vm252_vm11 = vmor %vm250_vm10, %vm251_vm9  ;;  %v308_v26 = vmul.f32 64.0, %v443_v25  ;;  %vm312_vm14 = vweird.f32 %v443_v25 }
 0x2d0   :  { %v247_v10 = vsub.f32 1.0, %v246_v9 }
 0x2d1   :  { %v309_v19 = vsub.f32 1.0, %v308_v26 }
 0x2d2   :  { %v248_v12 = vmul.f32 %v441_v8, %v247_v10 }
 0x2d3   :  { %v310_v27 = vmul.f32 %v443_v25, %v309_v19 }
 0x2d4   :  { %v249_v16 = vadd.f32 %v441_v8, %v248_v12 }
 0x2d5   :  { %v311_v28 = vadd.f32 %v443_v25, %v310_v27 }
 0x2d6   :  { %v253_v18 = vsel %vm252_vm11, %v441_v8, %v249_v16  ;;  %v429_v8 = vld [vmem:[%s790_s12] ss:$0 sm:$0xff] }
 0x2d7   :  { %v258_v20 = vsel %vm255_vm12, %v257_v17, %v253_v18  ;;  %v313_v29 = vsel %vm312_vm14, %v443_v25, %v311_v28 }
 0x2d8   :  { %v260_v21 = vmul.f32 %v258_v20, %v240_v4 }
 0x2da   :  { %297 = vmatmul.f32.vlgmr.msra.gmra.mxu2 %v260_v21 }
 0x35d   :  { %v298_v23 = vpop.f32.mrf.mxu2 }
 0x35e   :  { %v299_v24 = vadd.f32 %v426_v22, %v298_v23 }
 0x360   :  { %v304_v13 = vsel %vm303_vm13, %v299_v24, 0.0 }
 0x361   :  { %305 = vadd.xlane.f32.xlu2 %v304_v13 }
 0x3d4   :  { %v306_v30 = vpop.xlane.xlu2 %305 }
 0x3d5   :  { %v314_v31 = vmul.f32 %v313_v29, %v306_v30 }
 0x3d7   :  { %v315_v32 = vsub.f32 %v299_v24, %v314_v31 }
 0x3d9   :  { %v316_v33 = vmul.f32 %v315_v32, %v315_v32 }
 0x3db   :  { %v317_v34 = vsel %vm303_vm13, %v316_v33, 0.0 }
 0x3dc   :  { %318 = vadd.xlane.f32.xlu2 %v317_v34 }
 0x44f   :  { %v319_v41 = vpop.xlane.xlu2 %318 }
 0x450   :  { %v320_v42 = vmul.f32 %v319_v41, %v313_v29 }
 0x452   :  { %v321_v44 = vadd.f32 1e-05, %v320_v42 }
 0x454   :  { %444 = vrsqrt.f32 %v321_v44  ;;  %vm328_vm0 = vweird.f32 %v321_v44 }
 0x45a   :  { %v445_v46 = vpop.eup %444 }
 0x45b   :  { %v323_v47 = vmul.f32 %v445_v46, %v321_v44  ;;  %vm329_vm15 = vweird.f32 %v445_v46 }
 0x45c   :  { %vm330_vm1 = vmor %vm328_vm0, %vm329_vm15 }
 0x45d   :  { %v324_v48 = vmul.f32 %v445_v46, %v323_v47 }
 0x45f   :  { %v325_v49 = vmul.f32 0.5, %v324_v48 }
 0x461   :  { %v326_v50 = vsub.f32 1.5, %v325_v49 }
 0x463   :  { %v327_v51 = vmul.f32 %v445_v46, %v326_v50 }
 0x465   :  { %v331_v53 = vsel %vm330_vm1, %v445_v46, %v327_v51 }
 0x466   :  { %v332_v54 = vmul.f32 %v331_v53, %v315_v32 }
 0x468   :  { %v336_v56 = vmul.f32 %v427_v52, %v332_v54 }
 0x46a   :  { %v340_v57 = vadd.f32 %v428_v55, %v336_v56 }
 0x46c   :  { %v416_v58 = vmul.f32 -1.442695, %v340_v57 }
 0x46e   :  { %446 = vpow2.f32 %v416_v58 }
 0x474   :  { %v447_v59 = vpop.eup %446 }
 0x475   :  { %v344_v60 = vadd.f32 1.0, %v447_v59 }
 0x477   :  { %448 = vrcp.f32 %v344_v60  ;;  %v356_v0 = vand.u32 2147483648, %v344_v60  ;;  %v354_v2 = vand.u32 2147483647, %v344_v60  ;;  %vm350_vm3 = vweird.f32 %v344_v60 }
 0x479   :  { %v357_v4 = vor.u32 1.1754944e-38, %v356_v0  ;;  %vm355_vm5 = vcmp.eq.f32.partialorder %v354_v2, 8.507059e+37 }
 0x47d   :  { %v449_v61 = vpop.eup %448 }
 0x47e   :  { %v346_v62 = vmul.f32 %v449_v61, %v344_v60  ;;  %vm351_vm2 = vweird.f32 %v449_v61 }
 0x47f   :  { %vm352_vm4 = vmor %vm350_vm3, %vm351_vm2 }
 0x480   :  { %v347_v63 = vsub.f32 1.0, %v346_v62 }
 0x482   :  { %v348_v1 = vmul.f32 %v449_v61, %v347_v63 }
 0x484   :  { %v349_v3 = vadd.f32 %v449_v61, %v348_v1 }
 0x486   :  { %v353_v5 = vsel %vm352_vm4, %v449_v61, %v349_v3 }
 0x487   :  { %v358_v6 = vsel %vm355_vm5, %v357_v4, %v353_v5 }
 0x488   :  { %v360_v7 = vmul.f32 %v358_v6, %v340_v57 }
 0x48a   :  { %417 = vmatmul.msk.f32.vlgmr.msra.gmra.mxu3 %vm373_vm6, %v360_v7 }
 0x50d   :  { %v394_v9 = vpop.f32.mrf.mxu3 }
 0x50e   :  { %v395_v10 = vadd.f32 %v429_v8, %v394_v9 }
 0x510   :  { %398 = vst.msk [vmem:[#allocation2] sm:$0x3] %vm397_vm7, %v395_v10 }
 0x511   :  { %409 = dma.vmem_to_hbm [thread:$0]  %s405_s30, 32, %s407_s16, [#allocation3]  }
 0x512   :  { %474 = dma.done.wait [#allocation3], 32  }
 0x513   :  { %475 = vsyncadd [#allocation3], 4294967264 }
 0x514   :  { %414 = vsyncpa [#allocation3], 1 }

// kernel: lrcn_forward.6
= control target key start
LH: loop header
LB: loop body
LE: loop exit
PB: predicated region body
PF: predicated region fallthrough
CT: control target
= control target key end

     0   :  { %vm48_vm0 = vcmask 261120   ;;  %v1659_v6 = vmov 32.0   ;;  %vm178_vm8 = vcmask 1040384   ;;  %vm182_vm9 = vcmask 1041408   ;;  %s3150_s0 = inlined_call_operand.vmem [shape: f32[16,32], index: 0, kind: input, shape index: {}]   ;;  %s3151_s1 = inlined_call_operand.vmem [shape: f32[1,32], index: 1, kind: input, shape index: {}]   ;;  %s3152_s3 = inlined_call_operand.vmem [shape: f32[1,128], index: 3, kind: input, shape index: {}]   ;;  %s3153_s2 = inlined_call_operand.vmem [shape: f32[32,128], index: 2, kind: input, shape index: {}]   ;;  %s3154_s4 = inlined_call_operand.vmem [shape: f32[3,64], index: 4, kind: input, shape index: {}]   ;;  %s3155_s5 = inlined_call_operand.vmem [shape: f32[1,64], index: 5, kind: input, shape index: {}]   ;;  %s3156_s6 = inlined_call_operand.vmem [shape: f32[64,16], index: 6, kind: input, shape index: {}]   ;;  %s3157_s8 = inlined_call_operand.vmem [shape: f32[16,64], index: 8, kind: input, shape index: {}]   ;;  %s3158_s7 = inlined_call_operand.vmem [shape: f32[32,64], index: 7, kind: input, shape index: {}]   ;;  %s3159_s9 = inlined_call_operand.vmem [shape: f32[1,64], index: 9, kind: input, shape index: {}]   ;;  %s3160_s10 = inlined_call_operand.vmem [shape: f32[16,64], index: 10, kind: input, shape index: {}]   ;;  %s3161_s11 = inlined_call_operand.vmem [shape: f32[128,32], index: 11, kind: input, shape index: {}]   ;;  %s3162_s12 = inlined_call_operand.vmem [shape: f32[1,32], index: 12, kind: input, shape index: {}]   ;;  %s3163_s13 = inlined_call_operand.vmem [shape: f32[16,32], index: 13, kind: output, shape index: {}]  }
   0x1   :  { %v44_v0 = vld [vmem:[%s3150_s0] sm:$0xff]  ;;  %v45_v2 = vld [vmem:[%s3150_s0 + $0x8] sm:$0xff]  ;;  %1559 = vrcp.f32 %v1659_v6  ;;  %v97_v10 = vld [vmem:[%s3153_s2 + $0x18] sm:$0xff]  ;;  %vm257_vm14 = vcmask 523264  }
   0x2   :  { %v46_v1 = vmul.f32 %v44_v0, %v44_v0  ;;  %v47_v4 = vmul.f32 %v45_v2, %v45_v2  ;;  %120 = vmatpush.msra.mxu0 %v97_v10  ;;  %v96_v11 = vld [vmem:[%s3153_s2 + $0x10] sm:$0xff]  ;;  %v95_v13 = vld [vmem:[%s3153_s2 + $0x8] sm:$0xff]  ;;  %v94_v14 = vld [vmem:[%s3153_s2] sm:$0xff] }
   0x3   :  { %v1551_v31 = vld [vmem:[%s3151_s1] ss:$0 sm:$0xff]  ;;  %v256_v42 = vld [vmem:[%s3156_s6 + $0x38] sm:$0xff]  ;;  %v255_v43 = vld [vmem:[%s3156_s6 + $0x30] sm:$0xff] }
   0x4   :  { %v49_v3 = vsel %vm48_vm0, %v46_v1, 0.0  ;;  %v52_v5 = vsel %vm48_vm0, %v47_v4, 0.0  ;;  %121 = vmatpush.msra.mxu0 %v96_v11  ;;  %272 = vmatpush.msra.mxu1 %v256_v42  ;;  %v254_v44 = vld [vmem:[%s3156_s6 + $0x28] sm:$0xff]  ;;  %v253_v45 = vld [vmem:[%s3156_s6 + $0x20] sm:$0xff]  ;;  %v252_v46 = vld [vmem:[%s3156_s6 + $0x18] sm:$0xff] }
   0x5   :  { %50 = vadd.xlane.f32.xlu0 %v49_v3  ;;  %v1552_v47 = vld [vmem:[%s3152_s3] ss:$0 sm:$0xff]  ;;  %v251_v48 = vld [vmem:[%s3156_s6 + $0x10] sm:$0xff]  ;;  %v250_v50 = vld [vmem:[%s3156_s6 + $0x8] sm:$0xff] }
   0x6   :  { %122 = vmatpush.msra.mxu0 %v95_v13  ;;  %273 = vmatpush.msra.mxu1 %v255_v43  ;;  %v1553_v52 = vld [vmem:[%s3154_s4 + $0x2] ss:$0 sm:$0xff]  ;;  %v1554_v54 = vld [vmem:[%s3154_s4 + $0x1] ss:$0 sm:$0xff]  ;;  %v1555_v57 = vld [vmem:[%s3154_s4] ss:$0 sm:$0xff] }
   0x7   :  { %v1560_v7 = vpop.eup %1559  ;;  %v249_v53 = vld [vmem:[%s3156_s6] sm:$0xff]  ;;  %v333_v43 = vld [vmem:[%s3157_s8 + $0x8] sm:$0xff] }
   0x8   :  { %v56_v8 = vmul.f32 32.0, %v1560_v7  ;;  %123 = vmatpush.msra.mxu0 %v94_v14  ;;  %vm60_vm1 = vweird.f32 %v1560_v7  ;;  %274 = vmatpush.msra.mxu1 %v254_v44  ;;  %v1556_v1 = vld [vmem:[%s3155_s5] ss:$0 sm:$0xff] }
   0x9   :  { %v287_v44 = vld [vmem:[%s3158_s7] sm:$0xff] }
   0xa   :  { %v57_v9 = vsub.f32 1.0, %v56_v8  ;;  %275 = vmatpush.msra.mxu1 %v253_v45  ;;  %359 = vmatpush.msrb.mxu0 %v333_v43  ;;  %v288_v45 = vld [vmem:[%s3158_s7 + $0x8] sm:$0xff] }
   0xc   :  { %v58_v12 = vmul.f32 %v1560_v7, %v57_v9  ;;  %276 = vmatpush.msra.mxu1 %v252_v46  ;;  %v289_v46 = vld [vmem:[%s3158_s7 + $0x10] sm:$0xff] }
   0xd   :  { %53 = vadd.xlane.f32.xlu0 %v52_v5 }
   0xe   :  { %v59_v15 = vadd.f32 %v1560_v7, %v58_v12  ;;  %277 = vmatpush.msra.mxu1 %v251_v48  ;;  %v332_v48 = vld [vmem:[%s3157_s8] sm:$0xff] }
   0xf   :  { %360 = vmatpush.msrb.mxu0 %v332_v48 }
  0x10   :  { %v61_v16 = vsel %vm60_vm1, %v1560_v7, %v59_v15  ;;  %278 = vmatpush.msra.mxu1 %v250_v50  ;;  %v3181_v50 = vmov 1  }
  0x11   :  { %1487 = vset.pattern.permute.xlu0 %v3181_v50 }
  0x12   :  { %279 = vmatpush.msra.mxu1 %v249_v53 }
  0x78   :  { %v51_v17 = vpop.xlane.xlu0 %50 }
  0x79   :  { %v62_v18 = vmul.f32 %v61_v16, %v51_v17 }
  0x7b   :  { %v64_v19 = vadd.f32 1e-05, %v62_v18 }
  0x7d   :  { %1561 = vrsqrt.f32 %v64_v19  ;;  %vm72_vm3 = vweird.f32 %v64_v19 }
  0x80   :  { %v54_v20 = vpop.xlane.xlu0 %53 }
  0x81   :  { %v63_v21 = vmul.f32 %v61_v16, %v54_v20 }
  0x83   :  { %v1562_v22 = vpop.eup %1561  ;;  %v65_v23 = vadd.f32 1e-05, %v63_v21 }
  0x84   :  { %v67_v24 = vmul.f32 %v1562_v22, %v64_v19  ;;  %vm73_vm2 = vweird.f32 %v1562_v22 }
  0x85   :  { %1563 = vrsqrt.f32 %v65_v23  ;;  %vm74_vm4 = vmor %vm72_vm3, %vm73_vm2  ;;  %vm82_vm6 = vweird.f32 %v65_v23 }
  0x86   :  { %v68_v25 = vmul.f32 %v1562_v22, %v67_v24 }
  0x88   :  { %v69_v26 = vmul.f32 0.5, %v68_v25 }
  0x8a   :  { %v70_v27 = vsub.f32 1.5, %v69_v26 }
  0x8b   :  { %v1564_v28 = vpop.eup %1563 }
  0x8c   :  { %v71_v29 = vmul.f32 %v1562_v22, %v70_v27  ;;  %v77_v30 = vmul.f32 %v1564_v28, %v65_v23  ;;  %vm83_vm5 = vweird.f32 %v1564_v28 }
  0x8d   :  { %vm84_vm7 = vmor %vm82_vm6, %vm83_vm5 }
  0x8e   :  { %v78_v32 = vmul.f32 %v1564_v28, %v77_v30  ;;  %v75_v33 = vsel %vm74_vm4, %v1562_v22, %v71_v29  ;;  %vm338_vm4 = vcmask 130048  }
  0x8f   :  { %v86_v34 = vmul.f32 %v75_v33, %v44_v0 }
  0x90   :  { %v79_v35 = vmul.f32 0.5, %v78_v32 }
  0x91   :  { %v92_v36 = vmul.f32 %v1551_v31, %v86_v34 }
  0x92   :  { %v80_v37 = vsub.f32 1.5, %v79_v35 }
  0x93   :  { %1452 = vmatmul.msk.f32.vlgmr.msra.gmra.mxu0 %vm48_vm0, %v92_v36 }
  0x94   :  { %v81_v38 = vmul.f32 %v1564_v28, %v80_v37 }
  0x96   :  { %v85_v39 = vsel %vm84_vm7, %v1564_v28, %v81_v38 }
  0x97   :  { %v87_v40 = vmul.f32 %v85_v39, %v45_v2 }
  0x99   :  { %v93_v41 = vmul.f32 %v1551_v31, %v87_v40 }
  0x9b   :  { %1453 = vmatmul.msk.f32.gmra.mxu0 %vm48_vm0, %v93_v41 }
 0x110   :  { %v125_v49 = vpop.f32.mrf.mxu0 }
 0x111   :  { %v1796_v51 = vadd.f32 %v1552_v47, %v125_v49  ;;  %v3177_v49 = vmov 2  }
 0x112   :  { %1488 = vset.pattern.permute.xlu2 %v3177_v49 }
 0x113   :  { %v176_v55 = vrot.slane %v1796_v51, 7  ;;  %v180_v56 = vrot.slane %v1796_v51, 6  ;;  %v185_v60 = vmul.f32 %v1553_v52, %v1796_v51 }
 0x115   :  { %v179_v58 = vsel %vm178_vm8, 0.0, %v176_v55  ;;  %v183_v59 = vsel %vm182_vm9, 0.0, %v180_v56  ;;  %v1663_v56 = vmov 3  }
 0x116   :  { %v187_v61 = vmul.f32 %v1554_v54, %v179_v58  ;;  %v190_v0 = vmul.f32 %v1555_v57, %v183_v59  ;;  %v3178_v58 = vmov 4   ;;  %v3183_v59 = vmov 12  }
 0x118   :  { %v128_v62 = vpop.f32.mrf.mxu0  ;;  %v188_v63 = vadd.f32 %v187_v61, %v185_v60  ;;  %v3188_v60 = vmov 10   ;;  %v3164_v61 = vmov 8  }
 0x119   :  { %v1818_v2 = vadd.f32 %v1552_v47, %v128_v62  ;;  %v290_v47 = vld [vmem:[%s3158_s7 + $0x18] sm:$0xff]  ;;  %v3169_v62 = vmov 7  }
 0x11a   :  { %v191_v3 = vadd.f32 %v190_v0, %v188_v63  ;;  %v3170_v63 = vmov 6   ;;  %v3185_v0 = vmov 9  }
 0x11b   :  { %3252 = vst [vmem:[#allocation2_spill] sm:$0xff] %v1818_v2  ;;  %v217_v4 = vrot.slane %v1818_v2, 7  ;;  %v220_v5 = vrot.slane %v1818_v2, 6  ;;  %v223_v10 = vmul.f32 %v1553_v52, %v1818_v2  ;;  %v3182_v52 = vmov 0  }
 0x11c   :  { %v195_v6 = vadd.f32 %v1556_v1, %v191_v3  ;;  %1486 = vset.pattern.permute.xlu1 %v3182_v52 }
 0x11d   :  { %v219_v7 = vsel %vm178_vm8, 0.0, %v217_v4  ;;  %v222_v8 = vsel %vm182_vm9, 0.0, %v220_v5  ;;  %v3166_v4 = vmov 11   ;;  %v3186_v5 = vmov 13  }
 0x11e   :  { %v1456_v9 = vmul.f32 -1.442695, %v195_v6  ;;  %v224_v11 = vmul.f32 %v1554_v54, %v219_v7  ;;  %v226_v13 = vmul.f32 %v1555_v57, %v222_v8  ;;  %v3173_v57 = vmov 5  }
 0x120   :  { %1565 = vpow2.f32 %v1456_v9  ;;  %v225_v12 = vadd.f32 %v224_v11, %v223_v10  ;;  %v1557_v11 = vld [vmem:[%s3159_s9] ss:$0 sm:$0xff] }
 0x122   :  { %v227_v14 = vadd.f32 %v226_v13, %v225_v12 }
 0x124   :  { %v228_v15 = vadd.f32 %v1556_v1, %v227_v14  ;;  %v3167_v1 = vmov 14  }
 0x126   :  { %v1566_v16 = vpop.eup %1565  ;;  %v1457_v17 = vmul.f32 -1.442695, %v228_v15 }
 0x127   :  { %v199_v18 = vadd.f32 1.0, %v1566_v16 }
 0x128   :  { %1567 = vpow2.f32 %v1457_v17 }
 0x129   :  { %1569 = vrcp.f32 %v199_v18  ;;  %v211_v24 = vand.u32 2147483648, %v199_v18  ;;  %v209_v26 = vand.u32 2147483647, %v199_v18  ;;  %vm205_vm11 = vweird.f32 %v199_v18 }
 0x12b   :  { %v212_v29 = vor.u32 1.1754944e-38, %v211_v24  ;;  %vm210_vm13 = vcmp.eq.f32.partialorder %v209_v26, 8.507059e+37  ;;  %v406_v24 = vld [vmem:[%s3160_s10] sm:$0xff] }
 0x12e   :  { %v1568_v19 = vpop.eup %1567 }
 0x12f   :  { %v1570_v20 = vpop.eup %1569  ;;  %v232_v21 = vadd.f32 1.0, %v1568_v19 }
 0x130   :  { %v201_v22 = vmul.f32 %v1570_v20, %v199_v18  ;;  %vm206_vm10 = vweird.f32 %v1570_v20 }
 0x131   :  { %1571 = vrcp.f32 %v232_v21  ;;  %vm207_vm12 = vmor %vm205_vm11, %vm206_vm10  ;;  %v244_v35 = vand.u32 2147483648, %v232_v21  ;;  %v242_v37 = vand.u32 2147483647, %v232_v21  ;;  %vm238_vm1 = vweird.f32 %v232_v21 }
 0x132   :  { %v202_v23 = vsub.f32 1.0, %v201_v22 }
 0x133   :  { %v245_v39 = vor.u32 1.1754944e-38, %v244_v35  ;;  %vm243_vm3 = vcmp.eq.f32.partialorder %v242_v37, 8.507059e+37 }
 0x134   :  { %v203_v25 = vmul.f32 %v1570_v20, %v202_v23 }
 0x136   :  { %v204_v27 = vadd.f32 %v1570_v20, %v203_v25 }
 0x137   :  { %v1572_v28 = vpop.eup %1571 }
 0x138   :  { %v208_v30 = vsel %vm207_vm12, %v1570_v20, %v204_v27  ;;  %v234_v31 = vmul.f32 %v1572_v28, %v232_v21  ;;  %vm239_vm15 = vweird.f32 %v1572_v28 }
 0x139   :  { %v213_v32 = vsel %vm210_vm13, %v212_v29, %v208_v30  ;;  %vm240_vm2 = vmor %vm238_vm1, %vm239_vm15 }
 0x13a   :  { %v1825_v33 = vmul.f32 %v213_v32, %v195_v6  ;;  %v235_v34 = vsub.f32 1.0, %v234_v31  ;;  %v1675_v6 = vmov 15  }
 0x13c   :  { %1458 = vmatmul.msk.f32.vlgmr.msra.gmra.mxu1 %vm257_vm14, %v1825_v33  ;;  %v236_v36 = vmul.f32 %v1572_v28, %v235_v34 }
 0x13e   :  { %v237_v38 = vadd.f32 %v1572_v28, %v236_v36 }
 0x140   :  { %v241_v40 = vsel %vm240_vm2, %v1572_v28, %v237_v38  ;;  %v408_v28 = vmul.f32 1.442695, %v406_v24 }
 0x141   :  { %v246_v41 = vsel %vm243_vm3, %v245_v39, %v241_v40 }
 0x142   :  { %v1829_v42 = vmul.f32 %v246_v41, %v228_v15 }
 0x144   :  { %1459 = vmatmul.msk.f32.gmra.mxu1 %vm257_vm14, %v1829_v42  ;;  %1460 = vmatpush.xpose.msk.msra.mxu2 %vm257_vm14, %v1829_v42 }
 0x148   :  { %1461 = vmatpush.xpose.msk.msra.mxu2 %vm257_vm14, %v1825_v33 }
 0x14b   :  { %1462 = vmatmul.msk.f32.vlgmr.msra.gmra.mxu2 %vm257_vm14, %v287_v44 }
 0x153   :  { %1463 = vmatmul.msk.f32.gmra.mxu2 %vm257_vm14, %v288_v45 }
 0x15b   :  { %1464 = vmatmul.msk.f32.gmra.mxu2 %vm257_vm14, %v289_v46 }
 0x163   :  { %1465 = vmatmul.msk.f32.gmra.mxu2 %vm257_vm14, %v290_v47  ;;  %v407_v47 = vld [vmem:[%s3160_s10 + $0x8] sm:$0xff]  ;;  %s1676_s10 = smov 64  }
 0x1b9   :  { %v281_v53 = vpop.f32.mrf.mxu1 }
 0x1ba   :  { %1466 = vmatmul.msk.f32.vlgmr.msrb.gmra.mxu0 %vm338_vm4, %v281_v53 }
 0x1c1   :  { %v284_v54 = vpop.f32.mrf.mxu1 }
 0x1c2   :  { %1467 = vmatmul.msk.f32.gmra.mxu0 %vm338_vm4, %v284_v54  ;;  %vm884_vm4 = vcmask 1042432  }
 0x1ce   :  { %v320_v55 = vpop.f32.mrf.mxu2 }
 0x1cf   :  { %546 = vperm.xlu2 %1488, %v320_v55   ;;  %512 = vperm.xlu0 %1487, %v320_v55  }
 0x1d0   :  { %475 = vperm.xlu1 %1486, %v320_v55  }
 0x1d6   :  { %v1872_v3 = vpop.f32.mrf.mxu2 }
 0x1d7   :  { %1489 = vset.pattern.permute.xlu2 %v1663_v56  ;;  %1491 = vset.pattern.permute.xlu0 %v3173_v57 }
 0x1d8   :  { %1490 = vset.pattern.permute.xlu1 %v3178_v58  ;;  %580 = vperm.xlu2 %1489, %v320_v55  }
 0x1d9   :  { %648 = vperm.xlu0 %1491, %v320_v55   ;;  %614 = vperm.xlu1 %1490, %v320_v55  }
 0x1de   :  { %v1883_v7 = vpop.f32.mrf.mxu2 }
 0x1e0   :  { %1497 = vset.pattern.permute.xlu2 %v3183_v59 }
 0x1e1   :  { %1494 = vset.pattern.permute.xlu0 %v3188_v60  ;;  %1492 = vset.pattern.permute.xlu1 %v3164_v61 }
 0x1e2   :  { %1102 = vperm.xlu2 %1497, %v320_v55   ;;  %1034 = vperm.xlu0 %1494, %v320_v55  }
 0x1e3   :  { %966 = vperm.xlu1 %1492, %v320_v55  }
 0x1e6   :  { %v1901_v8 = vpop.f32.mrf.mxu2 }
 0x1ea   :  { %1498 = vset.pattern.permute.xlu2 %v3169_v62  ;;  %1496 = vset.pattern.permute.xlu0 %v3170_v63 }
 0x1eb   :  { %1493 = vset.pattern.permute.xlu1 %v3185_v0  ;;  %716 = vperm.xlu2 %1498, %v320_v55  }
 0x1ec   :  { %682 = vperm.xlu0 %1496, %v320_v55   ;;  %1000 = vperm.xlu1 %1493, %v320_v55  }
 0x1f3   :  { %1500 = vset.pattern.permute.xlu2 %v3167_v1 }
 0x1f4   :  { %1514 = vset.pattern.permute.xlu0 %v3169_v62  ;;  %1495 = vset.pattern.permute.xlu1 %v3166_v4 }
 0x1f5   :  { %1170 = vperm.xlu2 %1500, %v320_v55   ;;  %1068 = vperm.xlu1 %1495, %v320_v55  }
 0x1f6   :  { %720 = vperm.xlu0 %1514, %v1872_v3  }
 0x1fd   :  { %1506 = vset.pattern.permute.xlu2 %v3178_v58  ;;  %1499 = vset.pattern.permute.xlu1 %v3186_v5 }
 0x1fe   :  { %1516 = vset.pattern.permute.xlu0 %v3167_v1  ;;  %1136 = vperm.xlu1 %1499, %v320_v55  }
 0x1ff   :  { %1174 = vperm.xlu0 %1516, %v1872_v3   ;;  %618 = vperm.xlu2 %1506, %v1872_v3  }
 0x206   :  { %1501 = vset.pattern.permute.xlu1 %v1675_v6 }
 0x207   :  { %1524 = vset.pattern.permute.xlu0 %v3169_v62  ;;  %1507 = vset.pattern.permute.xlu2 %v3164_v61 }
 0x208   :  { %1204 = vperm.xlu1 %1501, %v320_v55   ;;  %970 = vperm.xlu2 %1507, %v1872_v3  }
 0x209   :  { %728 = vperm.xlu0 %1524, %v1883_v7  }
 0x210   :  { %1502 = vset.pattern.permute.xlu1 %v3182_v52  ;;  %1508 = vset.pattern.permute.xlu2 %v3185_v0 }
 0x211   :  { %1526 = vset.pattern.permute.xlu0 %v3167_v1  ;;  %1004 = vperm.xlu2 %1508, %v1872_v3  }
 0x212   :  { %480 = vperm.xlu1 %1502, %v1872_v3   ;;  %1182 = vperm.xlu0 %1526, %v1883_v7  }
 0x219   :  { %1510 = vset.pattern.permute.xlu2 %v3173_v57 }
 0x21a   :  { %1503 = vset.pattern.permute.xlu1 %v3181_v50  ;;  %1530 = vset.pattern.permute.xlu0 %v3166_v4 }
 0x21b   :  { %652 = vperm.xlu2 %1510, %v1872_v3   ;;  %516 = vperm.xlu1 %1503, %v1872_v3  }
 0x21c   :  { %1080 = vperm.xlu0 %1530, %v1883_v7  }
 0x223   :  { %1511 = vset.pattern.permute.xlu2 %v3166_v4  ;;  %1504 = vset.pattern.permute.xlu1 %v3177_v49 }
 0x224   :  { %1536 = vset.pattern.permute.xlu0 %v1663_v56  ;;  %1072 = vperm.xlu2 %1511, %v1872_v3  }
 0x225   :  { %550 = vperm.xlu1 %1504, %v1872_v3   ;;  %596 = vperm.xlu0 %1536, %v1901_v8  }
 0x229   :  { %v1909_v9 = vpop.permute.xlu2 %546 }
 0x22c   :  { %1515 = vset.pattern.permute.xlu2 %v3186_v5 }
 0x22d   :  { %1505 = vset.pattern.permute.xlu1 %v1663_v56  ;;  %1542 = vset.pattern.permute.xlu0 %v1675_v6 }
 0x22e   :  { %1140 = vperm.xlu2 %1515, %v1872_v3   ;;  %584 = vperm.xlu1 %1505, %v1872_v3  }
 0x22f   :  { %1220 = vperm.xlu0 %1542, %v1901_v8  }
 0x232   :  { %v1917_v10 = vpop.permute.xlu2 %580 }
 0x236   :  { %1517 = vset.pattern.permute.xlu2 %v1675_v6  ;;  %1509 = vset.pattern.permute.xlu1 %v3188_v60 }
 0x237   :  { %1547 = vset.pattern.permute.xlu0 %v3185_v0  ;;  %1208 = vperm.xlu2 %1517, %v1872_v3   ;;  %v362_v12 = vpop.f32.mrf.mxu0 }
 0x238   :  { %1038 = vperm.xlu1 %1509, %v1872_v3   ;;  %1016 = vperm.xlu0 %1547, %v1901_v8   ;;  %v363_v13 = vadd.f32 %v1557_v11, %v362_v12 }
 0x23a   :  { %v374_v14 = vand.u32 2147483647, %v363_v13  ;;  %v368_v44 = vmax.f32 %v363_v13, 0.0  ;;  %vm370_vm6 = vcmp.ne.f32.partialorder %v363_v13, %v363_v13 }
 0x23c   :  { %v376_v15 = vsub.f32 0.0, %v374_v14  ;;  %v1928_v16 = vpop.permute.xlu2 %1102  ;;  %v410_v14 = vmul.f32 1.442695, %v407_v47 }
 0x23e   :  { %v378_v17 = vmul.f32 1.442695, %v376_v15 }
 0x23f   :  { %1518 = vset.pattern.permute.xlu2 %v3182_v52  ;;  %v365_v18 = vpop.f32.mrf.mxu0 }
 0x240   :  { %1573 = vpow2.f32 %v378_v17  ;;  %1512 = vset.pattern.permute.xlu1 %v3170_v63  ;;  %489 = vperm.xlu2 %1518, %v1883_v7   ;;  %v1933_v19 = vadd.f32 %v1557_v11, %v365_v18 }
 0x241   :  { %686 = vperm.xlu1 %1512, %v1872_v3   ;;  %v1936_v20 = vpop.permute.xlu0 %512  ;;  %1550 = vset.pattern.permute.xlu0 %v1675_v6 }
 0x242   :  { %v375_v21 = vand.u32 2147483647, %v1933_v19  ;;  %v1940_v22 = vpop.permute.xlu1 %475  ;;  %vm371_vm10 = vcmp.ne.f32.partialorder %v1933_v19, %v1933_v19 }
 0x244   :  { %v377_v23 = vsub.f32 0.0, %v375_v21 }
 0x245   :  { %v1945_v29 = vpop.permute.xlu2 %716 }
 0x246   :  { %v1574_v25 = vpop.eup %1573  ;;  %v380_v26 = vmul.f32 1.442695, %v377_v23 }
 0x247   :  { %v382_v27 = vadd.f32 1.0, %v1574_v25  ;;  %v385_v30 = vmul.f32 -0.5, %v1574_v25  ;;  %v388_v35 = vand.u32 2147483647, %v1574_v25 }
 0x248   :  { %1575 = vpow2.f32 %v380_v26  ;;  %1519 = vset.pattern.permute.xlu2 %v3181_v50 }
 0x249   :  { %1577 = vlog2.f32 %v382_v27  ;;  %1513 = vset.pattern.permute.xlu1 %v3183_v59  ;;  %524 = vperm.xlu2 %1519, %v1883_v7   ;;  %v386_v34 = vadd.f32 1.0, %v385_v30  ;;  %vm389_vm5 = vcmp.lt.f32.partialorder %v388_v35, 0.0004427343  ;;  %v369_v30 = vmax.f32 %v1933_v19, 0.0 }
 0x24a   :  { %1106 = vperm.xlu1 %1513, %v1872_v3   ;;  %1579 = vpow2.f32 %v408_v28 }
 0x24b   :  { %v1951_v31 = vpop.permute.xlu0 %648  ;;  %v1953_v32 = vpop.permute.xlu1 %614  ;;  %v387_v41 = vmul.f32 %v1574_v25, %v386_v34 }
 0x24e   :  { %v1576_v36 = vpop.eup %1575 }
 0x24f   :  { %v1578_v37 = vpop.eup %1577  ;;  %v391_v38 = vadd.f32 1.0, %v1576_v36  ;;  %v394_v39 = vmul.f32 -0.5, %v1576_v36  ;;  %v1956_v45 = vpop.permute.xlu2 %1170  ;;  %v397_v3 = vand.u32 2147483647, %v1576_v36 }
 0x250   :  { %v384_v40 = vmul.f32 0.6931472, %v1578_v37  ;;  %v1580_v43 = vpop.eup %1579  ;;  %3253 = vst [vmem:[#allocation3_spill] sm:$0xff] %v1956_v45 }
 0x251   :  { %1581 = vlog2.f32 %v391_v38  ;;  %1520 = vset.pattern.permute.xlu2 %v3177_v49  ;;  %v395_v53 = vadd.f32 1.0, %v394_v39  ;;  %v1964_v54 = vsub.f32 0.0, %v1580_v43  ;;  %vm398_vm7 = vcmp.lt.f32.partialorder %v397_v3, 0.0004427343 }
 0x252   :  { %v390_v46 = vsel %vm389_vm5, %v387_v41, %v384_v40  ;;  %1522 = vset.pattern.permute.xlu1 %v3178_v58  ;;  %558 = vperm.xlu2 %1520, %v1883_v7   ;;  %1583 = vpow2.f32 %v410_v14  ;;  %vm886_vm5 = vcmask 1043456  }
 0x253   :  { %v400_v48 = vadd.f32 %v390_v46, %v368_v44  ;;  %626 = vperm.xlu1 %1522, %v1883_v7   ;;  %v396_v23 = vmul.f32 %v1576_v36, %v395_v53 }
 0x254   :  { %v1968_v11 = vpop.permute.xlu0 %1034 }
 0x255   :  { %v1966_v55 = vsel %vm370_vm6, %v363_v13, %v400_v48  ;;  %v1970_v12 = vpop.permute.xlu1 %966  ;;  %vm888_vm6 = vcmask 1044480  }
 0x256   :  { %v3180_v15 = vperm.slane %v1966_v55, 0  ;;  %v3176_v17 = vperm.slane %v1966_v55, 1  ;;  %v3174_v18 = vperm.slane %v1966_v55, 2  ;;  %v3172_v24 = vperm.slane %v1966_v55, 5 }
 0x257   :  { %v1582_v21 = vpop.eup %1581  ;;  %v3175_v25 = vperm.slane %v1966_v55, 6  ;;  %v404_v13 = vmul.f32 %v1966_v55, %v1825_v33  ;;  %v3179_v28 = vperm.slane %v1966_v55, 7  ;;  %v3168_v41 = vperm.slane %v1966_v55, 3 }
 0x258   :  { %v393_v26 = vmul.f32 0.6931472, %v1582_v21  ;;  %v415_v27 = vmul.f32 %v3180_v15, %v1964_v54  ;;  %v422_v34 = vmul.f32 %v3176_v17, %v1964_v54  ;;  %v429_v37 = vmul.f32 %v3174_v18, %v1964_v54 }
 0x259   :  { %v1987_v35 = vpop.permute.xlu2 %618  ;;  %v450_v39 = vmul.f32 %v3172_v24, %v1964_v54  ;;  %v457_v40 = vmul.f32 %v3175_v25, %v1964_v54  ;;  %v2007_v44 = vperm.slane %v404_v13, 0  ;;  %v2016_v47 = vperm.slane %v404_v13, 7 }
 0x25a   :  { %3254 = vst [vmem:[#allocation4_spill] sm:$0xff] %v1987_v35  ;;  %v399_v33 = vsel %vm398_vm7, %v396_v23, %v393_v26  ;;  %v417_v36 = vmul.f32 1.442695, %v415_v27  ;;  %1521 = vset.pattern.permute.xlu2 %v1663_v56  ;;  %v424_v43 = vmul.f32 1.442695, %v422_v34  ;;  %v464_v56 = vmul.f32 %v3179_v28, %v1964_v54  ;;  %v1584_v26 = vpop.eup %1583 }
 0x25b   :  { %v401_v38 = vadd.f32 %v399_v33, %v369_v30  ;;  %1523 = vset.pattern.permute.xlu1 %v3170_v63  ;;  %592 = vperm.xlu2 %1521, %v1883_v7   ;;  %3255 = vst [vmem:[#allocation5_spill] sm:$0xff] %v2007_v44  ;;  %v2018_v48 = vperm.slane %v404_v13, 2  ;;  %v2020_v53 = vperm.slane %v404_v13, 1  ;;  %v2022_v3 = vperm.slane %v404_v13, 6 }
 0x25c   :  { %1585 = vpow2.f32 %v417_v36  ;;  %694 = vperm.xlu1 %1523, %v1883_v7   ;;  %v466_v14 = vmul.f32 1.442695, %v464_v56  ;;  %v483_v21 = vmul.f32 %v1940_v22, %v2007_v44  ;;  %v431_v27 = vmul.f32 1.442695, %v429_v37 }
 0x25d   :  { %v2014_v46 = vsel %vm371_vm10, %v1933_v19, %v401_v38  ;;  %3256 = vst [vmem:[#allocation6_spill] sm:$0xff] %v2018_v48  ;;  %v452_v30 = vmul.f32 1.442695, %v450_v39  ;;  %v459_v34 = vmul.f32 1.442695, %v457_v40  ;;  %v2030_v19 = vmul.f32 %v1945_v29, %v2016_v47 }
 0x25e   :  { %v2026_v23 = vpop.permute.xlu1 %1000  ;;  %v2032_v33 = vpop.permute.xlu0 %682  ;;  %v2036_v36 = vmul.f32 %v2014_v46, %v1829_v42  ;;  %1587 = vpow2.f32 %v424_v43  ;;  %v2038_v38 = vperm.slane %v404_v13, 5  ;;  %v436_v56 = vmul.f32 %v3168_v41, %v1964_v54 }
 0x25f   :  { %3257 = vst [vmem:[#allocation7_spill] sm:$0xff] %v2030_v19  ;;  %1589 = vpow2.f32 %v466_v14  ;;  %v3171_v37 = vperm.slane %v1966_v55, 4  ;;  %v553_v39 = vmul.f32 %v1909_v9, %v2018_v48  ;;  %v2046_v40 = vperm.slane %v404_v13, 3 }
 0x260   :  { %v519_v42 = vmul.f32 %v1936_v20, %v2020_v53  ;;  %v2054_v43 = vmul.f32 %v1951_v31, %v2038_v38  ;;  %v2056_v4 = vperm.slane %v404_v13, 4  ;;  %v2058_v1 = vsub.f32 0.0, %v1584_v26 }
 0x261   :  { %3258 = vst [vmem:[#allocation8_spill] sm:$0xff] %v2046_v40  ;;  %1591 = vpow2.f32 %v431_v27  ;;  %v443_v62 = vmul.f32 %v3171_v37, %v1964_v54  ;;  %v2068_v63 = vmul.f32 %v1917_v10, %v2046_v40  ;;  %v765_v13 = vmul.f32 %v2022_v3, %v1936_v20 }
 0x262   :  { %v2048_v61 = vpop.eup %1585  ;;  %3259 = vst [vmem:[#allocation9_spill] sm:$0xff] %v2056_v4  ;;  %v2060_v14 = vpop.permute.xlu2 %970  ;;  %1593 = vpow2.f32 %v452_v30  ;;  %v438_v26 = vmul.f32 1.442695, %v436_v56  ;;  %v2075_v27 = vmul.f32 %v1953_v32, %v2056_v4  ;;  %v748_v24 = vmul.f32 %v2016_v47, %v1940_v22 }
 0x263   :  { %v470_v41 = vmul.f32 0.0, %v2048_v61  ;;  %1527 = vset.pattern.permute.xlu2 %v1675_v6  ;;  %1595 = vpow2.f32 %v459_v34  ;;  %v2084_v6 = vperm.slane %v2036_v36, 6  ;;  %v2091_v30 = vmul.f32 %v1951_v31, %v2018_v48 }
 0x264   :  { %1525 = vset.pattern.permute.xlu1 %v3173_v57  ;;  %1216 = vperm.xlu2 %1527, %v1883_v7   ;;  %v2087_v20 = vpop.eup %1587  ;;  %v782_v56 = vmul.f32 %v2038_v38, %v1909_v9  ;;  %v445_v57 = vmul.f32 1.442695, %v443_v62  ;;  %v2103_v18 = vmul.f32 %v1953_v32, %v2046_v40  ;;  %1597 = vpow2.f32 %v438_v26 }
 0x265   :  { %v2079_v37 = vadd.f32 %v483_v21, %v470_v41  ;;  %660 = vperm.xlu1 %1525, %v1883_v7   ;;  %v906_v41 = vperm.slane %v2014_v46, 0  ;;  %v955_v21 = vperm.slane %v2014_v46, 7  ;;  %v2097_v34 = vpop.eup %1589  ;;  %v2107_v31 = vmul.f32 %v1956_v45, %v2084_v6 }
 0x266   :  { %v746_v9 = vmul.f32 0.0, %v2097_v34  ;;  %v2120_v32 = vmul.f32 %v2056_v4, %v1917_v10  ;;  %v2123_v28 = vperm.slane %v2036_v36, 0  ;;  %v2127_v15 = vmul.f32 %v1987_v35, %v2056_v4 }
 0x267   :  { %3260 = vst [vmem:[#allocation10_spill] sm:$0xff] %v2079_v37  ;;  %v508_v22 = vmul.f32 %v2087_v20, %v2079_v37  ;;  %v2109_v25 = vpop.permute.xlu1 %1068  ;;  %v907_v17 = vmul.f32 %v906_v41, %v1964_v54  ;;  %v956_v49 = vmul.f32 %v955_v21, %v1964_v54  ;;  %v2114_v58 = vpop.eup %1591  ;;  %1599 = vpow2.f32 %v445_v57 }
 0x268   :  { %3261 = vst [vmem:[#allocation11_spill] sm:$0xff] %v2107_v31  ;;  %v2129_v26 = vpop.permute.xlu0 %720  ;;  %v2131_v50 = vpop.eup %1593  ;;  %v2133_v52 = vadd.f32 %v748_v24, %v746_v9  ;;  %v2143_v5 = vperm.slane %v2036_v36, 2  ;;  %v973_v60 = vmul.f32 %v1970_v12, %v2123_v28  ;;  %v3267_v9 = vmov 10  }
 0x269   :  { %v2116_v62 = vadd.f32 %v519_v42, %v508_v22  ;;  %3263 = vst [vmem:[#allocation13_spill] sm:$0xff] %v2127_v15  ;;  %v2136_v42 = vperm.slane %v2036_v36, 1  ;;  %v909_v22 = vmul.f32 1.442695, %v907_v17  ;;  %v958_v59 = vmul.f32 1.442695, %v956_v49  ;;  %v2138_v10 = vpop.eup %1595 }
 0x26a   :  { %3264 = vst [vmem:[#allocation14_spill] sm:$0xff] %v2129_v26  ;;  %v763_v24 = vmul.f32 %v2138_v10, %v2133_v52  ;;  %v2152_v17 = vperm.slane %v2036_v36, 5  ;;  %v3197_v49 = vperm.slane %v2014_v46, 1  ;;  %v3203_v35 = vperm.slane %v2014_v46, 2  ;;  %v1598_v4 = vpop.eup %1597 }
 0x26b   :  { %3262 = vst [vmem:[#allocation12_spill] sm:$0xff] %v2116_v62  ;;  %v542_v0 = vmul.f32 %v2114_v58, %v2116_v62  ;;  %v2147_v15 = vpop.permute.xlu2 %1004  ;;  %1601 = vpow2.f32 %v909_v22  ;;  %v3269_v62 = vmov 13   ;;  %vm890_vm7 = vcmask 1045504  }
 0x26c   :  { %3265 = vst [vmem:[#allocation15_spill] sm:$0xff] %v2133_v52  ;;  %1531 = vset.pattern.permute.xlu2 %v3267_v9  ;;  %1603 = vpow2.f32 %v958_v59  ;;  %v2162_v40 = vadd.f32 %v765_v13, %v763_v24  ;;  %v914_v22 = vmul.f32 %v3197_v49, %v1964_v54  ;;  %v3208_v9 = vperm.slane %v2014_v46, 6 }
 0x26d   :  { %3266 = vst [vmem:[#allocation16_spill] sm:$0xff] %v2143_v5  ;;  %v2156_v57 = vadd.f32 %v553_v39, %v542_v0  ;;  %1528 = vset.pattern.permute.xlu1 %v3269_v62  ;;  %1046 = vperm.xlu2 %1531, %v1883_v7   ;;  %v2170_v59 = vmul.f32 %v2026_v23, %v2136_v42  ;;  %v2179_v13 = vperm.slane %v2036_v36, 7  ;;  %v1600_v37 = vpop.eup %1599  ;;  %vm892_vm10 = vcmask 1046528  }
 0x26e   :  { %3270 = vst [vmem:[#allocation18_spill] sm:$0xff] %v2162_v40  ;;  %1148 = vperm.xlu1 %1528, %v1883_v7   ;;  %v2176_v39 = vmul.f32 %v1968_v11, %v2143_v5  ;;  %v921_v24 = vmul.f32 %v3203_v35, %v1964_v54  ;;  %v780_v49 = vmul.f32 %v2131_v50, %v2162_v40  ;;  %v916_v2 = vmul.f32 1.442695, %v914_v22 }
 0x26f   :  { %3268 = vst [vmem:[#allocation17_spill] sm:$0xff] %v2156_v57  ;;  %v576_v0 = vmul.f32 %v1598_v4, %v2156_v57  ;;  %v949_v62 = vmul.f32 %v3208_v9, %v1964_v54  ;;  %v908_v57 = vmul.f32 %v906_v41, %v2058_v1  ;;  %v3273_v35 = vperm.slane %v2014_v46, 5 }
 0x270   :  { %v2190_v52 = vpop.permute.xlu1 %1136  ;;  %v923_v31 = vmul.f32 1.442695, %v921_v24  ;;  %v957_v40 = vmul.f32 %v955_v21, %v2058_v1  ;;  %v2201_v5 = vadd.f32 %v782_v56, %v780_v49  ;;  %1605 = vpow2.f32 %v916_v2 }
 0x271   :  { %3271 = vst [vmem:[#allocation19_spill] sm:$0xff] %v2190_v52  ;;  %v2193_v48 = vadd.f32 %v2068_v63, %v576_v0  ;;  %v942_v45 = vmul.f32 %v3273_v35, %v1964_v54  ;;  %v2199_v22 = vpop.eup %1601  ;;  %v951_v9 = vmul.f32 1.442695, %v949_v62  ;;  %v911_v41 = vmul.f32 1.442695, %v908_v57  ;;  %v2211_v24 = vpop.permute.xlu0 %1174 }
 0x272   :  { %3274 = vst [vmem:[#allocation21_spill] sm:$0xff] %v2201_v5  ;;  %v2203_v19 = vpop.eup %1603  ;;  %v2208_v63 = vmul.f32 %v2152_v17, %v1968_v11  ;;  %v962_v0 = vmul.f32 0.0, %v2199_v22  ;;  %v960_v35 = vmul.f32 1.442695, %v957_v40  ;;  %v797_v21 = vmul.f32 %v1600_v37, %v2201_v5 }
 0x273   :  { %3272 = vst [vmem:[#allocation20_spill] sm:$0xff] %v2193_v48  ;;  %v610_v52 = vmul.f32 %v1600_v37, %v2193_v48  ;;  %v1234_v56 = vmul.f32 0.0, %v2203_v19  ;;  %1607 = vpow2.f32 %v923_v31  ;;  %v2217_v2 = vmul.f32 %v2060_v14, %v2123_v28 }
 0x274   :  { %3275 = vst [vmem:[#allocation22_spill] sm:$0xff] %v2211_v24  ;;  %v2222_v49 = vadd.f32 %v973_v60, %v962_v0  ;;  %v944_v11 = vmul.f32 1.442695, %v942_v45  ;;  %1609 = vpow2.f32 %v951_v9  ;;  %v3277_v57 = vmov 9  }
 0x275   :  { %v2220_v62 = vadd.f32 %v2075_v27, %v610_v52  ;;  %1532 = vset.pattern.permute.xlu2 %v3277_v57  ;;  %v2225_v40 = vpop.permute.xlu2 %652  ;;  %v2228_v37 = vadd.f32 %v2120_v32, %v797_v21  ;;  %v1236_v31 = vmul.f32 %v2179_v13, %v1970_v12  ;;  %1611 = vpow2.f32 %v911_v41 }
 0x276   :  { %3276 = vst [vmem:[#allocation23_spill] sm:$0xff] %v2222_v49  ;;  %v3213_v48 = vperm.slane %v2014_v46, 3  ;;  %v3278_v5 = vmov 12   ;;  %1012 = vperm.xlu2 %1532, %v1883_v7   ;;  %v689_v60 = vmul.f32 %v2032_v33, %v2022_v3  ;;  %1613 = vpow2.f32 %v960_v35  ;;  %v2241_v27 = vpop.eup %1605 }
 0x277   :  { %1529 = vset.pattern.permute.xlu1 %v3278_v5  ;;  %v644_v52 = vmul.f32 %v2131_v50, %v2220_v62  ;;  %v3212_v45 = vperm.slane %v2014_v46, 4  ;;  %v814_v12 = vmul.f32 %v1598_v4, %v2228_v37  ;;  %v2244_v32 = vadd.f32 %v1236_v31, %v1234_v56 }
 0x278   :  { %1114 = vperm.xlu1 %1529, %v1883_v7   ;;  %v928_v9 = vmul.f32 %v3213_v48, %v1964_v54  ;;  %v2251_v50 = vmul.f32 %v2129_v26, %v2016_v47  ;;  %1615 = vpow2.f32 %v944_v11  ;;  %v996_v0 = vmul.f32 %v2241_v27, %v2222_v49 }
 0x279   :  { %3279 = vst [vmem:[#allocation24_spill] sm:$0xff] %v2244_v32  ;;  %v2254_v41 = vadd.f32 %v2054_v43, %v644_v52  ;;  %v935_v4 = vmul.f32 %v3212_v45, %v1964_v54  ;;  %v2261_v35 = vpop.eup %1607  ;;  %v2264_v21 = vadd.f32 %v2103_v18, %v814_v12  ;;  %v850_v56 = vmul.f32 %v2032_v33, %v2020_v53 }
 0x27a   :  { %3280 = vst [vmem:[#allocation25_spill] sm:$0xff] %v2251_v50  ;;  %v1253_v43 = vmul.f32 %v2084_v6, %v2026_v23  ;;  %v930_v57 = vmul.f32 1.442695, %v928_v9  ;;  %v2270_v11 = vpop.permute.xlu1 %1204  ;;  %v2272_v31 = vpop.eup %1609  ;;  %v2277_v54 = vadd.f32 %v2170_v59, %v996_v0  ;;  %v3284_v18 = vperm.slane %v2014_v46, 1 }
 0x27b   :  { %3281 = vst [vmem:[#allocation26_spill] sm:$0xff] %v2254_v41  ;;  %v678_v52 = vmul.f32 %v2138_v10, %v2254_v41  ;;  %v937_v45 = vmul.f32 1.442695, %v935_v4  ;;  %v2282_v33 = vpop.permute.xlu0 %728  ;;  %v2284_v48 = vpop.eup %1611  ;;  %v831_v23 = vmul.f32 %v2114_v58, %v2264_v21  ;;  %v1251_v9 = vmul.f32 %v2272_v31, %v2244_v32 }
 0x27c   :  { %3282 = vst [vmem:[#allocation27_spill] sm:$0xff] %v2264_v21  ;;  %v915_v12 = vmul.f32 %v3284_v18, %v2058_v1  ;;  %1617 = vpow2.f32 %v930_v57  ;;  %v3287_v10 = vperm.slane %v2014_v46, 6  ;;  %v2293_v0 = vpop.eup %1613  ;;  %v1030_v18 = vmul.f32 %v2261_v35, %v2277_v54 }
 0x27d   :  { %3283 = vst [vmem:[#allocation28_spill] sm:$0xff] %v2277_v54  ;;  %v2295_v4 = vadd.f32 %v689_v60, %v678_v52  ;;  %1619 = vpow2.f32 %v937_v45  ;;  %v2300_v49 = vperm.slane %v2036_v36, 3  ;;  %v2303_v58 = vadd.f32 %v2091_v30, %v831_v23 }
 0x27e   :  { %3285 = vst [vmem:[#allocation29_spill] sm:$0xff] %v2282_v33  ;;  %v950_v59 = vmul.f32 %v3287_v10, %v2058_v1  ;;  %v2305_v32 = vadd.f32 %v1253_v43, %v1251_v9  ;;  %v2308_v57 = vperm.slane %v2036_v36, 4  ;;  %v918_v10 = vmul.f32 1.442695, %v915_v12  ;;  %v2311_v60 = vpop.permute.xlu2 %1072  ;;  %v2313_v52 = vpop.eup %1615 }
 0x27f   :  { %3286 = vst [vmem:[#allocation30_spill] sm:$0xff] %v2284_v48  ;;  %v3292_v26 = vmov 0   ;;  %v963_v45 = vmul.f32 0.0, %v2284_v48  ;;  %v2317_v21 = vadd.f32 %v2176_v39, %v1030_v18  ;;  %v1008_v30 = vmul.f32 %v2147_v15, %v2136_v42 }
 0x280   :  { %3288 = vst [vmem:[#allocation31_spill] sm:$0xff] %v2293_v0  ;;  %1533 = vset.pattern.permute.xlu2 %v3292_v26  ;;  %v953_v41 = vmul.f32 1.442695, %v950_v59  ;;  %v3294_v43 = vmov 1   ;;  %v848_v36 = vmul.f32 %v2087_v20, %v2303_v58  ;;  %v1268_v26 = vmul.f32 %v2313_v52, %v2305_v32 }
 0x281   :  { %3289 = vst [vmem:[#allocation32_spill] sm:$0xff] %v2295_v4  ;;  %1534 = vset.pattern.permute.xlu1 %v3294_v43  ;;  %494 = vperm.xlu2 %1533, %v1901_v8   ;;  %v1235_v12 = vmul.f32 0.0, %v2293_v0  ;;  %1621 = vpow2.f32 %v918_v10  ;;  %v1454_v39 = vmul.f32 -1.442695, %v1796_v51  ;;  %v867_v23 = vmul.f32 %v1945_v29, %v2007_v44 }
 0x282   :  { %3290 = vst [vmem:[#allocation33_spill] sm:$0xff] %v2303_v58  ;;  %528 = vperm.xlu1 %1534, %v1901_v8   ;;  %v1237_v9 = vmul.f32 %v2179_v13, %v2060_v14  ;;  %1623 = vpow2.f32 %v953_v41  ;;  %v1618_v59 = vpop.eup %1617  ;;  %v2334_v18 = vadd.f32 %v850_v56, %v848_v36  ;;  %v1075_v20 = vmul.f32 %v2109_v25, %v2300_v49 }
 0x283   :  { %3291 = vst [vmem:[#allocation34_spill] sm:$0xff] %v2305_v32  ;;  %v2339_v43 = vadd.f32 %v2208_v63, %v1268_v26  ;;  %v1287_v10 = vmul.f32 %v2308_v57, %v2109_v25  ;;  %v1620_v58 = vpop.eup %1619  ;;  %v2344_v48 = vadd.f32 %v2217_v2, %v963_v45  ;;  %v1064_v29 = vmul.f32 %v1618_v59, %v2317_v21 }
 0x284   :  { %3293 = vst [vmem:[#allocation35_spill] sm:$0xff] %v2317_v21  ;;  %v2349_v14 = vmul.f32 %v2211_v24, %v2084_v6  ;;  %v2353_v41 = vmul.f32 %v2225_v40, %v2038_v38  ;;  %v2355_v56 = vadd.f32 %v1237_v9, %v1235_v12  ;;  %v1254_v25 = vmul.f32 %v2084_v6, %v2147_v15  ;;  %v481_v45 = vpop.permute.xlu1 %480  ;;  %v2364_v36 = vpop.permute.xlu0 %1182 }
 0x285   :  { %3295 = vst [vmem:[#allocation36_spill] sm:$0xff] %v2334_v18  ;;  %v1285_v63 = vmul.f32 %v1620_v58, %v2339_v43  ;;  %v2362_v2 = vmul.f32 %v2270_v11, %v2179_v13  ;;  %v1077_v26 = vadd.f32 %v1075_v20, %v1064_v29  ;;  %v1109_v0 = vmul.f32 %v1928_v16, %v2308_v57 }
 0x286   :  { %3296 = vst [vmem:[#allocation37_spill] sm:$0xff] %v2339_v43  ;;  %v712_v12 = vmul.f32 %v2097_v34, %v2295_v4  ;;  %v865_v9 = vmul.f32 %v2048_v61, %v2334_v18  ;;  %v1304_v6 = vmul.f32 %v1928_v16, %v2300_v49  ;;  %v3302_v24 = vperm.slane %v1966_v55, 0  ;;  %v3304_v18 = vld [vmem:[#allocation7_spill] sm:$0xff] }
 0x287   :  { %3297 = vst [vmem:[#allocation38_spill] sm:$0xff] %v2344_v48  ;;  %v2374_v15 = vadd.f32 %v1287_v10, %v1285_v63  ;;  %v3303_v29 = vperm.slane %v1966_v55, 7  ;;  %v1098_v34 = vmul.f32 %v1620_v58, %v1077_v26  ;;  %v3306_v54 = vmov 4  }
 0x288   :  { %3298 = vst [vmem:[#allocation39_spill] sm:$0xff] %v2349_v14  ;;  %v2372_v14 = vpop.eup %1621  ;;  %v416_v20 = vmul.f32 %v3302_v24, %v2058_v1  ;;  %v725_v10 = vadd.f32 %v3304_v18, %v712_v12  ;;  %v2389_v63 = vadd.f32 %v867_v23, %v865_v9  ;;  %v2396_v21 = vpop.permute.xlu2 %1140  ;;  %1625 = vpow2.f32 %v1454_v39  ;;  %v3312_v9 = vld [vmem:[#allocation16_spill] sm:$0xff] }
 0x289   :  { %3299 = vst [vmem:[#allocation40_spill] sm:$0xff] %v2355_v56  ;;  %v465_v50 = vmul.f32 %v3303_v29, %v2058_v1  ;;  %v2384_v32 = vpop.eup %1623  ;;  %v997_v61 = vmul.f32 %v2372_v14, %v2344_v48  ;;  %1537 = vset.pattern.permute.xlu2 %v3306_v54  ;;  %v1302_v16 = vmul.f32 %v1618_v59, %v2374_v15  ;;  %v3307_v29 = vmov 2  }
 0x28a   :  { %3300 = vst [vmem:[#allocation41_spill] sm:$0xff] %v2364_v36  ;;  %v1252_v24 = vmul.f32 %v2384_v32, %v2355_v56  ;;  %v419_v4 = vmul.f32 1.442695, %v416_v20  ;;  %1535 = vset.pattern.permute.xlu1 %v3307_v29  ;;  %630 = vperm.xlu2 %1537, %v1901_v8   ;;  %v2401_v23 = vadd.f32 %v1109_v0, %v1098_v34  ;;  %v3315_v34 = vperm.slane %v1966_v55, 6 }
 0x28b   :  { %3301 = vst [vmem:[#allocation42_spill] sm:$0xff] %v2374_v15  ;;  %v468_v43 = vmul.f32 1.442695, %v465_v50  ;;  %v2399_v58 = vadd.f32 %v1008_v30, %v997_v61  ;;  %v2404_v54 = vmul.f32 %v2282_v33, %v725_v10  ;;  %562 = vperm.xlu1 %1535, %v1901_v8   ;;  %v2409_v18 = vadd.f32 %v1304_v6, %v1302_v16  ;;  %v3311_v30 = vld [vmem:[#allocation19_spill] sm:$0xff] }
 0x28c   :  { %3305 = vst [vmem:[#allocation7_spill] sm:$0xff] %v2389_v63  ;;  %v2407_v59 = vadd.f32 %v1254_v25, %v1252_v24  ;;  %1627 = vpow2.f32 %v419_v4  ;;  %v484_v50 = vmul.f32 %v481_v45, %v2007_v44  ;;  %v1132_v12 = vmul.f32 %v2313_v52, %v2401_v23  ;;  %v3338_v44 = vld [vmem:[#allocation15_spill] sm:$0xff] }
 0x28d   :  { %3308 = vst [vmem:[#allocation43_spill] sm:$0xff] %v2401_v23  ;;  %v1143_v39 = vmul.f32 %v3311_v30, %v2152_v17  ;;  %1629 = vpow2.f32 %v468_v43  ;;  %v1319_v0 = vmul.f32 %v2261_v35, %v2409_v18  ;;  %v1321_v20 = vmul.f32 %v3311_v30, %v3312_v9  ;;  %v517_v61 = vpop.permute.xlu1 %516 }
 0x28e   :  { %3309 = vst [vmem:[#allocation44_spill] sm:$0xff] %v2404_v54  ;;  %v3314_v4 = vperm.slane %v1966_v55, 1  ;;  %v458_v52 = vmul.f32 %v3315_v34, %v2058_v1  ;;  %v3316_v43 = vperm.slane %v1966_v55, 2  ;;  %v2433_v35 = vpop.permute.xlu0 %1080  ;;  %v3319_v24 = vperm.slane %v1966_v55, 5 }
 0x28f   :  { %3310 = vst [vmem:[#allocation45_spill] sm:$0xff] %v2409_v18  ;;  %v2420_v25 = vadd.f32 %v1143_v39, %v1132_v12  ;;  %v2431_v16 = vadd.f32 %v1321_v20, %v1319_v0  ;;  %v1626_v12 = vpop.eup %1625  ;;  %v2441_v34 = vmul.f32 %v2433_v35, %v1077_v26  ;;  %v3322_v0 = vld [vmem:[#allocation3_spill] sm:$0xff]  ;;  %v3325_v26 = vmov 7  }
 0x290   :  { %v423_v6 = vmul.f32 %v3314_v4, %v2058_v1  ;;  %v430_v10 = vmul.f32 %v3316_v43, %v2058_v1  ;;  %3318 = vst [vmem:[#allocation46_spill] sm:$0xff] %v2433_v35  ;;  %v451_v29 = vmul.f32 %v3319_v24, %v2058_v1  ;;  %v461_v4 = vmul.f32 1.442695, %v458_v52  ;;  %v3345_v35 = vld [vmem:[#allocation9_spill] sm:$0xff] }
 0x291   :  { %3313 = vst [vmem:[#allocation19_spill] sm:$0xff] %v2420_v25  ;;  %v1166_v30 = vmul.f32 %v2272_v31, %v2420_v25  ;;  %v1338_v20 = vmul.f32 %v3322_v0, %v2136_v42  ;;  %v749_v43 = vmul.f32 %v2016_v47, %v481_v45  ;;  %v1336_v48 = vmul.f32 %v2241_v27, %v2431_v16  ;;  %v3349_v25 = vld [vmem:[#allocation18_spill] sm:$0xff] }
 0x292   :  { %3317 = vst [vmem:[#allocation16_spill] sm:$0xff] %v2431_v16  ;;  %v426_v39 = vmul.f32 1.442695, %v423_v6  ;;  %v2443_v56 = vpop.eup %1627  ;;  %v3323_v24 = vmov 6   ;;  %v3324_v6 = vld [vmem:[#allocation11_spill] sm:$0xff]  ;;  %v2461_v45 = vadd.f32 1.0, %v1626_v12 }
 0x293   :  { %3320 = vst [vmem:[#allocation47_spill] sm:$0xff] %v2441_v34  ;;  %1538 = vset.pattern.permute.xlu2 %v3323_v24  ;;  %v2451_v18 = vpop.eup %1629  ;;  %v471_v31 = vmul.f32 0.0, %v2443_v56  ;;  %v2455_v52 = vadd.f32 %v3324_v6, %v1166_v30  ;;  %1539 = vset.pattern.permute.xlu1 %v3325_v26  ;;  %v2458_v34 = vpop.permute.xlu2 %1208  ;;  %v433_v47 = vmul.f32 1.442695, %v430_v10  ;;  %v2463_v27 = vadd.f32 %v1338_v20, %v1336_v48 }
 0x294   :  { %3321 = vst [vmem:[#allocation48_spill] sm:$0xff] %v2443_v56  ;;  %1631 = vpow2.f32 %v426_v39  ;;  %698 = vperm.xlu2 %1538, %v1901_v8   ;;  %732 = vperm.xlu1 %1539, %v1901_v8   ;;  %v454_v0 = vmul.f32 1.442695, %v451_v29  ;;  %v747_v24 = vmul.f32 0.0, %v2451_v18  ;;  %v2475_v6 = vmul.f32 %v2458_v34, %v2179_v13 }
 0x295   :  { %3326 = vst [vmem:[#allocation3_spill] sm:$0xff] %v2458_v34  ;;  %1633 = vpow2.f32 %v461_v4  ;;  %v2467_v30 = vadd.f32 %v484_v50, %v471_v31  ;;  %v2471_v39 = vmul.f32 %v2364_v36, %v2455_v52  ;;  %v3329_v48 = vperm.slane %v1966_v55, 3  ;;  %v3337_v36 = vld [vmem:[#allocation10_spill] sm:$0xff] }
 0x296   :  { %3328 = vst [vmem:[#allocation49_spill] sm:$0xff] %v2475_v6  ;;  %v2480_v12 = vadd.f32 %v749_v43, %v747_v24  ;;  %1635 = vpow2.f32 %v433_v47  ;;  %v3330_v29 = vperm.slane %v1966_v55, 4  ;;  %v3331_v4 = vperm.slane %v2014_v46, 2 }
 0x297   :  { %3327 = vst [vmem:[#allocation11_spill] sm:$0xff] %v2471_v39  ;;  %v437_v10 = vmul.f32 %v3329_v48, %v2058_v1  ;;  %v520_v31 = vmul.f32 %v517_v61, %v2020_v53  ;;  %1637 = vpow2.f32 %v454_v0  ;;  %v766_v43 = vmul.f32 %v2022_v3, %v517_v61  ;;  %v551_v24 = vpop.permute.xlu1 %550 }
 0x298   :  { %v444_v50 = vmul.f32 %v3330_v29, %v2058_v1  ;;  %v922_v20 = vmul.f32 %v3331_v4, %v2058_v1  ;;  %1639 = vrcp.f32 %v2461_v45  ;;  %v3332_v29 = vld [vmem:[#allocation6_spill] sm:$0xff]  ;;  %v3335_v61 = vmov 14  }
 0x299   :  { %v440_v13 = vmul.f32 1.442695, %v437_v10  ;;  %v554_v4 = vmul.f32 %v551_v24, %v3332_v29  ;;  %v3333_v10 = vmov 5   ;;  %v3346_v33 = vmov 13  }
 0x29a   :  { %v2489_v26 = vpop.eup %1631  ;;  %v447_v47 = vmul.f32 1.442695, %v444_v50  ;;  %v925_v48 = vmul.f32 1.442695, %v922_v20  ;;  %vm144_vm12 = vweird.f32 %v2461_v45 }
 0x29b   :  { %v2493_v16 = vpop.eup %1633  ;;  %v509_v55 = vmul.f32 %v2489_v26, %v2467_v30  ;;  %1641 = vpow2.f32 %v440_v13  ;;  %v490_v50 = vpop.permute.xlu2 %489  ;;  %v783_v13 = vmul.f32 %v2038_v38, %v551_v24 }
 0x29c   :  { %v764_v0 = vmul.f32 %v2493_v16, %v2480_v12  ;;  %1540 = vset.pattern.permute.xlu2 %v3333_v10  ;;  %1643 = vpow2.f32 %v447_v47  ;;  %1541 = vset.pattern.permute.xlu1 %v3335_v61  ;;  %v2505_v20 = vpop.eup %1635  ;;  %v2511_v54 = vmul.f32 %v490_v50, %v3337_v36  ;;  %v2514_v10 = vmul.f32 %v3338_v44, %v490_v50 }
 0x29d   :  { %v2501_v56 = vadd.f32 %v520_v31, %v509_v55  ;;  %664 = vperm.xlu2 %1540, %v1901_v8   ;;  %1645 = vpow2.f32 %v925_v48  ;;  %1186 = vperm.xlu1 %1541, %v1901_v8   ;;  %v2517_v31 = vpop.eup %1637  ;;  %v3339_v48 = vperm.slane %v2014_v46, 5  ;;  %v3342_v61 = vperm.slane %v2014_v46, 3 }
 0x29e   :  { %v2507_v39 = vadd.f32 %v766_v43, %v764_v0  ;;  %v2524_v55 = vpop.eup %1639 }
 0x29f   :  { %3334 = vst [vmem:[#allocation6_spill] sm:$0xff] %v2501_v56  ;;  %v543_v47 = vmul.f32 %v2505_v20, %v2501_v56  ;;  %v943_v43 = vmul.f32 %v3339_v48, %v2058_v1  ;;  %v929_v50 = vmul.f32 %v3342_v61, %v2058_v1  ;;  %v3343_v48 = vperm.slane %v2014_v46, 4 }
 0x2a0   :  { %3336 = vst [vmem:[#allocation50_spill] sm:$0xff] %v2507_v39  ;;  %v781_v38 = vmul.f32 %v2517_v31, %v2507_v39  ;;  %v585_v15 = vpop.permute.xlu1 %584  ;;  %vm145_vm11 = vweird.f32 %v2524_v55 }
 0x2a1   :  { %v2528_v36 = vpop.eup %1641  ;;  %v2530_v44 = vadd.f32 %v554_v4, %v543_v47  ;;  %v936_v56 = vmul.f32 %v3343_v48, %v2058_v1  ;;  %v946_v4 = vmul.f32 1.442695, %v943_v43  ;;  %v800_v63 = vmul.f32 %v3345_v35, %v585_v15  ;;  %v3348_v35 = vld [vmem:[#allocation12_spill] sm:$0xff]  ;;  %vm146_vm13 = vmor %vm144_vm12, %vm145_vm11 }
 0x2a2   :  { %v2532_v24 = vpop.eup %1643  ;;  %v2534_v0 = vadd.f32 %v783_v13, %v781_v38  ;;  %v3344_v13 = vld [vmem:[#allocation8_spill] sm:$0xff]  ;;  %v140_v1 = vmul.f32 %v2524_v55, %v2461_v45  ;;  %v3347_v43 = vmov 11  }
 0x2a3   :  { %3340 = vst [vmem:[#allocation10_spill] sm:$0xff] %v2530_v44  ;;  %v2542_v23 = vpop.eup %1645  ;;  %v577_v39 = vmul.f32 %v2528_v36, %v2530_v44  ;;  %v588_v38 = vmul.f32 %v585_v15, %v3344_v13  ;;  %v525_v44 = vpop.permute.xlu2 %524  ;;  %v939_v6 = vmul.f32 1.442695, %v936_v56  ;;  %1647 = vpow2.f32 %v946_v4 }
 0x2a4   :  { %3341 = vst [vmem:[#allocation15_spill] sm:$0xff] %v2534_v0  ;;  %v798_v47 = vmul.f32 %v2532_v24, %v2534_v0  ;;  %v1031_v61 = vmul.f32 %v2542_v23, %v2399_v58  ;;  %v932_v0 = vmul.f32 1.442695, %v929_v50  ;;  %v597_v15 = vpop.permute.xlu0 %596  ;;  %v2562_v34 = vmul.f32 %v525_v44, %v3348_v35 }
 0x2a5   :  { %1543 = vset.pattern.permute.xlu2 %v3346_v33  ;;  %v2555_v46 = vadd.f32 %v588_v38, %v577_v39  ;;  %1545 = vset.pattern.permute.xlu1 %v3347_v43  ;;  %v2565_v33 = vmul.f32 %v3349_v25, %v525_v44  ;;  %v1355_v39 = vmul.f32 %v2270_v11, %v2123_v28  ;;  %v141_v44 = vsub.f32 1.0, %v140_v1 }
 0x2a6   :  { %v2557_v48 = vadd.f32 %v800_v63, %v798_v47  ;;  %1152 = vperm.xlu2 %1543, %v1901_v8   ;;  %1084 = vperm.xlu1 %1545, %v1901_v8   ;;  %v1200_v63 = vmul.f32 %v2203_v19, %v2455_v52  ;;  %v1353_v56 = vmul.f32 %v2199_v22, %v2463_v27  ;;  %1649 = vpow2.f32 %v932_v0 }
 0x2a7   :  { %v600_v47 = vmul.f32 %v597_v15, %v2555_v46  ;;  %1651 = vpow2.f32 %v939_v6  ;;  %v3350_v22 = vmov 10   ;;  %v142_v6 = vmul.f32 %v2524_v55, %v141_v44 }
 0x2a8   :  { %v2576_v50 = vadd.f32 %v2362_v2, %v1200_v63  ;;  %v2578_v25 = vadd.f32 %v1355_v39, %v1353_v56  ;;  %v3353_v63 = vld [vmem:[#allocation17_spill] sm:$0xff]  ;;  %v1288_v44 = vmul.f32 %v2308_v57, %v2311_v60 }
 0x2a9   :  { %v2580_v4 = vpop.eup %1647  ;;  %v3354_v56 = vld [vmem:[#allocation21_spill] sm:$0xff] }
 0x2aa   :  { %v1039_v38 = vpop.permute.xlu1 %1038  ;;  %v1269_v11 = vmul.f32 %v2580_v4, %v2407_v59 }
 0x2ab   :  { %v1042_v19 = vmul.f32 %v1039_v38, %v3312_v9  ;;  %v1271_v52 = vmul.f32 %v2152_v17, %v1039_v38  ;;  %v1076_v38 = vmul.f32 %v2311_v60, %v2300_v49 }
 0x2ac   :  { %v559_v2 = vpop.permute.xlu2 %558  ;;  %v1650_v0 = vpop.eup %1649 }
 0x2ad   :  { %v2590_v1 = vadd.f32 %v1042_v19, %v1031_v61  ;;  %v2592_v43 = vadd.f32 %v1271_v52, %v1269_v11  ;;  %v1652_v35 = vpop.eup %1651  ;;  %v2596_v39 = vmul.f32 %v559_v2, %v3353_v63  ;;  %v143_v11 = vadd.f32 %v2524_v55, %v142_v6 }
 0x2ae   :  { %1544 = vset.pattern.permute.xlu2 %v3278_v5  ;;  %1546 = vset.pattern.permute.xlu1 %v3350_v22  ;;  %v2599_v5 = vmul.f32 %v3354_v56, %v559_v2  ;;  %v150_v2 = vand.u32 2147483648, %v2461_v45  ;;  %v148_v63 = vand.u32 2147483647, %v2461_v45 }
 0x2af   :  { %1118 = vperm.xlu2 %1544, %v1901_v8   ;;  %3351 = vst [vmem:[#allocation8_spill] sm:$0xff] %v2590_v1  ;;  %1050 = vperm.xlu1 %1546, %v1901_v8   ;;  %v1065_v61 = vmul.f32 %v1650_v0, %v2590_v1  ;;  %v1286_v19 = vmul.f32 %v1652_v35, %v2592_v43  ;;  %v3356_v1 = vmov 8  }
 0x2b0   :  { %3352 = vst [vmem:[#allocation9_spill] sm:$0xff] %v2592_v43  ;;  %v804_v43 = vmul.f32 %v2557_v48, %v597_v15  ;;  %v147_v6 = vsel %vm146_vm13, %v2524_v55, %v143_v11  ;;  %vm149_vm15 = vcmp.eq.f32.partialorder %v148_v63, 8.507059e+37 }
 0x2b1   :  { %v2609_v52 = vadd.f32 %v1076_v38, %v1065_v61  ;;  %v2611_v22 = vadd.f32 %v1288_v44, %v1286_v19  ;;  %v151_v44 = vor.u32 1.1754944e-38, %v150_v2  ;;  %v3357_v61 = vld [vmem:[#allocation20_spill] sm:$0xff]  ;;  %v3358_v2 = vld [vmem:[#allocation2_spill] sm:$0xff] }
 0x2b3   :  { %3355 = vst [vmem:[#allocation12_spill] sm:$0xff] %v2609_v52  ;;  %v687_v56 = vpop.permute.xlu1 %686  ;;  %v1099_v60 = vmul.f32 %v1652_v35, %v2609_v52  ;;  %v152_v35 = vsel %vm149_vm15, %v151_v44, %v147_v6  ;;  %v602_v52 = vsel %vm257_vm14, %v600_v47, 0.0  ;;  %v1303_v6 = vmul.f32 %v1650_v0, %v2611_v22 }
 0x2b4   :  { %v611_v44 = vmul.f32 %v2532_v24, %v2555_v46  ;;  %v834_v24 = vmul.f32 %v2225_v40, %v3332_v29 }
 0x2b5   :  { %v593_v38 = vpop.permute.xlu2 %592 }
 0x2b6   :  { %v599_v19 = vmul.f32 %v593_v38, %v3357_v61  ;;  %v803_v45 = vmul.f32 %v2228_v37, %v593_v38  ;;  %v1455_v61 = vmul.f32 -1.442695, %v3358_v2  ;;  %v2635_v37 = vmul.f32 %v152_v35, %v1796_v51  ;;  %v3396_v2 = vld [vmem:[#allocation48_spill] sm:$0xff] }
 0x2b7   :  { %1549 = vset.pattern.permute.xlu2 %v3356_v1  ;;  %1548 = vset.pattern.permute.xlu1 %v3356_v1  ;;  %v806_v1 = vsel %vm257_vm14, %v804_v43, 0.0  ;;  %v3360_v43 = vld [vmem:[#allocation4_spill] sm:$0xff]  ;;  %v815_v51 = vmul.f32 %v2528_v36, %v2557_v48  ;;  %v2665_v36 = vpop.permute.xlu0 %1220 }
 0x2b8   :  { %982 = vperm.xlu2 %1549, %v1901_v8   ;;  %978 = vperm.xlu1 %1548, %v1883_v7   ;;  %v601_v15 = vsel %vm257_vm14, %v599_v19, 0.0  ;;  %v805_v55 = vsel %vm257_vm14, %v803_v45, 0.0  ;;  %3359 = vst [vmem:[#allocation18_spill] sm:$0xff] %v2635_v37  ;;  %1653 = vpow2.f32 %v1455_v61  ;;  %v3361_v45 = vld [vmem:[#allocation13_spill] sm:$0xff] }
 0x2b9   :  { %v2629_v11 = vadd.f32 %v602_v52, %v601_v15  ;;  %v2631_v8 = vadd.f32 %v806_v1, %v805_v55  ;;  %v817_v52 = vmul.f32 %v3360_v43, %v3344_v13  ;;  %v2659_v13 = vadd.f32 %v3361_v45, %v611_v44  ;;  %v3362_v1 = vld [vmem:[#allocation35_spill] sm:$0xff]  ;;  %v3364_v44 = vld [vmem:[#allocation32_spill] sm:$0xff]  ;;  %v3366_v45 = vld [vmem:[#allocation34_spill] sm:$0xff] }
 0x2bb   :  { %v2661_v35 = vadd.f32 %v817_v52, %v815_v51  ;;  %v645_v46 = vmul.f32 %v2517_v31, %v2659_v13  ;;  %v3363_v31 = vld [vmem:[#allocation37_spill] sm:$0xff] }
 0x2bc   :  { %v1107_v7 = vpop.permute.xlu1 %1106 }
 0x2bd   :  { %v1110_v63 = vmul.f32 %v1107_v7, %v2308_v57  ;;  %v1305_v47 = vmul.f32 %v1107_v7, %v2300_v49  ;;  %v832_v48 = vmul.f32 %v2505_v20, %v2661_v35 }
 0x2be   :  { %v1217_v38 = vpop.permute.xlu2 %1216 }
 0x2bf   :  { %v2648_v57 = vadd.f32 %v1110_v63, %v1099_v60  ;;  %v2650_v0 = vadd.f32 %v1305_v47, %v1303_v6  ;;  %v2653_v49 = vmul.f32 %v1217_v38, %v2576_v50  ;;  %v2656_v19 = vmul.f32 %v2578_v25, %v1217_v38  ;;  %v1654_v60 = vpop.eup %1653  ;;  %v1017_v6 = vpop.permute.xlu0 %1016 }
 0x2c0   :  { %1391 = vrot.lane.b32.xlu2 %v2635_v37, %s1676_s10  ;;  %v2672_v50 = vadd.f32 %v2353_v41, %v645_v46  ;;  %v2674_v25 = vadd.f32 %v834_v24, %v832_v48  ;;  %v2687_v20 = vadd.f32 1.0, %v1654_v60  ;;  %v690_v41 = vmul.f32 %v687_v56, %v2022_v3  ;;  %v3367_v46 = vld [vmem:[#allocation25_spill] sm:$0xff]  ;;  %v3394_v37 = vld [vmem:[#allocation50_spill] sm:$0xff] }
 0x2c1   :  { %v851_v63 = vmul.f32 %v687_v56, %v2020_v53  ;;  %v1020_v52 = vmul.f32 %v1017_v6, %v2399_v58  ;;  %v1258_v38 = vmul.f32 %v2407_v59, %v1017_v6  ;;  %v3365_v56 = vld [vmem:[#allocation28_spill] sm:$0xff]  ;;  %v1144_v6 = vmul.f32 %v2396_v21, %v2152_v17  ;;  %v3369_v17 = vld [vmem:[#allocation22_spill] sm:$0xff] }
 0x2c2   :  { %v679_v40 = vmul.f32 %v2493_v16, %v2672_v50  ;;  %1655 = vrcp.f32 %v2687_v20  ;;  %vm159_vm2 = vweird.f32 %v2687_v20 }
 0x2c3   :  { %v1022_v58 = vsel %vm257_vm14, %v1020_v52, 0.0  ;;  %v1260_v59 = vsel %vm257_vm14, %v1258_v38, 0.0  ;;  %v1322_v52 = vmul.f32 %v2396_v21, %v3312_v9  ;;  %v499_v21 = vsel %vm257_vm14, %v2511_v54, 0.0  ;;  %v3370_v54 = vld [vmem:[#allocation39_spill] sm:$0xff] }
 0x2c4   :  { %v2694_v16 = vadd.f32 %v690_v41, %v679_v40  ;;  %v754_v9 = vsel %vm257_vm14, %v2514_v10, 0.0 }
 0x2c5   :  { %v627_v15 = vpop.permute.xlu1 %626 }
 0x2c6   :  { %v2677_v55 = vmul.f32 %v627_v15, %v2220_v62  ;;  %v849_v62 = vmul.f32 %v2489_v26, %v2674_v25  ;;  %v713_v53 = vmul.f32 %v2451_v18, %v2694_v16 }
 0x2c7   :  { %v1047_v29 = vpop.permute.xlu2 %1046 }
 0x2c8   :  { %v2682_v61 = vmul.f32 %v1047_v29, %v3362_v1  ;;  %v2685_v7 = vmul.f32 %v3363_v31, %v1047_v29  ;;  %v2696_v47 = vadd.f32 %v851_v63, %v849_v62  ;;  %v2711_v48 = vadd.f32 %v3367_v46, %v713_v53  ;;  %v2713_v60 = vpop.eup %1655  ;;  %v3368_v63 = vld [vmem:[#allocation26_spill] sm:$0xff] }
 0x2c9   :  { %v155_v31 = vmul.f32 %v2713_v60, %v2687_v20  ;;  %v1320_v53 = vmul.f32 %v2542_v23, %v2650_v0  ;;  %v1339_v46 = vmul.f32 %v3369_v17, %v2136_v42  ;;  %v604_v23 = vrot.slane %v2629_v11, 4  ;;  %v3375_v17 = vld [vmem:[#allocation3_spill] sm:$0xff] }
 0x2ca   :  { %v808_v42 = vrot.slane %v2631_v8, 4  ;;  %vm160_vm1 = vweird.f32 %v2713_v60 }
 0x2cb   :  { %vm2815_vm3 = vmor %vm159_vm2, %vm160_vm1 }
 0x2ce   :  { %v2698_v43 = vpop.permute.xlu1 %694 }
 0x2cf   :  { %v2704_v3 = vmul.f32 %v2698_v43, %v3364_v44  ;;  %v1133_v44 = vmul.f32 %v2580_v4, %v2648_v57 }
 0x2d0   :  { %v1013_v26 = vpop.permute.xlu2 %1012 }
 0x2d1   :  { %v1019_v51 = vmul.f32 %v1013_v26, %v3365_v56  ;;  %v1257_v24 = vmul.f32 %v3366_v45, %v1013_v26  ;;  %v156_v26 = vsub.f32 1.0, %v155_v31  ;;  %v2741_v45 = vadd.f32 %v1144_v6, %v1133_v44  ;;  %v3373_v44 = vld [vmem:[#allocation31_spill] sm:$0xff] }
 0x2d2   :  { %v605_v31 = vadd.f32 %v604_v23, %v2629_v11  ;;  %v809_v11 = vadd.f32 %v808_v42, %v2631_v8 }
 0x2d3   :  { %v1021_v40 = vsel %vm257_vm14, %v1019_v51, 0.0  ;;  %v1259_v29 = vsel %vm257_vm14, %v1257_v24, 0.0  ;;  %v2743_v24 = vadd.f32 %v1322_v52, %v1320_v53  ;;  %v157_v6 = vmul.f32 %v2713_v60, %v156_v26 }
 0x2d4   :  { %v2719_v1 = vadd.f32 %v1022_v58, %v1021_v40  ;;  %v2721_v18 = vadd.f32 %v1260_v59, %v1259_v29  ;;  %v606_v23 = vrot.slane %v605_v31, 2  ;;  %v810_v42 = vrot.slane %v809_v11, 2 }
 0x2d5   :  { %v1337_v58 = vmul.f32 %v2372_v14, %v2743_v24 }
 0x2d7   :  { %v2725_v41 = vpop.permute.xlu1 %660  ;;  %v2764_v10 = vadd.f32 %v1339_v46, %v1337_v58  ;;  %v1356_v46 = vmul.f32 %v3375_v17, %v2123_v28  ;;  %v2788_v58 = vadd.f32 %v2713_v60, %v157_v6  ;;  %v635_v28 = vsel %vm257_vm14, %v2677_v55, 0.0  ;;  %v3378_v55 = vld [vmem:[#allocation29_spill] sm:$0xff] }
 0x2d8   :  { %v2729_v62 = vmul.f32 %v2725_v41, %v3368_v63 }
 0x2db   :  { %v495_v38 = vpop.permute.xlu2 %494 }
 0x2dc   :  { %v498_v56 = vmul.f32 %v495_v38, %v2467_v30  ;;  %v753_v51 = vmul.f32 %v2480_v12, %v495_v38  ;;  %v1167_v12 = vmul.f32 %v2384_v32, %v2741_v45  ;;  %v3371_v32 = vld [vmem:[#allocation27_spill] sm:$0xff] }
 0x2dd   :  { %v820_v52 = vmul.f32 %v3371_v32, %v627_v15  ;;  %v3372_v38 = vld [vmem:[#allocation19_spill] sm:$0xff] }
 0x2de   :  { %v500_v4 = vsel %vm257_vm14, %v498_v56, 0.0  ;;  %v755_v30 = vsel %vm257_vm14, %v753_v51, 0.0  ;;  %v2762_v29 = vadd.f32 %v3370_v54, %v1167_v12  ;;  %v3374_v56 = vld [vmem:[#allocation30_spill] sm:$0xff] }
 0x2df   :  { %v501_v59 = vadd.f32 %v500_v4, %v499_v21  ;;  %v2759_v40 = vadd.f32 %v755_v30, %v754_v9  ;;  %v1354_v51 = vmul.f32 %v3374_v56, %v2764_v10  ;;  %v165_v9 = vand.u32 2147483648, %v2687_v20  ;;  %v3376_v4 = vld [vmem:[#allocation49_spill] sm:$0xff]  ;;  %v3379_v56 = vld [vmem:[#allocation7_spill] sm:$0xff] }
 0x2e0   :  { %v2767_v63 = vpop.permute.xlu1 %1148  ;;  %v1201_v53 = vmul.f32 %v3373_v44, %v2762_v29  ;;  %v822_v8 = vsel %vm257_vm14, %v820_v52, 0.0  ;;  %v871_v52 = vmul.f32 %v3379_v56, %v3378_v55 }
 0x2e1   :  { %v2773_v14 = vmul.f32 %v2767_v63, %v3372_v38  ;;  %v1358_v12 = vadd.f32 %v1356_v46, %v1354_v51  ;;  %v1225_v51 = vsel %vm257_vm14, %v2653_v49, 0.0  ;;  %v502_v17 = vrot.slane %v501_v59, 4 }
 0x2e2   :  { %v1214_v30 = vadd.f32 %v3376_v4, %v1201_v53  ;;  %v2799_v53 = vor.u32 1.1754944e-38, %v165_v9  ;;  %v607_v4 = vadd.f32 %v606_v23, %v605_v31  ;;  %v811_v49 = vadd.f32 %v810_v42, %v809_v11  ;;  %v3386_v23 = vld [vmem:[#allocation5_spill] sm:$0xff]  ;;  %v3389_v11 = vld [vmem:[#allocation36_spill] sm:$0xff] }
 0x2e3   :  { %v1360_v44 = vmul.f32 %v1358_v12, %v2665_v36  ;;  %v854_v42 = vmul.f32 %v3389_v11, %v2698_v43 }
 0x2e4   :  { %v631_v21 = vpop.permute.xlu2 %630  ;;  %v1224_v38 = vmul.f32 %v2665_v36, %v1214_v30  ;;  %3377 = vst [vmem:[#allocation17_spill] sm:$0xff] %v2799_v53  ;;  %v608_v43 = vrot.slane %v607_v4, 1 }
 0x2e5   :  { %v634_v26 = vmul.f32 %v631_v21, %v2659_v13  ;;  %v821_v15 = vmul.f32 %v2661_v35, %v631_v21  ;;  %v3380_v21 = vld [vmem:[#allocation46_spill] sm:$0xff]  ;;  %v1362_v9 = vsel %vm257_vm14, %v1360_v44, 0.0  ;;  %v3388_v44 = vld [vmem:[#allocation44_spill] sm:$0xff] }
 0x2e6   :  { %v1226_v46 = vsel %vm257_vm14, %v1224_v38, 0.0  ;;  %v2833_v55 = vsel %vm257_vm14, %v3388_v44, 0.0 }
 0x2e7   :  { %v636_v13 = vsel %vm257_vm14, %v634_v26, 0.0  ;;  %v823_v35 = vsel %vm257_vm14, %v821_v15, 0.0  ;;  %v3381_v26 = vld [vmem:[#allocation42_spill] sm:$0xff]  ;;  %v2810_v30 = vadd.f32 %v1226_v46, %v1225_v51  ;;  %v2840_v51 = vsel %vm257_vm14, %v871_v52, 0.0  ;;  %v3390_v46 = vld [vmem:[#allocation41_spill] sm:$0xff] }
 0x2e8   :  { %v637_v54 = vadd.f32 %v636_v13, %v635_v28  ;;  %v824_v32 = vadd.f32 %v823_v35, %v822_v8  ;;  %v1291_v15 = vmul.f32 %v3381_v26, %v3380_v21  ;;  %v1361_v28 = vsel %vm257_vm14, %v2656_v19, 0.0  ;;  %v3385_v8 = vld [vmem:[#allocation43_spill] sm:$0xff]  ;;  %v3387_v35 = vld [vmem:[#allocation14_spill] sm:$0xff] }
 0x2e9   :  { %3382 = vst [vmem:[#allocation21_spill] sm:$0xff] %v2810_v30  ;;  %v868_v38 = vmul.f32 %v3387_v35, %v3386_v23  ;;  %v2837_v56 = vadd.f32 %v1362_v9, %v1361_v28  ;;  %v1342_v21 = vmul.f32 %v2463_v27, %v3390_v46  ;;  %v503_v26 = vadd.f32 %v502_v17, %v501_v59  ;;  %v3391_v23 = vld [vmem:[#allocation47_spill] sm:$0xff] }
 0x2ea   :  { %v2808_v36 = vpop.permute.xlu1 %1114  ;;  %v2847_v35 = vsel %vm257_vm14, %v3391_v23, 0.0  ;;  %v2850_v44 = vsel %vm257_vm14, %v1291_v15, 0.0  ;;  %v812_v28 = vrot.slane %v811_v49, 1  ;;  %v703_v52 = vsel %vm257_vm14, %v2704_v3, 0.0  ;;  %v3392_v23 = vld [vmem:[#allocation11_spill] sm:$0xff] }
 0x2eb   :  { %v2823_v13 = vmul.f32 %v2808_v36, %v3385_v8  ;;  %v638_v11 = vrot.slane %v637_v54, 4  ;;  %v856_v59 = vsel %vm257_vm14, %v854_v42, 0.0  ;;  %v2862_v15 = vsel %vm257_vm14, %v3392_v23, 0.0  ;;  %v3393_v23 = vld [vmem:[#allocation6_spill] sm:$0xff] }
 0x2ec   :  { %v504_v31 = vrot.slane %v503_v26, 2  ;;  %v533_v3 = vsel %vm257_vm14, %v2562_v34, 0.0  ;;  %v771_v42 = vsel %vm257_vm14, %v2565_v33, 0.0  ;;  %v757_v33 = vrot.slane %v2759_v40, 4 }
 0x2ed   :  { %v639_v34 = vadd.f32 %v638_v11, %v637_v54  ;;  %v669_v54 = vsel %vm257_vm14, %v2729_v62, 0.0 }
 0x2ee   :  { %v699_v19 = vpop.permute.xlu2 %698 }
 0x2ef   :  { %v702_v8 = vmul.f32 %v699_v19, %v2694_v16  ;;  %v855_v9 = vmul.f32 %v2696_v47, %v699_v19  ;;  %v825_v16 = vrot.slane %v824_v32, 4  ;;  %v2865_v19 = vsel %vm257_vm14, %v1342_v21, 0.0 }
 0x2f0   :  { %v2881_v21 = vadd.f32 %v812_v28, %v811_v49  ;;  %v505_v49 = vadd.f32 %v504_v31, %v503_v26  ;;  %v3397_v31 = vld [vmem:[#allocation16_spill] sm:$0xff] }
 0x2f1   :  { %v704_v27 = vsel %vm257_vm14, %v702_v8, 0.0  ;;  %v857_v46 = vsel %vm257_vm14, %v855_v9, 0.0  ;;  %v2873_v8 = vsel %vm257_vm14, %v2596_v39, 0.0  ;;  %v2877_v9 = vsel %vm257_vm14, %v2599_v5, 0.0 }
 0x2f2   :  { %v2857_v17 = vadd.f32 %v704_v27, %v703_v52  ;;  %v858_v6 = vadd.f32 %v857_v46, %v856_v59  ;;  %v2879_v52 = vadd.f32 %v608_v43, %v607_v4  ;;  %v2885_v27 = vsel %vm257_vm14, %v2682_v61, 0.0  ;;  %v3395_v4 = vld [vmem:[#allocation33_spill] sm:$0xff] }
 0x2f3   :  { %v826_v46 = vadd.f32 %v825_v16, %v824_v32  ;;  %v1262_v5 = vrot.slane %v2721_v18, 4  ;;  %v837_v43 = vmul.f32 %v3395_v4, %v2725_v41  ;;  %v866_v61 = vmul.f32 %v3396_v2, %v2696_v47 }
 0x2f4   :  { %v529_v59 = vpop.permute.xlu1 %528  ;;  %v2902_v41 = vadd.f32 %v757_v33, %v2759_v40  ;;  %v1325_v2 = vmul.f32 %v3397_v31, %v2767_v63  ;;  %v506_v26 = vrot.slane %v505_v49, 1  ;;  %v1364_v40 = vrot.slane %v2837_v56, 4 }
 0x2f5   :  { %v532_v39 = vmul.f32 %v529_v59, %v3393_v23  ;;  %v770_v30 = vmul.f32 %v3394_v37, %v529_v59  ;;  %v640_v37 = vrot.slane %v639_v34, 2  ;;  %v827_v47 = vrot.slane %v826_v46, 2 }
 0x2f6   :  { %v859_v33 = vrot.slane %v858_v6, 4 }
 0x2f7   :  { %v665_v28 = vpop.permute.xlu2 %664  ;;  %v534_v11 = vsel %vm257_vm14, %v532_v39, 0.0  ;;  %v772_v32 = vsel %vm257_vm14, %v770_v30, 0.0  ;;  %v870_v30 = vadd.f32 %v868_v38, %v866_v61  ;;  %v641_v63 = vadd.f32 %v640_v37, %v639_v34  ;;  %v3399_v34 = vld [vmem:[#allocation10_spill] sm:$0xff] }
 0x2f8   :  { %v668_v16 = vmul.f32 %v665_v28, %v2672_v50  ;;  %v535_v59 = vadd.f32 %v534_v11, %v533_v3  ;;  %v773_v23 = vadd.f32 %v772_v32, %v771_v42  ;;  %v838_v53 = vmul.f32 %v2674_v25, %v665_v28 }
 0x2f9   :  { %v2908_v50 = vadd.f32 %v1262_v5, %v2721_v18  ;;  %v839_v3 = vsel %vm257_vm14, %v837_v43, 0.0  ;;  %v1157_v42 = vsel %vm257_vm14, %v2773_v14, 0.0  ;;  %v759_v11 = vrot.slane %v2902_v41, 2  ;;  %v3398_v43 = vld [vmem:[#allocation45_spill] sm:$0xff] }
 0x2fa   :  { %v670_v62 = vsel %vm257_vm14, %v668_v16, 0.0  ;;  %v536_v39 = vrot.slane %v535_v59, 4  ;;  %v840_v25 = vsel %vm257_vm14, %v838_v53, 0.0  ;;  %v828_v38 = vadd.f32 %v827_v47, %v826_v46 }
 0x2fb   :  { %v671_v4 = vadd.f32 %v670_v62, %v669_v54  ;;  %v1327_v54 = vsel %vm257_vm14, %v1325_v2, 0.0  ;;  %v841_v61 = vadd.f32 %v840_v25, %v839_v3  ;;  %v507_v5 = vadd.f32 %v506_v26, %v505_v49 }
 0x2fc   :  { %v537_v28 = vadd.f32 %v536_v39, %v535_v59  ;;  %v1308_v32 = vmul.f32 %v3398_v43, %v2808_v36  ;;  %v706_v53 = vrot.slane %v2857_v17, 4  ;;  %v2922_v14 = vsel %vm257_vm14, %v2823_v13, 0.0  ;;  %v3400_v59 = vld [vmem:[#allocation15_spill] sm:$0xff] }
 0x2fd   :  { %v563_v18 = vpop.permute.xlu1 %562  ;;  %v1365_v46 = vadd.f32 %v1364_v40, %v2837_v56  ;;  %v642_v2 = vrot.slane %v641_v63, 1  ;;  %v860_v47 = vadd.f32 %v859_v33, %v858_v6  ;;  %v829_v36 = vrot.slane %v828_v38, 1 }
 0x2fe   :  { %v538_v16 = vrot.slane %v537_v28, 2  ;;  %v566_v37 = vmul.f32 %v563_v18, %v3399_v34  ;;  %v787_v31 = vmul.f32 %v3400_v59, %v563_v18  ;;  %v707_v25 = vadd.f32 %v706_v53, %v2857_v17 }
 0x2ff   :  { %v774_v56 = vrot.slane %v773_v23, 4  ;;  %v861_v33 = vrot.slane %v860_v47, 2  ;;  %v2938_v53 = vadd.f32 %v642_v2, %v641_v63  ;;  %v2949_v2 = vadd.f32 %v829_v36, %v828_v38 }
 0x300   :  { %v1153_v62 = vpop.permute.xlu2 %1152  ;;  %v539_v49 = vadd.f32 %v538_v16, %v537_v28  ;;  %v568_v39 = vsel %vm257_vm14, %v566_v37, 0.0  ;;  %v789_v3 = vsel %vm257_vm14, %v787_v31, 0.0  ;;  %v672_v16 = vrot.slane %v671_v4, 4 }
 0x301   :  { %v1156_v26 = vmul.f32 %v1153_v62, %v2741_v45  ;;  %v1326_v13 = vmul.f32 %v2743_v24, %v1153_v62  ;;  %v569_v18 = vadd.f32 %v568_v39, %v2873_v8  ;;  %v790_v34 = vadd.f32 %v789_v3, %v2877_v9 }
 0x302   :  { %v540_v43 = vrot.slane %v539_v49, 1  ;;  %v1366_v45 = vrot.slane %v1365_v46, 2  ;;  %v842_v37 = vrot.slane %v841_v61, 4  ;;  %v1310_v8 = vsel %vm257_vm14, %v1308_v32, 0.0 }
 0x303   :  { %v1158_v6 = vsel %vm257_vm14, %v1156_v26, 0.0  ;;  %v1328_v40 = vsel %vm257_vm14, %v1326_v13, 0.0  ;;  %v570_v59 = vrot.slane %v569_v18, 4  ;;  %v791_v31 = vrot.slane %v790_v34, 4 }
 0x304   :  { %v541_v28 = vadd.f32 %v540_v43, %v539_v49  ;;  %v2936_v24 = vadd.f32 %v1158_v6, %v1157_v42  ;;  %v1329_v17 = vadd.f32 %v1328_v40, %v1327_v54  ;;  %v708_v9 = vrot.slane %v707_v25, 2 }
 0x305   :  { %v775_v39 = vadd.f32 %v774_v56, %v773_v23  ;;  %v2945_v13 = vadd.f32 %v1366_v45, %v1365_v46  ;;  %v2947_v43 = vadd.f32 %v861_v33, %v860_v47  ;;  %v673_v42 = vadd.f32 %v672_v16, %v671_v4 }
 0x306   :  { %v2942_v62 = vsel %vm178_vm8, %v507_v5, %v541_v28  ;;  %v733_v26 = vpop.permute.xlu1 %732  ;;  %v1330_v3 = vrot.slane %v1329_v17, 4  ;;  %v843_v6 = vadd.f32 %v842_v37, %v841_v61  ;;  %v571_v32 = vadd.f32 %v570_v59, %v569_v18 }
 0x307   :  { %v736_v49 = vmul.f32 %v733_v26, %v2711_v48  ;;  %v872_v54 = vmul.f32 %v870_v30, %v733_v26  ;;  %v792_v40 = vadd.f32 %v791_v31, %v790_v34  ;;  %v2952_v28 = vadd.f32 %v708_v9, %v707_v25 }
 0x308   :  { %v1331_v23 = vadd.f32 %v1330_v3, %v1329_v17  ;;  %v776_v46 = vrot.slane %v775_v39, 2  ;;  %v1368_v30 = vrot.slane %v2945_v13, 1  ;;  %v863_v38 = vrot.slane %v2947_v43, 1 }
 0x309   :  { %v1119_v63 = vpop.permute.xlu2 %1118  ;;  %v738_v5 = vsel %vm257_vm14, %v736_v49, 0.0  ;;  %v874_v48 = vsel %vm257_vm14, %v872_v54, 0.0  ;;  %v674_v61 = vrot.slane %v673_v42, 2  ;;  %v844_v36 = vrot.slane %v843_v6, 2 }
 0x30a   :  { %v739_v56 = vadd.f32 %v738_v5, %v2833_v55  ;;  %v875_v47 = vadd.f32 %v874_v48, %v2840_v51  ;;  %v1122_v4 = vmul.f32 %v1119_v63, %v2648_v57  ;;  %v1309_v18 = vmul.f32 %v2650_v0, %v1119_v63 }
 0x30b   :  { %v572_v25 = vrot.slane %v571_v32, 2  ;;  %v793_v34 = vrot.slane %v792_v40, 2  ;;  %v1332_v33 = vrot.slane %v1331_v23, 2  ;;  %v777_v51 = vadd.f32 %v776_v46, %v775_v39 }
 0x30c   :  { %v876_v45 = vrot.slane %v875_v47, 4  ;;  %v1124_v55 = vsel %vm257_vm14, %v1122_v4, 0.0  ;;  %v740_v16 = vrot.slane %v739_v56, 4  ;;  %v1311_v57 = vsel %vm257_vm14, %v1309_v18, 0.0 }
 0x30d   :  { %v2963_v37 = vadd.f32 %v1124_v55, %v2922_v14  ;;  %v1312_v31 = vadd.f32 %v1311_v57, %v1310_v8  ;;  %v760_v0 = vadd.f32 %v759_v11, %v2902_v41  ;;  %v675_v9 = vadd.f32 %v674_v61, %v673_v42 }
 0x30e   :  { %v877_v59 = vadd.f32 %v876_v45, %v875_v47  ;;  %v845_v26 = vadd.f32 %v844_v36, %v843_v6  ;;  %v573_v54 = vadd.f32 %v572_v25, %v571_v32  ;;  %v794_v63 = vadd.f32 %v793_v34, %v792_v40  ;;  %v3402_v6 = vld [vmem:[#allocation38_spill] sm:$0xff] }
 0x30f   :  { %v1187_v17 = vpop.permute.xlu1 %1186  ;;  %v1313_v5 = vrot.slane %v1312_v31, 4  ;;  %v1333_v39 = vadd.f32 %v1332_v33, %v1331_v23  ;;  %v741_v46 = vadd.f32 %v740_v16, %v739_v56  ;;  %v761_v40 = vrot.slane %v760_v0, 1 }
 0x310   :  { %v1190_v3 = vmul.f32 %v1187_v17, %v2762_v29  ;;  %v1343_v49 = vmul.f32 %v2764_v10, %v1187_v17  ;;  %v878_v14 = vrot.slane %v877_v59, 2  ;;  %v676_v10 = vrot.slane %v675_v9, 1 }
 0x311   :  { %v1314_v41 = vadd.f32 %v1313_v5, %v1312_v31  ;;  %v846_v42 = vrot.slane %v845_v26, 1  ;;  %v574_v23 = vrot.slane %v573_v54, 1  ;;  %v710_v18 = vrot.slane %v2952_v28, 1  ;;  %v3403_v5 = vld [vmem:[#allocation12_spill] sm:$0xff] }
 0x312   :  { %v2971_v48 = vpop.permute.xlu2 %982  ;;  %v1192_v8 = vsel %vm257_vm14, %v1190_v3, 0.0  ;;  %v1345_v47 = vsel %vm257_vm14, %v1343_v49, 0.0  ;;  %v879_v4 = vadd.f32 %v878_v14, %v877_v59  ;;  %v1334_v25 = vrot.slane %v1333_v39, 1 }
 0x313   :  { %v2976_v11 = vadd.f32 %v1192_v8, %v2862_v15  ;;  %v1346_v29 = vadd.f32 %v1345_v47, %v2865_v19  ;;  %v2981_v32 = vmul.f32 %v2971_v48, %v3402_v6  ;;  %v1315_v61 = vrot.slane %v1314_v41, 2 }
 0x314   :  { %v880_v56 = vrot.slane %v879_v4, 1  ;;  %v742_v34 = vrot.slane %v741_v46, 2  ;;  %v1369_v15 = vadd.f32 %v1368_v30, %v2945_v13  ;;  %v795_v45 = vrot.slane %v794_v63, 1 }
 0x315   :  { %3401 = vst [vmem:[#allocation20_spill] sm:$0xff] %v2976_v11  ;;  %v1347_v36 = vrot.slane %v1346_v29, 4  ;;  %v1316_v55 = vadd.f32 %v1315_v61, %v1314_v41  ;;  %v778_v33 = vrot.slane %v777_v51, 1  ;;  %v864_v16 = vadd.f32 %v863_v38, %v2947_v43 }
 0x316   :  { %v677_v57 = vadd.f32 %v676_v10, %v675_v9  ;;  %v847_v59 = vadd.f32 %v846_v42, %v845_v26  ;;  %v762_v17 = vadd.f32 %v761_v40, %v760_v0  ;;  %v575_v3 = vadd.f32 %v574_v23, %v573_v54 }
 0x317   :  { %v1348_v19 = vadd.f32 %v1347_v36, %v1346_v29  ;;  %v881_v49 = vadd.f32 %v880_v56, %v879_v4  ;;  %v1335_v47 = vadd.f32 %v1334_v25, %v1333_v39  ;;  %v743_v6 = vadd.f32 %v742_v34, %v741_v46  ;;  %v1414_v4 = vld [vmem:[%s3161_s11 + $0x68] sm:$0xff]  ;;  %v3404_v34 = vld [vmem:[#allocation8_spill] sm:$0xff] }
 0x318   :  { %v1085_v31 = vpop.permute.xlu1 %1084  ;;  %v1317_v11 = vrot.slane %v1316_v55, 1  ;;  %v779_v29 = vadd.f32 %v778_v33, %v777_v51  ;;  %v796_v61 = vadd.f32 %v795_v45, %v794_v63  ;;  %v1415_v51 = vld [vmem:[%s3161_s11 + $0x70] sm:$0xff]  ;;  %v883_v10 = vsel %vm182_vm9, %v2942_v62, %v575_v3  ;;  %v1413_v62 = vld [vmem:[%s3161_s11 + $0x60] sm:$0xff]  ;;  %v1412_v33 = vld [vmem:[%s3161_s11 + $0x58] sm:$0xff] }
 0x319   :  { %v1349_v14 = vrot.slane %v1348_v19, 2  ;;  %v1088_v8 = vmul.f32 %v1085_v31, %v3403_v5  ;;  %v1292_v13 = vmul.f32 %v2611_v22, %v1085_v31  ;;  %v894_v26 = vsel %vm178_vm8, %v881_v49, %v864_v16  ;;  %v1416_v22 = vld [vmem:[%s3161_s11 + $0x78] sm:$0xff] }
 0x31a   :  { %v895_v54 = vsel %vm182_vm9, %v894_v26, %v847_v59  ;;  %1421 = vmatpush.msra.mxu3 %v1416_v22  ;;  %v744_v63 = vrot.slane %v743_v6, 1  ;;  %v711_v42 = vadd.f32 %v710_v18, %v2952_v28  ;;  %v885_v40 = vsel %vm884_vm4, %v883_v10, %v2879_v52  ;;  %v3405_v18 = vld [vmem:[#allocation9_spill] sm:$0xff]  ;;  %v1409_v26 = vld [vmem:[%s3161_s11 + $0x40] sm:$0xff] }
 0x31b   :  { %v1350_v30 = vadd.f32 %v1349_v14, %v1348_v19  ;;  %v1090_v41 = vsel %vm257_vm14, %v1088_v8, 0.0  ;;  %v1294_v38 = vsel %vm257_vm14, %v1292_v13, 0.0  ;;  %v887_v25 = vsel %vm886_vm5, %v885_v40, %v2938_v53 }
 0x31c   :  { %v2990_v43 = vadd.f32 %v1090_v41, %v2847_v35  ;;  %v1295_v9 = vadd.f32 %v1294_v38, %v2850_v44  ;;  %v1318_v35 = vadd.f32 %v1317_v11, %v1316_v55  ;;  %v896_v44 = vsel %vm884_vm4, %v895_v54, %v2949_v2  ;;  %1422 = vmatpush.msra.mxu3 %v1415_v51  ;;  %v3408_v41 = vld [vmem:[#allocation17_spill] sm:$0xff]  ;;  %v3411_v54 = vld [vmem:[#allocation23_spill] sm:$0xff] }
 0x31d   :  { %v1351_v0 = vrot.slane %v1350_v30, 1  ;;  %v897_v11 = vsel %vm886_vm5, %v896_v44, %v2881_v21  ;;  %v745_v52 = vadd.f32 %v744_v63, %v743_v6  ;;  %v889_v16 = vsel %vm888_vm6, %v887_v25, %v677_v57  ;;  %v1411_v57 = vld [vmem:[%s3161_s11 + $0x50] sm:$0xff] }
 0x31e   :  { %v1296_v46 = vrot.slane %v1295_v9, 4  ;;  %v898_v2 = vsel %vm888_vm6, %v897_v11, %v796_v61  ;;  %1423 = vmatpush.msra.mxu3 %v1414_v4  ;;  %v1276_v53 = vsel %vm257_vm14, %v2685_v7, 0.0  ;;  %v891_v7 = vsel %vm890_vm7, %v889_v16, %v711_v42  ;;  %v1410_v61 = vld [vmem:[%s3161_s11 + $0x48] sm:$0xff]  ;;  %v1407_v42 = vld [vmem:[%s3161_s11 + $0x30] sm:$0xff] }
 0x31f   :  { %v1352_v39 = vadd.f32 %v1351_v0, %v1350_v30  ;;  %v899_v21 = vsel %vm890_vm7, %v898_v2, %v779_v29  ;;  %v1024_v5 = vrot.slane %v2719_v1, 4  ;;  %v1264_v8 = vrot.slane %v2908_v50, 2 }
 0x320   :  { %v1297_v23 = vadd.f32 %v1296_v46, %v1295_v9  ;;  %v900_v19 = vsel %vm892_vm10, %v899_v21, %v762_v17  ;;  %1424 = vmatpush.msra.mxu3 %v1413_v62  ;;  %v3048_v6 = vsel %vm892_vm10, %v891_v7, %v745_v52  ;;  %v3407_v30 = vsel %vm2815_vm3, %v2713_v60, %v2788_v58  ;;  %v3410_v58 = vld [vmem:[#allocation2_spill] sm:$0xff]  ;;  %v1408_v46 = vld [vmem:[%s3161_s11 + $0x38] sm:$0xff] }
 0x321   :  { %v1051_v56 = vpop.permute.xlu1 %1050  ;;  %v1377_v36 = vsel %vm178_vm8, %v1369_v15, %v1352_v39  ;;  %902 = vrot.lane.b32.xlu1 %v900_v19, %s1676_s10  ;;  %v1025_v12 = vadd.f32 %v1024_v5, %v2719_v1  ;;  %v1265_v60 = vadd.f32 %v1264_v8, %v2908_v50  ;;  %v3412_v39 = vld [vmem:[#allocation24_spill] sm:$0xff]  ;;  %v988_v44 = vsel %vm257_vm14, %v2981_v32, 0.0  ;;  %v1404_v19 = vld [vmem:[%s3161_s11 + $0x18] sm:$0xff] }
 0x322   :  { %v1054_v28 = vmul.f32 %v1051_v56, %v3404_v34  ;;  %v1275_v45 = vmul.f32 %v3405_v18, %v1051_v56  ;;  %v1298_v55 = vrot.slane %v1297_v23, 2  ;;  %v1378_v15 = vsel %vm182_vm9, %v1377_v36, %v1335_v47  ;;  %1425 = vmatpush.msra.mxu3 %v1412_v33  ;;  %v1406_v36 = vld [vmem:[%s3161_s11 + $0x28] sm:$0xff]  ;;  %v1405_v34 = vld [vmem:[%s3161_s11 + $0x20] sm:$0xff] }
 0x323   :  { %v1379_v3 = vsel %vm884_vm4, %v1378_v15, %v1318_v35  ;;  %v3406_v47 = vand.u32 2147483647, %v2687_v20  ;;  %v3409_v20 = vld [vmem:[#allocation40_spill] sm:$0xff]  ;;  %v1026_v40 = vrot.slane %v1025_v12, 2  ;;  %v1266_v2 = vrot.slane %v1265_v60, 1 }
 0x324   :  { %v1056_v59 = vsel %vm257_vm14, %v1054_v28, 0.0  ;;  %v1277_v31 = vsel %vm257_vm14, %v1275_v45, 0.0  ;;  %v1299_v17 = vadd.f32 %v1298_v55, %v1297_v23  ;;  %1426 = vmatpush.msra.mxu3 %v1411_v57  ;;  %v1241_v38 = vmul.f32 %v3409_v20, %v2971_v48 }
 0x325   :  { %v3037_v49 = vadd.f32 %v1056_v59, %v2885_v27  ;;  %v1278_v14 = vadd.f32 %v1277_v31, %v1276_v53  ;;  %vm164_vm11 = vcmp.eq.f32.partialorder %v3406_v47, 8.507059e+37  ;;  %v1027_v28 = vadd.f32 %v1026_v40, %v1025_v12  ;;  %v1403_v53 = vld [vmem:[%s3161_s11 + $0x10] sm:$0xff] }
 0x326   :  { %v1300_v27 = vrot.slane %v1299_v17, 1  ;;  %v167_v29 = vsel %vm164_vm11, %v3408_v41, %v3407_v30  ;;  %1427 = vmatpush.msra.mxu3 %v1410_v61  ;;  %v1243_v50 = vsel %vm257_vm14, %v1241_v38, 0.0  ;;  %v1267_v52 = vadd.f32 %v1266_v2, %v1265_v60 }
 0x327   :  { %v1279_v13 = vrot.slane %v1278_v14, 4  ;;  %v3067_v22 = vmul.f32 %v167_v29, %v3410_v58  ;;  %v1028_v59 = vrot.slane %v1027_v28, 1  ;;  %v1126_v30 = vrot.slane %v2963_v37, 4  ;;  %v3413_v29 = vld [vmem:[#allocation20_spill] sm:$0xff] }
 0x328   :  { %v1301_v0 = vadd.f32 %v1300_v27, %v1299_v17  ;;  %1428 = vmatpush.msra.mxu3 %v1409_v26  ;;  %v1058_v27 = vrot.slane %v3037_v49, 4  ;;  %v1160_v41 = vrot.slane %v2936_v24, 4  ;;  %v1194_v61 = vrot.slane %v3413_v29, 4 }
 0x329   :  { %v1280_v9 = vadd.f32 %v1279_v13, %v1278_v14  ;;  %1393 = vrot.lane.b32.xlu1 %v3067_v22, %s1676_s10  ;;  %v1029_v57 = vadd.f32 %v1028_v59, %v1027_v28  ;;  %v1092_v13 = vrot.slane %v2990_v43, 4  ;;  %v1127_v26 = vadd.f32 %v1126_v30, %v2963_v37 }
 0x32a   :  { %v979_v51 = vpop.permute.xlu1 %978  ;;  %v1380_v1 = vsel %vm886_vm5, %v1379_v3, %v1301_v0  ;;  %1429 = vmatpush.msra.mxu3 %v1408_v46  ;;  %v1059_v20 = vadd.f32 %v1058_v27, %v3037_v49  ;;  %v3414_v0 = vld [vmem:[#allocation21_spill] sm:$0xff]  ;;  %v1161_v12 = vadd.f32 %v1160_v41, %v2936_v24  ;;  %v1195_v60 = vadd.f32 %v1194_v61, %v3413_v29  ;;  %v1658_v27 = vld [vmem:[%s3150_s0 + $0x8] sm:$0xff] }
 0x32b   :  { %v1281_v35 = vrot.slane %v1280_v9, 2  ;;  %v985_v63 = vmul.f32 %v979_v51, %v3411_v54  ;;  %v1240_v48 = vmul.f32 %v3412_v39, %v979_v51  ;;  %v1093_v38 = vadd.f32 %v1092_v13, %v2990_v43 }
 0x32c   :  { %1430 = vmatpush.msra.mxu3 %v1407_v42  ;;  %v1060_v58 = vrot.slane %v1059_v20, 2  ;;  %v1128_v54 = vrot.slane %v1127_v26, 2  ;;  %v1196_v39 = vrot.slane %v1195_v60, 2 }
 0x32d   :  { %v1282_v4 = vadd.f32 %v1281_v35, %v1280_v9  ;;  %v987_v10 = vsel %vm257_vm14, %v985_v63, 0.0  ;;  %v1242_v11 = vsel %vm257_vm14, %v1240_v48, 0.0  ;;  %v1228_v9 = vrot.slane %v3414_v0, 4 }
 0x32e   :  { %v989_v23 = vadd.f32 %v988_v44, %v987_v10  ;;  %v1244_v32 = vadd.f32 %v1243_v50, %v1242_v11  ;;  %1431 = vmatpush.msra.mxu3 %v1406_v36  ;;  %v1094_v51 = vrot.slane %v1093_v38, 2  ;;  %v1162_v63 = vrot.slane %v1161_v12, 2 }
 0x32f   :  { %v1283_v56 = vrot.slane %v1282_v4, 1  ;;  %v1229_v35 = vadd.f32 %v1228_v9, %v3414_v0  ;;  %v1061_v48 = vadd.f32 %v1060_v58, %v1059_v20  ;;  %v1129_v44 = vadd.f32 %v1128_v54, %v1127_v26 }
 0x330   :  { %v990_v62 = vrot.slane %v989_v23, 4  ;;  %v1245_v25 = vrot.slane %v1244_v32, 4  ;;  %1432 = vmatpush.msra.mxu3 %v1405_v34  ;;  %v1095_v46 = vadd.f32 %v1094_v51, %v1093_v38  ;;  %v1163_v43 = vadd.f32 %v1162_v63, %v1161_v12 }
 0x331   :  { %v1284_v21 = vadd.f32 %v1283_v56, %v1282_v4  ;;  %v1230_v49 = vrot.slane %v1229_v35, 2  ;;  %v1062_v50 = vrot.slane %v1061_v48, 1  ;;  %v1130_v10 = vrot.slane %v1129_v44, 1 }
 0x332   :  { %v991_v18 = vadd.f32 %v990_v62, %v989_v23  ;;  %v1246_v45 = vadd.f32 %v1245_v25, %v1244_v32  ;;  %1433 = vmatpush.msra.mxu3 %v1404_v19  ;;  %v1096_v4 = vrot.slane %v1095_v46, 1  ;;  %v1164_v24 = vrot.slane %v1163_v43, 1 }
 0x333   :  { %v1381_v55 = vsel %vm888_vm6, %v1380_v1, %v1284_v21  ;;  %v1197_v1 = vadd.f32 %v1196_v39, %v1195_v60  ;;  %v1231_v37 = vadd.f32 %v1230_v49, %v1229_v35  ;;  %v1063_v42 = vadd.f32 %v1062_v50, %v1061_v48 }
 0x334   :  { %v992_v15 = vrot.slane %v991_v18, 2  ;;  %v1247_v33 = vrot.slane %v1246_v45, 2  ;;  %v1382_v16 = vsel %vm890_vm7, %v1381_v55, %v1267_v52  ;;  %1434 = vmatpush.msra.mxu3 %v1403_v53  ;;  %v1097_v40 = vadd.f32 %v1096_v4, %v1095_v46  ;;  %v1401_v52 = vld [vmem:[%s3161_s11] sm:$0xff]  ;;  %v1392_v55 = vpop.permute.xlu2 %1391 }
 0x335   :  { %v1198_v11 = vrot.slane %v1197_v1, 1  ;;  %v1232_v23 = vrot.slane %v1231_v37, 1  ;;  %v1131_v32 = vadd.f32 %v1130_v10, %v1129_v44  ;;  %v1165_v56 = vadd.f32 %v1164_v24, %v1163_v43 }
 0x336   :  { %v993_v31 = vadd.f32 %v992_v15, %v991_v18  ;;  %v1248_v3 = vadd.f32 %v1247_v33, %v1246_v45  ;;  %v1402_v45 = vld [vmem:[%s3161_s11 + $0x8] sm:$0xff]  ;;  %v3415_v15 = vld [vmem:[#allocation18_spill] sm:$0xff] }
 0x337   :  { %v1199_v62 = vadd.f32 %v1198_v11, %v1197_v1  ;;  %v1233_v21 = vadd.f32 %v1232_v23, %v1231_v37  ;;  %1435 = vmatpush.msra.mxu3 %v1402_v45  ;;  %v1397_v33 = vsel %vm257_vm14, %v1392_v55, %v3415_v15 }
 0x338   :  { %v994_v17 = vrot.slane %v993_v31, 1  ;;  %v1249_v14 = vrot.slane %v1248_v3, 1 }
 0x339   :  { %1436 = vmatpush.msra.mxu3 %v1401_v52 }
 0x33a   :  { %v995_v7 = vadd.f32 %v994_v17, %v993_v31  ;;  %v1250_v5 = vadd.f32 %v1249_v14, %v1248_v3 }
 0x33c   :  { %v1370_v8 = vsel %vm178_vm8, %v995_v7, %v1029_v57  ;;  %v1383_v47 = vsel %vm892_vm10, %v1382_v16, %v1250_v5  ;;  %v1558_v57 = vld [vmem:[%s3162_s12] ss:$0 sm:$0xff] }
 0x33d   :  { %1385 = vrot.lane.b32.xlu0 %v1383_v47, %s1676_s10  ;;  %v1371_v2 = vsel %vm182_vm9, %v1370_v8, %v1063_v42 }
 0x33e   :  { %v1372_v36 = vsel %vm884_vm4, %v1371_v2, %v1097_v40 }
 0x33f   :  { %v1373_v25 = vsel %vm886_vm5, %v1372_v36, %v1131_v32 }
 0x340   :  { %v1374_v34 = vsel %vm888_vm6, %v1373_v25, %v1165_v56 }
 0x341   :  { %v1375_v28 = vsel %vm890_vm7, %v1374_v34, %v1199_v62 }
 0x342   :  { %v1376_v18 = vsel %vm892_vm10, %v1375_v28, %v1233_v21 }
 0x393   :  { %v903_v19 = vpop.permute.xlu1 %902 }
 0x394   :  { %v905_v16 = vsel %vm257_vm14, %v3048_v6, %v903_v19  ;;  %v1657_v6 = vld [vmem:[%s3150_s0] sm:$0xff] }
 0x395   :  { %v1399_v53 = vmul.f32 %v1397_v33, %v905_v16 }
 0x397   :  { %1437 = vmatmul.f32.vlgmr.msra.gmra.mxu3 %v1399_v53 }
 0x39b   :  { %v1394_v59 = vpop.permute.xlu1 %1393 }
 0x39c   :  { %v1398_v3 = vsel %vm257_vm14, %v1394_v59, %v3067_v22 }
 0x3af   :  { %v1386_v31 = vpop.permute.xlu0 %1385 }
 0x3b0   :  { %v1388_v17 = vsel %vm257_vm14, %v1376_v18, %v1386_v31 }
 0x3b1   :  { %v1400_v14 = vmul.f32 %v1398_v3, %v1388_v17 }
 0x3b3   :  { %1440 = vmatmul.f32.gmra.mxu3 %v1400_v14 }
 0x41a   :  { %v1438_v7 = vpop.f32.mrf.mxu3 }
 0x41b   :  { %v1439_v5 = vadd.f32 %v1558_v57, %v1438_v7 }
 0x41d   :  { %v1444_v8 = vadd.f32 %v1657_v6, %v1439_v5 }
 0x41f   :  { %1446 = vst.msk [vmem:[%s3163_s13] sm:$0xff] %vm48_vm0, %v1444_v8 }
 0x436   :  { %v1441_v22 = vpop.f32.mrf.mxu3 }
 0x437   :  { %v1442_v47 = vadd.f32 %v1558_v57, %v1441_v22 }
 0x439   :  { %v1445_v13 = vadd.f32 %v1658_v27, %v1442_v47 }
 0x43b   :  { %1447 = vst.msk [vmem:[%s3163_s13 + $0x8] sm:$0xff] %vm48_vm0, %v1445_v13 }

</bundles_post_ra>
